<compile_context>
chip_gen: v5e
topology: v5e:2x2
jax: 0.10.0
libtpu: 0.0.40
codegen_flags: <defaults>
</compile_context>

<pallas_src>
import functools
import math

import jax
import jax.numpy as jnp
from jax.experimental import pallas as pl
from jax.experimental.pallas import tpu as pltpu

_EPS = 1e-5
_VMEM_LIMIT = 48 * 1024 * 1024  # explicit scoped-VMEM budget (safe on v5e/v6e/v7x)


def _pick_tile(m, candidates=(1024, 512, 256, 128, 64, 32, 16, 8)):
    """Largest candidate row-tile that divides m, else a single full block."""
    for c in candidates:
        if c <= m and m % c == 0:
            return c
    return m


# ----------------------------------------------------------------------------
# 1x1 conv == GEMM (bf16 operands, f32 accumulate) with fused BN statistics
# ----------------------------------------------------------------------------
def _matmul_bn_stats_kernel(a_ref, b_ref, o_ref, s_ref, sq_ref, acc_ref):
    i = pl.program_id(0)
    k = pl.program_id(1)

    @pl.when((i == 0) & (k == 0))
    def _():
        s_ref[...] = jnp.zeros_like(s_ref)
        sq_ref[...] = jnp.zeros_like(sq_ref)

    @pl.when(k == 0)
    def _():
        acc_ref[...] = jnp.zeros_like(acc_ref)

    acc_ref[...] += jnp.dot(a_ref[...], b_ref[...],
                            preferred_element_type=jnp.float32)

    # store output + accumulate per-channel stats only on the last K step
    @pl.when(k == pl.num_programs(1) - 1)
    def _():
        out = acc_ref[...]
        o_ref[...] = out.astype(o_ref.dtype)
        s_ref[...] += jnp.sum(out, axis=0, keepdims=True)
        sq_ref[...] += jnp.sum(out * out, axis=0, keepdims=True)


def matmul_bn_stats(a, b):
    """(M,K)@(K,N) with bf16 MXU inputs; returns (out f32, col_sum, col_sumsq)."""
    M, K = a.shape
    K2, N = b.shape
    assert K == K2
    a = a.astype(jnp.bfloat16)
    b = b.astype(jnp.bfloat16)

    tm = _pick_tile(M)
    Mp = M  # tiles are chosen to divide M; no activation padding round-trip

    if K <= 512:
        tk, Kp = K, K
    else:
        tk = next((c for c in (512, 256) if K % c == 0), 256)
        Kp = (K + tk - 1) // tk * tk
        if Kp != K:
            a = jnp.pad(a, ((0, 0), (0, Kp - K)))
            b = jnp.pad(b, ((0, Kp - K), (0, 0)))

    out, s, sq = pl.pallas_call(
        _matmul_bn_stats_kernel,
        out_shape=(jax.ShapeDtypeStruct((Mp, N), jnp.float32),
                   jax.ShapeDtypeStruct((1, N), jnp.float32),
                   jax.ShapeDtypeStruct((1, N), jnp.float32)),
        grid_spec=pltpu.PrefetchScalarGridSpec(
            num_scalar_prefetch=0,
            grid=(Mp // tm, Kp // tk),
            in_specs=[pl.BlockSpec((tm, tk), lambda i, k: (i, k)),
                      pl.BlockSpec((tk, N), lambda i, k: (k, 0))],
            out_specs=(pl.BlockSpec((tm, N), lambda i, k: (i, 0)),
                       pl.BlockSpec((1, N), lambda i, k: (0, 0)),
                       pl.BlockSpec((1, N), lambda i, k: (0, 0))),
            scratch_shapes=[pltpu.VMEM((tm, N), jnp.float32)]),
        # stats accumulate across the M axis too -> both axes "arbitrary"
        # (trades away megacore sharding on v7x for one fewer HBM pass).
        compiler_params=pltpu.CompilerParams(
            dimension_semantics=("arbitrary", "arbitrary"),
            vmem_limit_bytes=_VMEM_LIMIT),
    )(a, b)
    return out, s[0], sq[0]


# ----------------------------------------------------------------------------
# 3x3 conv (stride 1, pad 1): patches built in VMEM (no HBM im2col), fused stats
# ----------------------------------------------------------------------------
def _conv3x3_bn_stats_kernel(x_ref, w_ref, o_ref, s_ref, sq_ref, *, ho, wo, cin):
    n = pl.program_id(0)

    @pl.when(n == 0)
    def _():
        s_ref[...] = jnp.zeros_like(s_ref)
        sq_ref[...] = jnp.zeros_like(sq_ref)

    x = x_ref[0]  # (Hp, Wp, Cin) bf16, whole padded image resident in VMEM
    taps = [x[di:di + ho, dj:dj + wo, :] for di in range(3) for dj in range(3)]
    patch = jnp.concatenate(taps, axis=-1).reshape(ho * wo, 9 * cin)
    out = jnp.dot(patch, w_ref[...], preferred_element_type=jnp.float32)
    o_ref[0] = out.astype(o_ref.dtype)
    s_ref[...] += jnp.sum(out, axis=0, keepdims=True)
    sq_ref[...] += jnp.sum(out * out, axis=0, keepdims=True)


def conv3x3_bn_stats(x, w_mat):
    """x: (N,H,W,Cin) bf16, w_mat: (9*Cin, Cout) bf16 -> (N,H,W,Cout) f32 + stats."""
    n, h, w_, cin = x.shape
    cout = w_mat.shape[1]
    xp = jnp.pad(x, ((0, 0), (1, 1), (1, 1), (0, 0)))
    hp, wp = h + 2, w_ + 2
    out, s, sq = pl.pallas_call(
        functools.partial(_conv3x3_bn_stats_kernel, ho=h, wo=w_, cin=cin),
        out_shape=(jax.ShapeDtypeStruct((n, h * w_, cout), jnp.float32),
                   jax.ShapeDtypeStruct((1, cout), jnp.float32),
                   jax.ShapeDtypeStruct((1, cout), jnp.float32)),
        grid_spec=pltpu.PrefetchScalarGridSpec(
            num_scalar_prefetch=0,
            grid=(n,),
            in_specs=[pl.BlockSpec((1, hp, wp, cin), lambda i: (i, 0, 0, 0)),
                      pl.BlockSpec((9 * cin, cout), lambda i: (0, 0))],
            out_specs=(pl.BlockSpec((1, h * w_, cout), lambda i: (i, 0, 0)),
                       pl.BlockSpec((1, cout), lambda i: (0, 0)),
                       pl.BlockSpec((1, cout), lambda i: (0, 0)))),
        compiler_params=pltpu.CompilerParams(
            dimension_semantics=("arbitrary",),
            vmem_limit_bytes=_VMEM_LIMIT),
    )(xp, w_mat)
    return out.reshape(n, h, w_, cout), s[0], sq[0]


# ----------------------------------------------------------------------------
# Standalone per-channel stats (only needed for the strided conv2 fallback)
# ----------------------------------------------------------------------------
def _stats_kernel(x_ref, s_ref, sq_ref):
    @pl.when(pl.program_id(0) == 0)
    def _():
        s_ref[...] = jnp.zeros_like(s_ref)
        sq_ref[...] = jnp.zeros_like(sq_ref)

    x = x_ref[...].astype(jnp.float32)
    s_ref[...] += jnp.sum(x, axis=0, keepdims=True)
    sq_ref[...] += jnp.sum(x * x, axis=0, keepdims=True)


def channel_stats(x2):
    m, c = x2.shape
    g = 1
    if c < 128 and 128 % c == 0 and m % (128 // c) == 0:
        g = 128 // c
    cl, mr = c * g, m // g
    xr = x2.reshape(mr, cl)
    tm = _pick_tile(mr)
    s, sq = pl.pallas_call(
        _stats_kernel,
        out_shape=(jax.ShapeDtypeStruct((1, cl), jnp.float32),
                   jax.ShapeDtypeStruct((1, cl), jnp.float32)),
        grid_spec=pltpu.PrefetchScalarGridSpec(
            num_scalar_prefetch=0,
            grid=(mr // tm,),
            in_specs=[pl.BlockSpec((tm, cl), lambda i: (i, 0))],
            out_specs=(pl.BlockSpec((1, cl), lambda i: (0, 0)),
                       pl.BlockSpec((1, cl), lambda i: (0, 0)))),
        compiler_params=pltpu.CompilerParams(
            dimension_semantics=("arbitrary",)),
    )(xr)
    return s.reshape(g, c).sum(0), sq.reshape(g, c).sum(0)


# ----------------------------------------------------------------------------
# BatchNorm apply (+optional residual add)(+optional ReLU), lane-dense
# ----------------------------------------------------------------------------
def _bn_apply_kernel(x_ref, sb_ref, o_ref, *, relu):
    y = x_ref[...].astype(jnp.float32) * sb_ref[0:1, :] + sb_ref[1:2, :]
    if relu:
        y = jnp.maximum(y, 0.0)
    o_ref[...] = y.astype(o_ref.dtype)


def _bn_res_apply_kernel(x_ref, sb_ref, r_ref, o_ref, *, relu):
    y = (x_ref[...].astype(jnp.float32) * sb_ref[0:1, :] + sb_ref[1:2, :]
         + r_ref[...].astype(jnp.float32))
    if relu:
        y = jnp.maximum(y, 0.0)
    o_ref[...] = y.astype(o_ref.dtype)


def batch_norm_apply(x2, ch_sum, ch_sq, count, gamma, beta, residual=None,
                     relu=True, out_dtype=jnp.float32):
    """Training-mode BN on (M, C) rows using precomputed per-channel sums."""
    m, c = x2.shape
    mean = ch_sum / count
    # biased variance; clamp >= 0 to guard E[x^2]-mean^2 cancellation
    var = jnp.maximum(ch_sq / count - mean * mean, 0.0)
    scale = gamma * jax.lax.rsqrt(var + _EPS)
    bias = beta - mean * scale

    # lane-dense folding: present a 128-wide last dim when C < 128
    g = 1
    if c < 128 and 128 % c == 0 and m % (128 // c) == 0:
        g = 128 // c
    cl, mr = c * g, m // g
    xr = x2.reshape(mr, cl)
    sb = jnp.concatenate([jnp.tile(scale, g)[None, :],
                          jnp.tile(bias, g)[None, :]], axis=0)

    tm = _pick_tile(mr)
    args = [xr, sb]
    in_specs = [pl.BlockSpec((tm, cl), lambda i: (i, 0)),
                pl.BlockSpec((2, cl), lambda i: (0, 0))]
    if residual is None:
        kernel = functools.partial(_bn_apply_kernel, relu=relu)
    else:
        args.append(residual.reshape(mr, cl))
        in_specs.append(pl.BlockSpec((tm, cl), lambda i: (i, 0)))
        kernel = functools.partial(_bn_res_apply_kernel, relu=relu)

    out = pl.pallas_call(
        kernel,
        out_shape=jax.ShapeDtypeStruct((mr, cl), out_dtype),
        grid_spec=pltpu.PrefetchScalarGridSpec(
            num_scalar_prefetch=0,
            grid=(mr // tm,),
            in_specs=in_specs,
            out_specs=pl.BlockSpec((tm, cl), lambda i: (i, 0))),
        compiler_params=pltpu.CompilerParams(
            dimension_semantics=("parallel",)),
    )(*args)
    return out.reshape(m, c)


# ----------------------------------------------------------------------------
# Parameters (PyTorch layout converted to bf16 matmul form once, at init)
# ----------------------------------------------------------------------------
def conv_weight_to_matmul(w):
    """(Cout, Cin, kh, kw) -> (kh*kw*Cin, Cout) bf16, tap-major row order."""
    return jnp.transpose(w, (2, 3, 1, 0)).reshape(-1, w.shape[0]).astype(jnp.bfloat16)


def init_conv(key, cout, cin, kh, kw):
    n = kh * kw * cout
    std = math.sqrt(2.0 / n)
    w = jax.random.normal(key, (cout, cin, kh, kw), jnp.float32) * std
    return conv_weight_to_matmul(w)


def init_bn(c):
    return {"gamma": jnp.ones((c,), jnp.float32),
            "beta": jnp.zeros((c,), jnp.float32)}


def init_bottleneck(key, inplanes, planes, stride=1):
    ks = jax.random.split(key, 4)
    p = {"conv1": init_conv(ks[0], planes, inplanes, 1, 1),
         "bn1": init_bn(planes),
         "conv2": init_conv(ks[1], planes, planes, 3, 3),
         "bn2": init_bn(planes),
         "conv3": init_conv(ks[2], planes * 4, planes, 1, 1),
         "bn3": init_bn(planes * 4),
         "stride": stride}
    if stride != 1 or inplanes != planes * 4:
        p["ds_conv"] = init_conv(ks[3], planes * 4, inplanes, 1, 1)
        p["ds_bn"] = init_bn(planes * 4)
    return p


# ----------------------------------------------------------------------------
# Bottleneck forward (NCHW in / NCHW out, matching the PyTorch module)
# ----------------------------------------------------------------------------
def bottleneck_forward(params, x_nchw):
    x = jnp.transpose(x_nchw, (0, 2, 3, 1)).astype(jnp.float32)  # NHWC
    n, h, w, cin = x.shape
    stride = params["stride"]
    x_bf = x.astype(jnp.bfloat16)

    # conv1 (1x1) + bn1 + relu
    m1 = n * h * w
    o1, s1, q1 = matmul_bn_stats(x_bf.reshape(m1, cin), params["conv1"])
    o1 = batch_norm_apply(o1, s1, q1, float(m1),
                          params["bn1"]["gamma"], params["bn1"]["beta"],
                          relu=True, out_dtype=jnp.bfloat16)
    planes = o1.shape[1]
    o1 = o1.reshape(n, h, w, planes)

    # conv2 (3x3, stride, pad 1) + bn2 + relu
    if stride == 1:
        o2, s2, q2 = conv3x3_bn_stats(o1, params["conv2"])
        h2, w2 = h, w
        o2 = o2.reshape(n * h2 * w2, planes)
    else:
        # TODO(synk): strided 3x3 conv is computed at stride 1 and subsampled;
        # a dedicated strided-window kernel would avoid the redundant compute.
        o2f, _, _ = conv3x3_bn_stats(o1, params["conv2"])
        o2f = o2f[:, ::stride, ::stride, :]
        h2, w2 = o2f.shape[1], o2f.shape[2]
        o2 = o2f.reshape(n * h2 * w2, planes)
        s2, q2 = channel_stats(o2)
    m2 = n * h2 * w2
    o2 = batch_norm_apply(o2, s2, q2, float(m2),
                          params["bn2"]["gamma"], params["bn2"]["beta"],
                          relu=True, out_dtype=jnp.bfloat16)

    # conv3 (1x1)
    o3, s3, q3 = matmul_bn_stats(o2, params["conv3"])

    # residual branch
    if "ds_conv" in params:
        xr = x_bf if stride == 1 else x_bf[:, ::stride, ::stride, :]
        rr, sr, qr = matmul_bn_stats(xr.reshape(m2, cin), params["ds_conv"])
        residual = batch_norm_apply(rr, sr, qr, float(m2),
                                    params["ds_bn"]["gamma"],
                                    params["ds_bn"]["beta"],
                                    relu=False, out_dtype=jnp.float32)
    else:
        residual = x.reshape(m2, cin)

    # bn3 + residual add + relu (fused in one Pallas kernel)
    out = batch_norm_apply(o3, s3, q3, float(m2),
                           params["bn3"]["gamma"], params["bn3"]["beta"],
                           residual=residual, relu=True, out_dtype=jnp.float32)
    out = out.reshape(n, h2, w2, out.shape[1])
    return jnp.transpose(out, (0, 3, 1, 2))  # back to NCHW


if __name__ == "__main__":
    key = jax.random.PRNGKey(0)
    inplanes, planes, stride = 64, 32, 1          # downsample needed (64 != 4*32)
    params = init_bottleneck(key, inplanes, planes, stride)

    x = jax.random.normal(jax.random.fold_in(key, 1),
                          (2, inplanes, 16, 16), jnp.float32)

    fwd = jax.jit(lambda v: bottleneck_forward(params, v))
    out = jax.block_until_ready(fwd(x))
    assert out.shape == (2, planes * 4, 16, 16), out.shape
    assert bool(jnp.all(jnp.isfinite(out)))
    print("KERNEL_OK")
</pallas_src>

<mosaic_0001>
module attributes {stable_mosaic.version = 11 : i64} {
  func.func @_matmul_bn_stats_kernel(%arg0: i32, %arg1: i32, %arg2: memref<512x64xbf16, #tpu.memory_space<vmem>>, %arg3: memref<64x128xbf16, #tpu.memory_space<vmem>>, %arg4: memref<512x128xf32, #tpu.memory_space<vmem>>, %arg5: memref<1x128xf32, #tpu.memory_space<vmem>>, %arg6: memref<1x128xf32, #tpu.memory_space<vmem>>, %arg7: memref<512x128xf32, #tpu.memory_space<vmem>>) attributes {dimension_semantics = [#tpu.dimension_semantics<arbitrary>, #tpu.dimension_semantics<arbitrary>], iteration_bounds = array<i64: 1, 1>, scalar_prefetch = 0 : i64, scratch_operands = 1 : i64, tpu.core_type = #tpu.core_type<tc>, window_params = [{transform_indices = @transform_0, window_bounds = array<i64: 512, 64>}, {transform_indices = @transform_1, window_bounds = array<i64: 64, 128>}, {transform_indices = @transform_2, window_bounds = array<i64: 512, 128>}, {pipeline_mode = #tpu.pipeline_mode<synchronous>, transform_indices = @transform_3, window_bounds = array<i64: 1, 128>}, {pipeline_mode = #tpu.pipeline_mode<synchronous>, transform_indices = @transform_4, window_bounds = array<i64: 1, 128>}]} {
    %c0_i32 = arith.constant 0 : i32
    %0 = arith.cmpi eq, %arg0, %c0_i32 : i32
    %c0_i32_0 = arith.constant 0 : i32
    %1 = arith.cmpi eq, %arg1, %c0_i32_0 : i32
    %2 = arith.andi %0, %1 : i1
    %3 = arith.extui %2 : i1 to i32
    %c0_i32_1 = arith.constant 0 : i32
    %4 = arith.cmpi ne, %3, %c0_i32_1 : i32
    scf.if %4 {
      %cst_13 = arith.constant 0.000000e+00 : f32
      %17 = vector.broadcast %cst_13 : f32 to vector<1x128xf32>
      %c0_14 = arith.constant 0 : index
      %c0_15 = arith.constant 0 : index
      %18 = vector.load %arg5[%c0_14, %c0_15] : memref<1x128xf32, #tpu.memory_space<vmem>>, vector<1x128xf32>
      tpu.vector_store %arg5[%c0_14, %c0_15], %17 {strides = array<i32>} : memref<1x128xf32, #tpu.memory_space<vmem>>, vector<1x128xf32>,
      %cst_16 = arith.constant 0.000000e+00 : f32
      %19 = vector.broadcast %cst_16 : f32 to vector<1x128xf32>
      %c0_17 = arith.constant 0 : index
      %c0_18 = arith.constant 0 : index
      %20 = vector.load %arg6[%c0_17, %c0_18] : memref<1x128xf32, #tpu.memory_space<vmem>>, vector<1x128xf32>
      tpu.vector_store %arg6[%c0_17, %c0_18], %19 {strides = array<i32>} : memref<1x128xf32, #tpu.memory_space<vmem>>, vector<1x128xf32>,
    } else {
    }
    %c0_i32_2 = arith.constant 0 : i32
    %5 = arith.cmpi eq, %arg1, %c0_i32_2 : i32
    %6 = arith.extui %5 : i1 to i32
    %c0_i32_3 = arith.constant 0 : i32
    %7 = arith.cmpi ne, %6, %c0_i32_3 : i32
    scf.if %7 {
      %cst_13 = arith.constant 0.000000e+00 : f32
      %17 = vector.broadcast %cst_13 : f32 to vector<512x128xf32>
      %c0_14 = arith.constant 0 : index
      %c0_15 = arith.constant 0 : index
      %18 = vector.load %arg7[%c0_14, %c0_15] : memref<512x128xf32, #tpu.memory_space<vmem>>, vector<512x128xf32>
      tpu.vector_store %arg7[%c0_14, %c0_15], %17 {strides = array<i32>} : memref<512x128xf32, #tpu.memory_space<vmem>>, vector<512x128xf32>,
    } else {
    }
    %c0 = arith.constant 0 : index
    %c0_4 = arith.constant 0 : index
    %8 = vector.load %arg7[%c0, %c0_4] : memref<512x128xf32, #tpu.memory_space<vmem>>, vector<512x128xf32>
    %c0_5 = arith.constant 0 : index
    %c0_6 = arith.constant 0 : index
    %9 = vector.load %arg2[%c0_5, %c0_6] : memref<512x64xbf16, #tpu.memory_space<vmem>>, vector<512x64xbf16>
    %c0_7 = arith.constant 0 : index
    %c0_8 = arith.constant 0 : index
    %10 = vector.load %arg3[%c0_7, %c0_8] : memref<64x128xbf16, #tpu.memory_space<vmem>>, vector<64x128xbf16>
    %cst = arith.constant dense<0.000000e+00> : vector<512x128xf32>
    %11 = tpu.matmul %9, %10, %cst {dimension_numbers = #tpu.dot_dimension_numbers<[1], [0], [0], [1], [0, 0, 1, 1], [], []>} : vector<512x64xbf16>, vector<64x128xbf16>, vector<512x128xf32> -> vector<512x128xf32>
    %12 = arith.addf %8, %11 : vector<512x128xf32>
    %c0_9 = arith.constant 0 : index
    %c0_10 = arith.constant 0 : index
    %13 = vector.load %arg7[%c0_9, %c0_10] : memref<512x128xf32, #tpu.memory_space<vmem>>, vector<512x128xf32>
    tpu.vector_store %arg7[%c0_9, %c0_10], %12 {strides = array<i32>} : memref<512x128xf32, #tpu.memory_space<vmem>>, vector<512x128xf32>,
    %c0_i32_11 = arith.constant 0 : i32
    %14 = arith.cmpi eq, %arg1, %c0_i32_11 : i32
    %15 = arith.extui %14 : i1 to i32
    %c0_i32_12 = arith.constant 0 : i32
    %16 = arith.cmpi ne, %15, %c0_i32_12 : i32
    scf.if %16 {
      %c0_13 = arith.constant 0 : index
      %c0_14 = arith.constant 0 : index
      %17 = vector.load %arg7[%c0_13, %c0_14] : memref<512x128xf32, #tpu.memory_space<vmem>>, vector<512x128xf32>
      %c0_15 = arith.constant 0 : index
      %c0_16 = arith.constant 0 : index
      %18 = vector.load %arg4[%c0_15, %c0_16] : memref<512x128xf32, #tpu.memory_space<vmem>>, vector<512x128xf32>
      tpu.vector_store %arg4[%c0_15, %c0_16], %17 {strides = array<i32>} : memref<512x128xf32, #tpu.memory_space<vmem>>, vector<512x128xf32>,
      %c0_17 = arith.constant 0 : index
      %c0_18 = arith.constant 0 : index
      %19 = vector.load %arg5[%c0_17, %c0_18] : memref<1x128xf32, #tpu.memory_space<vmem>>, vector<1x128xf32>
      %cst_19 = arith.constant dense<0.000000e+00> : vector<128xf32>
      %20 = vector.multi_reduction <add>, %17, %cst_19 [0] : vector<512x128xf32> to vector<128xf32>
      %21 = vector.shape_cast %20 : vector<128xf32> to vector<1x128xf32>
      %22 = arith.addf %19, %21 : vector<1x128xf32>
      %c0_20 = arith.constant 0 : index
      %c0_21 = arith.constant 0 : index
      %23 = vector.load %arg5[%c0_20, %c0_21] : memref<1x128xf32, #tpu.memory_space<vmem>>, vector<1x128xf32>
      tpu.vector_store %arg5[%c0_20, %c0_21], %22 {strides = array<i32>} : memref<1x128xf32, #tpu.memory_space<vmem>>, vector<1x128xf32>,
      %c0_22 = arith.constant 0 : index
      %c0_23 = arith.constant 0 : index
      %24 = vector.load %arg6[%c0_22, %c0_23] : memref<1x128xf32, #tpu.memory_space<vmem>>, vector<1x128xf32>
      %25 = arith.mulf %17, %17 : vector<512x128xf32>
      %cst_24 = arith.constant dense<0.000000e+00> : vector<128xf32>
      %26 = vector.multi_reduction <add>, %25, %cst_24 [0] : vector<512x128xf32> to vector<128xf32>
      %27 = vector.shape_cast %26 : vector<128xf32> to vector<1x128xf32>
      %28 = arith.addf %24, %27 : vector<1x128xf32>
      %c0_25 = arith.constant 0 : index
      %c0_26 = arith.constant 0 : index
      %29 = vector.load %arg6[%c0_25, %c0_26] : memref<1x128xf32, #tpu.memory_space<vmem>>, vector<1x128xf32>
      tpu.vector_store %arg6[%c0_25, %c0_26], %28 {strides = array<i32>} : memref<1x128xf32, #tpu.memory_space<vmem>>, vector<1x128xf32>,
    } else {
    }
    return
  }
  func.func @transform_0(%arg0: i32, %arg1: i32) -> (i32, i32) {
    %c0_i32 = arith.constant 0 : i32
    return %arg0, %arg1 : i32, i32
  }
  func.func @transform_1(%arg0: i32, %arg1: i32) -> (i32, i32) {
    %c0_i32 = arith.constant 0 : i32
    %c0_i32_0 = arith.constant 0 : i32
    return %arg1, %c0_i32 : i32, i32
  }
  func.func @transform_2(%arg0: i32, %arg1: i32) -> (i32, i32) {
    %c0_i32 = arith.constant 0 : i32
    %c0_i32_0 = arith.constant 0 : i32
    return %arg0, %c0_i32 : i32, i32
  }
  func.func @transform_3(%arg0: i32, %arg1: i32) -> (i32, i32) {
    %c0_i32 = arith.constant 0 : i32
    %c0_i32_0 = arith.constant 0 : i32
    %c0_i32_1 = arith.constant 0 : i32
    return %c0_i32, %c0_i32_0 : i32, i32
  }
  func.func @transform_4(%arg0: i32, %arg1: i32) -> (i32, i32) {
    %c0_i32 = arith.constant 0 : i32
    %c0_i32_0 = arith.constant 0 : i32
    %c0_i32_1 = arith.constant 0 : i32
    return %c0_i32, %c0_i32_0 : i32, i32
  }
}

module attributes {stable_mosaic.version = 11 : i64} {
  func.func @_bn_apply_kernel(%arg0: i32, %arg1: memref<512x128xf32, #tpu.memory_space<vmem>>, %arg2: memref<2x128xf32, #tpu.memory_space<vmem>>, %arg3: memref<512x128xf32, #tpu.memory_space<vmem>>) attributes {dimension_semantics = [#tpu.dimension_semantics<parallel>], iteration_bounds = array<i64: 1>, scalar_prefetch = 0 : i64, scratch_operands = 0 : i64, tpu.core_type = #tpu.core_type<tc>, window_params = [{transform_indices = @transform_0, window_bounds = array<i64: 512, 128>}, {pipeline_mode = #tpu.pipeline_mode<synchronous>, transform_indices = @transform_1, window_bounds = array<i64: 2, 128>}, {transform_indices = @transform_2, window_bounds = array<i64: 512, 128>}]} {
    %c0 = arith.constant 0 : index
    %c0_0 = arith.constant 0 : index
    %0 = vector.load %arg1[%c0, %c0_0] : memref<512x128xf32, #tpu.memory_space<vmem>>, vector<512x128xf32>
    %c0_1 = arith.constant 0 : index
    %c0_2 = arith.constant 0 : index
    %1 = vector.load %arg2[%c0_1, %c0_2] : memref<2x128xf32, #tpu.memory_space<vmem>>, vector<1x128xf32>
    %2 = vector.broadcast %1 : vector<1x128xf32> to vector<512x128xf32>
    %3 = arith.mulf %0, %2 : vector<512x128xf32>
    %c1 = arith.constant 1 : index
    %c0_3 = arith.constant 0 : index
    %4 = vector.load %arg2[%c1, %c0_3] : memref<2x128xf32, #tpu.memory_space<vmem>>, vector<1x128xf32>
    %5 = vector.broadcast %4 : vector<1x128xf32> to vector<512x128xf32>
    %6 = arith.addf %3, %5 : vector<512x128xf32>
    %c0_4 = arith.constant 0 : index
    %c0_5 = arith.constant 0 : index
    %7 = vector.load %arg3[%c0_4, %c0_5] : memref<512x128xf32, #tpu.memory_space<vmem>>, vector<512x128xf32>
    tpu.vector_store %arg3[%c0_4, %c0_5], %6 {strides = array<i32>} : memref<512x128xf32, #tpu.memory_space<vmem>>, vector<512x128xf32>,
    return
  }
  func.func @transform_0(%arg0: i32) -> (i32, i32) {
    %c0_i32 = arith.constant 0 : i32
    %c0_i32_0 = arith.constant 0 : i32
    return %arg0, %c0_i32 : i32, i32
  }
  func.func @transform_1(%arg0: i32) -> (i32, i32) {
    %c0_i32 = arith.constant 0 : i32
    %c0_i32_0 = arith.constant 0 : i32
    %c0_i32_1 = arith.constant 0 : i32
    return %c0_i32, %c0_i32_0 : i32, i32
  }
  func.func @transform_2(%arg0: i32) -> (i32, i32) {
    %c0_i32 = arith.constant 0 : i32
    %c0_i32_0 = arith.constant 0 : i32
    return %arg0, %c0_i32 : i32, i32
  }
}

module attributes {stable_mosaic.version = 11 : i64} {
  func.func @_matmul_bn_stats_kernel(%arg0: i32, %arg1: i32, %arg2: memref<512x64xbf16, #tpu.memory_space<vmem>>, %arg3: memref<64x32xbf16, #tpu.memory_space<vmem>>, %arg4: memref<512x32xf32, #tpu.memory_space<vmem>>, %arg5: memref<1x32xf32, #tpu.memory_space<vmem>>, %arg6: memref<1x32xf32, #tpu.memory_space<vmem>>, %arg7: memref<512x32xf32, #tpu.memory_space<vmem>>) attributes {dimension_semantics = [#tpu.dimension_semantics<arbitrary>, #tpu.dimension_semantics<arbitrary>], iteration_bounds = array<i64: 1, 1>, scalar_prefetch = 0 : i64, scratch_operands = 1 : i64, tpu.core_type = #tpu.core_type<tc>, window_params = [{transform_indices = @transform_0, window_bounds = array<i64: 512, 64>}, {transform_indices = @transform_1, window_bounds = array<i64: 64, 32>}, {transform_indices = @transform_2, window_bounds = array<i64: 512, 32>}, {pipeline_mode = #tpu.pipeline_mode<synchronous>, transform_indices = @transform_3, window_bounds = array<i64: 1, 32>}, {pipeline_mode = #tpu.pipeline_mode<synchronous>, transform_indices = @transform_4, window_bounds = array<i64: 1, 32>}]} {
    %c0_i32 = arith.constant 0 : i32
    %0 = arith.cmpi eq, %arg0, %c0_i32 : i32
    %c0_i32_0 = arith.constant 0 : i32
    %1 = arith.cmpi eq, %arg1, %c0_i32_0 : i32
    %2 = arith.andi %0, %1 : i1
    %3 = arith.extui %2 : i1 to i32
    %c0_i32_1 = arith.constant 0 : i32
    %4 = arith.cmpi ne, %3, %c0_i32_1 : i32
    scf.if %4 {
      %cst_13 = arith.constant 0.000000e+00 : f32
      %17 = vector.broadcast %cst_13 : f32 to vector<1x32xf32>
      %c0_14 = arith.constant 0 : index
      %c0_15 = arith.constant 0 : index
      %18 = vector.load %arg5[%c0_14, %c0_15] : memref<1x32xf32, #tpu.memory_space<vmem>>, vector<1x32xf32>
      tpu.vector_store %arg5[%c0_14, %c0_15], %17 {strides = array<i32>} : memref<1x32xf32, #tpu.memory_space<vmem>>, vector<1x32xf32>,
      %cst_16 = arith.constant 0.000000e+00 : f32
      %19 = vector.broadcast %cst_16 : f32 to vector<1x32xf32>
      %c0_17 = arith.constant 0 : index
      %c0_18 = arith.constant 0 : index
      %20 = vector.load %arg6[%c0_17, %c0_18] : memref<1x32xf32, #tpu.memory_space<vmem>>, vector<1x32xf32>
      tpu.vector_store %arg6[%c0_17, %c0_18], %19 {strides = array<i32>} : memref<1x32xf32, #tpu.memory_space<vmem>>, vector<1x32xf32>,
    } else {
    }
    %c0_i32_2 = arith.constant 0 : i32
    %5 = arith.cmpi eq, %arg1, %c0_i32_2 : i32
    %6 = arith.extui %5 : i1 to i32
    %c0_i32_3 = arith.constant 0 : i32
    %7 = arith.cmpi ne, %6, %c0_i32_3 : i32
    scf.if %7 {
      %cst_13 = arith.constant 0.000000e+00 : f32
      %17 = vector.broadcast %cst_13 : f32 to vector<512x32xf32>
      %c0_14 = arith.constant 0 : index
      %c0_15 = arith.constant 0 : index
      %18 = vector.load %arg7[%c0_14, %c0_15] : memref<512x32xf32, #tpu.memory_space<vmem>>, vector<512x32xf32>
      tpu.vector_store %arg7[%c0_14, %c0_15], %17 {strides = array<i32>} : memref<512x32xf32, #tpu.memory_space<vmem>>, vector<512x32xf32>,
    } else {
    }
    %c0 = arith.constant 0 : index
    %c0_4 = arith.constant 0 : index
    %8 = vector.load %arg7[%c0, %c0_4] : memref<512x32xf32, #tpu.memory_space<vmem>>, vector<512x32xf32>
    %c0_5 = arith.constant 0 : index
    %c0_6 = arith.constant 0 : index
    %9 = vector.load %arg2[%c0_5, %c0_6] : memref<512x64xbf16, #tpu.memory_space<vmem>>, vector<512x64xbf16>
    %c0_7 = arith.constant 0 : index
    %c0_8 = arith.constant 0 : index
    %10 = vector.load %arg3[%c0_7, %c0_8] : memref<64x32xbf16, #tpu.memory_space<vmem>>, vector<64x32xbf16>
    %cst = arith.constant dense<0.000000e+00> : vector<512x32xf32>
    %11 = tpu.matmul %9, %10, %cst {dimension_numbers = #tpu.dot_dimension_numbers<[1], [0], [0], [1], [0, 0, 1, 1], [], []>} : vector<512x64xbf16>, vector<64x32xbf16>, vector<512x32xf32> -> vector<512x32xf32>
    %12 = arith.addf %8, %11 : vector<512x32xf32>
    %c0_9 = arith.constant 0 : index
    %c0_10 = arith.constant 0 : index
    %13 = vector.load %arg7[%c0_9, %c0_10] : memref<512x32xf32, #tpu.memory_space<vmem>>, vector<512x32xf32>
    tpu.vector_store %arg7[%c0_9, %c0_10], %12 {strides = array<i32>} : memref<512x32xf32, #tpu.memory_space<vmem>>, vector<512x32xf32>,
    %c0_i32_11 = arith.constant 0 : i32
    %14 = arith.cmpi eq, %arg1, %c0_i32_11 : i32
    %15 = arith.extui %14 : i1 to i32
    %c0_i32_12 = arith.constant 0 : i32
    %16 = arith.cmpi ne, %15, %c0_i32_12 : i32
    scf.if %16 {
      %c0_13 = arith.constant 0 : index
      %c0_14 = arith.constant 0 : index
      %17 = vector.load %arg7[%c0_13, %c0_14] : memref<512x32xf32, #tpu.memory_space<vmem>>, vector<512x32xf32>
      %c0_15 = arith.constant 0 : index
      %c0_16 = arith.constant 0 : index
      %18 = vector.load %arg4[%c0_15, %c0_16] : memref<512x32xf32, #tpu.memory_space<vmem>>, vector<512x32xf32>
      tpu.vector_store %arg4[%c0_15, %c0_16], %17 {strides = array<i32>} : memref<512x32xf32, #tpu.memory_space<vmem>>, vector<512x32xf32>,
      %c0_17 = arith.constant 0 : index
      %c0_18 = arith.constant 0 : index
      %19 = vector.load %arg5[%c0_17, %c0_18] : memref<1x32xf32, #tpu.memory_space<vmem>>, vector<1x32xf32>
      %cst_19 = arith.constant dense<0.000000e+00> : vector<32xf32>
      %20 = vector.multi_reduction <add>, %17, %cst_19 [0] : vector<512x32xf32> to vector<32xf32>
      %21 = vector.shape_cast %20 : vector<32xf32> to vector<1x32xf32>
      %22 = arith.addf %19, %21 : vector<1x32xf32>
      %c0_20 = arith.constant 0 : index
      %c0_21 = arith.constant 0 : index
      %23 = vector.load %arg5[%c0_20, %c0_21] : memref<1x32xf32, #tpu.memory_space<vmem>>, vector<1x32xf32>
      tpu.vector_store %arg5[%c0_20, %c0_21], %22 {strides = array<i32>} : memref<1x32xf32, #tpu.memory_space<vmem>>, vector<1x32xf32>,
      %c0_22 = arith.constant 0 : index
      %c0_23 = arith.constant 0 : index
      %24 = vector.load %arg6[%c0_22, %c0_23] : memref<1x32xf32, #tpu.memory_space<vmem>>, vector<1x32xf32>
      %25 = arith.mulf %17, %17 : vector<512x32xf32>
      %cst_24 = arith.constant dense<0.000000e+00> : vector<32xf32>
      %26 = vector.multi_reduction <add>, %25, %cst_24 [0] : vector<512x32xf32> to vector<32xf32>
      %27 = vector.shape_cast %26 : vector<32xf32> to vector<1x32xf32>
      %28 = arith.addf %24, %27 : vector<1x32xf32>
      %c0_25 = arith.constant 0 : index
      %c0_26 = arith.constant 0 : index
      %29 = vector.load %arg6[%c0_25, %c0_26] : memref<1x32xf32, #tpu.memory_space<vmem>>, vector<1x32xf32>
      tpu.vector_store %arg6[%c0_25, %c0_26], %28 {strides = array<i32>} : memref<1x32xf32, #tpu.memory_space<vmem>>, vector<1x32xf32>,
    } else {
    }
    return
  }
  func.func @transform_0(%arg0: i32, %arg1: i32) -> (i32, i32) {
    %c0_i32 = arith.constant 0 : i32
    return %arg0, %arg1 : i32, i32
  }
  func.func @transform_1(%arg0: i32, %arg1: i32) -> (i32, i32) {
    %c0_i32 = arith.constant 0 : i32
    %c0_i32_0 = arith.constant 0 : i32
    return %arg1, %c0_i32 : i32, i32
  }
  func.func @transform_2(%arg0: i32, %arg1: i32) -> (i32, i32) {
    %c0_i32 = arith.constant 0 : i32
    %c0_i32_0 = arith.constant 0 : i32
    return %arg0, %c0_i32 : i32, i32
  }
  func.func @transform_3(%arg0: i32, %arg1: i32) -> (i32, i32) {
    %c0_i32 = arith.constant 0 : i32
    %c0_i32_0 = arith.constant 0 : i32
    %c0_i32_1 = arith.constant 0 : i32
    return %c0_i32, %c0_i32_0 : i32, i32
  }
  func.func @transform_4(%arg0: i32, %arg1: i32) -> (i32, i32) {
    %c0_i32 = arith.constant 0 : i32
    %c0_i32_0 = arith.constant 0 : i32
    %c0_i32_1 = arith.constant 0 : i32
    return %c0_i32, %c0_i32_0 : i32, i32
  }
}

module attributes {stable_mosaic.version = 11 : i64} {
  func.func @_bn_apply_kernel(%arg0: i32, %arg1: memref<128x128xf32, #tpu.memory_space<vmem>>, %arg2: memref<2x128xf32, #tpu.memory_space<vmem>>, %arg3: memref<128x128xbf16, #tpu.memory_space<vmem>>) attributes {dimension_semantics = [#tpu.dimension_semantics<parallel>], iteration_bounds = array<i64: 1>, scalar_prefetch = 0 : i64, scratch_operands = 0 : i64, tpu.core_type = #tpu.core_type<tc>, window_params = [{transform_indices = @transform_0, window_bounds = array<i64: 128, 128>}, {pipeline_mode = #tpu.pipeline_mode<synchronous>, transform_indices = @transform_1, window_bounds = array<i64: 2, 128>}, {transform_indices = @transform_2, window_bounds = array<i64: 128, 128>}]} {
    %c0 = arith.constant 0 : index
    %c0_0 = arith.constant 0 : index
    %0 = vector.load %arg1[%c0, %c0_0] : memref<128x128xf32, #tpu.memory_space<vmem>>, vector<128x128xf32>
    %c0_1 = arith.constant 0 : index
    %c0_2 = arith.constant 0 : index
    %1 = vector.load %arg2[%c0_1, %c0_2] : memref<2x128xf32, #tpu.memory_space<vmem>>, vector<1x128xf32>
    %2 = vector.broadcast %1 : vector<1x128xf32> to vector<128x128xf32>
    %3 = arith.mulf %0, %2 : vector<128x128xf32>
    %c1 = arith.constant 1 : index
    %c0_3 = arith.constant 0 : index
    %4 = vector.load %arg2[%c1, %c0_3] : memref<2x128xf32, #tpu.memory_space<vmem>>, vector<1x128xf32>
    %5 = vector.broadcast %4 : vector<1x128xf32> to vector<128x128xf32>
    %6 = arith.addf %3, %5 : vector<128x128xf32>
    %cst = arith.constant 0.000000e+00 : f32
    %7 = vector.broadcast %cst : f32 to vector<128x128xf32>
    %8 = arith.maximumf %6, %7 : vector<128x128xf32>
    %9 = arith.truncf %8 : vector<128x128xf32> to vector<128x128xbf16>
    %c0_4 = arith.constant 0 : index
    %c0_5 = arith.constant 0 : index
    %10 = vector.load %arg3[%c0_4, %c0_5] : memref<128x128xbf16, #tpu.memory_space<vmem>>, vector<128x128xbf16>
    tpu.vector_store %arg3[%c0_4, %c0_5], %9 {strides = array<i32>} : memref<128x128xbf16, #tpu.memory_space<vmem>>, vector<128x128xbf16>,
    return
  }
  func.func @transform_0(%arg0: i32) -> (i32, i32) {
    %c0_i32 = arith.constant 0 : i32
    %c0_i32_0 = arith.constant 0 : i32
    return %arg0, %c0_i32 : i32, i32
  }
  func.func @transform_1(%arg0: i32) -> (i32, i32) {
    %c0_i32 = arith.constant 0 : i32
    %c0_i32_0 = arith.constant 0 : i32
    %c0_i32_1 = arith.constant 0 : i32
    return %c0_i32, %c0_i32_0 : i32, i32
  }
  func.func @transform_2(%arg0: i32) -> (i32, i32) {
    %c0_i32 = arith.constant 0 : i32
    %c0_i32_0 = arith.constant 0 : i32
    return %arg0, %c0_i32 : i32, i32
  }
}

module attributes {stable_mosaic.version = 11 : i64} {
  func.func @_conv3x3_bn_stats_kernel(%arg0: i32, %arg1: memref<1x18x18x32xbf16, #tpu.memory_space<vmem>>, %arg2: memref<288x32xbf16, #tpu.memory_space<vmem>>, %arg3: memref<1x256x32xf32, #tpu.memory_space<vmem>>, %arg4: memref<1x32xf32, #tpu.memory_space<vmem>>, %arg5: memref<1x32xf32, #tpu.memory_space<vmem>>) attributes {dimension_semantics = [#tpu.dimension_semantics<arbitrary>], iteration_bounds = array<i64: 2>, scalar_prefetch = 0 : i64, scratch_operands = 0 : i64, tpu.core_type = #tpu.core_type<tc>, window_params = [{transform_indices = @transform_0, window_bounds = array<i64: 1, 18, 18, 32>}, {pipeline_mode = #tpu.pipeline_mode<synchronous>, transform_indices = @transform_1, window_bounds = array<i64: 288, 32>}, {transform_indices = @transform_2, window_bounds = array<i64: 1, 256, 32>}, {pipeline_mode = #tpu.pipeline_mode<synchronous>, transform_indices = @transform_3, window_bounds = array<i64: 1, 32>}, {pipeline_mode = #tpu.pipeline_mode<synchronous>, transform_indices = @transform_4, window_bounds = array<i64: 1, 32>}]} {
    %c0_i32 = arith.constant 0 : i32
    %0 = arith.cmpi eq, %arg0, %c0_i32 : i32
    %1 = arith.extui %0 : i1 to i32
    %c0_i32_0 = arith.constant 0 : i32
    %2 = arith.cmpi ne, %1, %c0_i32_0 : i32
    scf.if %2 {
      %cst_19 = arith.constant 0.000000e+00 : f32
      %32 = vector.broadcast %cst_19 : f32 to vector<1x32xf32>
      %c0_20 = arith.constant 0 : index
      %c0_21 = arith.constant 0 : index
      %33 = vector.load %arg4[%c0_20, %c0_21] : memref<1x32xf32, #tpu.memory_space<vmem>>, vector<1x32xf32>
      tpu.vector_store %arg4[%c0_20, %c0_21], %32 {strides = array<i32>} : memref<1x32xf32, #tpu.memory_space<vmem>>, vector<1x32xf32>,
      %cst_22 = arith.constant 0.000000e+00 : f32
      %34 = vector.broadcast %cst_22 : f32 to vector<1x32xf32>
      %c0_23 = arith.constant 0 : index
      %c0_24 = arith.constant 0 : index
      %35 = vector.load %arg5[%c0_23, %c0_24] : memref<1x32xf32, #tpu.memory_space<vmem>>, vector<1x32xf32>
      tpu.vector_store %arg5[%c0_23, %c0_24], %34 {strides = array<i32>} : memref<1x32xf32, #tpu.memory_space<vmem>>, vector<1x32xf32>,
    } else {
    }
    %c0 = arith.constant 0 : index
    %c0_1 = arith.constant 0 : index
    %c0_2 = arith.constant 0 : index
    %c0_3 = arith.constant 0 : index
    %3 = vector.load %arg1[%c0, %c0_1, %c0_2, %c0_3] : memref<1x18x18x32xbf16, #tpu.memory_space<vmem>>, vector<1x18x18x32xbf16>
    %4 = vector.shape_cast %3 : vector<1x18x18x32xbf16> to vector<18x18x32xbf16>
    %5 = vector.extract_strided_slice %4 {offsets = [0, 0, 0], sizes = [16, 16, 32], strides = [1, 1, 1]} : vector<18x18x32xbf16> to vector<16x16x32xbf16>
    %6 = vector.extract_strided_slice %4 {offsets = [0, 1, 0], sizes = [16, 16, 32], strides = [1, 1, 1]} : vector<18x18x32xbf16> to vector<16x16x32xbf16>
    %7 = vector.extract_strided_slice %4 {offsets = [0, 2, 0], sizes = [16, 16, 32], strides = [1, 1, 1]} : vector<18x18x32xbf16> to vector<16x16x32xbf16>
    %8 = vector.extract_strided_slice %4 {offsets = [1, 0, 0], sizes = [16, 16, 32], strides = [1, 1, 1]} : vector<18x18x32xbf16> to vector<16x16x32xbf16>
    %9 = vector.extract_strided_slice %4 {offsets = [1, 1, 0], sizes = [16, 16, 32], strides = [1, 1, 1]} : vector<18x18x32xbf16> to vector<16x16x32xbf16>
    %10 = vector.extract_strided_slice %4 {offsets = [1, 2, 0], sizes = [16, 16, 32], strides = [1, 1, 1]} : vector<18x18x32xbf16> to vector<16x16x32xbf16>
    %11 = vector.extract_strided_slice %4 {offsets = [2, 0, 0], sizes = [16, 16, 32], strides = [1, 1, 1]} : vector<18x18x32xbf16> to vector<16x16x32xbf16>
    %12 = vector.extract_strided_slice %4 {offsets = [2, 1, 0], sizes = [16, 16, 32], strides = [1, 1, 1]} : vector<18x18x32xbf16> to vector<16x16x32xbf16>
    %13 = vector.extract_strided_slice %4 {offsets = [2, 2, 0], sizes = [16, 16, 32], strides = [1, 1, 1]} : vector<18x18x32xbf16> to vector<16x16x32xbf16>
    %14 = tpu.concatenate %5, %6, %7, %8, %9, %10, %11, %12, %13 in 2 : vector<16x16x32xbf16>, vector<16x16x32xbf16>, vector<16x16x32xbf16>, vector<16x16x32xbf16>, vector<16x16x32xbf16>, vector<16x16x32xbf16>, vector<16x16x32xbf16>, vector<16x16x32xbf16>, vector<16x16x32xbf16> -> vector<16x16x288xbf16>
    %15 = vector.shape_cast %14 : vector<16x16x288xbf16> to vector<256x288xbf16>
    %c0_4 = arith.constant 0 : index
    %c0_5 = arith.constant 0 : index
    %16 = vector.load %arg2[%c0_4, %c0_5] : memref<288x32xbf16, #tpu.memory_space<vmem>>, vector<288x32xbf16>
    %cst = arith.constant dense<0.000000e+00> : vector<256x32xf32>
    %17 = tpu.matmul %15, %16, %cst {dimension_numbers = #tpu.dot_dimension_numbers<[1], [0], [0], [1], [0, 0, 1, 1], [], []>} : vector<256x288xbf16>, vector<288x32xbf16>, vector<256x32xf32> -> vector<256x32xf32>
    %c0_6 = arith.constant 0 : index
    %c0_7 = arith.constant 0 : index
    %c0_8 = arith.constant 0 : index
    %18 = vector.load %arg3[%c0_6, %c0_7, %c0_8] : memref<1x256x32xf32, #tpu.memory_space<vmem>>, vector<1x256x32xf32>
    %19 = vector.shape_cast %18 : vector<1x256x32xf32> to vector<256x32xf32>
    %20 = vector.shape_cast %17 : vector<256x32xf32> to vector<1x256x32xf32>
    tpu.vector_store %arg3[%c0_6, %c0_7, %c0_8], %20 {strides = array<i32>} : memref<1x256x32xf32, #tpu.memory_space<vmem>>, vector<1x256x32xf32>,
    %c0_9 = arith.constant 0 : index
    %c0_10 = arith.constant 0 : index
    %21 = vector.load %arg4[%c0_9, %c0_10] : memref<1x32xf32, #tpu.memory_space<vmem>>, vector<1x32xf32>
    %cst_11 = arith.constant dense<0.000000e+00> : vector<32xf32>
    %22 = vector.multi_reduction <add>, %17, %cst_11 [0] : vector<256x32xf32> to vector<32xf32>
    %23 = vector.shape_cast %22 : vector<32xf32> to vector<1x32xf32>
    %24 = arith.addf %21, %23 : vector<1x32xf32>
    %c0_12 = arith.constant 0 : index
    %c0_13 = arith.constant 0 : index
    %25 = vector.load %arg4[%c0_12, %c0_13] : memref<1x32xf32, #tpu.memory_space<vmem>>, vector<1x32xf32>
    tpu.vector_store %arg4[%c0_12, %c0_13], %24 {strides = array<i32>} : memref<1x32xf32, #tpu.memory_space<vmem>>, vector<1x32xf32>,
    %c0_14 = arith.constant 0 : index
    %c0_15 = arith.constant 0 : index
    %26 = vector.load %arg5[%c0_14, %c0_15] : memref<1x32xf32, #tpu.memory_space<vmem>>, vector<1x32xf32>
    %27 = arith.mulf %17, %17 : vector<256x32xf32>
    %cst_16 = arith.constant dense<0.000000e+00> : vector<32xf32>
    %28 = vector.multi_reduction <add>, %27, %cst_16 [0] : vector<256x32xf32> to vector<32xf32>
    %29 = vector.shape_cast %28 : vector<32xf32> to vector<1x32xf32>
    %30 = arith.addf %26, %29 : vector<1x32xf32>
    %c0_17 = arith.constant 0 : index
    %c0_18 = arith.constant 0 : index
    %31 = vector.load %arg5[%c0_17, %c0_18] : memref<1x32xf32, #tpu.memory_space<vmem>>, vector<1x32xf32>
    tpu.vector_store %arg5[%c0_17, %c0_18], %30 {strides = array<i32>} : memref<1x32xf32, #tpu.memory_space<vmem>>, vector<1x32xf32>,
    return
  }
  func.func @transform_0(%arg0: i32) -> (i32, i32, i32, i32) {
    %c0_i32 = arith.constant 0 : i32
    %c0_i32_0 = arith.constant 0 : i32
    %c0_i32_1 = arith.constant 0 : i32
    %c0_i32_2 = arith.constant 0 : i32
    return %arg0, %c0_i32, %c0_i32_0, %c0_i32_1 : i32, i32, i32, i32
  }
  func.func @transform_1(%arg0: i32) -> (i32, i32) {
    %c0_i32 = arith.constant 0 : i32
    %c0_i32_0 = arith.constant 0 : i32
    %c0_i32_1 = arith.constant 0 : i32
    return %c0_i32, %c0_i32_0 : i32, i32
  }
  func.func @transform_2(%arg0: i32) -> (i32, i32, i32) {
    %c0_i32 = arith.constant 0 : i32
    %c0_i32_0 = arith.constant 0 : i32
    %c0_i32_1 = arith.constant 0 : i32
    return %arg0, %c0_i32, %c0_i32_0 : i32, i32, i32
  }
  func.func @transform_3(%arg0: i32) -> (i32, i32) {
    %c0_i32 = arith.constant 0 : i32
    %c0_i32_0 = arith.constant 0 : i32
    %c0_i32_1 = arith.constant 0 : i32
    return %c0_i32, %c0_i32_0 : i32, i32
  }
  func.func @transform_4(%arg0: i32) -> (i32, i32) {
    %c0_i32 = arith.constant 0 : i32
    %c0_i32_0 = arith.constant 0 : i32
    %c0_i32_1 = arith.constant 0 : i32
    return %c0_i32, %c0_i32_0 : i32, i32
  }
}

module attributes {stable_mosaic.version = 11 : i64} {
  func.func @_matmul_bn_stats_kernel(%arg0: i32, %arg1: i32, %arg2: memref<512x32xbf16, #tpu.memory_space<vmem>>, %arg3: memref<32x128xbf16, #tpu.memory_space<vmem>>, %arg4: memref<512x128xf32, #tpu.memory_space<vmem>>, %arg5: memref<1x128xf32, #tpu.memory_space<vmem>>, %arg6: memref<1x128xf32, #tpu.memory_space<vmem>>, %arg7: memref<512x128xf32, #tpu.memory_space<vmem>>) attributes {dimension_semantics = [#tpu.dimension_semantics<arbitrary>, #tpu.dimension_semantics<arbitrary>], iteration_bounds = array<i64: 1, 1>, scalar_prefetch = 0 : i64, scratch_operands = 1 : i64, tpu.core_type = #tpu.core_type<tc>, window_params = [{transform_indices = @transform_0, window_bounds = array<i64: 512, 32>}, {transform_indices = @transform_1, window_bounds = array<i64: 32, 128>}, {transform_indices = @transform_2, window_bounds = array<i64: 512, 128>}, {pipeline_mode = #tpu.pipeline_mode<synchronous>, transform_indices = @transform_3, window_bounds = array<i64: 1, 128>}, {pipeline_mode = #tpu.pipeline_mode<synchronous>, transform_indices = @transform_4, window_bounds = array<i64: 1, 128>}]} {
    %c0_i32 = arith.constant 0 : i32
    %0 = arith.cmpi eq, %arg0, %c0_i32 : i32
    %c0_i32_0 = arith.constant 0 : i32
    %1 = arith.cmpi eq, %arg1, %c0_i32_0 : i32
    %2 = arith.andi %0, %1 : i1
    %3 = arith.extui %2 : i1 to i32
    %c0_i32_1 = arith.constant 0 : i32
    %4 = arith.cmpi ne, %3, %c0_i32_1 : i32
    scf.if %4 {
      %cst_13 = arith.constant 0.000000e+00 : f32
      %17 = vector.broadcast %cst_13 : f32 to vector<1x128xf32>
      %c0_14 = arith.constant 0 : index
      %c0_15 = arith.constant 0 : index
      %18 = vector.load %arg5[%c0_14, %c0_15] : memref<1x128xf32, #tpu.memory_space<vmem>>, vector<1x128xf32>
      tpu.vector_store %arg5[%c0_14, %c0_15], %17 {strides = array<i32>} : memref<1x128xf32, #tpu.memory_space<vmem>>, vector<1x128xf32>,
      %cst_16 = arith.constant 0.000000e+00 : f32
      %19 = vector.broadcast %cst_16 : f32 to vector<1x128xf32>
      %c0_17 = arith.constant 0 : index
      %c0_18 = arith.constant 0 : index
      %20 = vector.load %arg6[%c0_17, %c0_18] : memref<1x128xf32, #tpu.memory_space<vmem>>, vector<1x128xf32>
      tpu.vector_store %arg6[%c0_17, %c0_18], %19 {strides = array<i32>} : memref<1x128xf32, #tpu.memory_space<vmem>>, vector<1x128xf32>,
    } else {
    }
    %c0_i32_2 = arith.constant 0 : i32
    %5 = arith.cmpi eq, %arg1, %c0_i32_2 : i32
    %6 = arith.extui %5 : i1 to i32
    %c0_i32_3 = arith.constant 0 : i32
    %7 = arith.cmpi ne, %6, %c0_i32_3 : i32
    scf.if %7 {
      %cst_13 = arith.constant 0.000000e+00 : f32
      %17 = vector.broadcast %cst_13 : f32 to vector<512x128xf32>
      %c0_14 = arith.constant 0 : index
      %c0_15 = arith.constant 0 : index
      %18 = vector.load %arg7[%c0_14, %c0_15] : memref<512x128xf32, #tpu.memory_space<vmem>>, vector<512x128xf32>
      tpu.vector_store %arg7[%c0_14, %c0_15], %17 {strides = array<i32>} : memref<512x128xf32, #tpu.memory_space<vmem>>, vector<512x128xf32>,
    } else {
    }
    %c0 = arith.constant 0 : index
    %c0_4 = arith.constant 0 : index
    %8 = vector.load %arg7[%c0, %c0_4] : memref<512x128xf32, #tpu.memory_space<vmem>>, vector<512x128xf32>
    %c0_5 = arith.constant 0 : index
    %c0_6 = arith.constant 0 : index
    %9 = vector.load %arg2[%c0_5, %c0_6] : memref<512x32xbf16, #tpu.memory_space<vmem>>, vector<512x32xbf16>
    %c0_7 = arith.constant 0 : index
    %c0_8 = arith.constant 0 : index
    %10 = vector.load %arg3[%c0_7, %c0_8] : memref<32x128xbf16, #tpu.memory_space<vmem>>, vector<32x128xbf16>
    %cst = arith.constant dense<0.000000e+00> : vector<512x128xf32>
    %11 = tpu.matmul %9, %10, %cst {dimension_numbers = #tpu.dot_dimension_numbers<[1], [0], [0], [1], [0, 0, 1, 1], [], []>} : vector<512x32xbf16>, vector<32x128xbf16>, vector<512x128xf32> -> vector<512x128xf32>
    %12 = arith.addf %8, %11 : vector<512x128xf32>
    %c0_9 = arith.constant 0 : index
    %c0_10 = arith.constant 0 : index
    %13 = vector.load %arg7[%c0_9, %c0_10] : memref<512x128xf32, #tpu.memory_space<vmem>>, vector<512x128xf32>
    tpu.vector_store %arg7[%c0_9, %c0_10], %12 {strides = array<i32>} : memref<512x128xf32, #tpu.memory_space<vmem>>, vector<512x128xf32>,
    %c0_i32_11 = arith.constant 0 : i32
    %14 = arith.cmpi eq, %arg1, %c0_i32_11 : i32
    %15 = arith.extui %14 : i1 to i32
    %c0_i32_12 = arith.constant 0 : i32
    %16 = arith.cmpi ne, %15, %c0_i32_12 : i32
    scf.if %16 {
      %c0_13 = arith.constant 0 : index
      %c0_14 = arith.constant 0 : index
      %17 = vector.load %arg7[%c0_13, %c0_14] : memref<512x128xf32, #tpu.memory_space<vmem>>, vector<512x128xf32>
      %c0_15 = arith.constant 0 : index
      %c0_16 = arith.constant 0 : index
      %18 = vector.load %arg4[%c0_15, %c0_16] : memref<512x128xf32, #tpu.memory_space<vmem>>, vector<512x128xf32>
      tpu.vector_store %arg4[%c0_15, %c0_16], %17 {strides = array<i32>} : memref<512x128xf32, #tpu.memory_space<vmem>>, vector<512x128xf32>,
      %c0_17 = arith.constant 0 : index
      %c0_18 = arith.constant 0 : index
      %19 = vector.load %arg5[%c0_17, %c0_18] : memref<1x128xf32, #tpu.memory_space<vmem>>, vector<1x128xf32>
      %cst_19 = arith.constant dense<0.000000e+00> : vector<128xf32>
      %20 = vector.multi_reduction <add>, %17, %cst_19 [0] : vector<512x128xf32> to vector<128xf32>
      %21 = vector.shape_cast %20 : vector<128xf32> to vector<1x128xf32>
      %22 = arith.addf %19, %21 : vector<1x128xf32>
      %c0_20 = arith.constant 0 : index
      %c0_21 = arith.constant 0 : index
      %23 = vector.load %arg5[%c0_20, %c0_21] : memref<1x128xf32, #tpu.memory_space<vmem>>, vector<1x128xf32>
      tpu.vector_store %arg5[%c0_20, %c0_21], %22 {strides = array<i32>} : memref<1x128xf32, #tpu.memory_space<vmem>>, vector<1x128xf32>,
      %c0_22 = arith.constant 0 : index
      %c0_23 = arith.constant 0 : index
      %24 = vector.load %arg6[%c0_22, %c0_23] : memref<1x128xf32, #tpu.memory_space<vmem>>, vector<1x128xf32>
      %25 = arith.mulf %17, %17 : vector<512x128xf32>
      %cst_24 = arith.constant dense<0.000000e+00> : vector<128xf32>
      %26 = vector.multi_reduction <add>, %25, %cst_24 [0] : vector<512x128xf32> to vector<128xf32>
      %27 = vector.shape_cast %26 : vector<128xf32> to vector<1x128xf32>
      %28 = arith.addf %24, %27 : vector<1x128xf32>
      %c0_25 = arith.constant 0 : index
      %c0_26 = arith.constant 0 : index
      %29 = vector.load %arg6[%c0_25, %c0_26] : memref<1x128xf32, #tpu.memory_space<vmem>>, vector<1x128xf32>
      tpu.vector_store %arg6[%c0_25, %c0_26], %28 {strides = array<i32>} : memref<1x128xf32, #tpu.memory_space<vmem>>, vector<1x128xf32>,
    } else {
    }
    return
  }
  func.func @transform_0(%arg0: i32, %arg1: i32) -> (i32, i32) {
    %c0_i32 = arith.constant 0 : i32
    return %arg0, %arg1 : i32, i32
  }
  func.func @transform_1(%arg0: i32, %arg1: i32) -> (i32, i32) {
    %c0_i32 = arith.constant 0 : i32
    %c0_i32_0 = arith.constant 0 : i32
    return %arg1, %c0_i32 : i32, i32
  }
  func.func @transform_2(%arg0: i32, %arg1: i32) -> (i32, i32) {
    %c0_i32 = arith.constant 0 : i32
    %c0_i32_0 = arith.constant 0 : i32
    return %arg0, %c0_i32 : i32, i32
  }
  func.func @transform_3(%arg0: i32, %arg1: i32) -> (i32, i32) {
    %c0_i32 = arith.constant 0 : i32
    %c0_i32_0 = arith.constant 0 : i32
    %c0_i32_1 = arith.constant 0 : i32
    return %c0_i32, %c0_i32_0 : i32, i32
  }
  func.func @transform_4(%arg0: i32, %arg1: i32) -> (i32, i32) {
    %c0_i32 = arith.constant 0 : i32
    %c0_i32_0 = arith.constant 0 : i32
    %c0_i32_1 = arith.constant 0 : i32
    return %c0_i32, %c0_i32_0 : i32, i32
  }
}

module attributes {stable_mosaic.version = 11 : i64} {
  func.func @_bn_res_apply_kernel(%arg0: i32, %arg1: memref<512x128xf32, #tpu.memory_space<vmem>>, %arg2: memref<2x128xf32, #tpu.memory_space<vmem>>, %arg3: memref<512x128xf32, #tpu.memory_space<vmem>>, %arg4: memref<512x128xf32, #tpu.memory_space<vmem>>) attributes {dimension_semantics = [#tpu.dimension_semantics<parallel>], iteration_bounds = array<i64: 1>, scalar_prefetch = 0 : i64, scratch_operands = 0 : i64, tpu.core_type = #tpu.core_type<tc>, window_params = [{transform_indices = @transform_0, window_bounds = array<i64: 512, 128>}, {pipeline_mode = #tpu.pipeline_mode<synchronous>, transform_indices = @transform_1, window_bounds = array<i64: 2, 128>}, {transform_indices = @transform_2, window_bounds = array<i64: 512, 128>}, {transform_indices = @transform_3, window_bounds = array<i64: 512, 128>}]} {
    %c0 = arith.constant 0 : index
    %c0_0 = arith.constant 0 : index
    %0 = vector.load %arg1[%c0, %c0_0] : memref<512x128xf32, #tpu.memory_space<vmem>>, vector<512x128xf32>
    %c0_1 = arith.constant 0 : index
    %c0_2 = arith.constant 0 : index
    %1 = vector.load %arg2[%c0_1, %c0_2] : memref<2x128xf32, #tpu.memory_space<vmem>>, vector<1x128xf32>
    %2 = vector.broadcast %1 : vector<1x128xf32> to vector<512x128xf32>
    %3 = arith.mulf %0, %2 : vector<512x128xf32>
    %c1 = arith.constant 1 : index
    %c0_3 = arith.constant 0 : index
    %4 = vector.load %arg2[%c1, %c0_3] : memref<2x128xf32, #tpu.memory_space<vmem>>, vector<1x128xf32>
    %5 = vector.broadcast %4 : vector<1x128xf32> to vector<512x128xf32>
    %6 = arith.addf %3, %5 : vector<512x128xf32>
    %c0_4 = arith.constant 0 : index
    %c0_5 = arith.constant 0 : index
    %7 = vector.load %arg3[%c0_4, %c0_5] : memref<512x128xf32, #tpu.memory_space<vmem>>, vector<512x128xf32>
    %8 = arith.addf %6, %7 : vector<512x128xf32>
    %cst = arith.constant 0.000000e+00 : f32
    %9 = vector.broadcast %cst : f32 to vector<512x128xf32>
    %10 = arith.maximumf %8, %9 : vector<512x128xf32>
    %c0_6 = arith.constant 0 : index
    %c0_7 = arith.constant 0 : index
    %11 = vector.load %arg4[%c0_6, %c0_7] : memref<512x128xf32, #tpu.memory_space<vmem>>, vector<512x128xf32>
    tpu.vector_store %arg4[%c0_6, %c0_7], %10 {strides = array<i32>} : memref<512x128xf32, #tpu.memory_space<vmem>>, vector<512x128xf32>,
    return
  }
  func.func @transform_0(%arg0: i32) -> (i32, i32) {
    %c0_i32 = arith.constant 0 : i32
    %c0_i32_0 = arith.constant 0 : i32
    return %arg0, %c0_i32 : i32, i32
  }
  func.func @transform_1(%arg0: i32) -> (i32, i32) {
    %c0_i32 = arith.constant 0 : i32
    %c0_i32_0 = arith.constant 0 : i32
    %c0_i32_1 = arith.constant 0 : i32
    return %c0_i32, %c0_i32_0 : i32, i32
  }
  func.func @transform_2(%arg0: i32) -> (i32, i32) {
    %c0_i32 = arith.constant 0 : i32
    %c0_i32_0 = arith.constant 0 : i32
    return %arg0, %c0_i32 : i32, i32
  }
  func.func @transform_3(%arg0: i32) -> (i32, i32) {
    %c0_i32 = arith.constant 0 : i32
    %c0_i32_0 = arith.constant 0 : i32
    return %arg0, %c0_i32 : i32, i32
  }
}

</mosaic_0001>

<bundles_post_ra>
// kernel: tile.27
= control target key start
LH: loop header
LB: loop body
LE: loop exit
PB: predicated region body
PF: predicated region fallthrough
CT: control target
= control target key end

     0   :  { %s22_s0 = inlined_call_operand.vmem [shape: f32[32], index: 0, kind: input, shape index: {}]   ;;  %s23_s1 = inlined_call_operand.vmem [shape: f32[4,32], index: 1, kind: output, shape index: {}]  }
   0x1   :  { %v4_v0 = vld [vmem:[%s22_s0] ss:$0 sm:$0xff] }
   0x2   :  { %5 = vst [vmem:[%s23_s1] sm:$0xf] %v4_v0 }

// kernel: tile.28
= control target key start
LH: loop header
LB: loop body
LE: loop exit
PB: predicated region body
PF: predicated region fallthrough
CT: control target
= control target key end

     0   :  { %s37_s8 = smov 32   ;;  %s38_s9 = smov 64   ;;  %vm7_vm0 = vcmask 261120   ;;  %vm13_vm1 = vcmask 1048320   ;;  %vm19_vm2 = vcmask 785920   ;;  %vm25_vm3 = vcmask 523520   ;;  %s55_s0 = inlined_call_operand.vmem [shape: f32[4,32], index: 0, kind: input, shape index: {}]   ;;  %s56_s1 = inlined_call_operand.vmem [shape: f32[1,128], index: 1, kind: output, shape index: {}]  }
   0x1   :  { %v4_v0 = vld [vmem:[%s55_s0] sm:$0xf]  ;;  %s36_s0 = smov 96  }
   0x2   :  { %5 = vst [vmem:[#allocation1] sm:$0xf] %v4_v0 }
   0x9   :  { %v10_v1 = vld [vmem:[#allocation1 + $0x3] sm:$0x1]   ;;  %v22_v2 = vld [vmem:[#allocation1 + $0x1] sm:$0x1]   ;;  %v16_v3 = vld [vmem:[#allocation1 + $0x2] sm:$0x1]  }
   0xa   :  { %11 = vrot.lane.b32.xlu0 %v10_v1, %s36_s0  ;;  %23 = vrot.lane.b32.xlu1 %v22_v2, %s37_s8  ;;  %v6_v4 = vld [vmem:[#allocation1] sm:$0x1]  }
   0xb   :  { %8 = vst.msk [vmem:[#allocation0] sm:$0x1] %vm7_vm0, %v6_v4  }
  0x12   :  { %17 = vrot.lane.b32.xlu0 %v16_v3, %s38_s9 }
  0x7c   :  { %v12_v5 = vpop.permute.xlu0 %11   ;;  %v24_v6 = vpop.permute.xlu1 %23  }
  0x7d   :  { %14 = vst.msk [vmem:[#allocation0] sm:$0x1] %vm13_vm1, %v12_v5  }
  0x84   :  { %v18_v7 = vpop.permute.xlu0 %17  }
  0x85   :  { %20 = vst.msk [vmem:[#allocation0] sm:$0x1] %vm19_vm2, %v18_v7  }
  0x86   :  { %26 = vst.msk [vmem:[#allocation0] sm:$0x1] %vm25_vm3, %v24_v6  }
  0x8d   :  { %v29_v8 = vld [vmem:[#allocation0] sm:$0x1] }
  0x8e   :  { %32 = vst [vmem:[%s56_s1] sm:$0x1] %v29_v8 }

// kernel: _lambda_.14
= control target key start
LH: loop header
LB: loop body
LE: loop exit
PB: predicated region body
PF: predicated region fallthrough
CT: control target
= control target key end

     0   :  { %s817_s0 = inlined_call_operand.vmem [shape: f32[512,128], index: 0, kind: input, shape index: {}]   ;;  %s818_s1 = inlined_call_operand.vmem [shape: f32[2,128], index: 1, kind: input, shape index: {}]   ;;  %s819_s2 = inlined_call_operand.vmem [shape: f32[512,128], index: 2, kind: output, shape index: {}]  }
   0x1   :  { %v11_v0 = vld [vmem:[%s817_s0] sm:$0xff]  ;;  %v12_v3 = vld [vmem:[%s817_s0 + $0x8] sm:$0xff]  ;;  %v13_v6 = vld [vmem:[%s817_s0 + $0x10] sm:$0xff] }
   0x2   :  { %v298_v1 = vld [vmem:[%s818_s1] ss:$0 sm:$0xff]  ;;  %v303_v2 = vld [vmem:[%s818_s1 + $0x1] ss:$0 sm:$0xff]  ;;  %v14_v7 = vld [vmem:[%s817_s0 + $0x18] sm:$0xff] }
   0x3   :  { %v77_v4 = vmul.f32 %v298_v1, %v11_v0  ;;  %v78_v5 = vmul.f32 %v298_v1, %v12_v3  ;;  %v15_v8 = vld [vmem:[%s817_s0 + $0x20] sm:$0xff]  ;;  %v79_v9 = vmul.f32 %v298_v1, %v13_v6  ;;  %v80_v10 = vmul.f32 %v298_v1, %v14_v7  ;;  %v16_v12 = vld [vmem:[%s817_s0 + $0x28] sm:$0xff]  ;;  %v17_v13 = vld [vmem:[%s817_s0 + $0x30] sm:$0xff] }
   0x4   :  { %v81_v11 = vmul.f32 %v298_v1, %v15_v8  ;;  %v18_v14 = vld [vmem:[%s817_s0 + $0x38] sm:$0xff]  ;;  %v82_v17 = vmul.f32 %v298_v1, %v16_v12  ;;  %v83_v18 = vmul.f32 %v298_v1, %v17_v13  ;;  %v19_v19 = vld [vmem:[%s817_s0 + $0x40] sm:$0xff]  ;;  %v20_v20 = vld [vmem:[%s817_s0 + $0x48] sm:$0xff] }
   0x5   :  { %v143_v15 = vadd.f32 %v303_v2, %v77_v4  ;;  %v144_v16 = vadd.f32 %v303_v2, %v78_v5  ;;  %v145_v21 = vadd.f32 %v303_v2, %v79_v9  ;;  %v146_v22 = vadd.f32 %v303_v2, %v80_v10  ;;  %v21_v24 = vld [vmem:[%s817_s0 + $0x50] sm:$0xff]  ;;  %v22_v27 = vld [vmem:[%s817_s0 + $0x58] sm:$0xff]  ;;  %v23_v30 = vld [vmem:[%s817_s0 + $0x60] sm:$0xff] }
   0x6   :  { %v84_v23 = vmul.f32 %v298_v1, %v18_v14  ;;  %v147_v25 = vadd.f32 %v303_v2, %v81_v11  ;;  %v85_v26 = vmul.f32 %v298_v1, %v19_v19  ;;  %v148_v28 = vadd.f32 %v303_v2, %v82_v17  ;;  %v24_v33 = vld [vmem:[%s817_s0 + $0x68] sm:$0xff]  ;;  %v25_v36 = vld [vmem:[%s817_s0 + $0x70] sm:$0xff]  ;;  %v26_v39 = vld [vmem:[%s817_s0 + $0x78] sm:$0xff] }
   0x7   :  { %207 = vst [vmem:[%s819_s2] sm:$0xff] %v143_v15  ;;  %v86_v29 = vmul.f32 %v298_v1, %v20_v20  ;;  %v149_v31 = vadd.f32 %v303_v2, %v83_v18  ;;  %v87_v32 = vmul.f32 %v298_v1, %v21_v24  ;;  %v88_v35 = vmul.f32 %v298_v1, %v22_v27  ;;  %v27_v42 = vld [vmem:[%s817_s0 + $0x80] sm:$0xff]  ;;  %v28_v45 = vld [vmem:[%s817_s0 + $0x88] sm:$0xff]  ;;  %v29_v48 = vld [vmem:[%s817_s0 + $0x90] sm:$0xff] }
   0x8   :  { %208 = vst [vmem:[%s819_s2 + $0x8] sm:$0xff] %v144_v16  ;;  %v150_v34 = vadd.f32 %v303_v2, %v84_v23  ;;  %v151_v37 = vadd.f32 %v303_v2, %v85_v26  ;;  %v89_v38 = vmul.f32 %v298_v1, %v23_v30  ;;  %v90_v41 = vmul.f32 %v298_v1, %v24_v33  ;;  %v30_v51 = vld [vmem:[%s817_s0 + $0x98] sm:$0xff]  ;;  %v31_v54 = vld [vmem:[%s817_s0 + $0xa0] sm:$0xff]  ;;  %v32_v57 = vld [vmem:[%s817_s0 + $0xa8] sm:$0xff] }
   0x9   :  { %209 = vst [vmem:[%s819_s2 + $0x10] sm:$0xff] %v145_v21  ;;  %v152_v40 = vadd.f32 %v303_v2, %v86_v29  ;;  %v153_v43 = vadd.f32 %v303_v2, %v87_v32  ;;  %v91_v44 = vmul.f32 %v298_v1, %v25_v36  ;;  %v154_v46 = vadd.f32 %v303_v2, %v88_v35  ;;  %v33_v60 = vld [vmem:[%s817_s0 + $0xb0] sm:$0xff]  ;;  %v34_v63 = vld [vmem:[%s817_s0 + $0xb8] sm:$0xff]  ;;  %v35_v4 = vld [vmem:[%s817_s0 + $0xc0] sm:$0xff] }
   0xa   :  { %210 = vst [vmem:[%s819_s2 + $0x18] sm:$0xff] %v146_v22  ;;  %v92_v47 = vmul.f32 %v298_v1, %v26_v39  ;;  %v155_v49 = vadd.f32 %v303_v2, %v89_v38  ;;  %v93_v50 = vmul.f32 %v298_v1, %v27_v42  ;;  %v156_v52 = vadd.f32 %v303_v2, %v90_v41  ;;  %v36_v7 = vld [vmem:[%s817_s0 + $0xc8] sm:$0xff]  ;;  %v37_v10 = vld [vmem:[%s817_s0 + $0xd0] sm:$0xff]  ;;  %v38_v13 = vld [vmem:[%s817_s0 + $0xd8] sm:$0xff] }
   0xb   :  { %211 = vst [vmem:[%s819_s2 + $0x20] sm:$0xff] %v147_v25  ;;  %v94_v53 = vmul.f32 %v298_v1, %v28_v45  ;;  %v157_v55 = vadd.f32 %v303_v2, %v91_v44  ;;  %v95_v56 = vmul.f32 %v298_v1, %v29_v48  ;;  %v96_v59 = vmul.f32 %v298_v1, %v30_v51  ;;  %v39_v16 = vld [vmem:[%s817_s0 + $0xe0] sm:$0xff]  ;;  %v40_v19 = vld [vmem:[%s817_s0 + $0xe8] sm:$0xff]  ;;  %v41_v22 = vld [vmem:[%s817_s0 + $0xf0] sm:$0xff] }
   0xc   :  { %212 = vst [vmem:[%s819_s2 + $0x28] sm:$0xff] %v148_v28  ;;  %v158_v58 = vadd.f32 %v303_v2, %v92_v47  ;;  %v159_v61 = vadd.f32 %v303_v2, %v93_v50  ;;  %v97_v62 = vmul.f32 %v298_v1, %v31_v54  ;;  %v98_v3 = vmul.f32 %v298_v1, %v32_v57  ;;  %v42_v25 = vld [vmem:[%s817_s0 + $0xf8] sm:$0xff]  ;;  %v43_v28 = vld [vmem:[%s817_s0 + $0x100] sm:$0xff]  ;;  %v48_v44 = vld [vmem:[%s817_s0 + $0x128] sm:$0xff] }
   0xd   :  { %213 = vst [vmem:[%s819_s2 + $0x30] sm:$0xff] %v149_v31  ;;  %v160_v0 = vadd.f32 %v303_v2, %v94_v53  ;;  %v161_v5 = vadd.f32 %v303_v2, %v95_v56  ;;  %v99_v6 = vmul.f32 %v298_v1, %v33_v60  ;;  %v162_v8 = vadd.f32 %v303_v2, %v96_v59  ;;  %v44_v31 = vld [vmem:[%s817_s0 + $0x108] sm:$0xff]  ;;  %v74_v41 = vld [vmem:[%s817_s0 + $0x1f8] sm:$0xff]  ;;  %v49_v47 = vld [vmem:[%s817_s0 + $0x130] sm:$0xff] }
   0xe   :  { %214 = vst [vmem:[%s819_s2 + $0x38] sm:$0xff] %v150_v34  ;;  %v100_v9 = vmul.f32 %v298_v1, %v34_v63  ;;  %v163_v11 = vadd.f32 %v303_v2, %v97_v62  ;;  %v101_v12 = vmul.f32 %v298_v1, %v35_v4  ;;  %v164_v14 = vadd.f32 %v303_v2, %v98_v3  ;;  %v45_v34 = vld [vmem:[%s817_s0 + $0x110] sm:$0xff]  ;;  %v50_v51 = vld [vmem:[%s817_s0 + $0x138] sm:$0xff]  ;;  %v51_v54 = vld [vmem:[%s817_s0 + $0x140] sm:$0xff] }
   0xf   :  { %215 = vst [vmem:[%s819_s2 + $0x40] sm:$0xff] %v151_v37  ;;  %v102_v15 = vmul.f32 %v298_v1, %v36_v7  ;;  %v165_v17 = vadd.f32 %v303_v2, %v99_v6  ;;  %v103_v18 = vmul.f32 %v298_v1, %v37_v10  ;;  %v104_v21 = vmul.f32 %v298_v1, %v38_v13  ;;  %v46_v37 = vld [vmem:[%s817_s0 + $0x118] sm:$0xff] }
  0x10   :  { %216 = vst [vmem:[%s819_s2 + $0x48] sm:$0xff] %v152_v40  ;;  %v166_v20 = vadd.f32 %v303_v2, %v100_v9  ;;  %v167_v23 = vadd.f32 %v303_v2, %v101_v12  ;;  %v105_v24 = vmul.f32 %v298_v1, %v39_v16  ;;  %v106_v27 = vmul.f32 %v298_v1, %v40_v19  ;;  %v47_v40 = vld [vmem:[%s817_s0 + $0x120] sm:$0xff] }
  0x11   :  { %217 = vst [vmem:[%s819_s2 + $0x50] sm:$0xff] %v153_v43  ;;  %v168_v26 = vadd.f32 %v303_v2, %v102_v15  ;;  %v169_v29 = vadd.f32 %v303_v2, %v103_v18  ;;  %v107_v30 = vmul.f32 %v298_v1, %v41_v22  ;;  %v170_v32 = vadd.f32 %v303_v2, %v104_v21 }
  0x12   :  { %218 = vst [vmem:[%s819_s2 + $0x58] sm:$0xff] %v154_v46  ;;  %v108_v33 = vmul.f32 %v298_v1, %v42_v25  ;;  %v171_v35 = vadd.f32 %v303_v2, %v105_v24  ;;  %v109_v36 = vmul.f32 %v298_v1, %v43_v28  ;;  %v172_v38 = vadd.f32 %v303_v2, %v106_v27 }
  0x13   :  { %219 = vst [vmem:[%s819_s2 + $0x60] sm:$0xff] %v155_v49  ;;  %v110_v39 = vmul.f32 %v298_v1, %v44_v31  ;;  %v173_v42 = vadd.f32 %v303_v2, %v107_v30  ;;  %v111_v43 = vmul.f32 %v298_v1, %v45_v34  ;;  %v112_v46 = vmul.f32 %v298_v1, %v46_v37 }
  0x14   :  { %220 = vst [vmem:[%s819_s2 + $0x68] sm:$0xff] %v156_v52  ;;  %v174_v45 = vadd.f32 %v303_v2, %v108_v33  ;;  %v140_v48 = vmul.f32 %v298_v1, %v74_v41  ;;  %v175_v49 = vadd.f32 %v303_v2, %v109_v36  ;;  %v113_v50 = vmul.f32 %v298_v1, %v47_v40  ;;  %v67_v41 = vld [vmem:[%s817_s0 + $0x1c0] sm:$0xff] }
  0x15   :  { %221 = vst [vmem:[%s819_s2 + $0x70] sm:$0xff] %v157_v55  ;;  %v176_v52 = vadd.f32 %v303_v2, %v110_v39  ;;  %v114_v53 = vmul.f32 %v298_v1, %v48_v44  ;;  %v177_v56 = vadd.f32 %v303_v2, %v111_v43  ;;  %v115_v57 = vmul.f32 %v298_v1, %v49_v47  ;;  %v68_v44 = vld [vmem:[%s817_s0 + $0x1c8] sm:$0xff]  ;;  %v69_v47 = vld [vmem:[%s817_s0 + $0x1d0] sm:$0xff] }
  0x16   :  { %222 = vst [vmem:[%s819_s2 + $0x78] sm:$0xff] %v158_v58  ;;  %v592_v55 = vadd.f32 %v303_v2, %v140_v48  ;;  %v52_v58 = vld [vmem:[%s817_s0 + $0x148] sm:$0xff]  ;;  %v178_v59 = vadd.f32 %v303_v2, %v112_v46  ;;  %v116_v60 = vmul.f32 %v298_v1, %v50_v51  ;;  %v179_v62 = vadd.f32 %v303_v2, %v113_v50  ;;  %v70_v50 = vld [vmem:[%s817_s0 + $0x1d8] sm:$0xff] }
  0x17   :  { %223 = vst [vmem:[%s819_s2 + $0x80] sm:$0xff] %v159_v61  ;;  %v53_v61 = vld [vmem:[%s817_s0 + $0x150] sm:$0xff]  ;;  %v117_v63 = vmul.f32 %v298_v1, %v51_v54  ;;  %v180_v3 = vadd.f32 %v303_v2, %v114_v53  ;;  %v118_v4 = vmul.f32 %v298_v1, %v52_v58  ;;  %v181_v6 = vadd.f32 %v303_v2, %v115_v57  ;;  %v71_v53 = vld [vmem:[%s817_s0 + $0x1e0] sm:$0xff]  ;;  %v72_v57 = vld [vmem:[%s817_s0 + $0x1e8] sm:$0xff] }
  0x18   :  { %224 = vst [vmem:[%s819_s2 + $0x88] sm:$0xff] %v160_v0  ;;  %v54_v0 = vld [vmem:[%s817_s0 + $0x158] sm:$0xff]  ;;  %v119_v7 = vmul.f32 %v298_v1, %v53_v61  ;;  %v182_v9 = vadd.f32 %v303_v2, %v116_v60  ;;  %v73_v60 = vld [vmem:[%s817_s0 + $0x1f0] sm:$0xff] }
  0x19   :  { %225 = vst [vmem:[%s819_s2 + $0x90] sm:$0xff] %v161_v5  ;;  %v55_v5 = vld [vmem:[%s817_s0 + $0x160] sm:$0xff]  ;;  %v120_v10 = vmul.f32 %v298_v1, %v54_v0  ;;  %v183_v12 = vadd.f32 %v303_v2, %v117_v63  ;;  %v184_v15 = vadd.f32 %v303_v2, %v118_v4  ;;  %v138_v0 = vmul.f32 %v298_v1, %v72_v57 }
  0x1a   :  { %226 = vst [vmem:[%s819_s2 + $0x98] sm:$0xff] %v162_v8  ;;  %v56_v8 = vld [vmem:[%s817_s0 + $0x168] sm:$0xff]  ;;  %v121_v13 = vmul.f32 %v298_v1, %v55_v5  ;;  %v185_v18 = vadd.f32 %v303_v2, %v119_v7  ;;  %v139_v4 = vmul.f32 %v298_v1, %v73_v60 }
  0x1b   :  { %227 = vst [vmem:[%s819_s2 + $0xa0] sm:$0xff] %v163_v11  ;;  %v57_v11 = vld [vmem:[%s817_s0 + $0x170] sm:$0xff]  ;;  %v122_v16 = vmul.f32 %v298_v1, %v56_v8  ;;  %v186_v21 = vadd.f32 %v303_v2, %v120_v10  ;;  %v204_v7 = vadd.f32 %v303_v2, %v138_v0 }
  0x1c   :  { %228 = vst [vmem:[%s819_s2 + $0xa8] sm:$0xff] %v164_v14  ;;  %v58_v14 = vld [vmem:[%s817_s0 + $0x178] sm:$0xff]  ;;  %v123_v19 = vmul.f32 %v298_v1, %v57_v11  ;;  %v187_v24 = vadd.f32 %v303_v2, %v121_v13 }
  0x1d   :  { %229 = vst [vmem:[%s819_s2 + $0xb0] sm:$0xff] %v165_v17  ;;  %v59_v17 = vld [vmem:[%s817_s0 + $0x180] sm:$0xff]  ;;  %v124_v22 = vmul.f32 %v298_v1, %v58_v14  ;;  %v188_v27 = vadd.f32 %v303_v2, %v122_v16 }
  0x1e   :  { %230 = vst [vmem:[%s819_s2 + $0xb8] sm:$0xff] %v166_v20  ;;  %v60_v20 = vld [vmem:[%s817_s0 + $0x188] sm:$0xff]  ;;  %v125_v25 = vmul.f32 %v298_v1, %v59_v17  ;;  %v189_v30 = vadd.f32 %v303_v2, %v123_v19 }
  0x1f   :  { %231 = vst [vmem:[%s819_s2 + $0xc0] sm:$0xff] %v167_v23  ;;  %v61_v23 = vld [vmem:[%s817_s0 + $0x190] sm:$0xff]  ;;  %v126_v28 = vmul.f32 %v298_v1, %v60_v20  ;;  %v190_v33 = vadd.f32 %v303_v2, %v124_v22 }
  0x20   :  { %232 = vst [vmem:[%s819_s2 + $0xc8] sm:$0xff] %v168_v26  ;;  %v62_v26 = vld [vmem:[%s817_s0 + $0x198] sm:$0xff]  ;;  %v127_v31 = vmul.f32 %v298_v1, %v61_v23  ;;  %v191_v36 = vadd.f32 %v303_v2, %v125_v25 }
  0x21   :  { %233 = vst [vmem:[%s819_s2 + $0xd0] sm:$0xff] %v169_v29  ;;  %v63_v29 = vld [vmem:[%s817_s0 + $0x1a0] sm:$0xff]  ;;  %v128_v34 = vmul.f32 %v298_v1, %v62_v26  ;;  %v192_v39 = vadd.f32 %v303_v2, %v126_v28 }
  0x22   :  { %234 = vst [vmem:[%s819_s2 + $0xd8] sm:$0xff] %v170_v32  ;;  %v64_v32 = vld [vmem:[%s817_s0 + $0x1a8] sm:$0xff]  ;;  %v129_v37 = vmul.f32 %v298_v1, %v63_v29 }
  0x23   :  { %235 = vst [vmem:[%s819_s2 + $0xe0] sm:$0xff] %v171_v35  ;;  %v65_v35 = vld [vmem:[%s817_s0 + $0x1b0] sm:$0xff]  ;;  %v130_v40 = vmul.f32 %v298_v1, %v64_v32 }
  0x24   :  { %236 = vst [vmem:[%s819_s2 + $0xe8] sm:$0xff] %v172_v38  ;;  %v66_v38 = vld [vmem:[%s817_s0 + $0x1b8] sm:$0xff]  ;;  %v131_v43 = vmul.f32 %v298_v1, %v65_v35  ;;  %v195_v48 = vadd.f32 %v303_v2, %v129_v37 }
  0x25   :  { %237 = vst [vmem:[%s819_s2 + $0xf0] sm:$0xff] %v173_v42  ;;  %v193_v42 = vadd.f32 %v303_v2, %v127_v31  ;;  %v132_v46 = vmul.f32 %v298_v1, %v66_v38  ;;  %v196_v51 = vadd.f32 %v303_v2, %v130_v40 }
  0x26   :  { %238 = vst [vmem:[%s819_s2 + $0xf8] sm:$0xff] %v174_v45  ;;  %v194_v45 = vadd.f32 %v303_v2, %v128_v34  ;;  %v197_v54 = vadd.f32 %v303_v2, %v131_v43 }
  0x27   :  { %239 = vst [vmem:[%s819_s2 + $0x100] sm:$0xff] %v175_v49  ;;  %v133_v49 = vmul.f32 %v298_v1, %v67_v41  ;;  %v198_v58 = vadd.f32 %v303_v2, %v132_v46 }
  0x28   :  { %240 = vst [vmem:[%s819_s2 + $0x108] sm:$0xff] %v176_v52  ;;  %v134_v52 = vmul.f32 %v298_v1, %v68_v44 }
  0x29   :  { %241 = vst [vmem:[%s819_s2 + $0x110] sm:$0xff] %v177_v56  ;;  %v135_v56 = vmul.f32 %v298_v1, %v69_v47  ;;  %v199_v61 = vadd.f32 %v303_v2, %v133_v49 }
  0x2a   :  { %242 = vst [vmem:[%s819_s2 + $0x118] sm:$0xff] %v178_v59  ;;  %v136_v59 = vmul.f32 %v298_v1, %v70_v50  ;;  %v200_v63 = vadd.f32 %v303_v2, %v134_v52 }
  0x2b   :  { %243 = vst [vmem:[%s819_s2 + $0x120] sm:$0xff] %v179_v62  ;;  %v137_v62 = vmul.f32 %v298_v1, %v71_v53  ;;  %v205_v1 = vadd.f32 %v303_v2, %v139_v4 }
  0x2c   :  { %244 = vst [vmem:[%s819_s2 + $0x128] sm:$0xff] %v180_v3  ;;  %v201_v3 = vadd.f32 %v303_v2, %v135_v56  ;;  %v202_v5 = vadd.f32 %v303_v2, %v136_v59 }
  0x2d   :  { %245 = vst [vmem:[%s819_s2 + $0x130] sm:$0xff] %v181_v6  ;;  %v203_v6 = vadd.f32 %v303_v2, %v137_v62 }
  0x2e   :  { %246 = vst [vmem:[%s819_s2 + $0x138] sm:$0xff] %v182_v9 }
  0x2f   :  { %247 = vst [vmem:[%s819_s2 + $0x140] sm:$0xff] %v183_v12 }
  0x30   :  { %248 = vst [vmem:[%s819_s2 + $0x148] sm:$0xff] %v184_v15 }
  0x31   :  { %249 = vst [vmem:[%s819_s2 + $0x150] sm:$0xff] %v185_v18 }
  0x32   :  { %250 = vst [vmem:[%s819_s2 + $0x158] sm:$0xff] %v186_v21 }
  0x33   :  { %251 = vst [vmem:[%s819_s2 + $0x160] sm:$0xff] %v187_v24 }
  0x34   :  { %252 = vst [vmem:[%s819_s2 + $0x168] sm:$0xff] %v188_v27 }
  0x35   :  { %253 = vst [vmem:[%s819_s2 + $0x170] sm:$0xff] %v189_v30 }
  0x36   :  { %254 = vst [vmem:[%s819_s2 + $0x178] sm:$0xff] %v190_v33 }
  0x37   :  { %255 = vst [vmem:[%s819_s2 + $0x180] sm:$0xff] %v191_v36 }
  0x38   :  { %256 = vst [vmem:[%s819_s2 + $0x188] sm:$0xff] %v192_v39 }
  0x39   :  { %257 = vst [vmem:[%s819_s2 + $0x190] sm:$0xff] %v193_v42 }
  0x3a   :  { %258 = vst [vmem:[%s819_s2 + $0x198] sm:$0xff] %v194_v45 }
  0x3b   :  { %259 = vst [vmem:[%s819_s2 + $0x1a0] sm:$0xff] %v195_v48 }
  0x3c   :  { %260 = vst [vmem:[%s819_s2 + $0x1a8] sm:$0xff] %v196_v51 }
  0x3d   :  { %261 = vst [vmem:[%s819_s2 + $0x1b0] sm:$0xff] %v197_v54 }
  0x3e   :  { %262 = vst [vmem:[%s819_s2 + $0x1b8] sm:$0xff] %v198_v58 }
  0x3f   :  { %263 = vst [vmem:[%s819_s2 + $0x1c0] sm:$0xff] %v199_v61 }
  0x40   :  { %264 = vst [vmem:[%s819_s2 + $0x1c8] sm:$0xff] %v200_v63 }
  0x41   :  { %265 = vst [vmem:[%s819_s2 + $0x1d0] sm:$0xff] %v201_v3 }
  0x42   :  { %266 = vst [vmem:[%s819_s2 + $0x1d8] sm:$0xff] %v202_v5 }
  0x43   :  { %267 = vst [vmem:[%s819_s2 + $0x1e0] sm:$0xff] %v203_v6 }
  0x44   :  { %268 = vst [vmem:[%s819_s2 + $0x1e8] sm:$0xff] %v204_v7 }
  0x45   :  { %269 = vst [vmem:[%s819_s2 + $0x1f0] sm:$0xff] %v205_v1 }
  0x46   :  { %270 = vst [vmem:[%s819_s2 + $0x1f8] sm:$0xff] %v592_v55 }

// kernel: _lambda_.9
= control target key start
LH: loop header
LB: loop body
LE: loop exit
PB: predicated region body
PF: predicated region fallthrough
CT: control target
= control target key end

     0   :  { %s275_s0 = inlined_call_operand.vmem [shape: f32[128,128], index: 0, kind: input, shape index: {}]   ;;  %s276_s1 = inlined_call_operand.vmem [shape: f32[2,128], index: 1, kind: input, shape index: {}]   ;;  %s277_s2 = inlined_call_operand.vmem [shape: bf16[128,128], index: 2, kind: output, shape index: {}]  }
   0x1   :  { %v11_v0 = vld [vmem:[%s275_s0] sm:$0xff]  ;;  %v12_v1 = vld [vmem:[%s275_s0 + $0x8] sm:$0xff]  ;;  %v13_v4 = vld [vmem:[%s275_s0 + $0x10] sm:$0xff] }
   0x2   :  { %v162_v2 = vld [vmem:[%s276_s1] ss:$0 sm:$0xff]  ;;  %v191_v3 = vld [vmem:[%s276_s1 + $0x1] ss:$0 sm:$0xff]  ;;  %v14_v5 = vld [vmem:[%s275_s0 + $0x18] sm:$0xff] }
   0x3   :  { %v15_v6 = vld [vmem:[%s275_s0 + $0x20] sm:$0xff]  ;;  %v29_v7 = vmul.f32 %v162_v2, %v11_v0  ;;  %v30_v8 = vmul.f32 %v162_v2, %v12_v1  ;;  %v31_v9 = vmul.f32 %v162_v2, %v13_v4  ;;  %v32_v10 = vmul.f32 %v162_v2, %v14_v5  ;;  %v16_v11 = vld [vmem:[%s275_s0 + $0x28] sm:$0xff]  ;;  %v17_v12 = vld [vmem:[%s275_s0 + $0x30] sm:$0xff] }
   0x4   :  { %v18_v13 = vld [vmem:[%s275_s0 + $0x38] sm:$0xff]  ;;  %v33_v14 = vmul.f32 %v162_v2, %v15_v6  ;;  %v34_v15 = vmul.f32 %v162_v2, %v16_v11  ;;  %v35_v16 = vmul.f32 %v162_v2, %v17_v12  ;;  %v19_v26 = vld [vmem:[%s275_s0 + $0x40] sm:$0xff]  ;;  %v20_v27 = vld [vmem:[%s275_s0 + $0x48] sm:$0xff] }
   0x5   :  { %v36_v17 = vmul.f32 %v162_v2, %v18_v13  ;;  %v47_v18 = vadd.f32 %v191_v3, %v29_v7  ;;  %v48_v19 = vadd.f32 %v191_v3, %v30_v8  ;;  %v49_v20 = vadd.f32 %v191_v3, %v31_v9  ;;  %v21_v32 = vld [vmem:[%s275_s0 + $0x50] sm:$0xff]  ;;  %v22_v33 = vld [vmem:[%s275_s0 + $0x58] sm:$0xff]  ;;  %v23_v38 = vld [vmem:[%s275_s0 + $0x60] sm:$0xff] }
   0x6   :  { %v50_v21 = vadd.f32 %v191_v3, %v32_v10  ;;  %v51_v22 = vadd.f32 %v191_v3, %v33_v14  ;;  %v52_v23 = vadd.f32 %v191_v3, %v34_v15  ;;  %v53_v24 = vadd.f32 %v191_v3, %v35_v16  ;;  %v24_v39 = vld [vmem:[%s275_s0 + $0x68] sm:$0xff]  ;;  %v25_v44 = vld [vmem:[%s275_s0 + $0x70] sm:$0xff]  ;;  %v26_v45 = vld [vmem:[%s275_s0 + $0x78] sm:$0xff] }
   0x7   :  { %v54_v25 = vadd.f32 %v191_v3, %v36_v17  ;;  %v63_v28 = vmax.f32 %v47_v18, 0.0  ;;  %v64_v29 = vmax.f32 %v48_v19, 0.0  ;;  %v65_v30 = vmax.f32 %v49_v20, 0.0 }
   0x8   :  { %v66_v31 = vmax.f32 %v50_v21, 0.0  ;;  %v67_v34 = vmax.f32 %v51_v22, 0.0  ;;  %v68_v35 = vmax.f32 %v52_v23, 0.0  ;;  %v69_v36 = vmax.f32 %v53_v24, 0.0 }
   0x9   :  { %v70_v37 = vmax.f32 %v54_v25, 0.0  ;;  %v118_v40 = vpack.c.bf16 %v64_v29, %v63_v28  ;;  %v37_v42 = vmul.f32 %v162_v2, %v19_v26  ;;  %v38_v43 = vmul.f32 %v162_v2, %v20_v27 }
   0xa   :  { %v123_v41 = vpack.c.bf16 %v66_v31, %v65_v30  ;;  %v128_v46 = vpack.c.bf16 %v68_v35, %v67_v34  ;;  %v39_v48 = vmul.f32 %v162_v2, %v21_v32  ;;  %v40_v49 = vmul.f32 %v162_v2, %v22_v33 }
   0xb   :  { %v133_v47 = vpack.c.bf16 %v70_v37, %v69_v36  ;;  %119 = vst [vmem:[%s277_s2] sm:$0xff] %v118_v40   ;;  %v55_v50 = vadd.f32 %v191_v3, %v37_v42  ;;  %v56_v51 = vadd.f32 %v191_v3, %v38_v43  ;;  %v41_v52 = vmul.f32 %v162_v2, %v23_v38 }
   0xc   :  { %v42_v53 = vmul.f32 %v162_v2, %v24_v39  ;;  %155 = vst [vmem:[%s277_s2 + $0x8] sm:$0xff] %v123_v41   ;;  %v57_v54 = vadd.f32 %v191_v3, %v39_v48  ;;  %v58_v55 = vadd.f32 %v191_v3, %v40_v49  ;;  %v43_v56 = vmul.f32 %v162_v2, %v25_v44 }
   0xd   :  { %v44_v57 = vmul.f32 %v162_v2, %v26_v45  ;;  %156 = vst [vmem:[%s277_s2 + $0x10] sm:$0xff] %v128_v46   ;;  %v71_v58 = vmax.f32 %v55_v50, 0.0  ;;  %v72_v59 = vmax.f32 %v56_v51, 0.0  ;;  %v59_v60 = vadd.f32 %v191_v3, %v41_v52 }
   0xe   :  { %v60_v61 = vadd.f32 %v191_v3, %v42_v53  ;;  %157 = vst [vmem:[%s277_s2 + $0x18] sm:$0xff] %v133_v47   ;;  %v73_v62 = vmax.f32 %v57_v54, 0.0  ;;  %v74_v63 = vmax.f32 %v58_v55, 0.0  ;;  %v61_v0 = vadd.f32 %v191_v3, %v43_v56 }
   0xf   :  { %v62_v1 = vadd.f32 %v191_v3, %v44_v57  ;;  %v138_v2 = vpack.c.bf16 %v72_v59, %v71_v58  ;;  %v75_v4 = vmax.f32 %v59_v60, 0.0 }
  0x10   :  { %v76_v5 = vmax.f32 %v60_v61, 0.0  ;;  %v143_v6 = vpack.c.bf16 %v74_v63, %v73_v62  ;;  %v77_v7 = vmax.f32 %v61_v0, 0.0 }
  0x11   :  { %v78_v8 = vmax.f32 %v62_v1, 0.0  ;;  %158 = vst [vmem:[%s277_s2 + $0x20] sm:$0xff] %v138_v2  }
  0x12   :  { %v148_v9 = vpack.c.bf16 %v76_v5, %v75_v4  ;;  %159 = vst [vmem:[%s277_s2 + $0x28] sm:$0xff] %v143_v6  }
  0x13   :  { %v153_v10 = vpack.c.bf16 %v78_v8, %v77_v7 }
  0x14   :  { %160 = vst [vmem:[%s277_s2 + $0x30] sm:$0xff] %v148_v9  }
  0x15   :  { %161 = vst [vmem:[%s277_s2 + $0x38] sm:$0xff] %v153_v10  }

// kernel: _lambda_.8
= control target key start
LH: loop header
LB: loop body
LE: loop exit
PB: predicated region body
PF: predicated region fallthrough
CT: control target
= control target key end

     0   :  { %vm412_vm0 = vcmask 523264   ;;  %vm27_vm1 = vcmask 261120   ;;  %v1512_v24 = vmov 0.0   ;;  %vm21_vm2 = vcmask 253952   ;;  %s2620_s1 = inlined_call_operand.vmem [shape: bf16[64,32], index: 1, kind: input, shape index: {}]   ;;  %s2621_s0 = inlined_call_operand.vmem [shape: bf16[512,64], index: 0, kind: input, shape index: {}]   ;;  %s2622_s2 = inlined_call_operand.vmem [shape: f32[512,32], index: 2, kind: output, shape index: {0}]   ;;  %s2623_s3 = inlined_call_operand.vmem [shape: f32[1,32], index: 3, kind: output, shape index: {1}]   ;;  %s2624_s4 = inlined_call_operand.vmem [shape: f32[1,32], index: 4, kind: output, shape index: {2}]  }
   0x1   :  { %v1498_v0 = vld [vmem:[%s2620_s1 + $0x18] sm:$0xff]  ;;  %v1497_v1 = vld [vmem:[%s2620_s1 + $0x10] sm:$0xff]  ;;  %v1496_v2 = vld [vmem:[%s2620_s1 + $0x8] sm:$0xff]  ;;  %28 = vst.msk [vmem:[#allocation2] sm:$0xff] %vm27_vm1, %v1512_v24 }
   0x2   :  { %513 = vmatpush.bf16.msra.mxu0 %v1498_v0  ;;  %1499 = vmatpush.bf16.msra.mxu1 %v1498_v0  ;;  %v1495_v3 = vld [vmem:[%s2620_s1] sm:$0xff]  ;;  %v1464_v6 = vld [vmem:[%s2621_s0 + $0x8] sm:$0xff]  ;;  %v1465_v9 = vld [vmem:[%s2621_s0 + $0x10] sm:$0xff]  ;;  %29 = vst.msk [vmem:[#allocation2 + $0x8] sm:$0xff] %vm27_vm1, %v1512_v24 }
   0x3   :  { %1500 = vmatpush.bf16.msra.mxu2 %v1498_v0  ;;  %1501 = vmatpush.bf16.msra.mxu3 %v1498_v0  ;;  %v1463_v4 = vld [vmem:[%s2621_s0] sm:$0xff]  ;;  %v1472_v7 = vld [vmem:[%s2621_s0 + $0x48] sm:$0xff]  ;;  %v1473_v10 = vld [vmem:[%s2621_s0 + $0x50] sm:$0xff]  ;;  %30 = vst.msk [vmem:[#allocation2 + $0x10] sm:$0xff] %vm27_vm1, %v1512_v24 }
   0x4   :  { %v1471_v5 = vld [vmem:[%s2621_s0 + $0x40] sm:$0xff]  ;;  %v1480_v11 = vld [vmem:[%s2621_s0 + $0x88] sm:$0xff]  ;;  %v1466_v12 = vld [vmem:[%s2621_s0 + $0x18] sm:$0xff]  ;;  %31 = vst.msk [vmem:[#allocation2 + $0x18] sm:$0xff] %vm27_vm1, %v1512_v24 }
   0x5   :  { %v1479_v8 = vld [vmem:[%s2621_s0 + $0x80] sm:$0xff]  ;;  %v1474_v13 = vld [vmem:[%s2621_s0 + $0x58] sm:$0xff]  ;;  %v1481_v14 = vld [vmem:[%s2621_s0 + $0x90] sm:$0xff]  ;;  %32 = vst.msk [vmem:[#allocation2 + $0x20] sm:$0xff] %vm27_vm1, %v1512_v24 }
   0x6   :  { %514 = vmatpush.bf16.msra.mxu0 %v1497_v1  ;;  %1502 = vmatpush.bf16.msra.mxu1 %v1497_v1  ;;  %v1487_v15 = vld [vmem:[%s2621_s0 + $0xc0] sm:$0xff]  ;;  %v1482_v18 = vld [vmem:[%s2621_s0 + $0x98] sm:$0xff]  ;;  %v1488_v19 = vld [vmem:[%s2621_s0 + $0xc8] sm:$0xff]  ;;  %33 = vst.msk [vmem:[#allocation2 + $0x28] sm:$0xff] %vm27_vm1, %v1512_v24 }
   0x7   :  { %1503 = vmatpush.bf16.msra.mxu2 %v1497_v1  ;;  %1504 = vmatpush.bf16.msra.mxu3 %v1497_v1  ;;  %v1467_v16 = vld [vmem:[%s2621_s0 + $0x20] sm:$0xff]  ;;  %v1468_v20 = vld [vmem:[%s2621_s0 + $0x28] sm:$0xff]  ;;  %v1489_v23 = vld [vmem:[%s2621_s0 + $0xd0] sm:$0xff]  ;;  %34 = vst.msk [vmem:[#allocation2 + $0x30] sm:$0xff] %vm27_vm1, %v1512_v24 }
   0x8   :  { %v1475_v17 = vld [vmem:[%s2621_s0 + $0x60] sm:$0xff]  ;;  %v1476_v21 = vld [vmem:[%s2621_s0 + $0x68] sm:$0xff]  ;;  %35 = vst.msk [vmem:[#allocation2 + $0x38] sm:$0xff] %vm27_vm1, %v1512_v24  ;;  %v1469_v25 = vld [vmem:[%s2621_s0 + $0x30] sm:$0xff] }
   0x9   :  { %v1483_v22 = vld [vmem:[%s2621_s0 + $0xa0] sm:$0xff]  ;;  %36 = vst.msk [vmem:[#allocation2 + $0x40] sm:$0xff] %vm27_vm1, %v1512_v24  ;;  %v1477_v26 = vld [vmem:[%s2621_s0 + $0x70] sm:$0xff]  ;;  %v1484_v27 = vld [vmem:[%s2621_s0 + $0xa8] sm:$0xff] }
   0xa   :  { %515 = vmatpush.bf16.msra.mxu0 %v1496_v2  ;;  %1505 = vmatpush.bf16.msra.mxu1 %v1496_v2  ;;  %37 = vst.msk [vmem:[#allocation2 + $0x48] sm:$0xff] %vm27_vm1, %v1512_v24  ;;  %v1490_v28 = vld [vmem:[%s2621_s0 + $0xd8] sm:$0xff]  ;;  %v92_v31 = vld [vmem:[#allocation2] sm:$0xff]  ;;  %v1485_v32 = vld [vmem:[%s2621_s0 + $0xb0] sm:$0xff] }
   0xb   :  { %1506 = vmatpush.bf16.msra.mxu2 %v1496_v2  ;;  %1507 = vmatpush.bf16.msra.mxu3 %v1496_v2  ;;  %38 = vst.msk [vmem:[#allocation2 + $0x50] sm:$0xff] %vm27_vm1, %v1512_v24  ;;  %v1470_v29 = vld [vmem:[%s2621_s0 + $0x38] sm:$0xff]  ;;  %v1491_v33 = vld [vmem:[%s2621_s0 + $0xe0] sm:$0xff]  ;;  %v1492_v41 = vld [vmem:[%s2621_s0 + $0xe8] sm:$0xff] }
   0xc   :  { %39 = vst.msk [vmem:[#allocation2 + $0x58] sm:$0xff] %vm27_vm1, %v1512_v24  ;;  %v1478_v30 = vld [vmem:[%s2621_s0 + $0x78] sm:$0xff]  ;;  %v93_v42 = vld [vmem:[#allocation2 + $0x8] sm:$0xff]  ;;  %v94_v43 = vld [vmem:[#allocation2 + $0x10] sm:$0xff] }
   0xd   :  { %40 = vst.msk [vmem:[#allocation2 + $0x60] sm:$0xff] %vm27_vm1, %v1512_v24  ;;  %v1486_v40 = vld [vmem:[%s2621_s0 + $0xb8] sm:$0xff]  ;;  %v96_v1 = vld [vmem:[#allocation2 + $0x20] sm:$0xff]  ;;  %v1493_v2 = vld [vmem:[%s2621_s0 + $0xf0] sm:$0xff] }
   0xe   :  { %516 = vmatpush.bf16.msra.mxu0 %v1495_v3  ;;  %1508 = vmatpush.bf16.msra.mxu1 %v1495_v3  ;;  %41 = vst.msk [vmem:[#allocation2 + $0x68] sm:$0xff] %vm27_vm1, %v1512_v24  ;;  %v95_v52 = vld [vmem:[#allocation2 + $0x18] sm:$0xff] }
   0xf   :  { %1509 = vmatpush.bf16.msra.mxu2 %v1495_v3  ;;  %1510 = vmatpush.bf16.msra.mxu3 %v1495_v3  ;;  %42 = vst.msk [vmem:[#allocation2 + $0x70] sm:$0xff] %vm27_vm1, %v1512_v24 }
  0x10   :  { %43 = vst.msk [vmem:[#allocation2 + $0x78] sm:$0xff] %vm27_vm1, %v1512_v24 }
  0x11   :  { %1431 = vmatmul.msk.bf16.vlgmr.msra.gmra.mxu0 %vm412_vm0, %v1463_v4  ;;  %1439 = vmatmul.msk.bf16.vlgmr.msra.gmra.mxu1 %vm412_vm0, %v1471_v5  ;;  %44 = vst.msk [vmem:[#allocation2 + $0x80] sm:$0xff] %vm27_vm1, %v1512_v24 }
  0x12   :  { %1447 = vmatmul.msk.bf16.vlgmr.msra.gmra.mxu2 %vm412_vm0, %v1479_v8  ;;  %1455 = vmatmul.msk.bf16.vlgmr.msra.gmra.mxu3 %vm412_vm0, %v1487_v15  ;;  %45 = vst.msk [vmem:[#allocation2 + $0x88] sm:$0xff] %vm27_vm1, %v1512_v24 }
  0x13   :  { %46 = vst.msk [vmem:[#allocation2 + $0x90] sm:$0xff] %vm27_vm1, %v1512_v24 }
  0x14   :  { %47 = vst.msk [vmem:[#allocation2 + $0x98] sm:$0xff] %vm27_vm1, %v1512_v24 }
  0x15   :  { %48 = vst.msk [vmem:[#allocation2 + $0xa0] sm:$0xff] %vm27_vm1, %v1512_v24 }
  0x16   :  { %49 = vst.msk [vmem:[#allocation2 + $0xa8] sm:$0xff] %vm27_vm1, %v1512_v24 }
  0x17   :  { %50 = vst.msk [vmem:[#allocation2 + $0xb0] sm:$0xff] %vm27_vm1, %v1512_v24 }
  0x18   :  { %51 = vst.msk [vmem:[#allocation2 + $0xb8] sm:$0xff] %vm27_vm1, %v1512_v24  ;;  %v108_v45 = vld [vmem:[#allocation2 + $0x80] sm:$0xff] }
  0x19   :  { %52 = vst.msk [vmem:[#allocation2 + $0xc0] sm:$0xff] %vm27_vm1, %v1512_v24  ;;  %v109_v47 = vld [vmem:[#allocation2 + $0x88] sm:$0xff] }
  0x1a   :  { %53 = vst.msk [vmem:[#allocation2 + $0xc8] sm:$0xff] %vm27_vm1, %v1512_v24  ;;  %v110_v53 = vld [vmem:[#allocation2 + $0x90] sm:$0xff] }
  0x1b   :  { %54 = vst.msk [vmem:[#allocation2 + $0xd0] sm:$0xff] %vm27_vm1, %v1512_v24  ;;  %v111_v60 = vld [vmem:[#allocation2 + $0x98] sm:$0xff] }
  0x1c   :  { %55 = vst.msk [vmem:[#allocation2 + $0xd8] sm:$0xff] %vm27_vm1, %v1512_v24 }
  0x1d   :  { %56 = vst.msk [vmem:[#allocation2 + $0xe0] sm:$0xff] %vm27_vm1, %v1512_v24 }
  0x1e   :  { %57 = vst.msk [vmem:[#allocation2 + $0xe8] sm:$0xff] %vm27_vm1, %v1512_v24 }
  0x1f   :  { %58 = vst.msk [vmem:[#allocation2 + $0xf0] sm:$0xff] %vm27_vm1, %v1512_v24 }
  0x20   :  { %59 = vst.msk [vmem:[#allocation2 + $0xf8] sm:$0xff] %vm27_vm1, %v1512_v24 }
  0x21   :  { %1432 = vmatmul.msk.bf16.gmra.mxu0 %vm412_vm0, %v1464_v6  ;;  %1440 = vmatmul.msk.bf16.gmra.mxu1 %vm412_vm0, %v1472_v7  ;;  %60 = vst.msk [vmem:[#allocation2 + $0x100] sm:$0xff] %vm27_vm1, %v1512_v24 }
  0x22   :  { %1448 = vmatmul.msk.bf16.gmra.mxu2 %vm412_vm0, %v1480_v11  ;;  %1456 = vmatmul.msk.bf16.gmra.mxu3 %vm412_vm0, %v1488_v19  ;;  %61 = vst.msk [vmem:[#allocation2 + $0x108] sm:$0xff] %vm27_vm1, %v1512_v24 }
  0x23   :  { %62 = vst.msk [vmem:[#allocation2 + $0x110] sm:$0xff] %vm27_vm1, %v1512_v24 }
  0x24   :  { %63 = vst.msk [vmem:[#allocation2 + $0x118] sm:$0xff] %vm27_vm1, %v1512_v24 }
  0x25   :  { %64 = vst.msk [vmem:[#allocation2 + $0x120] sm:$0xff] %vm27_vm1, %v1512_v24 }
  0x26   :  { %65 = vst.msk [vmem:[#allocation2 + $0x128] sm:$0xff] %vm27_vm1, %v1512_v24 }
  0x27   :  { %66 = vst.msk [vmem:[#allocation2 + $0x130] sm:$0xff] %vm27_vm1, %v1512_v24 }
  0x28   :  { %67 = vst.msk [vmem:[#allocation2 + $0x138] sm:$0xff] %vm27_vm1, %v1512_v24 }
  0x29   :  { %68 = vst.msk [vmem:[#allocation2 + $0x140] sm:$0xff] %vm27_vm1, %v1512_v24 }
  0x2a   :  { %69 = vst.msk [vmem:[#allocation2 + $0x148] sm:$0xff] %vm27_vm1, %v1512_v24 }
  0x2b   :  { %70 = vst.msk [vmem:[#allocation2 + $0x150] sm:$0xff] %vm27_vm1, %v1512_v24 }
  0x2c   :  { %71 = vst.msk [vmem:[#allocation2 + $0x158] sm:$0xff] %vm27_vm1, %v1512_v24 }
  0x2d   :  { %72 = vst.msk [vmem:[#allocation2 + $0x160] sm:$0xff] %vm27_vm1, %v1512_v24 }
  0x2e   :  { %73 = vst.msk [vmem:[#allocation2 + $0x168] sm:$0xff] %vm27_vm1, %v1512_v24 }
  0x2f   :  { %74 = vst.msk [vmem:[#allocation2 + $0x170] sm:$0xff] %vm27_vm1, %v1512_v24 }
  0x30   :  { %75 = vst.msk [vmem:[#allocation2 + $0x178] sm:$0xff] %vm27_vm1, %v1512_v24 }
  0x31   :  { %1433 = vmatmul.msk.bf16.gmra.mxu0 %vm412_vm0, %v1465_v9  ;;  %1441 = vmatmul.msk.bf16.gmra.mxu1 %vm412_vm0, %v1473_v10  ;;  %76 = vst.msk [vmem:[#allocation2 + $0x180] sm:$0xff] %vm27_vm1, %v1512_v24 }
  0x32   :  { %1449 = vmatmul.msk.bf16.gmra.mxu2 %vm412_vm0, %v1481_v14  ;;  %1457 = vmatmul.msk.bf16.gmra.mxu3 %vm412_vm0, %v1489_v23  ;;  %77 = vst.msk [vmem:[#allocation2 + $0x188] sm:$0xff] %vm27_vm1, %v1512_v24 }
  0x33   :  { %78 = vst.msk [vmem:[#allocation2 + $0x190] sm:$0xff] %vm27_vm1, %v1512_v24 }
  0x34   :  { %79 = vst.msk [vmem:[#allocation2 + $0x198] sm:$0xff] %vm27_vm1, %v1512_v24 }
  0x35   :  { %80 = vst.msk [vmem:[#allocation2 + $0x1a0] sm:$0xff] %vm27_vm1, %v1512_v24 }
  0x36   :  { %81 = vst.msk [vmem:[#allocation2 + $0x1a8] sm:$0xff] %vm27_vm1, %v1512_v24 }
  0x37   :  { %82 = vst.msk [vmem:[#allocation2 + $0x1b0] sm:$0xff] %vm27_vm1, %v1512_v24 }
  0x38   :  { %83 = vst.msk [vmem:[#allocation2 + $0x1b8] sm:$0xff] %vm27_vm1, %v1512_v24 }
  0x39   :  { %84 = vst.msk [vmem:[#allocation2 + $0x1c0] sm:$0xff] %vm27_vm1, %v1512_v24 }
  0x3a   :  { %85 = vst.msk [vmem:[#allocation2 + $0x1c8] sm:$0xff] %vm27_vm1, %v1512_v24 }
  0x3b   :  { %86 = vst.msk [vmem:[#allocation2 + $0x1d0] sm:$0xff] %vm27_vm1, %v1512_v24 }
  0x3c   :  { %87 = vst.msk [vmem:[#allocation2 + $0x1d8] sm:$0xff] %vm27_vm1, %v1512_v24 }
  0x3d   :  { %88 = vst.msk [vmem:[#allocation2 + $0x1e0] sm:$0xff] %vm27_vm1, %v1512_v24 }
  0x3e   :  { %89 = vst.msk [vmem:[#allocation2 + $0x1e8] sm:$0xff] %vm27_vm1, %v1512_v24 }
  0x3f   :  { %90 = vst.msk [vmem:[#allocation2 + $0x1f0] sm:$0xff] %vm27_vm1, %v1512_v24 }
  0x40   :  { %91 = vst.msk [vmem:[#allocation2 + $0x1f8] sm:$0xff] %vm27_vm1, %v1512_v24 }
  0x41   :  { %1434 = vmatmul.msk.bf16.gmra.mxu0 %vm412_vm0, %v1466_v12  ;;  %1442 = vmatmul.msk.bf16.gmra.mxu1 %vm412_vm0, %v1474_v13  ;;  %22 = vst.msk [vmem:[%s2623_s3] sm:$0x1] %vm21_vm2, %v1512_v24 }
  0x42   :  { %1450 = vmatmul.msk.bf16.gmra.mxu2 %vm412_vm0, %v1482_v18  ;;  %1458 = vmatmul.msk.bf16.gmra.mxu3 %vm412_vm0, %v1490_v28  ;;  %v112_v28 = vld [vmem:[#allocation2 + $0xa0] sm:$0xff]  ;;  %23 = vst.msk [vmem:[%s2624_s4] sm:$0x1] %vm21_vm2, %v1512_v24 }
  0x51   :  { %1435 = vmatmul.msk.bf16.gmra.mxu0 %vm412_vm0, %v1467_v16  ;;  %1443 = vmatmul.msk.bf16.gmra.mxu1 %vm412_vm0, %v1475_v17 }
  0x52   :  { %1451 = vmatmul.msk.bf16.gmra.mxu2 %vm412_vm0, %v1483_v22  ;;  %1459 = vmatmul.msk.bf16.gmra.mxu3 %vm412_vm0, %v1491_v33 }
  0x61   :  { %1436 = vmatmul.msk.bf16.gmra.mxu0 %vm412_vm0, %v1468_v20  ;;  %1444 = vmatmul.msk.bf16.gmra.mxu1 %vm412_vm0, %v1476_v21 }
  0x62   :  { %1452 = vmatmul.msk.bf16.gmra.mxu2 %vm412_vm0, %v1484_v27  ;;  %1460 = vmatmul.msk.bf16.gmra.mxu3 %vm412_vm0, %v1492_v41  ;;  %v97_v27 = vld [vmem:[#allocation2 + $0x28] sm:$0xff] }
  0x71   :  { %1437 = vmatmul.msk.bf16.gmra.mxu0 %vm412_vm0, %v1469_v25  ;;  %1445 = vmatmul.msk.bf16.gmra.mxu1 %vm412_vm0, %v1477_v26 }
  0x72   :  { %1453 = vmatmul.msk.bf16.gmra.mxu2 %vm412_vm0, %v1485_v32  ;;  %1461 = vmatmul.msk.bf16.gmra.mxu3 %vm412_vm0, %v1493_v2  ;;  %v115_v2 = vld [vmem:[#allocation2 + $0xb8] sm:$0xff] }
  0x81   :  { %1438 = vmatmul.msk.bf16.gmra.mxu0 %vm412_vm0, %v1470_v29  ;;  %1446 = vmatmul.msk.bf16.gmra.mxu1 %vm412_vm0, %v1478_v30  ;;  %v124_v29 = vld [vmem:[#allocation2 + $0x100] sm:$0xff] }
  0x82   :  { %1454 = vmatmul.msk.bf16.gmra.mxu2 %vm412_vm0, %v1486_v40 }
  0x8e   :  { %v518_v34 = vpop.f32.mrf.mxu0  ;;  %v558_v36 = vpop.f32.mrf.mxu1 }
  0x8f   :  { %v678_v35 = vadd.f32 %v518_v34, %v92_v31  ;;  %v694_v50 = vadd.f32 %v558_v36, %v108_v45 }
  0x91   :  { %743 = vst.msk [vmem:[#allocation2] sm:$0xff] %vm27_vm1, %v678_v35  ;;  %v113_v35 = vld [vmem:[#allocation2 + $0xa8] sm:$0xff] }
  0x92   :  { %759 = vst.msk [vmem:[#allocation2 + $0x80] sm:$0xff] %vm27_vm1, %v694_v50 }
  0x95   :  { %v598_v22 = vpop.f32.mrf.mxu2 }
  0x96   :  { %v520_v37 = vpop.f32.mrf.mxu0  ;;  %v560_v39 = vpop.f32.mrf.mxu1  ;;  %v710_v31 = vadd.f32 %v598_v22, %v124_v29 }
  0x97   :  { %v679_v46 = vadd.f32 %v520_v37, %v93_v42  ;;  %v695_v51 = vadd.f32 %v560_v39, %v109_v47  ;;  %v125_v37 = vld [vmem:[#allocation2 + $0x108] sm:$0xff]  ;;  %v1494_v47 = vld [vmem:[%s2621_s0 + $0xf8] sm:$0xff] }
  0x98   :  { %v810_v38 = vld [vmem:[#allocation2] sm:$0xff]  ;;  %775 = vst.msk [vmem:[#allocation2 + $0x100] sm:$0xff] %vm27_vm1, %v710_v31  ;;  %1462 = vmatmul.msk.bf16.gmra.mxu3 %vm412_vm0, %v1494_v47 }
  0x99   :  { %874 = vst.msk [vmem:[%s2622_s2] sm:$0xff] %vm27_vm1, %v810_v38  ;;  %v1076_v58 = vmul.f32 %v810_v38, %v810_v38  ;;  %v939_v61 = vsel %vm27_vm1, %v810_v38, 0.0  ;;  %v1823_v6 = vld [vmem:[#allocation2 + $0x80] sm:$0xff] }
  0x9a   :  { %744 = vst.msk [vmem:[#allocation2 + $0x8] sm:$0xff] %vm27_vm1, %v679_v46  ;;  %v98_v46 = vld [vmem:[#allocation2 + $0x30] sm:$0xff] }
  0x9b   :  { %760 = vst.msk [vmem:[#allocation2 + $0x88] sm:$0xff] %vm27_vm1, %v695_v51  ;;  %v1140_v7 = vsel %vm27_vm1, %v1076_v58, 0.0 }
  0x9c   :  { %890 = vst.msk [vmem:[%s2622_s2 + $0x80] sm:$0xff] %vm27_vm1, %v1823_v6 }
  0x9d   :  { %v600_v38 = vpop.f32.mrf.mxu2 }
  0x9e   :  { %v523_v44 = vpop.f32.mrf.mxu0  ;;  %v563_v49 = vpop.f32.mrf.mxu1 }
  0x9f   :  { %v680_v48 = vadd.f32 %v523_v44, %v94_v43  ;;  %v696_v54 = vadd.f32 %v563_v49, %v110_v53  ;;  %v711_v43 = vadd.f32 %v600_v38, %v125_v37 }
  0xa1   :  { %745 = vst.msk [vmem:[#allocation2 + $0x10] sm:$0xff] %vm27_vm1, %v680_v48  ;;  %v811_v59 = vld [vmem:[#allocation2 + $0x8] sm:$0xff] }
  0xa2   :  { %761 = vst.msk [vmem:[#allocation2 + $0x90] sm:$0xff] %vm27_vm1, %v696_v54  ;;  %v940_v62 = vsel %vm27_vm1, %v811_v59, 0.0  ;;  %v1077_v63 = vmul.f32 %v811_v59, %v811_v59  ;;  %v1832_v10 = vld [vmem:[#allocation2 + $0x88] sm:$0xff] }
  0xa3   :  { %875 = vst.msk [vmem:[%s2622_s2 + $0x8] sm:$0xff] %vm27_vm1, %v811_v59  ;;  %v941_v3 = vadd.f32 %v940_v62, %v939_v61  ;;  %v114_v59 = vld [vmem:[#allocation2 + $0xb0] sm:$0xff] }
  0xa4   :  { %v1141_v8 = vsel %vm27_vm1, %v1077_v63, 0.0  ;;  %891 = vst.msk [vmem:[%s2622_s2 + $0x88] sm:$0xff] %vm27_vm1, %v1832_v10 }
  0xa5   :  { %v1142_v12 = vadd.f32 %v1141_v8, %v1140_v7  ;;  %776 = vst.msk [vmem:[#allocation2 + $0x108] sm:$0xff] %vm27_vm1, %v711_v43  ;;  %v102_v43 = vld [vmem:[#allocation2 + $0x50] sm:$0xff] }
  0xa6   :  { %v525_v55 = vpop.f32.mrf.mxu0  ;;  %v565_v57 = vpop.f32.mrf.mxu1 }
  0xa7   :  { %v681_v56 = vadd.f32 %v525_v55, %v95_v52  ;;  %v697_v11 = vadd.f32 %v565_v57, %v111_v60  ;;  %v1889_v52 = vld [vmem:[#allocation2 + $0x100] sm:$0xff]  ;;  %v603_v55 = vpop.f32.mrf.mxu2  ;;  %v126_v60 = vld [vmem:[#allocation2 + $0x110] sm:$0xff] }
  0xa8   :  { %v812_v0 = vld [vmem:[#allocation2 + $0x10] sm:$0xff]  ;;  %906 = vst.msk [vmem:[%s2622_s2 + $0x100] sm:$0xff] %vm27_vm1, %v1889_v52  ;;  %v712_v62 = vadd.f32 %v603_v55, %v126_v60  ;;  %v103_v60 = vld [vmem:[#allocation2 + $0x58] sm:$0xff] }
  0xa9   :  { %746 = vst.msk [vmem:[#allocation2 + $0x18] sm:$0xff] %vm27_vm1, %v681_v56  ;;  %v942_v4 = vsel %vm27_vm1, %v812_v0, 0.0  ;;  %v1078_v5 = vmul.f32 %v812_v0, %v812_v0  ;;  %v1841_v16 = vld [vmem:[#allocation2 + $0x90] sm:$0xff]  ;;  %v99_v56 = vld [vmem:[#allocation2 + $0x38] sm:$0xff] }
  0xaa   :  { %876 = vst.msk [vmem:[%s2622_s2 + $0x10] sm:$0xff] %vm27_vm1, %v812_v0  ;;  %v943_v13 = vadd.f32 %v942_v4, %v941_v3  ;;  %v127_v4 = vld [vmem:[#allocation2 + $0x118] sm:$0xff] }
  0xab   :  { %v1143_v14 = vsel %vm27_vm1, %v1078_v5, 0.0  ;;  %892 = vst.msk [vmem:[%s2622_s2 + $0x90] sm:$0xff] %vm27_vm1, %v1841_v16 }
  0xac   :  { %v1144_v18 = vadd.f32 %v1143_v14, %v1142_v12  ;;  %762 = vst.msk [vmem:[#allocation2 + $0x98] sm:$0xff] %vm27_vm1, %v697_v11  ;;  %v1911_v58 = vld [vmem:[#allocation2 + $0x108] sm:$0xff] }
  0xad   :  { %907 = vst.msk [vmem:[%s2622_s2 + $0x108] sm:$0xff] %vm27_vm1, %v1911_v58 }
  0xae   :  { %v528_v9 = vpop.f32.mrf.mxu0  ;;  %v568_v21 = vpop.f32.mrf.mxu1  ;;  %777 = vst.msk [vmem:[#allocation2 + $0x110] sm:$0xff] %vm27_vm1, %v712_v62 }
  0xaf   :  { %v682_v15 = vadd.f32 %v528_v9, %v96_v1  ;;  %v698_v30 = vadd.f32 %v568_v21, %v112_v28  ;;  %v605_v5 = vpop.f32.mrf.mxu2  ;;  %v100_v9 = vld [vmem:[#allocation2 + $0x40] sm:$0xff] }
  0xb0   :  { %v813_v17 = vld [vmem:[#allocation2 + $0x18] sm:$0xff]  ;;  %v713_v8 = vadd.f32 %v605_v5, %v127_v4  ;;  %v140_v28 = vld [vmem:[#allocation2 + $0x180] sm:$0xff]  ;;  %v142_v4 = vld [vmem:[#allocation2 + $0x190] sm:$0xff] }
  0xb1   :  { %877 = vst.msk [vmem:[%s2622_s2 + $0x18] sm:$0xff] %vm27_vm1, %v813_v17  ;;  %v944_v19 = vsel %vm27_vm1, %v813_v17, 0.0  ;;  %v1079_v20 = vmul.f32 %v813_v17, %v813_v17 }
  0xb2   :  { %v945_v23 = vadd.f32 %v944_v19, %v943_v13  ;;  %747 = vst.msk [vmem:[#allocation2 + $0x20] sm:$0xff] %vm27_vm1, %v682_v15  ;;  %v638_v19 = vpop.f32.mrf.mxu3 }
  0xb3   :  { %v1145_v25 = vsel %vm27_vm1, %v1079_v20, 0.0  ;;  %763 = vst.msk [vmem:[#allocation2 + $0xa0] sm:$0xff] %vm27_vm1, %v698_v30  ;;  %v1864_v41 = vld [vmem:[#allocation2 + $0x98] sm:$0xff]  ;;  %v101_v20 = vld [vmem:[#allocation2 + $0x48] sm:$0xff]  ;;  %v726_v31 = vadd.f32 %v638_v19, %v140_v28  ;;  %v104_v28 = vld [vmem:[#allocation2 + $0x60] sm:$0xff] }
  0xb4   :  { %v1146_v26 = vadd.f32 %v1145_v25, %v1144_v18  ;;  %893 = vst.msk [vmem:[%s2622_s2 + $0x98] sm:$0xff] %vm27_vm1, %v1864_v41  ;;  %v128_v25 = vld [vmem:[#allocation2 + $0x120] sm:$0xff] }
  0xb5   :  { %778 = vst.msk [vmem:[#allocation2 + $0x118] sm:$0xff] %vm27_vm1, %v713_v8  ;;  %v1937_v14 = vld [vmem:[#allocation2 + $0x110] sm:$0xff] }
  0xb6   :  { %v530_v32 = vpop.f32.mrf.mxu0  ;;  %v570_v36 = vpop.f32.mrf.mxu1  ;;  %908 = vst.msk [vmem:[%s2622_s2 + $0x110] sm:$0xff] %vm27_vm1, %v1937_v14 }
  0xb7   :  { %v683_v33 = vadd.f32 %v530_v32, %v97_v27  ;;  %v699_v42 = vadd.f32 %v570_v36, %v113_v35  ;;  %v608_v18 = vpop.f32.mrf.mxu2  ;;  %v129_v35 = vld [vmem:[#allocation2 + $0x128] sm:$0xff]  ;;  %791 = vst.msk [vmem:[#allocation2 + $0x180] sm:$0xff] %vm27_vm1, %v726_v31 }
  0xb8   :  { %v714_v27 = vadd.f32 %v608_v18, %v128_v25  ;;  %v131_v18 = vld [vmem:[#allocation2 + $0x138] sm:$0xff] }
  0xb9   :  { %v814_v34 = vld [vmem:[#allocation2 + $0x20] sm:$0xff]  ;;  %748 = vst.msk [vmem:[#allocation2 + $0x28] sm:$0xff] %vm27_vm1, %v683_v33  ;;  %v117_v33 = vld [vmem:[#allocation2 + $0xc8] sm:$0xff]  ;;  %v143_v25 = vld [vmem:[#allocation2 + $0x198] sm:$0xff] }
  0xba   :  { %878 = vst.msk [vmem:[%s2622_s2 + $0x20] sm:$0xff] %vm27_vm1, %v814_v34  ;;  %v946_v39 = vsel %vm27_vm1, %v814_v34, 0.0  ;;  %v1080_v40 = vmul.f32 %v814_v34, %v814_v34  ;;  %v1881_v50 = vld [vmem:[#allocation2 + $0xa0] sm:$0xff] }
  0xbb   :  { %v1866_v44 = vadd.f32 %v946_v39, %v945_v23  ;;  %764 = vst.msk [vmem:[#allocation2 + $0xa8] sm:$0xff] %vm27_vm1, %v699_v42  ;;  %v116_v23 = vld [vmem:[#allocation2 + $0xc0] sm:$0xff]  ;;  %v141_v39 = vld [vmem:[#allocation2 + $0x188] sm:$0xff] }
  0xbc   :  { %v1147_v45 = vsel %vm27_vm1, %v1080_v40, 0.0  ;;  %894 = vst.msk [vmem:[%s2622_s2 + $0xa0] sm:$0xff] %vm27_vm1, %v1881_v50  ;;  %v1959_v22 = vld [vmem:[#allocation2 + $0x118] sm:$0xff]  ;;  %v640_v40 = vpop.f32.mrf.mxu3 }
  0xbd   :  { %v1878_v48 = vadd.f32 %v1147_v45, %v1146_v26  ;;  %909 = vst.msk [vmem:[%s2622_s2 + $0x118] sm:$0xff] %vm27_vm1, %v1959_v22  ;;  %v727_v42 = vadd.f32 %v640_v40, %v141_v39  ;;  %v105_v40 = vld [vmem:[#allocation2 + $0x68] sm:$0xff] }
  0xbe   :  { %v533_v49 = vpop.f32.mrf.mxu0  ;;  %v573_v54 = vpop.f32.mrf.mxu1  ;;  %779 = vst.msk [vmem:[#allocation2 + $0x120] sm:$0xff] %vm27_vm1, %v714_v27 }
  0xbf   :  { %v684_v51 = vadd.f32 %v533_v49, %v98_v46  ;;  %v700_v61 = vadd.f32 %v573_v54, %v114_v59  ;;  %v610_v36 = vpop.f32.mrf.mxu2  ;;  %792 = vst.msk [vmem:[#allocation2 + $0x188] sm:$0xff] %vm27_vm1, %v727_v42 }
  0xc0   :  { %v1891_v53 = vld [vmem:[#allocation2 + $0x28] sm:$0xff]  ;;  %v715_v38 = vadd.f32 %v610_v36, %v129_v35 }
  0xc1   :  { %879 = vst.msk [vmem:[%s2622_s2 + $0x28] sm:$0xff] %vm27_vm1, %v1891_v53 }
  0xc2   :  { %749 = vst.msk [vmem:[#allocation2 + $0x30] sm:$0xff] %vm27_vm1, %v684_v51  ;;  %v1904_v57 = vld [vmem:[#allocation2 + $0xa8] sm:$0xff] }
  0xc3   :  { %895 = vst.msk [vmem:[%s2622_s2 + $0xa8] sm:$0xff] %vm27_vm1, %v1904_v57 }
  0xc4   :  { %765 = vst.msk [vmem:[#allocation2 + $0xb0] sm:$0xff] %vm27_vm1, %v700_v61  ;;  %v643_v59 = vpop.f32.mrf.mxu3 }
  0xc5   :  { %780 = vst.msk [vmem:[#allocation2 + $0x128] sm:$0xff] %vm27_vm1, %v715_v38  ;;  %v1987_v49 = vld [vmem:[#allocation2 + $0x120] sm:$0xff] }
  0xc6   :  { %v535_v63 = vpop.f32.mrf.mxu0  ;;  %v575_v3 = vpop.f32.mrf.mxu1  ;;  %910 = vst.msk [vmem:[%s2622_s2 + $0x120] sm:$0xff] %vm27_vm1, %v1987_v49 }
  0xc7   :  { %v685_v0 = vadd.f32 %v535_v63, %v99_v56  ;;  %v701_v7 = vadd.f32 %v575_v3, %v115_v2  ;;  %v613_v55 = vpop.f32.mrf.mxu2  ;;  %v2002_v56 = vld [vmem:[#allocation2 + $0x180] sm:$0xff]  ;;  %v118_v63 = vld [vmem:[#allocation2 + $0xd0] sm:$0xff]  ;;  %v2023_v2 = vld [vmem:[#allocation2 + $0x188] sm:$0xff] }
  0xc8   :  { %922 = vst.msk [vmem:[%s2622_s2 + $0x180] sm:$0xff] %vm27_vm1, %v2002_v56 }
  0xc9   :  { %v1920_v1 = vld [vmem:[#allocation2 + $0x30] sm:$0xff]  ;;  %750 = vst.msk [vmem:[#allocation2 + $0x38] sm:$0xff] %vm27_vm1, %v685_v0 }
  0xca   :  { %880 = vst.msk [vmem:[%s2622_s2 + $0x30] sm:$0xff] %vm27_vm1, %v1920_v1  ;;  %v130_v0 = vld [vmem:[#allocation2 + $0x130] sm:$0xff] }
  0xcb   :  { %766 = vst.msk [vmem:[#allocation2 + $0xb8] sm:$0xff] %vm27_vm1, %v701_v7  ;;  %v1930_v12 = vld [vmem:[#allocation2 + $0xb0] sm:$0xff]  ;;  %v716_v7 = vadd.f32 %v613_v55, %v130_v0  ;;  %v1082_v55 = vmul.f32 %v1920_v1, %v1920_v1 }
  0xcc   :  { %896 = vst.msk [vmem:[%s2622_s2 + $0xb0] sm:$0xff] %vm27_vm1, %v1930_v12  ;;  %v2016_v62 = vld [vmem:[#allocation2 + $0x128] sm:$0xff] }
  0xcd   :  { %911 = vst.msk [vmem:[%s2622_s2 + $0x128] sm:$0xff] %vm27_vm1, %v2016_v62 }
  0xce   :  { %v538_v11 = vpop.f32.mrf.mxu0  ;;  %v578_v17 = vpop.f32.mrf.mxu1  ;;  %923 = vst.msk [vmem:[%s2622_s2 + $0x188] sm:$0xff] %vm27_vm1, %v2023_v2 }
  0xcf   :  { %v686_v13 = vadd.f32 %v538_v11, %v100_v9  ;;  %v702_v26 = vadd.f32 %v578_v17, %v116_v23  ;;  %v728_v9 = vadd.f32 %v643_v59, %v142_v4  ;;  %781 = vst.msk [vmem:[#allocation2 + $0x130] sm:$0xff] %vm27_vm1, %v716_v7  ;;  %v615_v19 = vpop.f32.mrf.mxu2  ;;  %v948_v4 = vsel %vm27_vm1, %v1891_v53, 0.0 }
  0xd0   :  { %v1939_v15 = vld [vmem:[#allocation2 + $0x38] sm:$0xff]  ;;  %v717_v23 = vadd.f32 %v615_v19, %v131_v18 }
  0xd1   :  { %881 = vst.msk [vmem:[%s2622_s2 + $0x38] sm:$0xff] %vm27_vm1, %v1939_v15  ;;  %v1083_v19 = vmul.f32 %v1939_v15, %v1939_v15 }
  0xd2   :  { %751 = vst.msk [vmem:[#allocation2 + $0x40] sm:$0xff] %vm27_vm1, %v686_v13  ;;  %v1952_v21 = vld [vmem:[#allocation2 + $0xb8] sm:$0xff] }
  0xd3   :  { %897 = vst.msk [vmem:[%s2622_s2 + $0xb8] sm:$0xff] %vm27_vm1, %v1952_v21  ;;  %v119_v13 = vld [vmem:[#allocation2 + $0xd8] sm:$0xff] }
  0xd4   :  { %767 = vst.msk [vmem:[#allocation2 + $0xc0] sm:$0xff] %vm27_vm1, %v702_v26  ;;  %v645_v26 = vpop.f32.mrf.mxu3 }
  0xd5   :  { %793 = vst.msk [vmem:[#allocation2 + $0x190] sm:$0xff] %vm27_vm1, %v728_v9  ;;  %v729_v27 = vadd.f32 %v645_v26, %v143_v25  ;;  %v121_v9 = vld [vmem:[#allocation2 + $0xe8] sm:$0xff] }
  0xd6   :  { %v540_v29 = vpop.f32.mrf.mxu0  ;;  %v580_v34 = vpop.f32.mrf.mxu1  ;;  %782 = vst.msk [vmem:[#allocation2 + $0x138] sm:$0xff] %vm27_vm1, %v717_v23  ;;  %v145_v26 = vld [vmem:[#allocation2 + $0x1a8] sm:$0xff] }
  0xd7   :  { %v687_v30 = vadd.f32 %v540_v29, %v101_v20  ;;  %v703_v37 = vadd.f32 %v580_v34, %v117_v33  ;;  %794 = vst.msk [vmem:[#allocation2 + $0x198] sm:$0xff] %vm27_vm1, %v729_v27  ;;  %v2051_v33 = vld [vmem:[#allocation2 + $0x130] sm:$0xff]  ;;  %v618_v36 = vpop.f32.mrf.mxu2  ;;  %v950_v27 = vsel %vm27_vm1, %v1920_v1, 0.0 }
  0xd8   :  { %912 = vst.msk [vmem:[%s2622_s2 + $0x130] sm:$0xff] %vm27_vm1, %v2051_v33 }
  0xd9   :  { %v1968_v32 = vld [vmem:[#allocation2 + $0x40] sm:$0xff]  ;;  %752 = vst.msk [vmem:[#allocation2 + $0x48] sm:$0xff] %vm27_vm1, %v687_v30 }
  0xda   :  { %882 = vst.msk [vmem:[%s2622_s2 + $0x40] sm:$0xff] %vm27_vm1, %v1968_v32 }
  0xdb   :  { %768 = vst.msk [vmem:[#allocation2 + $0xc8] sm:$0xff] %vm27_vm1, %v703_v37  ;;  %v1979_v46 = vld [vmem:[#allocation2 + $0xc0] sm:$0xff] }
  0xdc   :  { %898 = vst.msk [vmem:[%s2622_s2 + $0xc0] sm:$0xff] %vm27_vm1, %v1979_v46  ;;  %v2066_v37 = vld [vmem:[#allocation2 + $0x190] sm:$0xff]  ;;  %v648_v38 = vpop.f32.mrf.mxu3 }
  0xdd   :  { %924 = vst.msk [vmem:[%s2622_s2 + $0x190] sm:$0xff] %vm27_vm1, %v2066_v37  ;;  %v2080_v42 = vld [vmem:[#allocation2 + $0x138] sm:$0xff] }
  0xde   :  { %v543_v45 = vpop.f32.mrf.mxu0  ;;  %v583_v54 = vpop.f32.mrf.mxu1  ;;  %913 = vst.msk [vmem:[%s2622_s2 + $0x138] sm:$0xff] %vm27_vm1, %v2080_v42 }
  0xdf   :  { %v688_v47 = vadd.f32 %v543_v45, %v102_v43  ;;  %v704_v3 = vadd.f32 %v583_v54, %v118_v63  ;;  %v2087_v43 = vld [vmem:[#allocation2 + $0x198] sm:$0xff]  ;;  %v132_v63 = vld [vmem:[#allocation2 + $0x140] sm:$0xff] }
  0xe0   :  { %v1989_v51 = vld [vmem:[#allocation2 + $0x48] sm:$0xff]  ;;  %925 = vst.msk [vmem:[%s2622_s2 + $0x198] sm:$0xff] %vm27_vm1, %v2087_v43  ;;  %v718_v7 = vadd.f32 %v618_v36, %v132_v63  ;;  %v952_v36 = vsel %vm27_vm1, %v1939_v15, 0.0 }
  0xe1   :  { %883 = vst.msk [vmem:[%s2622_s2 + $0x48] sm:$0xff] %vm27_vm1, %v1989_v51  ;;  %v1085_v1 = vmul.f32 %v1989_v51, %v1989_v51 }
  0xe2   :  { %753 = vst.msk [vmem:[#allocation2 + $0x50] sm:$0xff] %vm27_vm1, %v688_v47  ;;  %v2009_v61 = vld [vmem:[#allocation2 + $0xc8] sm:$0xff]  ;;  %v1081_v47 = vmul.f32 %v1891_v53, %v1891_v53  ;;  %v106_v53 = vld [vmem:[#allocation2 + $0x70] sm:$0xff] }
  0xe3   :  { %899 = vst.msk [vmem:[%s2622_s2 + $0xc8] sm:$0xff] %vm27_vm1, %v2009_v61 }
  0xe4   :  { %769 = vst.msk [vmem:[#allocation2 + $0xd0] sm:$0xff] %vm27_vm1, %v704_v3  ;;  %v620_v3 = vpop.f32.mrf.mxu2  ;;  %v1149_v18 = vsel %vm27_vm1, %v1081_v47, 0.0 }
  0xe5   :  { %783 = vst.msk [vmem:[#allocation2 + $0x140] sm:$0xff] %vm27_vm1, %v718_v7  ;;  %v1157_v7 = vsel %vm27_vm1, %v1085_v1, 0.0 }
  0xe6   :  { %v545_v5 = vpop.f32.mrf.mxu0  ;;  %v585_v17 = vpop.f32.mrf.mxu1 }
  0xe7   :  { %v689_v8 = vadd.f32 %v545_v5, %v103_v60  ;;  %v705_v20 = vadd.f32 %v585_v17, %v119_v13  ;;  %v120_v60 = vld [vmem:[#allocation2 + $0xe0] sm:$0xff]  ;;  %v133_v13 = vld [vmem:[#allocation2 + $0x148] sm:$0xff]  ;;  %v650_v17 = vpop.f32.mrf.mxu3 }
  0xe8   :  { %v719_v25 = vadd.f32 %v620_v3, %v133_v13  ;;  %v731_v47 = vadd.f32 %v650_v17, %v145_v26 }
  0xe9   :  { %v2032_v11 = vld [vmem:[#allocation2 + $0x50] sm:$0xff]  ;;  %754 = vst.msk [vmem:[#allocation2 + $0x58] sm:$0xff] %vm27_vm1, %v689_v8  ;;  %v144_v8 = vld [vmem:[#allocation2 + $0x1a0] sm:$0xff] }
  0xea   :  { %884 = vst.msk [vmem:[%s2622_s2 + $0x50] sm:$0xff] %vm27_vm1, %v2032_v11 }
  0xeb   :  { %770 = vst.msk [vmem:[#allocation2 + $0xd8] sm:$0xff] %vm27_vm1, %v705_v20  ;;  %v2043_v30 = vld [vmem:[#allocation2 + $0xd0] sm:$0xff]  ;;  %v730_v20 = vadd.f32 %v648_v38, %v144_v8 }
  0xec   :  { %900 = vst.msk [vmem:[%s2622_s2 + $0xd0] sm:$0xff] %vm27_vm1, %v2043_v30 }
  0xed   :  { %795 = vst.msk [vmem:[#allocation2 + $0x1a0] sm:$0xff] %vm27_vm1, %v730_v20 }
  0xee   :  { %v548_v29 = vpop.f32.mrf.mxu0  ;;  %v588_v35 = vpop.f32.mrf.mxu1  ;;  %784 = vst.msk [vmem:[#allocation2 + $0x148] sm:$0xff] %vm27_vm1, %v719_v25 }
  0xef   :  { %v690_v31 = vadd.f32 %v548_v29, %v104_v28  ;;  %v706_v5 = vadd.f32 %v588_v35, %v120_v60  ;;  %v1151_v28 = vsel %vm27_vm1, %v1082_v55, 0.0  ;;  %v1084_v29 = vmul.f32 %v1968_v32, %v1968_v32  ;;  %796 = vst.msk [vmem:[#allocation2 + $0x1a8] sm:$0xff] %vm27_vm1, %v731_v47  ;;  %v134_v47 = vld [vmem:[#allocation2 + $0x150] sm:$0xff] }
  0xf0   :  { %v2053_v34 = vld [vmem:[#allocation2 + $0x58] sm:$0xff]  ;;  %v1150_v35 = vadd.f32 %v1149_v18, %v1878_v48  ;;  %v954_v48 = vsel %vm27_vm1, %v1968_v32, 0.0  ;;  %v1086_v60 = vmul.f32 %v2032_v11, %v2032_v11  ;;  %v956_v32 = vsel %vm27_vm1, %v1989_v51, 0.0 }
  0xf1   :  { %885 = vst.msk [vmem:[%s2622_s2 + $0x58] sm:$0xff] %vm27_vm1, %v2053_v34  ;;  %v1155_v15 = vsel %vm27_vm1, %v1084_v29, 0.0  ;;  %v1087_v8 = vmul.f32 %v2053_v34, %v2053_v34  ;;  %v107_v18 = vld [vmem:[#allocation2 + $0x78] sm:$0xff]  ;;  %v958_v51 = vsel %vm27_vm1, %v2032_v11, 0.0 }
  0xf2   :  { %755 = vst.msk [vmem:[#allocation2 + $0x60] sm:$0xff] %vm27_vm1, %v690_v31  ;;  %v2073_v39 = vld [vmem:[#allocation2 + $0xd8] sm:$0xff]  ;;  %v949_v31 = vadd.f32 %v948_v4, %v1866_v44  ;;  %v1152_v55 = vadd.f32 %v1151_v28, %v1150_v35  ;;  %v1159_v20 = vsel %vm27_vm1, %v1086_v60, 0.0 }
  0xf3   :  { %901 = vst.msk [vmem:[%s2622_s2 + $0xd8] sm:$0xff] %vm27_vm1, %v2073_v39  ;;  %v1161_v28 = vsel %vm27_vm1, %v1087_v8, 0.0 }
  0xf4   :  { %771 = vst.msk [vmem:[#allocation2 + $0xe0] sm:$0xff] %vm27_vm1, %v706_v5  ;;  %v653_v5 = vpop.f32.mrf.mxu3 }
  0xf5   :  { %v2180_v35 = vld [vmem:[#allocation2 + $0x148] sm:$0xff] }
  0xf6   :  { %v550_v45 = vpop.f32.mrf.mxu0  ;;  %v590_v0 = vpop.f32.mrf.mxu1  ;;  %915 = vst.msk [vmem:[%s2622_s2 + $0x148] sm:$0xff] %vm27_vm1, %v2180_v35  ;;  %v2194_v60 = vld [vmem:[#allocation2 + $0x1a8] sm:$0xff] }
  0xf7   :  { %v691_v54 = vadd.f32 %v550_v45, %v105_v40  ;;  %v707_v23 = vadd.f32 %v590_v0, %v121_v9  ;;  %v1153_v40 = vsel %vm27_vm1, %v1083_v19, 0.0  ;;  %v623_v0 = vpop.f32.mrf.mxu2  ;;  %v2151_v19 = vld [vmem:[#allocation2 + $0x140] sm:$0xff]  ;;  %927 = vst.msk [vmem:[%s2622_s2 + $0x1a8] sm:$0xff] %vm27_vm1, %v2194_v60 }
  0xf8   :  { %v1154_v4 = vadd.f32 %v1153_v40, %v1152_v55  ;;  %914 = vst.msk [vmem:[%s2622_s2 + $0x140] sm:$0xff] %vm27_vm1, %v2151_v19 }
  0xf9   :  { %v2098_v59 = vld [vmem:[#allocation2 + $0x60] sm:$0xff]  ;;  %756 = vst.msk [vmem:[#allocation2 + $0x68] sm:$0xff] %vm27_vm1, %v691_v54  ;;  %v951_v54 = vadd.f32 %v950_v27, %v949_v31  ;;  %v960_v27 = vsel %vm27_vm1, %v2053_v34, 0.0 }
  0xfa   :  { %886 = vst.msk [vmem:[%s2622_s2 + $0x60] sm:$0xff] %vm27_vm1, %v2098_v59  ;;  %v1156_v17 = vadd.f32 %v1155_v15, %v1154_v4  ;;  %v1088_v29 = vmul.f32 %v2098_v59, %v2098_v59  ;;  %v962_v34 = vsel %vm27_vm1, %v2098_v59, 0.0  ;;  %v146_v4 = vld [vmem:[#allocation2 + $0x1b0] sm:$0xff]  ;;  %v123_v59 = vld [vmem:[#allocation2 + $0xf8] sm:$0xff] }
  0xfb   :  { %772 = vst.msk [vmem:[#allocation2 + $0xe8] sm:$0xff] %vm27_vm1, %v707_v23  ;;  %v953_v3 = vadd.f32 %v952_v36, %v951_v54  ;;  %v2143_v9 = vld [vmem:[#allocation2 + $0xe0] sm:$0xff] }
  0xfc   :  { %902 = vst.msk [vmem:[%s2622_s2 + $0xe0] sm:$0xff] %vm27_vm1, %v2143_v9  ;;  %v2161_v23 = vld [vmem:[#allocation2 + $0x1a0] sm:$0xff]  ;;  %v1158_v25 = vadd.f32 %v1157_v7, %v1156_v17  ;;  %v1163_v7 = vsel %vm27_vm1, %v1088_v29, 0.0  ;;  %v720_v17 = vadd.f32 %v623_v0, %v134_v47 }
  0xfd   :  { %v955_v13 = vadd.f32 %v954_v48, %v953_v3  ;;  %926 = vst.msk [vmem:[%s2622_s2 + $0x1a0] sm:$0xff] %vm27_vm1, %v2161_v23 }
  0xfe   :  { %v553_v38 = vpop.f32.mrf.mxu0  ;;  %v593_v63 = vpop.f32.mrf.mxu1  ;;  %785 = vst.msk [vmem:[#allocation2 + $0x150] sm:$0xff] %vm27_vm1, %v720_v17  ;;  %v1095_v17 = vmul.f32 %v1864_v41, %v1864_v41 }
  0xff   :  { %v692_v45 = vadd.f32 %v553_v38, %v106_v53  ;;  %v957_v53 = vadd.f32 %v956_v32, %v955_v13  ;;  %v1160_v38 = vadd.f32 %v1159_v20, %v1158_v25  ;;  %v625_v55 = vpop.f32.mrf.mxu2  ;;  %v655_v32 = vpop.f32.mrf.mxu3 }
 0x100   :  { %v823_v44 = vld [vmem:[#allocation2 + $0x68] sm:$0xff] }
 0x101   :  { %887 = vst.msk [vmem:[%s2622_s2 + $0x68] sm:$0xff] %vm27_vm1, %v823_v44  ;;  %v959_v36 = vadd.f32 %v958_v51, %v957_v53  ;;  %v1089_v40 = vmul.f32 %v823_v44, %v823_v44  ;;  %v1162_v15 = vadd.f32 %v1161_v28, %v1160_v38  ;;  %v964_v8 = vsel %vm27_vm1, %v823_v44, 0.0  ;;  %v147_v51 = vld [vmem:[#allocation2 + $0x1b8] sm:$0xff] }
 0x102   :  { %757 = vst.msk [vmem:[#allocation2 + $0x70] sm:$0xff] %vm27_vm1, %v692_v45  ;;  %v2168_v11 = vld [vmem:[#allocation2 + $0xe8] sm:$0xff]  ;;  %v122_v45 = vld [vmem:[#allocation2 + $0xf0] sm:$0xff]  ;;  %v733_v29 = vadd.f32 %v655_v32, %v147_v51  ;;  %v1092_v38 = vmul.f32 %v1823_v6, %v1823_v6 }
 0x103   :  { %903 = vst.msk [vmem:[%s2622_s2 + $0xe8] sm:$0xff] %vm27_vm1, %v2168_v11  ;;  %v961_v48 = vadd.f32 %v960_v27, %v959_v36  ;;  %v708_v3 = vadd.f32 %v593_v63, %v122_v45  ;;  %v732_v63 = vadd.f32 %v653_v5, %v146_v4  ;;  %v1164_v27 = vadd.f32 %v1163_v7, %v1162_v15 }
 0x104   :  { %798 = vst.msk [vmem:[#allocation2 + $0x1b8] sm:$0xff] %vm27_vm1, %v733_v29  ;;  %v1171_v7 = vsel %vm27_vm1, %v1092_v38, 0.0  ;;  %v136_v29 = vld [vmem:[#allocation2 + $0x160] sm:$0xff] }
 0x105   :  { %v963_v20 = vadd.f32 %v962_v34, %v961_v48  ;;  %773 = vst.msk [vmem:[#allocation2 + $0xf0] sm:$0xff] %vm27_vm1, %v708_v3  ;;  %v1093_v48 = vmul.f32 %v1832_v10, %v1832_v10  ;;  %v2231_v32 = vld [vmem:[#allocation2 + $0x150] sm:$0xff] }
 0x106   :  { %v555_v26 = vpop.f32.mrf.mxu0  ;;  %v595_v54 = vpop.f32.mrf.mxu1  ;;  %797 = vst.msk [vmem:[#allocation2 + $0x1b0] sm:$0xff] %vm27_vm1, %v732_v63  ;;  %v974_v63 = vsel %vm27_vm1, %v1841_v16, 0.0 }
 0x107   :  { %v693_v31 = vadd.f32 %v555_v26, %v107_v18  ;;  %v135_v18 = vld [vmem:[#allocation2 + $0x158] sm:$0xff]  ;;  %v709_v53 = vadd.f32 %v595_v54, %v123_v59  ;;  %v1165_v26 = vsel %vm27_vm1, %v1089_v40, 0.0  ;;  %v965_v28 = vadd.f32 %v964_v8, %v963_v20  ;;  %v658_v54 = vpop.f32.mrf.mxu3  ;;  %916 = vst.msk [vmem:[%s2622_s2 + $0x150] sm:$0xff] %vm27_vm1, %v2231_v32 }
 0x108   :  { %v721_v25 = vadd.f32 %v625_v55, %v135_v18  ;;  %v970_v55 = vsel %vm27_vm1, %v1823_v6, 0.0  ;;  %v972_v6 = vsel %vm27_vm1, %v1832_v10, 0.0  ;;  %v1094_v8 = vmul.f32 %v1841_v16, %v1841_v16 }
 0x109   :  { %v824_v1 = vld [vmem:[#allocation2 + $0x70] sm:$0xff]  ;;  %758 = vst.msk [vmem:[#allocation2 + $0x78] sm:$0xff] %vm27_vm1, %v693_v31  ;;  %v1166_v31 = vadd.f32 %v1165_v26, %v1164_v27  ;;  %v1173_v20 = vsel %vm27_vm1, %v1093_v48, 0.0  ;;  %v976_v16 = vsel %vm27_vm1, %v1864_v41, 0.0  ;;  %v1096_v27 = vmul.f32 %v1881_v50, %v1881_v50  ;;  %v137_v41 = vld [vmem:[#allocation2 + $0x168] sm:$0xff] }
 0x10a   :  { %888 = vst.msk [vmem:[%s2622_s2 + $0x70] sm:$0xff] %vm27_vm1, %v824_v1  ;;  %v1090_v13 = vmul.f32 %v824_v1, %v824_v1  ;;  %v966_v44 = vsel %vm27_vm1, %v824_v1, 0.0  ;;  %v628_v1 = vpop.f32.mrf.mxu2 }
 0x10b   :  { %774 = vst.msk [vmem:[#allocation2 + $0xf8] sm:$0xff] %vm27_vm1, %v709_v53  ;;  %v967_v36 = vadd.f32 %v966_v44, %v965_v28  ;;  %v1175_v44 = vsel %vm27_vm1, %v1094_v8, 0.0  ;;  %v2274_v28 = vld [vmem:[#allocation2 + $0x1b8] sm:$0xff]  ;;  %v1098_v8 = vmul.f32 %v1930_v12, %v1930_v12 }
 0x10c   :  { %v1167_v0 = vsel %vm27_vm1, %v1090_v13, 0.0  ;;  %786 = vst.msk [vmem:[#allocation2 + $0x158] sm:$0xff] %vm27_vm1, %v721_v25  ;;  %v2224_v3 = vld [vmem:[#allocation2 + $0xf0] sm:$0xff] }
 0x10d   :  { %v1168_v45 = vadd.f32 %v1167_v0, %v1166_v31  ;;  %904 = vst.msk [vmem:[%s2622_s2 + $0xf0] sm:$0xff] %vm27_vm1, %v2224_v3  ;;  %v2243_v13 = vld [vmem:[#allocation2 + $0x1b0] sm:$0xff]  ;;  %v148_v0 = vld [vmem:[#allocation2 + $0x1c0] sm:$0xff] }
 0x10e   :  { %928 = vst.msk [vmem:[%s2622_s2 + $0x1b0] sm:$0xff] %vm27_vm1, %v2243_v13  ;;  %v734_v48 = vadd.f32 %v658_v54, %v148_v0  ;;  %v982_v54 = vsel %vm27_vm1, %v1930_v12, 0.0  ;;  %v986_v0 = vsel %vm27_vm1, %v1979_v46, 0.0 }
 0x10f   :  { %929 = vst.msk [vmem:[%s2622_s2 + $0x1b8] sm:$0xff] %vm27_vm1, %v2274_v28 }
 0x110   :  { %v825_v5 = vld [vmem:[#allocation2 + $0x78] sm:$0xff]  ;;  %799 = vst.msk [vmem:[#allocation2 + $0x1c0] sm:$0xff] %vm27_vm1, %v734_v48  ;;  %v990_v48 = vsel %vm27_vm1, %v2043_v30, 0.0 }
 0x111   :  { %889 = vst.msk [vmem:[%s2622_s2 + $0x78] sm:$0xff] %vm27_vm1, %v825_v5  ;;  %v968_v34 = vsel %vm27_vm1, %v825_v5, 0.0  ;;  %v1091_v40 = vmul.f32 %v825_v5, %v825_v5  ;;  %v978_v5 = vsel %vm27_vm1, %v1881_v50, 0.0 }
 0x112   :  { %v969_v47 = vadd.f32 %v968_v34, %v967_v36  ;;  %v2252_v10 = vld [vmem:[#allocation2 + $0xf8] sm:$0xff]  ;;  %v630_v31 = vpop.f32.mrf.mxu2  ;;  %v1177_v36 = vsel %vm27_vm1, %v1095_v17, 0.0 }
 0x113   :  { %v1169_v15 = vsel %vm27_vm1, %v1091_v40, 0.0  ;;  %905 = vst.msk [vmem:[%s2622_s2 + $0xf8] sm:$0xff] %vm27_vm1, %v2252_v10  ;;  %v2262_v53 = vld [vmem:[#allocation2 + $0x158] sm:$0xff]  ;;  %v149_v40 = vld [vmem:[#allocation2 + $0x1c8] sm:$0xff] }
 0x114   :  { %v971_v4 = vadd.f32 %v970_v55, %v969_v47  ;;  %v1170_v59 = vadd.f32 %v1169_v15, %v1168_v45  ;;  %917 = vst.msk [vmem:[%s2622_s2 + $0x158] sm:$0xff] %vm27_vm1, %v2262_v53  ;;  %v660_v45 = vpop.f32.mrf.mxu3  ;;  %v1097_v47 = vmul.f32 %v1904_v57, %v1904_v57  ;;  %v722_v55 = vadd.f32 %v628_v1, %v136_v29 }
 0x115   :  { %v723_v15 = vadd.f32 %v630_v31, %v137_v41  ;;  %v735_v50 = vadd.f32 %v660_v45, %v149_v40  ;;  %v1101_v31 = vmul.f32 %v2009_v61, %v2009_v61  ;;  %v1102_v41 = vmul.f32 %v2043_v30, %v2043_v30 }
 0x116   :  { %v973_v18 = vadd.f32 %v972_v6, %v971_v4  ;;  %v1172_v51 = vadd.f32 %v1171_v7, %v1170_v59  ;;  %v1179_v7 = vsel %vm27_vm1, %v1096_v27, 0.0  ;;  %v980_v6 = vsel %vm27_vm1, %v1904_v57, 0.0  ;;  %787 = vst.msk [vmem:[#allocation2 + $0x160] sm:$0xff] %vm27_vm1, %v722_v55 }
 0x117   :  { %v1181_v1 = vsel %vm27_vm1, %v1097_v47, 0.0  ;;  %788 = vst.msk [vmem:[#allocation2 + $0x168] sm:$0xff] %vm27_vm1, %v723_v15  ;;  %v1103_v40 = vmul.f32 %v2073_v39, %v2073_v39  ;;  %v1189_v55 = vsel %vm27_vm1, %v1101_v31, 0.0  ;;  %v992_v30 = vsel %vm27_vm1, %v2073_v39, 0.0 }
 0x118   :  { %v975_v25 = vadd.f32 %v974_v63, %v973_v18  ;;  %v1174_v26 = vadd.f32 %v1173_v20, %v1172_v51  ;;  %v1099_v51 = vmul.f32 %v1952_v21, %v1952_v21  ;;  %800 = vst.msk [vmem:[#allocation2 + $0x1c8] sm:$0xff] %vm27_vm1, %v735_v50  ;;  %v1183_v63 = vsel %vm27_vm1, %v1098_v8, 0.0  ;;  %v138_v8 = vld [vmem:[#allocation2 + $0x170] sm:$0xff] }
 0x119   :  { %v1191_v50 = vsel %vm27_vm1, %v1102_v41, 0.0  ;;  %v1105_v39 = vmul.f32 %v2168_v11, %v2168_v11 }
 0x11a   :  { %v977_v38 = vadd.f32 %v976_v16, %v975_v25  ;;  %v1176_v34 = vadd.f32 %v1175_v44, %v1174_v26  ;;  %v984_v25 = vsel %vm27_vm1, %v1952_v21, 0.0  ;;  %v1100_v26 = vmul.f32 %v1979_v46, %v1979_v46  ;;  %v633_v44 = vpop.f32.mrf.mxu2  ;;  %v2324_v46 = vld [vmem:[#allocation2 + $0x1c0] sm:$0xff] }
 0x11b   :  { %v1185_v29 = vsel %vm27_vm1, %v1099_v51, 0.0  ;;  %930 = vst.msk [vmem:[%s2622_s2 + $0x1c0] sm:$0xff] %vm27_vm1, %v2324_v46 }
 0x11c   :  { %v979_v4 = vadd.f32 %v978_v5, %v977_v38  ;;  %v1178_v59 = vadd.f32 %v1177_v36, %v1176_v34  ;;  %v663_v27 = vpop.f32.mrf.mxu3  ;;  %v1187_v21 = vsel %vm27_vm1, %v1100_v26, 0.0  ;;  %v988_v34 = vsel %vm27_vm1, %v2009_v61, 0.0 }
 0x11d   :  { %v2310_v38 = vld [vmem:[#allocation2 + $0x160] sm:$0xff]  ;;  %v994_v26 = vsel %vm27_vm1, %v2143_v9, 0.0 }
 0x11e   :  { %v981_v17 = vadd.f32 %v980_v6, %v979_v4  ;;  %v1180_v18 = vadd.f32 %v1179_v7, %v1178_v59  ;;  %918 = vst.msk [vmem:[%s2622_s2 + $0x160] sm:$0xff] %vm27_vm1, %v2310_v38  ;;  %v2331_v61 = vld [vmem:[#allocation2 + $0x168] sm:$0xff]  ;;  %v1193_v7 = vsel %vm27_vm1, %v1103_v40, 0.0  ;;  %v1104_v6 = vmul.f32 %v2143_v9, %v2143_v9 }
 0x11f   :  { %919 = vst.msk [vmem:[%s2622_s2 + $0x168] sm:$0xff] %vm27_vm1, %v2331_v61  ;;  %v2341_v15 = vld [vmem:[#allocation2 + $0x1c8] sm:$0xff]  ;;  %v1108_v40 = vmul.f32 %v1889_v52, %v1889_v52 }
 0x120   :  { %v1182_v57 = vadd.f32 %v1181_v1, %v1180_v18  ;;  %v983_v20 = vadd.f32 %v982_v54, %v981_v17  ;;  %931 = vst.msk [vmem:[%s2622_s2 + $0x1c8] sm:$0xff] %vm27_vm1, %v2341_v15  ;;  %v150_v17 = vld [vmem:[#allocation2 + $0x1d0] sm:$0xff]  ;;  %v139_v18 = vld [vmem:[#allocation2 + $0x178] sm:$0xff]  ;;  %v1195_v31 = vsel %vm27_vm1, %v1104_v6, 0.0 }
 0x122   :  { %v985_v16 = vadd.f32 %v984_v25, %v983_v20  ;;  %v1184_v12 = vadd.f32 %v1183_v63, %v1182_v57  ;;  %v635_v1 = vpop.f32.mrf.mxu2  ;;  %v724_v57 = vadd.f32 %v633_v44, %v138_v8  ;;  %v736_v20 = vadd.f32 %v663_v27, %v150_v17  ;;  %v151_v63 = vld [vmem:[#allocation2 + $0x1d8] sm:$0xff] }
 0x123   :  { %v996_v44 = vsel %vm27_vm1, %v2168_v11, 0.0  ;;  %v1106_v27 = vmul.f32 %v2224_v3, %v2224_v3  ;;  %v1203_v8 = vsel %vm27_vm1, %v1108_v40, 0.0  ;;  %v1110_v17 = vmul.f32 %v1937_v14, %v1937_v14 }
 0x124   :  { %v987_v36 = vadd.f32 %v986_v0, %v985_v16  ;;  %v1186_v5 = vadd.f32 %v1185_v29, %v1184_v12  ;;  %v665_v25 = vpop.f32.mrf.mxu3  ;;  %v725_v16 = vadd.f32 %v635_v1, %v139_v18  ;;  %789 = vst.msk [vmem:[#allocation2 + $0x170] sm:$0xff] %vm27_vm1, %v724_v57  ;;  %v1006_v57 = vsel %vm27_vm1, %v1937_v14, 0.0  ;;  %v152_v14 = vld [vmem:[#allocation2 + $0x1e0] sm:$0xff] }
 0x125   :  { %v737_v12 = vadd.f32 %v665_v25, %v151_v63  ;;  %801 = vst.msk [vmem:[#allocation2 + $0x1d0] sm:$0xff] %vm27_vm1, %v736_v20  ;;  %v1111_v20 = vmul.f32 %v1959_v22, %v1959_v22 }
 0x126   :  { %v989_v45 = vadd.f32 %v988_v34, %v987_v36  ;;  %v1188_v47 = vadd.f32 %v1187_v21, %v1186_v5  ;;  %790 = vst.msk [vmem:[#allocation2 + $0x178] sm:$0xff] %vm27_vm1, %v725_v16  ;;  %v1197_v5 = vsel %vm27_vm1, %v1105_v39, 0.0  ;;  %v998_v21 = vsel %vm27_vm1, %v2224_v3, 0.0 }
 0x127   :  { %v1107_v34 = vmul.f32 %v2252_v10, %v2252_v10  ;;  %802 = vst.msk [vmem:[#allocation2 + $0x1d8] sm:$0xff] %vm27_vm1, %v737_v12  ;;  %v1002_v3 = vsel %vm27_vm1, %v1889_v52, 0.0  ;;  %v1004_v52 = vsel %vm27_vm1, %v1911_v58, 0.0  ;;  %v1008_v39 = vsel %vm27_vm1, %v1959_v22, 0.0  ;;  %v153_v12 = vld [vmem:[#allocation2 + $0x1e8] sm:$0xff] }
 0x128   :  { %v991_v4 = vadd.f32 %v990_v48, %v989_v45  ;;  %v1190_v59 = vadd.f32 %v1189_v55, %v1188_v47  ;;  %v1199_v45 = vsel %vm27_vm1, %v1106_v27, 0.0  ;;  %v1000_v47 = vsel %vm27_vm1, %v2252_v10, 0.0 }
 0x129   :  { %v1112_v16 = vmul.f32 %v1987_v49, %v1987_v49  ;;  %v1209_v27 = vsel %vm27_vm1, %v1111_v20, 0.0 }
 0x12a   :  { %v993_v54 = vadd.f32 %v992_v30, %v991_v4  ;;  %v1192_v51 = vadd.f32 %v1191_v50, %v1190_v59  ;;  %v1109_v59 = vmul.f32 %v1911_v58, %v1911_v58  ;;  %v1201_v50 = vsel %vm27_vm1, %v1107_v34, 0.0 }
 0x12b   :  { %v2382_v30 = vld [vmem:[#allocation2 + $0x170] sm:$0xff]  ;;  %v1211_v34 = vsel %vm27_vm1, %v1112_v16, 0.0 }
 0x12c   :  { %v995_v29 = vadd.f32 %v994_v26, %v993_v54  ;;  %v1194_v0 = vadd.f32 %v1193_v7, %v1192_v51  ;;  %v668_v4 = vpop.f32.mrf.mxu3  ;;  %920 = vst.msk [vmem:[%s2622_s2 + $0x170] sm:$0xff] %vm27_vm1, %v2382_v30  ;;  %v2389_v10 = vld [vmem:[#allocation2 + $0x1d0] sm:$0xff]  ;;  %v1205_v51 = vsel %vm27_vm1, %v1109_v59, 0.0  ;;  %v1207_v26 = vsel %vm27_vm1, %v1110_v17, 0.0 }
 0x12d   :  { %932 = vst.msk [vmem:[%s2622_s2 + $0x1d0] sm:$0xff] %vm27_vm1, %v2389_v10  ;;  %v2401_v18 = vld [vmem:[#allocation2 + $0x178] sm:$0xff]  ;;  %v1116_v59 = vmul.f32 %v2151_v19, %v2151_v19 }
 0x12e   :  { %v1196_v9 = vadd.f32 %v1195_v31, %v1194_v0  ;;  %v997_v36 = vadd.f32 %v996_v44, %v995_v29  ;;  %921 = vst.msk [vmem:[%s2622_s2 + $0x178] sm:$0xff] %vm27_vm1, %v2401_v18  ;;  %v2408_v58 = vld [vmem:[#allocation2 + $0x1d8] sm:$0xff]  ;;  %v738_v31 = vadd.f32 %v668_v4, %v152_v14 }
 0x12f   :  { %933 = vst.msk [vmem:[%s2622_s2 + $0x1d8] sm:$0xff] %vm27_vm1, %v2408_v58 }
 0x130   :  { %v1198_v11 = vadd.f32 %v1197_v5, %v1196_v9  ;;  %v999_v41 = vadd.f32 %v998_v21, %v997_v36  ;;  %v1010_v9 = vsel %vm27_vm1, %v1987_v49, 0.0  ;;  %v1113_v36 = vmul.f32 %v2016_v62, %v2016_v62  ;;  %803 = vst.msk [vmem:[#allocation2 + $0x1e0] sm:$0xff] %vm27_vm1, %v738_v31  ;;  %v155_v31 = vld [vmem:[#allocation2 + $0x1f8] sm:$0xff] }
 0x132   :  { %v1200_v55 = vadd.f32 %v1199_v45, %v1198_v11  ;;  %v1001_v48 = vadd.f32 %v1000_v47, %v999_v41  ;;  %v1012_v11 = vsel %vm27_vm1, %v2016_v62, 0.0  ;;  %v1114_v41 = vmul.f32 %v2051_v33, %v2051_v33 }
 0x133   :  { %v1213_v45 = vsel %vm27_vm1, %v1113_v36, 0.0  ;;  %v1014_v47 = vsel %vm27_vm1, %v2051_v33, 0.0  ;;  %v1016_v62 = vsel %vm27_vm1, %v2080_v42, 0.0  ;;  %v1018_v33 = vsel %vm27_vm1, %v2151_v19, 0.0 }
 0x134   :  { %v1003_v7 = vadd.f32 %v1002_v3, %v1001_v48  ;;  %v1202_v6 = vadd.f32 %v1201_v50, %v1200_v55  ;;  %v670_v44 = vpop.f32.mrf.mxu3  ;;  %v1115_v55 = vmul.f32 %v2080_v42, %v2080_v42  ;;  %v1215_v3 = vsel %vm27_vm1, %v1114_v41, 0.0 }
 0x135   :  { %v739_v5 = vadd.f32 %v670_v44, %v153_v12  ;;  %v1020_v19 = vsel %vm27_vm1, %v2180_v35, 0.0  ;;  %v1024_v12 = vsel %vm27_vm1, %v2262_v53, 0.0  ;;  %v1028_v41 = vsel %vm27_vm1, %v2331_v61, 0.0 }
 0x136   :  { %v1005_v1 = vadd.f32 %v1004_v52, %v1003_v7  ;;  %v1204_v54 = vadd.f32 %v1203_v8, %v1202_v6  ;;  %v1217_v8 = vsel %vm27_vm1, %v1115_v55, 0.0  ;;  %v1117_v52 = vmul.f32 %v2180_v35, %v2180_v35 }
 0x137   :  { %804 = vst.msk [vmem:[#allocation2 + $0x1e8] sm:$0xff] %vm27_vm1, %v739_v5  ;;  %v2452_v17 = vld [vmem:[#allocation2 + $0x1e0] sm:$0xff]  ;;  %v1026_v5 = vsel %vm27_vm1, %v2310_v38, 0.0  ;;  %v1123_v55 = vmul.f32 %v2401_v18, %v2401_v18 }
 0x138   :  { %v1007_v63 = vadd.f32 %v1006_v57, %v1005_v1  ;;  %v1206_v25 = vadd.f32 %v1205_v51, %v1204_v54  ;;  %934 = vst.msk [vmem:[%s2622_s2 + $0x1e0] sm:$0xff] %vm27_vm1, %v2452_v17  ;;  %v1219_v51 = vsel %vm27_vm1, %v1116_v59, 0.0  ;;  %v1118_v57 = vmul.f32 %v2231_v32, %v2231_v32 }
 0x13a   :  { %v1009_v29 = vadd.f32 %v1008_v39, %v1007_v63  ;;  %v1208_v0 = vadd.f32 %v1207_v26, %v1206_v25  ;;  %v1221_v25 = vsel %vm27_vm1, %v1117_v52, 0.0  ;;  %v1022_v26 = vsel %vm27_vm1, %v2231_v32, 0.0 }
 0x13b   :  { %v1119_v39 = vmul.f32 %v2262_v53, %v2262_v53  ;;  %v1223_v14 = vsel %vm27_vm1, %v1118_v57, 0.0 }
 0x13c   :  { %v1011_v21 = vadd.f32 %v1010_v9, %v1009_v29  ;;  %v1210_v22 = vadd.f32 %v1209_v27, %v1208_v0  ;;  %v673_v6 = vpop.f32.mrf.mxu3  ;;  %v1120_v29 = vmul.f32 %v2310_v38, %v2310_v38  ;;  %v154_v0 = vld [vmem:[#allocation2 + $0x1f0] sm:$0xff] }
 0x13d   :  { %v740_v9 = vadd.f32 %v673_v6, %v154_v0  ;;  %v1225_v32 = vsel %vm27_vm1, %v1119_v39, 0.0  ;;  %v1233_v6 = vsel %vm27_vm1, %v1123_v55, 0.0  ;;  %v1128_v39 = vmul.f32 %v2161_v23, %v2161_v23 }
 0x13e   :  { %v1212_v40 = vadd.f32 %v1211_v34, %v1210_v22  ;;  %v1013_v49 = vadd.f32 %v1012_v11, %v1011_v21  ;;  %v2459_v42 = vld [vmem:[#allocation2 + $0x1e8] sm:$0xff]  ;;  %v1121_v21 = vmul.f32 %v2331_v61, %v2331_v61  ;;  %v1227_v11 = vsel %vm27_vm1, %v1120_v29, 0.0 }
 0x13f   :  { %935 = vst.msk [vmem:[%s2622_s2 + $0x1e8] sm:$0xff] %vm27_vm1, %v2459_v42  ;;  %v1124_v61 = vmul.f32 %v2002_v56, %v2002_v56 }
 0x140   :  { %v1015_v48 = vadd.f32 %v1014_v47, %v1013_v49  ;;  %v1214_v4 = vadd.f32 %v1213_v45, %v1212_v40  ;;  %805 = vst.msk [vmem:[#allocation2 + $0x1f0] sm:$0xff] %vm27_vm1, %v740_v9  ;;  %v1122_v40 = vmul.f32 %v2382_v30, %v2382_v30  ;;  %v1229_v45 = vsel %vm27_vm1, %v1121_v21, 0.0 }
 0x141   :  { %v1030_v47 = vsel %vm27_vm1, %v2382_v30, 0.0  ;;  %v1125_v30 = vmul.f32 %v2023_v2, %v2023_v2  ;;  %v1235_v52 = vsel %vm27_vm1, %v1124_v61, 0.0  ;;  %v1135_v61 = vmul.f32 %v2408_v58, %v2408_v58 }
 0x142   :  { %v1017_v50 = vadd.f32 %v1016_v62, %v1015_v48  ;;  %v1216_v7 = vadd.f32 %v1215_v3, %v1214_v4  ;;  %v1231_v3 = vsel %vm27_vm1, %v1122_v40, 0.0  ;;  %v1032_v62 = vsel %vm27_vm1, %v2401_v18, 0.0 }
 0x143   :  { %v1237_v57 = vsel %vm27_vm1, %v1125_v30, 0.0  ;;  %v1133_v40 = vmul.f32 %v2341_v15, %v2341_v15 }
 0x144   :  { %v1019_v1 = vadd.f32 %v1018_v33, %v1017_v50  ;;  %v1218_v54 = vadd.f32 %v1217_v8, %v1216_v7  ;;  %v675_v36 = vpop.f32.mrf.mxu3  ;;  %v1034_v7 = vsel %vm27_vm1, %v2002_v56, 0.0 }
 0x145   :  { %v741_v22 = vadd.f32 %v675_v36, %v155_v31  ;;  %v1243_v31 = vsel %vm27_vm1, %v1128_v39, 0.0 }
 0x146   :  { %v1021_v20 = vadd.f32 %v1020_v19, %v1019_v1  ;;  %v1220_v63 = vadd.f32 %v1219_v51, %v1218_v54  ;;  %v1036_v1 = vsel %vm27_vm1, %v2023_v2, 0.0  ;;  %v1126_v54 = vmul.f32 %v2066_v37, %v2066_v37 }
 0x147   :  { %806 = vst.msk [vmem:[#allocation2 + $0x1f8] sm:$0xff] %vm27_vm1, %v741_v22  ;;  %v2508_v8 = vld [vmem:[#allocation2 + $0x1f0] sm:$0xff]  ;;  %v1038_v2 = vsel %vm27_vm1, %v2066_v37, 0.0  ;;  %v1042_v37 = vsel %vm27_vm1, %v2161_v23, 0.0  ;;  %v1046_v23 = vsel %vm27_vm1, %v2243_v13, 0.0 }
 0x148   :  { %v1023_v35 = vadd.f32 %v1022_v26, %v1021_v20  ;;  %v1222_v16 = vadd.f32 %v1221_v25, %v1220_v63  ;;  %936 = vst.msk [vmem:[%s2622_s2 + $0x1f0] sm:$0xff] %vm27_vm1, %v2508_v8  ;;  %v1127_v20 = vmul.f32 %v2087_v43, %v2087_v43  ;;  %v1239_v24 = vsel %vm27_vm1, %v1126_v54, 0.0 }
 0x149   :  { %v1040_v26 = vsel %vm27_vm1, %v2087_v43, 0.0  ;;  %v1044_v43 = vsel %vm27_vm1, %v2194_v60, 0.0  ;;  %v1138_v54 = vmul.f32 %v2508_v8, %v2508_v8 }
 0x14a   :  { %v1025_v44 = vadd.f32 %v1024_v12, %v1023_v35  ;;  %v1224_v27 = vadd.f32 %v1223_v14, %v1222_v16  ;;  %v1241_v14 = vsel %vm27_vm1, %v1127_v20, 0.0  ;;  %v1129_v12 = vmul.f32 %v2194_v60, %v2194_v60 }
 0x14b   :  { %v1048_v60 = vsel %vm27_vm1, %v2274_v28, 0.0 }
 0x14c   :  { %v1226_v34 = vadd.f32 %v1225_v32, %v1224_v27  ;;  %v1027_v53 = vadd.f32 %v1026_v5, %v1025_v44  ;;  %v1130_v44 = vmul.f32 %v2243_v13, %v2243_v13  ;;  %v1245_v36 = vsel %vm27_vm1, %v1129_v12, 0.0 }
 0x14d   :  { %v1131_v32 = vmul.f32 %v2274_v28, %v2274_v28  ;;  %v1050_v13 = vsel %vm27_vm1, %v2324_v46, 0.0  ;;  %v1052_v28 = vsel %vm27_vm1, %v2341_v15, 0.0  ;;  %v1056_v15 = vsel %vm27_vm1, %v2408_v58, 0.0 }
 0x14e   :  { %v1228_v49 = vadd.f32 %v1227_v11, %v1226_v34  ;;  %v1029_v38 = vadd.f32 %v1028_v41, %v1027_v53  ;;  %v2520_v56 = vld [vmem:[#allocation2 + $0x1f8] sm:$0xff]  ;;  %v1247_v22 = vsel %vm27_vm1, %v1130_v44, 0.0  ;;  %v1132_v34 = vmul.f32 %v2324_v46, %v2324_v46  ;;  %v938_v44 = vld [vmem:[%s2623_s3] sm:$0x1] }
 0x14f   :  { %937 = vst.msk [vmem:[%s2622_s2 + $0x1f8] sm:$0xff] %vm27_vm1, %v2520_v56  ;;  %v1249_v41 = vsel %vm27_vm1, %v1131_v32, 0.0  ;;  %v1054_v46 = vsel %vm27_vm1, %v2389_v10, 0.0  ;;  %v1060_v58 = vsel %vm27_vm1, %v2459_v42, 0.0 }
 0x150   :  { %v1230_v48 = vadd.f32 %v1229_v45, %v1228_v49  ;;  %v1031_v4 = vadd.f32 %v1030_v47, %v1029_v38  ;;  %v1251_v45 = vsel %vm27_vm1, %v1132_v34, 0.0  ;;  %v1134_v47 = vmul.f32 %v2389_v10, %v2389_v10 }
 0x151   :  { %v1058_v10 = vsel %vm27_vm1, %v2452_v17, 0.0 }
 0x152   :  { %v1232_v59 = vadd.f32 %v1231_v3, %v1230_v48  ;;  %v1033_v50 = vadd.f32 %v1032_v62, %v1031_v4  ;;  %v1253_v4 = vsel %vm27_vm1, %v1133_v40, 0.0 }
 0x154   :  { %v1035_v18 = vadd.f32 %v1034_v7, %v1033_v50  ;;  %v1234_v33 = vadd.f32 %v1233_v6, %v1232_v59  ;;  %v1255_v59 = vsel %vm27_vm1, %v1134_v47, 0.0  ;;  %v1136_v50 = vmul.f32 %v2452_v17, %v2452_v17 }
 0x155   :  { %v1257_v6 = vsel %vm27_vm1, %v1135_v61, 0.0  ;;  %v1062_v17 = vsel %vm27_vm1, %v2508_v8, 0.0 }
 0x156   :  { %v1037_v51 = vadd.f32 %v1036_v1, %v1035_v18  ;;  %v1236_v19 = vadd.f32 %v1235_v52, %v1234_v33  ;;  %v1137_v18 = vmul.f32 %v2459_v42, %v2459_v42  ;;  %v1259_v1 = vsel %vm27_vm1, %v1136_v50, 0.0 }
 0x157   :  { %v1064_v42 = vsel %vm27_vm1, %v2520_v56, 0.0 }
 0x158   :  { %v1039_v63 = vadd.f32 %v1038_v2, %v1037_v51  ;;  %v1238_v25 = vadd.f32 %v1237_v57, %v1236_v19  ;;  %v1261_v57 = vsel %vm27_vm1, %v1137_v18, 0.0  ;;  %v1139_v2 = vmul.f32 %v2520_v56, %v2520_v56 }
 0x15a   :  { %v1041_v35 = vadd.f32 %v1040_v26, %v1039_v63  ;;  %v1240_v16 = vadd.f32 %v1239_v24, %v1238_v25  ;;  %v1263_v25 = vsel %vm27_vm1, %v1138_v54, 0.0  ;;  %v1265_v39 = vsel %vm27_vm1, %v1139_v2, 0.0 }
 0x15c   :  { %v1043_v29 = vadd.f32 %v1042_v37, %v1041_v35  ;;  %v1242_v0 = vadd.f32 %v1241_v14, %v1240_v16 }
 0x15e   :  { %v1244_v27 = vadd.f32 %v1243_v31, %v1242_v0  ;;  %v1045_v9 = vadd.f32 %v1044_v43, %v1043_v29 }
 0x160   :  { %v1047_v5 = vadd.f32 %v1046_v23, %v1045_v9  ;;  %v1246_v21 = vadd.f32 %v1245_v36, %v1244_v27  ;;  %v1075_v9 = vld [vmem:[%s2624_s4] sm:$0x1] }
 0x162   :  { %v1049_v53 = vadd.f32 %v1048_v60, %v1047_v5  ;;  %v1248_v11 = vadd.f32 %v1247_v22, %v1246_v21 }
 0x164   :  { %v1051_v49 = vadd.f32 %v1050_v13, %v1049_v53  ;;  %v1250_v38 = vadd.f32 %v1249_v41, %v1248_v11 }
 0x166   :  { %v1053_v55 = vadd.f32 %v1052_v28, %v1051_v49  ;;  %v1252_v48 = vadd.f32 %v1251_v45, %v1250_v38 }
 0x168   :  { %v1055_v3 = vadd.f32 %v1054_v46, %v1053_v55  ;;  %v1254_v62 = vadd.f32 %v1253_v4, %v1252_v48 }
 0x16a   :  { %v1057_v7 = vadd.f32 %v1056_v15, %v1055_v3  ;;  %v1256_v30 = vadd.f32 %v1255_v59, %v1254_v62 }
 0x16c   :  { %v1258_v33 = vadd.f32 %v1257_v6, %v1256_v30  ;;  %v1059_v52 = vadd.f32 %v1058_v10, %v1057_v7 }
 0x16e   :  { %v1260_v51 = vadd.f32 %v1259_v1, %v1258_v33  ;;  %v1061_v19 = vadd.f32 %v1060_v58, %v1059_v52 }
 0x170   :  { %v1262_v20 = vadd.f32 %v1261_v57, %v1260_v51  ;;  %v1063_v63 = vadd.f32 %v1062_v17, %v1061_v19 }
 0x172   :  { %v1264_v24 = vadd.f32 %v1263_v25, %v1262_v20  ;;  %v1065_v26 = vadd.f32 %v1064_v42, %v1063_v63 }
 0x174   :  { %v1066_v35 = vrot.slane %v1065_v26, 4  ;;  %v1266_v16 = vadd.f32 %v1265_v39, %v1264_v24 }
 0x176   :  { %v1067_v14 = vadd.f32 %v1066_v35, %v1065_v26  ;;  %v1267_v37 = vrot.slane %v1266_v16, 4 }
 0x178   :  { %v1068_v12 = vrot.slane %v1067_v14, 2  ;;  %v1268_v8 = vadd.f32 %v1267_v37, %v1266_v16 }
 0x17a   :  { %v1069_v29 = vadd.f32 %v1068_v12, %v1067_v14  ;;  %v1269_v0 = vrot.slane %v1268_v8, 2 }
 0x17c   :  { %v1070_v31 = vrot.slane %v1069_v29, 1  ;;  %v1270_v43 = vadd.f32 %v1269_v0, %v1268_v8 }
 0x17e   :  { %v1071_v27 = vadd.f32 %v1070_v31, %v1069_v29  ;;  %v1271_v56 = vrot.slane %v1270_v43, 1 }
 0x180   :  { %v1072_v36 = vadd.f32 %v1071_v27, %v938_v44  ;;  %v1272_v23 = vadd.f32 %v1271_v56, %v1270_v43 }
 0x182   :  { %1074 = vst.msk [vmem:[%s2623_s3] sm:$0x1] %vm21_vm2, %v1072_v36  ;;  %v1273_v32 = vadd.f32 %v1272_v23, %v1075_v9 }
 0x184   :  { %1274 = vst.msk [vmem:[%s2624_s4] sm:$0x1] %vm21_vm2, %v1273_v32 }

// kernel: _lambda_.13
= control target key start
LH: loop header
LB: loop body
LE: loop exit
PB: predicated region body
PF: predicated region fallthrough
CT: control target
= control target key end

     0   :  { %vm410_vm0 = vcmask 523264   ;;  %s2050_s1 = inlined_call_operand.vmem [shape: bf16[64,128], index: 1, kind: input, shape index: {}]   ;;  %s2051_s0 = inlined_call_operand.vmem [shape: bf16[512,64], index: 0, kind: input, shape index: {}]   ;;  %s2052_s2 = inlined_call_operand.vmem [shape: f32[512,128], index: 2, kind: output, shape index: {0}]   ;;  %s2053_s3 = inlined_call_operand.vmem [shape: f32[1,128], index: 3, kind: output, shape index: {1}]   ;;  %s2054_s4 = inlined_call_operand.vmem [shape: f32[1,128], index: 4, kind: output, shape index: {2}]  }
   0x1   :  { %v1366_v0 = vld [vmem:[%s2050_s1 + $0x18] sm:$0xff]  ;;  %v1365_v1 = vld [vmem:[%s2050_s1 + $0x10] sm:$0xff]  ;;  %v1364_v2 = vld [vmem:[%s2050_s1 + $0x8] sm:$0xff] }
   0x2   :  { %511 = vmatpush.bf16.msra.mxu0 %v1366_v0  ;;  %1367 = vmatpush.bf16.msra.mxu1 %v1366_v0  ;;  %v1363_v3 = vld [vmem:[%s2050_s1] sm:$0xff]  ;;  %v1332_v6 = vld [vmem:[%s2051_s0 + $0x8] sm:$0xff]  ;;  %v1333_v9 = vld [vmem:[%s2051_s0 + $0x10] sm:$0xff] }
   0x3   :  { %1368 = vmatpush.bf16.msra.mxu2 %v1366_v0  ;;  %1369 = vmatpush.bf16.msra.mxu3 %v1366_v0  ;;  %v1331_v4 = vld [vmem:[%s2051_s0] sm:$0xff]  ;;  %v1340_v7 = vld [vmem:[%s2051_s0 + $0x48] sm:$0xff]  ;;  %v1341_v10 = vld [vmem:[%s2051_s0 + $0x50] sm:$0xff] }
   0x4   :  { %v1339_v5 = vld [vmem:[%s2051_s0 + $0x40] sm:$0xff]  ;;  %v1348_v11 = vld [vmem:[%s2051_s0 + $0x88] sm:$0xff]  ;;  %v1334_v12 = vld [vmem:[%s2051_s0 + $0x18] sm:$0xff] }
   0x5   :  { %v1347_v8 = vld [vmem:[%s2051_s0 + $0x80] sm:$0xff]  ;;  %v1342_v13 = vld [vmem:[%s2051_s0 + $0x58] sm:$0xff]  ;;  %v1349_v14 = vld [vmem:[%s2051_s0 + $0x90] sm:$0xff] }
   0x6   :  { %512 = vmatpush.bf16.msra.mxu0 %v1365_v1  ;;  %1370 = vmatpush.bf16.msra.mxu1 %v1365_v1  ;;  %v1355_v15 = vld [vmem:[%s2051_s0 + $0xc0] sm:$0xff]  ;;  %v1350_v18 = vld [vmem:[%s2051_s0 + $0x98] sm:$0xff]  ;;  %v1356_v19 = vld [vmem:[%s2051_s0 + $0xc8] sm:$0xff] }
   0x7   :  { %1371 = vmatpush.bf16.msra.mxu2 %v1365_v1  ;;  %1372 = vmatpush.bf16.msra.mxu3 %v1365_v1  ;;  %v1335_v16 = vld [vmem:[%s2051_s0 + $0x20] sm:$0xff]  ;;  %v1336_v20 = vld [vmem:[%s2051_s0 + $0x28] sm:$0xff]  ;;  %v1357_v23 = vld [vmem:[%s2051_s0 + $0xd0] sm:$0xff] }
   0x8   :  { %v1343_v17 = vld [vmem:[%s2051_s0 + $0x60] sm:$0xff]  ;;  %v1344_v21 = vld [vmem:[%s2051_s0 + $0x68] sm:$0xff]  ;;  %v1337_v24 = vld [vmem:[%s2051_s0 + $0x30] sm:$0xff] }
   0x9   :  { %v1351_v22 = vld [vmem:[%s2051_s0 + $0xa0] sm:$0xff]  ;;  %v1345_v25 = vld [vmem:[%s2051_s0 + $0x70] sm:$0xff]  ;;  %v1352_v26 = vld [vmem:[%s2051_s0 + $0xa8] sm:$0xff] }
   0xa   :  { %513 = vmatpush.bf16.msra.mxu0 %v1364_v2  ;;  %1373 = vmatpush.bf16.msra.mxu1 %v1364_v2  ;;  %v1358_v27 = vld [vmem:[%s2051_s0 + $0xd8] sm:$0xff]  ;;  %v1353_v30 = vld [vmem:[%s2051_s0 + $0xb0] sm:$0xff]  ;;  %v1359_v31 = vld [vmem:[%s2051_s0 + $0xe0] sm:$0xff] }
   0xb   :  { %1374 = vmatpush.bf16.msra.mxu2 %v1364_v2  ;;  %1375 = vmatpush.bf16.msra.mxu3 %v1364_v2  ;;  %v1338_v28 = vld [vmem:[%s2051_s0 + $0x38] sm:$0xff]  ;;  %v1360_v35 = vld [vmem:[%s2051_s0 + $0xe8] sm:$0xff]  ;;  %v1361_v47 = vld [vmem:[%s2051_s0 + $0xf0] sm:$0xff] }
   0xc   :  { %v1346_v29 = vld [vmem:[%s2051_s0 + $0x78] sm:$0xff] }
   0xd   :  { %v1354_v34 = vld [vmem:[%s2051_s0 + $0xb8] sm:$0xff] }
   0xe   :  { %514 = vmatpush.bf16.msra.mxu0 %v1363_v3  ;;  %1376 = vmatpush.bf16.msra.mxu1 %v1363_v3  ;;  %v1362_v60 = vld [vmem:[%s2051_s0 + $0xf8] sm:$0xff] }
   0xf   :  { %1377 = vmatpush.bf16.msra.mxu2 %v1363_v3  ;;  %1378 = vmatpush.bf16.msra.mxu3 %v1363_v3 }
  0x11   :  { %1299 = vmatmul.msk.bf16.vlgmr.msra.gmra.mxu0 %vm410_vm0, %v1331_v4  ;;  %1307 = vmatmul.msk.bf16.vlgmr.msra.gmra.mxu1 %vm410_vm0, %v1339_v5 }
  0x12   :  { %1315 = vmatmul.msk.bf16.vlgmr.msra.gmra.mxu2 %vm410_vm0, %v1347_v8  ;;  %1323 = vmatmul.msk.bf16.vlgmr.msra.gmra.mxu3 %vm410_vm0, %v1355_v15 }
  0x21   :  { %1300 = vmatmul.msk.bf16.gmra.mxu0 %vm410_vm0, %v1332_v6  ;;  %1308 = vmatmul.msk.bf16.gmra.mxu1 %vm410_vm0, %v1340_v7 }
  0x22   :  { %1316 = vmatmul.msk.bf16.gmra.mxu2 %vm410_vm0, %v1348_v11  ;;  %1324 = vmatmul.msk.bf16.gmra.mxu3 %vm410_vm0, %v1356_v19 }
  0x31   :  { %1301 = vmatmul.msk.bf16.gmra.mxu0 %vm410_vm0, %v1333_v9  ;;  %1309 = vmatmul.msk.bf16.gmra.mxu1 %vm410_vm0, %v1341_v10 }
  0x32   :  { %1317 = vmatmul.msk.bf16.gmra.mxu2 %vm410_vm0, %v1349_v14  ;;  %1325 = vmatmul.msk.bf16.gmra.mxu3 %vm410_vm0, %v1357_v23 }
  0x41   :  { %1302 = vmatmul.msk.bf16.gmra.mxu0 %vm410_vm0, %v1334_v12  ;;  %1310 = vmatmul.msk.bf16.gmra.mxu1 %vm410_vm0, %v1342_v13 }
  0x42   :  { %1318 = vmatmul.msk.bf16.gmra.mxu2 %vm410_vm0, %v1350_v18  ;;  %1326 = vmatmul.msk.bf16.gmra.mxu3 %vm410_vm0, %v1358_v27 }
  0x51   :  { %1303 = vmatmul.msk.bf16.gmra.mxu0 %vm410_vm0, %v1335_v16  ;;  %1311 = vmatmul.msk.bf16.gmra.mxu1 %vm410_vm0, %v1343_v17 }
  0x52   :  { %1319 = vmatmul.msk.bf16.gmra.mxu2 %vm410_vm0, %v1351_v22  ;;  %1327 = vmatmul.msk.bf16.gmra.mxu3 %vm410_vm0, %v1359_v31 }
  0x61   :  { %1304 = vmatmul.msk.bf16.gmra.mxu0 %vm410_vm0, %v1336_v20  ;;  %1312 = vmatmul.msk.bf16.gmra.mxu1 %vm410_vm0, %v1344_v21 }
  0x62   :  { %1320 = vmatmul.msk.bf16.gmra.mxu2 %vm410_vm0, %v1352_v26  ;;  %1328 = vmatmul.msk.bf16.gmra.mxu3 %vm410_vm0, %v1360_v35 }
  0x71   :  { %1305 = vmatmul.msk.bf16.gmra.mxu0 %vm410_vm0, %v1337_v24  ;;  %1313 = vmatmul.msk.bf16.gmra.mxu1 %vm410_vm0, %v1345_v25 }
  0x72   :  { %1321 = vmatmul.msk.bf16.gmra.mxu2 %vm410_vm0, %v1353_v30  ;;  %1329 = vmatmul.msk.bf16.gmra.mxu3 %vm410_vm0, %v1361_v47 }
  0x81   :  { %1306 = vmatmul.msk.bf16.gmra.mxu0 %vm410_vm0, %v1338_v28  ;;  %1314 = vmatmul.msk.bf16.gmra.mxu1 %vm410_vm0, %v1346_v29 }
  0x82   :  { %1322 = vmatmul.msk.bf16.gmra.mxu2 %vm410_vm0, %v1354_v34  ;;  %1330 = vmatmul.msk.bf16.gmra.mxu3 %vm410_vm0, %v1362_v60 }
  0x8e   :  { %v516_v32 = vpop.f32.mrf.mxu0  ;;  %v1530_v33 = vpop.f32.mrf.mxu1 }
  0x8f   :  { %871 = vst [vmem:[%s2052_s2] sm:$0xff] %v516_v32  ;;  %v1008_v38 = vmul.f32 %v516_v32, %v516_v32 }
  0x90   :  { %887 = vst [vmem:[%s2052_s2 + $0x80] sm:$0xff] %v1530_v33 }
  0x95   :  { %v1574_v52 = vpop.f32.mrf.mxu2  ;;  %v1644_v6 = vpop.f32.mrf.mxu3 }
  0x96   :  { %v518_v36 = vpop.f32.mrf.mxu0  ;;  %v1547_v37 = vpop.f32.mrf.mxu1  ;;  %903 = vst [vmem:[%s2052_s2 + $0x100] sm:$0xff] %v1574_v52 }
  0x97   :  { %872 = vst [vmem:[%s2052_s2 + $0x8] sm:$0xff] %v518_v36  ;;  %v936_v39 = vadd.f32 %v518_v36, %v516_v32  ;;  %v1009_v40 = vmul.f32 %v518_v36, %v518_v36 }
  0x98   :  { %888 = vst [vmem:[%s2052_s2 + $0x88] sm:$0xff] %v1547_v37 }
  0x99   :  { %v1072_v41 = vadd.f32 %v1009_v40, %v1008_v38  ;;  %919 = vst [vmem:[%s2052_s2 + $0x180] sm:$0xff] %v1644_v6 }
  0x9d   :  { %v1591_v58 = vpop.f32.mrf.mxu2  ;;  %v1665_v10 = vpop.f32.mrf.mxu3 }
  0x9e   :  { %v521_v42 = vpop.f32.mrf.mxu0  ;;  %v1556_v43 = vpop.f32.mrf.mxu1  ;;  %904 = vst [vmem:[%s2052_s2 + $0x108] sm:$0xff] %v1591_v58 }
  0x9f   :  { %873 = vst [vmem:[%s2052_s2 + $0x10] sm:$0xff] %v521_v42  ;;  %v937_v44 = vadd.f32 %v936_v39, %v521_v42  ;;  %v1010_v45 = vmul.f32 %v521_v42, %v521_v42 }
  0xa0   :  { %889 = vst [vmem:[%s2052_s2 + $0x90] sm:$0xff] %v1556_v43 }
  0xa1   :  { %v1073_v46 = vadd.f32 %v1072_v41, %v1010_v45  ;;  %920 = vst [vmem:[%s2052_s2 + $0x188] sm:$0xff] %v1665_v10 }
  0xa5   :  { %v1612_v63 = vpop.f32.mrf.mxu2  ;;  %v1686_v14 = vpop.f32.mrf.mxu3 }
  0xa6   :  { %v523_v48 = vpop.f32.mrf.mxu0  ;;  %v1569_v49 = vpop.f32.mrf.mxu1  ;;  %905 = vst [vmem:[%s2052_s2 + $0x110] sm:$0xff] %v1612_v63 }
  0xa7   :  { %874 = vst [vmem:[%s2052_s2 + $0x18] sm:$0xff] %v523_v48  ;;  %v938_v50 = vadd.f32 %v937_v44, %v523_v48  ;;  %v1011_v51 = vmul.f32 %v523_v48, %v523_v48 }
  0xa8   :  { %890 = vst [vmem:[%s2052_s2 + $0x98] sm:$0xff] %v1569_v49 }
  0xa9   :  { %v1074_v53 = vadd.f32 %v1073_v46, %v1011_v51  ;;  %921 = vst [vmem:[%s2052_s2 + $0x190] sm:$0xff] %v1686_v14 }
  0xad   :  { %v1627_v2 = vpop.f32.mrf.mxu2  ;;  %v1707_v18 = vpop.f32.mrf.mxu3 }
  0xae   :  { %v526_v54 = vpop.f32.mrf.mxu0  ;;  %v1584_v55 = vpop.f32.mrf.mxu1  ;;  %906 = vst [vmem:[%s2052_s2 + $0x118] sm:$0xff] %v1627_v2 }
  0xaf   :  { %875 = vst [vmem:[%s2052_s2 + $0x20] sm:$0xff] %v526_v54  ;;  %v1589_v56 = vadd.f32 %v938_v50, %v526_v54  ;;  %v1012_v57 = vmul.f32 %v526_v54, %v526_v54 }
  0xb0   :  { %891 = vst [vmem:[%s2052_s2 + $0xa0] sm:$0xff] %v1584_v55 }
  0xb1   :  { %v1597_v59 = vadd.f32 %v1074_v53, %v1012_v57  ;;  %922 = vst [vmem:[%s2052_s2 + $0x198] sm:$0xff] %v1707_v18 }
  0xb5   :  { %v1642_v5 = vpop.f32.mrf.mxu2  ;;  %v1728_v22 = vpop.f32.mrf.mxu3 }
  0xb6   :  { %v528_v61 = vpop.f32.mrf.mxu0  ;;  %v1607_v62 = vpop.f32.mrf.mxu1  ;;  %907 = vst [vmem:[%s2052_s2 + $0x120] sm:$0xff] %v1642_v5 }
  0xb7   :  { %876 = vst [vmem:[%s2052_s2 + $0x28] sm:$0xff] %v528_v61  ;;  %v1013_v27 = vmul.f32 %v528_v61, %v528_v61  ;;  %v940_v28 = vadd.f32 %v1589_v56, %v528_v61 }
  0xb8   :  { %892 = vst [vmem:[%s2052_s2 + $0xa8] sm:$0xff] %v1607_v62 }
  0xb9   :  { %923 = vst [vmem:[%s2052_s2 + $0x1a0] sm:$0xff] %v1728_v22  ;;  %v1076_v30 = vadd.f32 %v1597_v59, %v1013_v27 }
  0xbd   :  { %v1663_v9 = vpop.f32.mrf.mxu2  ;;  %v1749_v26 = vpop.f32.mrf.mxu3 }
  0xbe   :  { %v531_v0 = vpop.f32.mrf.mxu0  ;;  %v1622_v1 = vpop.f32.mrf.mxu1  ;;  %908 = vst [vmem:[%s2052_s2 + $0x128] sm:$0xff] %v1663_v9 }
  0xbf   :  { %877 = vst [vmem:[%s2052_s2 + $0x30] sm:$0xff] %v531_v0  ;;  %v1014_v29 = vmul.f32 %v531_v0, %v531_v0  ;;  %v941_v31 = vadd.f32 %v940_v28, %v531_v0 }
  0xc0   :  { %893 = vst [vmem:[%s2052_s2 + $0xb0] sm:$0xff] %v1622_v1 }
  0xc1   :  { %924 = vst [vmem:[%s2052_s2 + $0x1a8] sm:$0xff] %v1749_v26  ;;  %v1077_v36 = vadd.f32 %v1076_v30, %v1014_v29 }
  0xc5   :  { %v1684_v13 = vpop.f32.mrf.mxu2  ;;  %v1772_v41 = vpop.f32.mrf.mxu3 }
  0xc6   :  { %v533_v3 = vpop.f32.mrf.mxu0  ;;  %v1637_v4 = vpop.f32.mrf.mxu1  ;;  %909 = vst [vmem:[%s2052_s2 + $0x130] sm:$0xff] %v1684_v13 }
  0xc7   :  { %878 = vst [vmem:[%s2052_s2 + $0x38] sm:$0xff] %v533_v3  ;;  %v1015_v32 = vmul.f32 %v533_v3, %v533_v3  ;;  %v942_v38 = vadd.f32 %v941_v31, %v533_v3 }
  0xc8   :  { %894 = vst [vmem:[%s2052_s2 + $0xb8] sm:$0xff] %v1637_v4 }
  0xc9   :  { %v1078_v42 = vadd.f32 %v1077_v36, %v1015_v32  ;;  %925 = vst [vmem:[%s2052_s2 + $0x1b0] sm:$0xff] %v1772_v41 }
  0xcd   :  { %v1705_v17 = vpop.f32.mrf.mxu2  ;;  %v1793_v0 = vpop.f32.mrf.mxu3 }
  0xce   :  { %v536_v7 = vpop.f32.mrf.mxu0  ;;  %v1658_v8 = vpop.f32.mrf.mxu1  ;;  %910 = vst [vmem:[%s2052_s2 + $0x138] sm:$0xff] %v1705_v17 }
  0xcf   :  { %879 = vst [vmem:[%s2052_s2 + $0x40] sm:$0xff] %v536_v7  ;;  %v1016_v39 = vmul.f32 %v536_v7, %v536_v7  ;;  %v943_v44 = vadd.f32 %v942_v38, %v536_v7 }
  0xd0   :  { %895 = vst [vmem:[%s2052_s2 + $0xc0] sm:$0xff] %v1658_v8 }
  0xd1   :  { %v1079_v46 = vadd.f32 %v1078_v42, %v1016_v39  ;;  %926 = vst [vmem:[%s2052_s2 + $0x1b8] sm:$0xff] %v1793_v0 }
  0xd5   :  { %v1726_v21 = vpop.f32.mrf.mxu2  ;;  %v1814_v39 = vpop.f32.mrf.mxu3 }
  0xd6   :  { %v538_v11 = vpop.f32.mrf.mxu0  ;;  %v1679_v12 = vpop.f32.mrf.mxu1  ;;  %911 = vst [vmem:[%s2052_s2 + $0x140] sm:$0xff] %v1726_v21 }
  0xd7   :  { %880 = vst [vmem:[%s2052_s2 + $0x48] sm:$0xff] %v538_v11  ;;  %v1017_v45 = vmul.f32 %v538_v11, %v538_v11  ;;  %v944_v47 = vadd.f32 %v943_v44, %v538_v11 }
  0xd8   :  { %896 = vst [vmem:[%s2052_s2 + $0xc8] sm:$0xff] %v1679_v12 }
  0xd9   :  { %v1080_v50 = vadd.f32 %v1079_v46, %v1017_v45  ;;  %927 = vst [vmem:[%s2052_s2 + $0x1c0] sm:$0xff] %v1814_v39  ;;  %v1025_v45 = vmul.f32 %v1547_v37, %v1547_v37 }
  0xdd   :  { %v1747_v25 = vpop.f32.mrf.mxu2 }
  0xde   :  { %v541_v15 = vpop.f32.mrf.mxu0  ;;  %v1700_v16 = vpop.f32.mrf.mxu1  ;;  %912 = vst [vmem:[%s2052_s2 + $0x148] sm:$0xff] %v1747_v25 }
  0xdf   :  { %881 = vst [vmem:[%s2052_s2 + $0x50] sm:$0xff] %v541_v15  ;;  %v1018_v48 = vmul.f32 %v541_v15, %v541_v15  ;;  %v945_v51 = vadd.f32 %v944_v47, %v541_v15 }
  0xe0   :  { %897 = vst [vmem:[%s2052_s2 + $0xd0] sm:$0xff] %v1700_v16 }
  0xe1   :  { %v1081_v57 = vadd.f32 %v1080_v50, %v1018_v48 }
  0xe5   :  { %v1770_v40 = vpop.f32.mrf.mxu2 }
  0xe6   :  { %v543_v19 = vpop.f32.mrf.mxu0  ;;  %v1721_v20 = vpop.f32.mrf.mxu1  ;;  %913 = vst [vmem:[%s2052_s2 + $0x150] sm:$0xff] %v1770_v40 }
  0xe7   :  { %882 = vst [vmem:[%s2052_s2 + $0x58] sm:$0xff] %v543_v19  ;;  %v1019_v53 = vmul.f32 %v543_v19, %v543_v19  ;;  %v946_v59 = vadd.f32 %v945_v51, %v543_v19  ;;  %v1027_v51 = vmul.f32 %v1569_v49, %v1569_v49 }
  0xe8   :  { %898 = vst [vmem:[%s2052_s2 + $0xd8] sm:$0xff] %v1721_v20 }
  0xe9   :  { %v1082_v3 = vadd.f32 %v1081_v57, %v1019_v53 }
  0xed   :  { %v1791_v61 = vpop.f32.mrf.mxu2 }
  0xee   :  { %v546_v23 = vpop.f32.mrf.mxu0  ;;  %v1742_v24 = vpop.f32.mrf.mxu1  ;;  %914 = vst [vmem:[%s2052_s2 + $0x158] sm:$0xff] %v1791_v61 }
  0xef   :  { %883 = vst [vmem:[%s2052_s2 + $0x60] sm:$0xff] %v546_v23  ;;  %v1020_v60 = vmul.f32 %v546_v23, %v546_v23  ;;  %v947_v7 = vadd.f32 %v946_v59, %v546_v23  ;;  %v1842_v59 = vpop.f32.mrf.mxu3 }
  0xf0   :  { %899 = vst [vmem:[%s2052_s2 + $0xe0] sm:$0xff] %v1742_v24 }
  0xf1   :  { %v1083_v15 = vadd.f32 %v1082_v3, %v1020_v60  ;;  %928 = vst [vmem:[%s2052_s2 + $0x1c8] sm:$0xff] %v1842_v59 }
  0xf5   :  { %v1812_v38 = vpop.f32.mrf.mxu2 }
  0xf6   :  { %v548_v34 = vpop.f32.mrf.mxu0  ;;  %v1765_v35 = vpop.f32.mrf.mxu1  ;;  %915 = vst [vmem:[%s2052_s2 + $0x160] sm:$0xff] %v1812_v38 }
  0xf7   :  { %884 = vst [vmem:[%s2052_s2 + $0x68] sm:$0xff] %v548_v34  ;;  %v1021_v11 = vmul.f32 %v548_v34, %v548_v34  ;;  %v948_v19 = vadd.f32 %v947_v7, %v548_v34  ;;  %v1024_v34 = vmul.f32 %v1530_v33, %v1530_v33 }
  0xf8   :  { %900 = vst [vmem:[%s2052_s2 + $0xe8] sm:$0xff] %v1765_v35 }
  0xf9   :  { %v1084_v28 = vadd.f32 %v1083_v15, %v1021_v11  ;;  %v1030_v11 = vmul.f32 %v1622_v1, %v1622_v1 }
  0xfd   :  { %v1840_v57 = vpop.f32.mrf.mxu2 }
  0xfe   :  { %v551_v54 = vpop.f32.mrf.mxu0  ;;  %v1786_v56 = vpop.f32.mrf.mxu1  ;;  %916 = vst [vmem:[%s2052_s2 + $0x168] sm:$0xff] %v1840_v57 }
  0xff   :  { %885 = vst [vmem:[%s2052_s2 + $0x70] sm:$0xff] %v551_v54  ;;  %v1022_v27 = vmul.f32 %v551_v54, %v551_v54  ;;  %v949_v29 = vadd.f32 %v948_v19, %v551_v54 }
 0x100   :  { %901 = vst [vmem:[%s2052_s2 + $0xf0] sm:$0xff] %v1786_v56 }
 0x101   :  { %v1085_v23 = vadd.f32 %v1084_v28, %v1022_v27 }
 0x106   :  { %v553_v30 = vpop.f32.mrf.mxu0  ;;  %v1807_v31 = vpop.f32.mrf.mxu1 }
 0x107   :  { %886 = vst [vmem:[%s2052_s2 + $0x78] sm:$0xff] %v553_v30  ;;  %v950_v32 = vadd.f32 %v949_v29, %v553_v30  ;;  %v1023_v36 = vmul.f32 %v553_v30, %v553_v30  ;;  %v1864_v29 = vpop.f32.mrf.mxu2  ;;  %v1866_v30 = vpop.f32.mrf.mxu3 }
 0x108   :  { %902 = vst [vmem:[%s2052_s2 + $0xf8] sm:$0xff] %v1807_v31 }
 0x109   :  { %v951_v42 = vadd.f32 %v950_v32, %v1530_v33  ;;  %v1086_v44 = vadd.f32 %v1085_v23, %v1023_v36  ;;  %v1026_v33 = vmul.f32 %v1556_v43, %v1556_v43  ;;  %917 = vst [vmem:[%s2052_s2 + $0x170] sm:$0xff] %v1864_v29 }
 0x10a   :  { %929 = vst [vmem:[%s2052_s2 + $0x1d0] sm:$0xff] %v1866_v30 }
 0x10b   :  { %v952_v46 = vadd.f32 %v951_v42, %v1547_v37  ;;  %v1087_v47 = vadd.f32 %v1086_v44, %v1024_v34  ;;  %v1028_v37 = vmul.f32 %v1584_v55, %v1584_v55  ;;  %v1034_v34 = vmul.f32 %v1700_v16, %v1700_v16 }
 0x10d   :  { %v953_v48 = vadd.f32 %v952_v46, %v1556_v43  ;;  %v1088_v50 = vadd.f32 %v1087_v47, %v1025_v45 }
 0x10f   :  { %v954_v53 = vadd.f32 %v953_v48, %v1569_v49  ;;  %v1089_v54 = vadd.f32 %v1088_v50, %v1026_v33  ;;  %v1029_v49 = vmul.f32 %v1607_v62, %v1607_v62  ;;  %v1888_v47 = vpop.f32.mrf.mxu2  ;;  %v1890_v33 = vpop.f32.mrf.mxu3 }
 0x110   :  { %918 = vst [vmem:[%s2052_s2 + $0x178] sm:$0xff] %v1888_v47 }
 0x111   :  { %v955_v43 = vadd.f32 %v954_v53, %v1584_v55  ;;  %v1090_v60 = vadd.f32 %v1089_v54, %v1027_v51  ;;  %v1031_v55 = vmul.f32 %v1637_v4, %v1637_v4  ;;  %930 = vst [vmem:[%s2052_s2 + $0x1d8] sm:$0xff] %v1890_v33  ;;  %v1037_v51 = vmul.f32 %v1765_v35, %v1765_v35 }
 0x113   :  { %v956_v3 = vadd.f32 %v955_v43, %v1607_v62  ;;  %v1091_v7 = vadd.f32 %v1090_v60, %v1028_v37  ;;  %v1032_v62 = vmul.f32 %v1658_v8, %v1658_v8  ;;  %v1038_v37 = vmul.f32 %v1786_v56, %v1786_v56 }
 0x114   :  { %v1039_v60 = vmul.f32 %v1807_v31, %v1807_v31 }
 0x115   :  { %v1092_v15 = vadd.f32 %v1091_v7, %v1029_v49  ;;  %v957_v19 = vadd.f32 %v956_v3, %v1622_v1 }
 0x117   :  { %v958_v27 = vadd.f32 %v957_v19, %v1637_v4  ;;  %v1093_v28 = vadd.f32 %v1092_v15, %v1030_v11  ;;  %v1033_v4 = vmul.f32 %v1679_v12, %v1679_v12  ;;  %v1912_v49 = vpop.f32.mrf.mxu3 }
 0x118   :  { %931 = vst [vmem:[%s2052_s2 + $0x1e0] sm:$0xff] %v1912_v49 }
 0x119   :  { %v959_v1 = vadd.f32 %v958_v27, %v1658_v8  ;;  %v1094_v23 = vadd.f32 %v1093_v28, %v1031_v55  ;;  %v1035_v8 = vmul.f32 %v1721_v20, %v1721_v20  ;;  %v1043_v27 = vmul.f32 %v1627_v2, %v1627_v2 }
 0x11b   :  { %v960_v32 = vadd.f32 %v959_v1, %v1679_v12  ;;  %v1095_v36 = vadd.f32 %v1094_v23, %v1032_v62  ;;  %v1045_v23 = vmul.f32 %v1663_v9, %v1663_v9 }
 0x11d   :  { %v961_v42 = vadd.f32 %v960_v32, %v1700_v16  ;;  %v1096_v44 = vadd.f32 %v1095_v36, %v1033_v4  ;;  %v1036_v16 = vmul.f32 %v1742_v24, %v1742_v24  ;;  %v1046_v32 = vmul.f32 %v1684_v13, %v1684_v13 }
 0x11f   :  { %v962_v45 = vadd.f32 %v961_v42, %v1721_v20  ;;  %v1097_v46 = vadd.f32 %v1096_v44, %v1034_v34  ;;  %v1047_v42 = vmul.f32 %v1705_v17, %v1705_v17 }
 0x121   :  { %v963_v12 = vadd.f32 %v962_v45, %v1742_v24  ;;  %v1098_v48 = vadd.f32 %v1097_v46, %v1035_v8 }
 0x123   :  { %v1099_v20 = vadd.f32 %v1098_v48, %v1036_v16  ;;  %v964_v50 = vadd.f32 %v963_v12, %v1765_v35  ;;  %v1040_v35 = vmul.f32 %v1574_v52, %v1574_v52  ;;  %v1050_v16 = vmul.f32 %v1770_v40, %v1770_v40 }
 0x125   :  { %v1100_v53 = vadd.f32 %v1099_v20, %v1037_v51  ;;  %v965_v54 = vadd.f32 %v964_v50, %v1786_v56  ;;  %v1041_v56 = vmul.f32 %v1591_v58, %v1591_v58  ;;  %v1051_v51 = vmul.f32 %v1791_v61, %v1791_v61 }
 0x127   :  { %v1101_v43 = vadd.f32 %v1100_v53, %v1038_v37  ;;  %v966_v24 = vadd.f32 %v965_v54, %v1807_v31  ;;  %v1042_v31 = vmul.f32 %v1612_v63, %v1612_v63 }
 0x129   :  { %v967_v3 = vadd.f32 %v966_v24, %v1574_v52  ;;  %v1102_v7 = vadd.f32 %v1101_v43, %v1039_v60  ;;  %v1930_v52 = vpop.f32.mrf.mxu3 }
 0x12a   :  { %932 = vst [vmem:[%s2052_s2 + $0x1e8] sm:$0xff] %v1930_v52 }
 0x12b   :  { %v968_v11 = vadd.f32 %v967_v3, %v1591_v58  ;;  %v1103_v15 = vadd.f32 %v1102_v7, %v1040_v35  ;;  %v1044_v58 = vmul.f32 %v1642_v5, %v1642_v5  ;;  %v1054_v35 = vmul.f32 %v1864_v29, %v1864_v29 }
 0x12d   :  { %v969_v19 = vadd.f32 %v968_v11, %v1612_v63  ;;  %v1104_v55 = vadd.f32 %v1103_v15, %v1041_v56  ;;  %v1055_v56 = vmul.f32 %v1888_v47, %v1888_v47  ;;  %v1380_v11 = vmov 0.0  }
 0x12e   :  { %21 = vst [vmem:[%s2053_s3] sm:$0x1] %v1380_v11 }
 0x12f   :  { %v970_v28 = vadd.f32 %v969_v19, %v1627_v2  ;;  %v1105_v62 = vadd.f32 %v1104_v55, %v1042_v31  ;;  %22 = vst [vmem:[%s2054_s4] sm:$0x1] %v1380_v11  ;;  %v1058_v19 = vmul.f32 %v1686_v14, %v1686_v14 }
 0x131   :  { %v971_v1 = vadd.f32 %v970_v28, %v1642_v5  ;;  %v1106_v63 = vadd.f32 %v1105_v62, %v1043_v27  ;;  %v1948_v5 = vpop.f32.mrf.mxu3 }
 0x132   :  { %933 = vst [vmem:[%s2052_s2 + $0x1f0] sm:$0xff] %v1948_v5 }
 0x133   :  { %v972_v4 = vadd.f32 %v971_v1, %v1663_v9  ;;  %v1107_v2 = vadd.f32 %v1106_v63, %v1044_v58  ;;  %v1048_v9 = vmul.f32 %v1726_v21, %v1726_v21  ;;  %v1060_v58 = vmul.f32 %v1728_v22, %v1728_v22 }
 0x135   :  { %v1108_v36 = vadd.f32 %v1107_v2, %v1045_v23  ;;  %v973_v34 = vadd.f32 %v972_v4, %v1684_v13  ;;  %v1049_v13 = vmul.f32 %v1747_v25, %v1747_v25 }
 0x137   :  { %v974_v44 = vadd.f32 %v973_v34, %v1705_v17  ;;  %v1109_v8 = vadd.f32 %v1108_v36, %v1046_v32 }
 0x139   :  { %v975_v45 = vadd.f32 %v974_v44, %v1726_v21  ;;  %v1110_v46 = vadd.f32 %v1109_v8, %v1047_v42  ;;  %v1966_v21 = vpop.f32.mrf.mxu3 }
 0x13a   :  { %934 = vst [vmem:[%s2052_s2 + $0x1f8] sm:$0xff] %v1966_v21 }
 0x13b   :  { %v976_v12 = vadd.f32 %v975_v45, %v1747_v25  ;;  %v1111_v17 = vadd.f32 %v1110_v46, %v1048_v9 }
 0x13d   :  { %v977_v48 = vadd.f32 %v976_v12, %v1770_v40  ;;  %v1112_v20 = vadd.f32 %v1111_v17, %v1049_v13  ;;  %v1052_v40 = vmul.f32 %v1812_v38, %v1812_v38  ;;  %v1067_v13 = vmul.f32 %v1890_v33, %v1890_v33 }
 0x13f   :  { %v978_v50 = vadd.f32 %v977_v48, %v1791_v61  ;;  %v1113_v53 = vadd.f32 %v1112_v20, %v1050_v16  ;;  %v1053_v61 = vmul.f32 %v1840_v57, %v1840_v57  ;;  %v1068_v16 = vmul.f32 %v1912_v49, %v1912_v49 }
 0x140   :  { %v1069_v20 = vmul.f32 %v1930_v52, %v1930_v52 }
 0x141   :  { %v1114_v25 = vadd.f32 %v1113_v53, %v1051_v51  ;;  %v979_v54 = vadd.f32 %v978_v50, %v1812_v38  ;;  %v1056_v38 = vmul.f32 %v1644_v6, %v1644_v6  ;;  %v1070_v51 = vmul.f32 %v1948_v5, %v1948_v5 }
 0x143   :  { %v1115_v37 = vadd.f32 %v1114_v25, %v1052_v40  ;;  %v980_v43 = vadd.f32 %v979_v54, %v1840_v57  ;;  %v1071_v25 = vmul.f32 %v1966_v21, %v1966_v21 }
 0x145   :  { %v1116_v24 = vadd.f32 %v1115_v37, %v1053_v61  ;;  %v981_v60 = vadd.f32 %v980_v43, %v1864_v29  ;;  %v1057_v29 = vmul.f32 %v1665_v10, %v1665_v10 }
 0x147   :  { %v1117_v3 = vadd.f32 %v1116_v24, %v1054_v35  ;;  %v982_v7 = vadd.f32 %v981_v60, %v1888_v47 }
 0x149   :  { %v983_v57 = vadd.f32 %v982_v7, %v1644_v6  ;;  %v1118_v15 = vadd.f32 %v1117_v3, %v1055_v56  ;;  %v1059_v6 = vmul.f32 %v1707_v18, %v1707_v18 }
 0x14b   :  { %v984_v47 = vadd.f32 %v983_v57, %v1665_v10  ;;  %v1119_v31 = vadd.f32 %v1118_v15, %v1056_v38  ;;  %v1061_v10 = vmul.f32 %v1749_v26, %v1749_v26 }
 0x14d   :  { %v985_v55 = vadd.f32 %v984_v47, %v1686_v14  ;;  %v1120_v27 = vadd.f32 %v1119_v31, %v1057_v29  ;;  %v1062_v14 = vmul.f32 %v1772_v41, %v1772_v41 }
 0x14f   :  { %v986_v28 = vadd.f32 %v985_v55, %v1707_v18  ;;  %v1121_v62 = vadd.f32 %v1120_v27, %v1058_v19  ;;  %v1063_v18 = vmul.f32 %v1793_v0, %v1793_v0 }
 0x151   :  { %v987_v1 = vadd.f32 %v986_v28, %v1728_v22  ;;  %v1122_v63 = vadd.f32 %v1121_v62, %v1059_v6  ;;  %v1064_v22 = vmul.f32 %v1814_v39, %v1814_v39 }
 0x153   :  { %v988_v23 = vadd.f32 %v987_v1, %v1749_v26  ;;  %v1123_v4 = vadd.f32 %v1122_v63, %v1060_v58  ;;  %v1065_v26 = vmul.f32 %v1842_v59, %v1842_v59 }
 0x155   :  { %v1124_v2 = vadd.f32 %v1123_v4, %v1061_v10  ;;  %v989_v32 = vadd.f32 %v988_v23, %v1772_v41  ;;  %v1066_v41 = vmul.f32 %v1866_v30, %v1866_v30 }
 0x157   :  { %v990_v36 = vadd.f32 %v989_v32, %v1793_v0  ;;  %v1125_v34 = vadd.f32 %v1124_v2, %v1062_v14 }
 0x159   :  { %v991_v42 = vadd.f32 %v990_v36, %v1814_v39  ;;  %v1126_v44 = vadd.f32 %v1125_v34, %v1063_v18 }
 0x15b   :  { %v992_v8 = vadd.f32 %v991_v42, %v1842_v59  ;;  %v1127_v9 = vadd.f32 %v1126_v44, %v1064_v22 }
 0x15d   :  { %v993_v45 = vadd.f32 %v992_v8, %v1866_v30  ;;  %v1128_v46 = vadd.f32 %v1127_v9, %v1065_v26 }
 0x15f   :  { %v994_v0 = vadd.f32 %v993_v45, %v1890_v33  ;;  %v1129_v12 = vadd.f32 %v1128_v46, %v1066_v41 }
 0x161   :  { %v1130_v39 = vadd.f32 %v1129_v12, %v1067_v13  ;;  %v995_v17 = vadd.f32 %v994_v0, %v1912_v49 }
 0x163   :  { %v1131_v59 = vadd.f32 %v1130_v39, %v1068_v16  ;;  %v996_v48 = vadd.f32 %v995_v17, %v1930_v52 }
 0x165   :  { %v1132_v30 = vadd.f32 %v1131_v59, %v1069_v20  ;;  %v997_v50 = vadd.f32 %v996_v48, %v1948_v5  ;;  %v935_v5 = vld [vmem:[%s2053_s3] sm:$0x1] }
 0x167   :  { %v1133_v33 = vadd.f32 %v1132_v30, %v1070_v51  ;;  %v998_v53 = vadd.f32 %v997_v50, %v1966_v21  ;;  %v1007_v21 = vld [vmem:[%s2054_s4] sm:$0x1] }
 0x169   :  { %v999_v54 = vrot.slane %v998_v53, 4  ;;  %v1134_v49 = vadd.f32 %v1133_v33, %v1071_v25 }
 0x16b   :  { %v1000_v40 = vadd.f32 %v999_v54, %v998_v53  ;;  %v1135_v37 = vrot.slane %v1134_v49, 4 }
 0x16d   :  { %v1001_v43 = vrot.slane %v1000_v40, 2  ;;  %v1136_v61 = vadd.f32 %v1135_v37, %v1134_v49 }
 0x16f   :  { %v1002_v24 = vadd.f32 %v1001_v43, %v1000_v40  ;;  %v1137_v52 = vrot.slane %v1136_v61, 2 }
 0x171   :  { %v1003_v60 = vrot.slane %v1002_v24, 1  ;;  %v1138_v35 = vadd.f32 %v1137_v52, %v1136_v61 }
 0x173   :  { %v1004_v3 = vadd.f32 %v1003_v60, %v1002_v24  ;;  %v1139_v7 = vrot.slane %v1138_v35, 1 }
 0x175   :  { %v1005_v56 = vadd.f32 %v1004_v3, %v935_v5  ;;  %v1140_v11 = vadd.f32 %v1139_v7, %v1138_v35 }
 0x177   :  { %1006 = vst [vmem:[%s2053_s3] sm:$0x1] %v1005_v56  ;;  %v1141_v38 = vadd.f32 %v1140_v11, %v1007_v21 }
 0x179   :  { %1142 = vst [vmem:[%s2054_s4] sm:$0x1] %v1141_v38 }

// kernel: _lambda_.15
= control target key start
LH: loop header
LB: loop body
LE: loop exit
PB: predicated region body
PF: predicated region fallthrough
CT: control target
= control target key end

     0   :  { %s1064_s0 = inlined_call_operand.vmem [shape: f32[512,128], index: 0, kind: input, shape index: {}]   ;;  %s1065_s1 = inlined_call_operand.vmem [shape: f32[2,128], index: 1, kind: input, shape index: {}]   ;;  %s1066_s2 = inlined_call_operand.vmem [shape: f32[512,128], index: 2, kind: input, shape index: {}]   ;;  %s1067_s3 = inlined_call_operand.hbm [shape: f32[512,128], index: 3, kind: output, shape index: {}]  }
   0x1   :  { %v15_v0 = vld [vmem:[%s1064_s0] sm:$0xff]  ;;  %v16_v4 = vld [vmem:[%s1064_s0 + $0x8] sm:$0xff]  ;;  %v17_v5 = vld [vmem:[%s1064_s0 + $0x10] sm:$0xff] }
   0x2   :  { %v545_v1 = vld [vmem:[%s1065_s1] ss:$0 sm:$0xff]  ;;  %v550_v2 = vld [vmem:[%s1065_s1 + $0x1] ss:$0 sm:$0xff]  ;;  %v212_v8 = vld [vmem:[%s1066_s2 + $0x8] sm:$0xff] }
   0x3   :  { %v81_v3 = vmul.f32 %v545_v1, %v15_v0  ;;  %v211_v6 = vld [vmem:[%s1066_s2] sm:$0xff]  ;;  %v82_v7 = vmul.f32 %v545_v1, %v16_v4  ;;  %v83_v9 = vmul.f32 %v545_v1, %v17_v5  ;;  %v18_v10 = vld [vmem:[%s1064_s0 + $0x18] sm:$0xff]  ;;  %v213_v12 = vld [vmem:[%s1066_s2 + $0x10] sm:$0xff] }
   0x4   :  { %v84_v13 = vmul.f32 %v545_v1, %v18_v10  ;;  %v19_v14 = vld [vmem:[%s1064_s0 + $0x20] sm:$0xff]  ;;  %v20_v15 = vld [vmem:[%s1064_s0 + $0x28] sm:$0xff]  ;;  %v214_v18 = vld [vmem:[%s1066_s2 + $0x18] sm:$0xff] }
   0x5   :  { %v147_v11 = vadd.f32 %v550_v2, %v81_v3  ;;  %v148_v16 = vadd.f32 %v550_v2, %v82_v7  ;;  %v149_v17 = vadd.f32 %v550_v2, %v83_v9  ;;  %v85_v19 = vmul.f32 %v545_v1, %v19_v14  ;;  %v21_v21 = vld [vmem:[%s1064_s0 + $0x30] sm:$0xff]  ;;  %v215_v24 = vld [vmem:[%s1066_s2 + $0x20] sm:$0xff]  ;;  %v216_v25 = vld [vmem:[%s1066_s2 + $0x28] sm:$0xff] }
   0x6   :  { %v86_v20 = vmul.f32 %v545_v1, %v20_v15  ;;  %v150_v23 = vadd.f32 %v550_v2, %v84_v13  ;;  %v87_v26 = vmul.f32 %v545_v1, %v21_v21  ;;  %v22_v27 = vld [vmem:[%s1064_s0 + $0x38] sm:$0xff]  ;;  %v217_v32 = vld [vmem:[%s1066_s2 + $0x30] sm:$0xff]  ;;  %v23_v33 = vld [vmem:[%s1064_s0 + $0x40] sm:$0xff] }
   0x7   :  { %v275_v22 = vadd.f32 %v211_v6, %v147_v11  ;;  %v276_v28 = vadd.f32 %v212_v8, %v148_v16  ;;  %v277_v29 = vadd.f32 %v213_v12, %v149_v17  ;;  %v151_v30 = vadd.f32 %v550_v2, %v85_v19  ;;  %v24_v38 = vld [vmem:[%s1064_s0 + $0x48] sm:$0xff]  ;;  %v25_v39 = vld [vmem:[%s1064_s0 + $0x50] sm:$0xff]  ;;  %v218_v44 = vld [vmem:[%s1066_s2 + $0x38] sm:$0xff] }
   0x8   :  { %v152_v31 = vadd.f32 %v550_v2, %v86_v20  ;;  %v278_v35 = vadd.f32 %v214_v18, %v150_v23  ;;  %v153_v36 = vadd.f32 %v550_v2, %v87_v26  ;;  %v88_v37 = vmul.f32 %v545_v1, %v22_v27  ;;  %v26_v45 = vld [vmem:[%s1064_s0 + $0x58] sm:$0xff]  ;;  %v27_v50 = vld [vmem:[%s1064_s0 + $0x60] sm:$0xff]  ;;  %v28_v51 = vld [vmem:[%s1064_s0 + $0x68] sm:$0xff] }
   0x9   :  { %v339_v34 = vmax.f32 %v275_v22, 0.0  ;;  %v340_v40 = vmax.f32 %v276_v28, 0.0  ;;  %v341_v41 = vmax.f32 %v277_v29, 0.0  ;;  %v279_v42 = vadd.f32 %v215_v24, %v151_v30  ;;  %v219_v54 = vld [vmem:[%s1066_s2 + $0x40] sm:$0xff]  ;;  %v29_v57 = vld [vmem:[%s1064_s0 + $0x70] sm:$0xff]  ;;  %v220_v61 = vld [vmem:[%s1066_s2 + $0x48] sm:$0xff] }
   0xa   :  { %v280_v43 = vadd.f32 %v216_v25, %v152_v31  ;;  %v342_v46 = vmax.f32 %v278_v35, 0.0  ;;  %v281_v47 = vadd.f32 %v217_v32, %v153_v36  ;;  %v154_v48 = vadd.f32 %v550_v2, %v88_v37  ;;  %v221_v62 = vld [vmem:[%s1066_s2 + $0x50] sm:$0xff]  ;;  %v222_v4 = vld [vmem:[%s1066_s2 + $0x58] sm:$0xff]  ;;  %v223_v11 = vld [vmem:[%s1066_s2 + $0x60] sm:$0xff] }
   0xb   :  { %403 = vst [vmem:[#allocation2] sm:$0xff] %v339_v34  ;;  %v89_v49 = vmul.f32 %v545_v1, %v23_v33  ;;  %v343_v52 = vmax.f32 %v279_v42, 0.0  ;;  %v90_v55 = vmul.f32 %v545_v1, %v24_v38  ;;  %v91_v56 = vmul.f32 %v545_v1, %v25_v39  ;;  %v30_v7 = vld [vmem:[%s1064_s0 + $0x78] sm:$0xff]  ;;  %v224_v12 = vld [vmem:[%s1066_s2 + $0x68] sm:$0xff]  ;;  %v225_v18 = vld [vmem:[%s1066_s2 + $0x70] sm:$0xff] }
   0xc   :  { %404 = vst [vmem:[#allocation2 + $0x8] sm:$0xff] %v340_v40  ;;  %v344_v53 = vmax.f32 %v280_v43, 0.0  ;;  %v345_v58 = vmax.f32 %v281_v47, 0.0  ;;  %v282_v59 = vadd.f32 %v218_v44, %v154_v48  ;;  %v92_v63 = vmul.f32 %v545_v1, %v26_v45  ;;  %v31_v19 = vld [vmem:[%s1064_s0 + $0x80] sm:$0xff]  ;;  %v32_v24 = vld [vmem:[%s1064_s0 + $0x88] sm:$0xff]  ;;  %v33_v25 = vld [vmem:[%s1064_s0 + $0x90] sm:$0xff] }
   0xd   :  { %405 = vst [vmem:[#allocation2 + $0x10] sm:$0xff] %v341_v41  ;;  %v155_v60 = vadd.f32 %v550_v2, %v89_v49  ;;  %v156_v0 = vadd.f32 %v550_v2, %v90_v55  ;;  %v157_v3 = vadd.f32 %v550_v2, %v91_v56  ;;  %v93_v5 = vmul.f32 %v545_v1, %v27_v50  ;;  %v226_v30 = vld [vmem:[%s1066_s2 + $0x78] sm:$0xff]  ;;  %v35_v36 = vld [vmem:[%s1064_s0 + $0xa0] sm:$0xff]  ;;  %v36_v37 = vld [vmem:[%s1064_s0 + $0xa8] sm:$0xff] }
   0xe   :  { %406 = vst [vmem:[#allocation2 + $0x18] sm:$0xff] %v342_v46  ;;  %v94_v6 = vmul.f32 %v545_v1, %v28_v51  ;;  %v346_v8 = vmax.f32 %v282_v59, 0.0  ;;  %v158_v10 = vadd.f32 %v550_v2, %v92_v63  ;;  %v95_v13 = vmul.f32 %v545_v1, %v29_v57  ;;  %v34_v31 = vld [vmem:[%s1064_s0 + $0x98] sm:$0xff]  ;;  %v227_v40 = vld [vmem:[%s1066_s2 + $0x80] sm:$0xff]  ;;  %v37_v43 = vld [vmem:[%s1064_s0 + $0xb0] sm:$0xff] }
   0xf   :  { %407 = vst [vmem:[#allocation2 + $0x20] sm:$0xff] %v343_v52  ;;  %v283_v9 = vadd.f32 %v219_v54, %v155_v60  ;;  %v284_v14 = vadd.f32 %v220_v61, %v156_v0  ;;  %v285_v15 = vadd.f32 %v221_v62, %v157_v3  ;;  %v159_v16 = vadd.f32 %v550_v2, %v93_v5  ;;  %v228_v47 = vld [vmem:[%s1066_s2 + $0x88] sm:$0xff]  ;;  %v229_v48 = vld [vmem:[%s1066_s2 + $0x90] sm:$0xff]  ;;  %v230_v52 = vld [vmem:[%s1066_s2 + $0x98] sm:$0xff] }
  0x10   :  { %408 = vst [vmem:[#allocation2 + $0x28] sm:$0xff] %v344_v53  ;;  %v160_v17 = vadd.f32 %v550_v2, %v94_v6  ;;  %v286_v21 = vadd.f32 %v222_v4, %v158_v10  ;;  %v161_v22 = vadd.f32 %v550_v2, %v95_v13  ;;  %v96_v23 = vmul.f32 %v545_v1, %v30_v7  ;;  %v38_v55 = vld [vmem:[%s1064_s0 + $0xb8] sm:$0xff]  ;;  %v231_v59 = vld [vmem:[%s1066_s2 + $0xa0] sm:$0xff]  ;;  %v232_v60 = vld [vmem:[%s1066_s2 + $0xa8] sm:$0xff] }
  0x11   :  { %409 = vst [vmem:[#allocation2 + $0x30] sm:$0xff] %v345_v58  ;;  %v347_v20 = vmax.f32 %v283_v9, 0.0  ;;  %v348_v26 = vmax.f32 %v284_v14, 0.0  ;;  %v349_v27 = vmax.f32 %v285_v15, 0.0  ;;  %v287_v28 = vadd.f32 %v223_v11, %v159_v16  ;;  %v233_v4 = vld [vmem:[%s1066_s2 + $0xb0] sm:$0xff]  ;;  %v39_v5 = vld [vmem:[%s1064_s0 + $0xc0] sm:$0xff] }
  0x12   :  { %410 = vst [vmem:[#allocation2 + $0x38] sm:$0xff] %v346_v8  ;;  %v288_v29 = vadd.f32 %v224_v12, %v160_v17  ;;  %v350_v32 = vmax.f32 %v286_v21, 0.0  ;;  %v289_v33 = vadd.f32 %v225_v18, %v161_v22  ;;  %v162_v34 = vadd.f32 %v550_v2, %v96_v23  ;;  %v40_v10 = vld [vmem:[%s1064_s0 + $0xc8] sm:$0xff]  ;;  %v41_v11 = vld [vmem:[%s1064_s0 + $0xd0] sm:$0xff]  ;;  %v234_v16 = vld [vmem:[%s1066_s2 + $0xb8] sm:$0xff] }
  0x13   :  { %411 = vst [vmem:[#allocation2 + $0x40] sm:$0xff] %v347_v20  ;;  %v97_v35 = vmul.f32 %v545_v1, %v31_v19  ;;  %v351_v38 = vmax.f32 %v287_v28, 0.0  ;;  %v98_v41 = vmul.f32 %v545_v1, %v32_v24  ;;  %v99_v42 = vmul.f32 %v545_v1, %v33_v25  ;;  %v42_v17 = vld [vmem:[%s1064_s0 + $0xd8] sm:$0xff]  ;;  %v43_v22 = vld [vmem:[%s1064_s0 + $0xe0] sm:$0xff]  ;;  %v44_v23 = vld [vmem:[%s1064_s0 + $0xe8] sm:$0xff] }
  0x14   :  { %412 = vst [vmem:[#allocation2 + $0x48] sm:$0xff] %v348_v26  ;;  %v352_v39 = vmax.f32 %v288_v29, 0.0  ;;  %v353_v44 = vmax.f32 %v289_v33, 0.0  ;;  %v290_v45 = vadd.f32 %v226_v30, %v162_v34  ;;  %v100_v49 = vmul.f32 %v545_v1, %v34_v31  ;;  %v235_v26 = vld [vmem:[%s1066_s2 + $0xc0] sm:$0xff]  ;;  %v45_v29 = vld [vmem:[%s1064_s0 + $0xf0] sm:$0xff]  ;;  %v236_v33 = vld [vmem:[%s1066_s2 + $0xc8] sm:$0xff] }
  0x15   :  { %413 = vst [vmem:[#allocation2 + $0x50] sm:$0xff] %v349_v27  ;;  %v163_v46 = vadd.f32 %v550_v2, %v97_v35  ;;  %v164_v50 = vadd.f32 %v550_v2, %v98_v41  ;;  %v165_v51 = vadd.f32 %v550_v2, %v99_v42  ;;  %v101_v53 = vmul.f32 %v545_v1, %v35_v36  ;;  %v237_v34 = vld [vmem:[%s1066_s2 + $0xd0] sm:$0xff]  ;;  %v46_v41 = vld [vmem:[%s1064_s0 + $0xf8] sm:$0xff] }
  0x16   :  { %414 = vst [vmem:[#allocation2 + $0x58] sm:$0xff] %v350_v32  ;;  %v102_v54 = vmul.f32 %v545_v1, %v36_v37  ;;  %v354_v56 = vmax.f32 %v290_v45, 0.0  ;;  %v166_v58 = vadd.f32 %v550_v2, %v100_v49  ;;  %v103_v61 = vmul.f32 %v545_v1, %v37_v43  ;;  %v239_v45 = vld [vmem:[%s1066_s2 + $0xe0] sm:$0xff] }
  0x17   :  { %415 = vst [vmem:[#allocation2 + $0x60] sm:$0xff] %v351_v38  ;;  %v291_v57 = vadd.f32 %v227_v40, %v163_v46  ;;  %v292_v62 = vadd.f32 %v228_v47, %v164_v50  ;;  %v293_v63 = vadd.f32 %v229_v48, %v165_v51  ;;  %v167_v0 = vadd.f32 %v550_v2, %v101_v53  ;;  %v238_v38 = vld [vmem:[%s1066_s2 + $0xd8] sm:$0xff]  ;;  %v240_v46 = vld [vmem:[%s1066_s2 + $0xe8] sm:$0xff]  ;;  %v47_v53 = vld [vmem:[%s1064_s0 + $0x100] sm:$0xff] }
  0x18   :  { %416 = vst [vmem:[#allocation2 + $0x68] sm:$0xff] %v352_v39  ;;  %v168_v3 = vadd.f32 %v550_v2, %v102_v54  ;;  %v294_v7 = vadd.f32 %v230_v52, %v166_v58  ;;  %v169_v8 = vadd.f32 %v550_v2, %v103_v61  ;;  %v104_v9 = vmul.f32 %v545_v1, %v38_v55  ;;  %v241_v52 = vld [vmem:[%s1066_s2 + $0xf0] sm:$0xff]  ;;  %v48_v58 = vld [vmem:[%s1064_s0 + $0x108] sm:$0xff] }
  0x19   :  { %417 = vst [vmem:[#allocation2 + $0x70] sm:$0xff] %v353_v44  ;;  %v355_v6 = vmax.f32 %v291_v57, 0.0  ;;  %v356_v12 = vmax.f32 %v292_v62, 0.0  ;;  %v357_v13 = vmax.f32 %v293_v63, 0.0  ;;  %v295_v14 = vadd.f32 %v231_v59, %v167_v0  ;;  %v49_v59 = vld [vmem:[%s1064_s0 + $0x110] sm:$0xff]  ;;  %v242_v0 = vld [vmem:[%s1066_s2 + $0xf8] sm:$0xff] }
  0x1a   :  { %418 = vst [vmem:[#allocation2 + $0x78] sm:$0xff] %v354_v56  ;;  %v296_v15 = vadd.f32 %v232_v60, %v168_v3  ;;  %v358_v18 = vmax.f32 %v294_v7, 0.0  ;;  %v297_v19 = vadd.f32 %v233_v4, %v169_v8  ;;  %v170_v20 = vadd.f32 %v550_v2, %v104_v9  ;;  %v50_v3 = vld [vmem:[%s1064_s0 + $0x118] sm:$0xff]  ;;  %v51_v8 = vld [vmem:[%s1064_s0 + $0x120] sm:$0xff]  ;;  %v52_v9 = vld [vmem:[%s1064_s0 + $0x128] sm:$0xff] }
  0x1b   :  { %419 = vst [vmem:[#allocation2 + $0x80] sm:$0xff] %v355_v6  ;;  %v105_v21 = vmul.f32 %v545_v1, %v39_v5  ;;  %v359_v24 = vmax.f32 %v295_v14, 0.0  ;;  %v106_v27 = vmul.f32 %v545_v1, %v40_v10  ;;  %v107_v28 = vmul.f32 %v545_v1, %v41_v11 }
  0x1c   :  { %420 = vst [vmem:[#allocation2 + $0x88] sm:$0xff] %v356_v12  ;;  %v360_v25 = vmax.f32 %v296_v15, 0.0  ;;  %v361_v30 = vmax.f32 %v297_v19, 0.0  ;;  %v298_v31 = vadd.f32 %v234_v16, %v170_v20  ;;  %v108_v35 = vmul.f32 %v545_v1, %v42_v17  ;;  %v243_v12 = vld [vmem:[%s1066_s2 + $0x100] sm:$0xff]  ;;  %v53_v15 = vld [vmem:[%s1064_s0 + $0x130] sm:$0xff]  ;;  %v244_v19 = vld [vmem:[%s1066_s2 + $0x108] sm:$0xff] }
  0x1d   :  { %421 = vst [vmem:[#allocation2 + $0x90] sm:$0xff] %v357_v13  ;;  %v171_v32 = vadd.f32 %v550_v2, %v105_v21  ;;  %v172_v36 = vadd.f32 %v550_v2, %v106_v27  ;;  %v173_v37 = vadd.f32 %v550_v2, %v107_v28  ;;  %v109_v39 = vmul.f32 %v545_v1, %v43_v22  ;;  %v245_v20 = vld [vmem:[%s1066_s2 + $0x110] sm:$0xff]  ;;  %v54_v27 = vld [vmem:[%s1064_s0 + $0x138] sm:$0xff] }
  0x1e   :  { %422 = vst [vmem:[#allocation2 + $0x98] sm:$0xff] %v358_v18  ;;  %v110_v40 = vmul.f32 %v545_v1, %v44_v23  ;;  %v362_v42 = vmax.f32 %v298_v31, 0.0  ;;  %v174_v44 = vadd.f32 %v550_v2, %v108_v35  ;;  %v111_v47 = vmul.f32 %v545_v1, %v45_v29  ;;  %v247_v31 = vld [vmem:[%s1066_s2 + $0x120] sm:$0xff] }
  0x1f   :  { %423 = vst [vmem:[#allocation2 + $0xa0] sm:$0xff] %v359_v24  ;;  %v299_v43 = vadd.f32 %v235_v26, %v171_v32  ;;  %v300_v48 = vadd.f32 %v236_v33, %v172_v36  ;;  %v301_v49 = vadd.f32 %v237_v34, %v173_v37  ;;  %v175_v50 = vadd.f32 %v550_v2, %v109_v39  ;;  %v246_v24 = vld [vmem:[%s1066_s2 + $0x118] sm:$0xff]  ;;  %v248_v32 = vld [vmem:[%s1066_s2 + $0x128] sm:$0xff]  ;;  %v55_v39 = vld [vmem:[%s1064_s0 + $0x140] sm:$0xff] }
  0x20   :  { %424 = vst [vmem:[#allocation2 + $0xa8] sm:$0xff] %v360_v25  ;;  %v176_v51 = vadd.f32 %v550_v2, %v110_v40  ;;  %v302_v55 = vadd.f32 %v238_v38, %v174_v44  ;;  %v177_v56 = vadd.f32 %v550_v2, %v111_v47  ;;  %v112_v57 = vmul.f32 %v545_v1, %v46_v41  ;;  %v249_v38 = vld [vmem:[%s1066_s2 + $0x130] sm:$0xff]  ;;  %v56_v44 = vld [vmem:[%s1064_s0 + $0x148] sm:$0xff] }
  0x21   :  { %425 = vst [vmem:[#allocation2 + $0xb0] sm:$0xff] %v361_v30  ;;  %v363_v54 = vmax.f32 %v299_v43, 0.0  ;;  %v364_v60 = vmax.f32 %v300_v48, 0.0  ;;  %v365_v61 = vmax.f32 %v301_v49, 0.0  ;;  %v303_v62 = vadd.f32 %v239_v45, %v175_v50  ;;  %v57_v45 = vld [vmem:[%s1064_s0 + $0x150] sm:$0xff]  ;;  %v250_v50 = vld [vmem:[%s1066_s2 + $0x138] sm:$0xff] }
  0x22   :  { %426 = vst [vmem:[#allocation2 + $0xb8] sm:$0xff] %v362_v42  ;;  %v304_v63 = vadd.f32 %v240_v46, %v176_v51  ;;  %v366_v4 = vmax.f32 %v302_v55, 0.0  ;;  %v305_v5 = vadd.f32 %v241_v52, %v177_v56  ;;  %v178_v6 = vadd.f32 %v550_v2, %v112_v57  ;;  %v58_v51 = vld [vmem:[%s1064_s0 + $0x158] sm:$0xff]  ;;  %v59_v56 = vld [vmem:[%s1064_s0 + $0x160] sm:$0xff]  ;;  %v60_v57 = vld [vmem:[%s1064_s0 + $0x168] sm:$0xff] }
  0x23   :  { %427 = vst [vmem:[#allocation2 + $0xc0] sm:$0xff] %v363_v54  ;;  %v113_v7 = vmul.f32 %v545_v1, %v47_v53  ;;  %v367_v10 = vmax.f32 %v303_v62, 0.0  ;;  %v114_v13 = vmul.f32 %v545_v1, %v48_v58  ;;  %v115_v14 = vmul.f32 %v545_v1, %v49_v59 }
  0x24   :  { %428 = vst [vmem:[#allocation2 + $0xc8] sm:$0xff] %v364_v60  ;;  %v368_v11 = vmax.f32 %v304_v63, 0.0  ;;  %v369_v16 = vmax.f32 %v305_v5, 0.0  ;;  %v306_v17 = vadd.f32 %v242_v0, %v178_v6  ;;  %v116_v21 = vmul.f32 %v545_v1, %v50_v3  ;;  %v251_v60 = vld [vmem:[%s1066_s2 + $0x140] sm:$0xff]  ;;  %v61_v63 = vld [vmem:[%s1064_s0 + $0x170] sm:$0xff]  ;;  %v252_v5 = vld [vmem:[%s1066_s2 + $0x148] sm:$0xff] }
  0x25   :  { %429 = vst [vmem:[#allocation2 + $0xd0] sm:$0xff] %v365_v61  ;;  %v179_v18 = vadd.f32 %v550_v2, %v113_v7  ;;  %v180_v22 = vadd.f32 %v550_v2, %v114_v13  ;;  %v181_v23 = vadd.f32 %v550_v2, %v115_v14  ;;  %v117_v25 = vmul.f32 %v545_v1, %v51_v8  ;;  %v253_v6 = vld [vmem:[%s1066_s2 + $0x150] sm:$0xff] }
  0x26   :  { %430 = vst [vmem:[#allocation2 + $0xd8] sm:$0xff] %v366_v4  ;;  %v118_v26 = vmul.f32 %v545_v1, %v52_v9  ;;  %v370_v28 = vmax.f32 %v306_v17, 0.0  ;;  %v182_v30 = vadd.f32 %v550_v2, %v116_v21  ;;  %v119_v33 = vmul.f32 %v545_v1, %v53_v15 }
  0x27   :  { %431 = vst [vmem:[#allocation2 + $0xe0] sm:$0xff] %v367_v10  ;;  %v307_v29 = vadd.f32 %v243_v12, %v179_v18  ;;  %v308_v34 = vadd.f32 %v244_v19, %v180_v22  ;;  %v309_v35 = vadd.f32 %v245_v20, %v181_v23  ;;  %v183_v36 = vadd.f32 %v550_v2, %v117_v25 }
  0x28   :  { %432 = vst [vmem:[#allocation2 + $0xe8] sm:$0xff] %v368_v11  ;;  %v184_v37 = vadd.f32 %v550_v2, %v118_v26  ;;  %v310_v41 = vadd.f32 %v246_v24, %v182_v30  ;;  %v185_v42 = vadd.f32 %v550_v2, %v119_v33  ;;  %v120_v43 = vmul.f32 %v545_v1, %v54_v27 }
  0x29   :  { %433 = vst [vmem:[#allocation2 + $0xf0] sm:$0xff] %v369_v16  ;;  %v371_v40 = vmax.f32 %v307_v29, 0.0  ;;  %v372_v46 = vmax.f32 %v308_v34, 0.0  ;;  %v373_v47 = vmax.f32 %v309_v35, 0.0  ;;  %v311_v48 = vadd.f32 %v247_v31, %v183_v36 }
  0x2a   :  { %434 = vst [vmem:[#allocation2 + $0xf8] sm:$0xff] %v370_v28  ;;  %v312_v49 = vadd.f32 %v248_v32, %v184_v37  ;;  %v374_v52 = vmax.f32 %v310_v41, 0.0  ;;  %v313_v53 = vadd.f32 %v249_v38, %v185_v42  ;;  %v186_v54 = vadd.f32 %v550_v2, %v120_v43 }
  0x2b   :  { %435 = vst [vmem:[#allocation2 + $0x100] sm:$0xff] %v371_v40  ;;  %v121_v55 = vmul.f32 %v545_v1, %v55_v39  ;;  %v375_v58 = vmax.f32 %v311_v48, 0.0  ;;  %v122_v61 = vmul.f32 %v545_v1, %v56_v44  ;;  %v123_v62 = vmul.f32 %v545_v1, %v57_v45 }
  0x2c   :  { %436 = vst [vmem:[#allocation2 + $0x108] sm:$0xff] %v372_v46  ;;  %v376_v59 = vmax.f32 %v312_v49, 0.0  ;;  %v377_v0 = vmax.f32 %v313_v53, 0.0  ;;  %v314_v3 = vadd.f32 %v250_v50, %v186_v54  ;;  %v124_v7 = vmul.f32 %v545_v1, %v58_v51 }
  0x2d   :  { %437 = vst [vmem:[#allocation2 + $0x110] sm:$0xff] %v373_v47  ;;  %v187_v4 = vadd.f32 %v550_v2, %v121_v55 }
  0x2e   :  { %8 = vsyncpa [#allocation3], 0  ;;  %438 = vst [vmem:[#allocation2 + $0x118] sm:$0xff] %v374_v52  ;;  %v188_v8 = vadd.f32 %v550_v2, %v122_v61  ;;  %v189_v9 = vadd.f32 %v550_v2, %v123_v62  ;;  %v254_v10 = vld [vmem:[%s1066_s2 + $0x158] sm:$0xff]  ;;  %v125_v11 = vmul.f32 %v545_v1, %v59_v56  ;;  %v126_v12 = vmul.f32 %v545_v1, %v60_v57  ;;  %v255_v17 = vld [vmem:[%s1066_s2 + $0x160] sm:$0xff]  ;;  %s516_s19 = smov [#allocation2]  }
  0x2f   :  { %v62_v13 = vld [vmem:[%s1064_s0 + $0x178] sm:$0xff]  ;;  %439 = vst [vmem:[#allocation2 + $0x120] sm:$0xff] %v375_v58  ;;  %v378_v14 = vmax.f32 %v314_v3, 0.0  ;;  %v315_v15 = vadd.f32 %v251_v60, %v187_v4  ;;  %v190_v16 = vadd.f32 %v550_v2, %v124_v7  ;;  %v256_v18 = vld [vmem:[%s1066_s2 + $0x168] sm:$0xff]  ;;  %v127_v19 = vmul.f32 %v545_v1, %v61_v63  ;;  %v257_v24 = vld [vmem:[%s1066_s2 + $0x170] sm:$0xff]  ;;  %s471_s20 = sshll.u32 %s516_s19, 4  ;;  %s472_s20 = int_to_ptr.vmem [resolvable:$true] %s471_s20 }
  0x30   :  { %440 = vst [vmem:[#allocation2 + $0x128] sm:$0xff] %v376_v59  ;;  %v316_v20 = vadd.f32 %v252_v5, %v188_v8  ;;  %v317_v21 = vadd.f32 %v253_v6, %v189_v9  ;;  %v191_v22 = vadd.f32 %v550_v2, %v125_v11  ;;  %v192_v23 = vadd.f32 %v550_v2, %v126_v12  ;;  %v63_v25 = vld [vmem:[%s1064_s0 + $0x180] sm:$0xff]  ;;  %v64_v30 = vld [vmem:[%s1064_s0 + $0x188] sm:$0xff]  ;;  %v65_v31 = vld [vmem:[%s1064_s0 + $0x190] sm:$0xff]  ;;  %s473_s23 = sshll.u32 %s1067_s3, 4  ;;  %s518_s24 = smov 8   ;;  %s474_s23 = int_to_ptr.hbm [resolvable:$true] %s473_s23 }
  0x31   :  { %441 = vst [vmem:[#allocation2 + $0x130] sm:$0xff] %v377_v0  ;;  %v379_v26 = vmax.f32 %v315_v15, 0.0  ;;  %v318_v27 = vadd.f32 %v254_v10, %v190_v16  ;;  %v193_v28 = vadd.f32 %v550_v2, %v127_v19  ;;  %v128_v29 = vmul.f32 %v545_v1, %v62_v13  ;;  %v258_v36 = vld [vmem:[%s1066_s2 + $0x178] sm:$0xff]  ;;  %v67_v42 = vld [vmem:[%s1064_s0 + $0x1a0] sm:$0xff]  ;;  %v68_v43 = vld [vmem:[%s1064_s0 + $0x1a8] sm:$0xff] }
  0x32   :  { %442 = vst [vmem:[#allocation2 + $0x138] sm:$0xff] %v378_v14  ;;  %v380_v32 = vmax.f32 %v316_v20, 0.0  ;;  %v381_v33 = vmax.f32 %v317_v21, 0.0  ;;  %v319_v34 = vadd.f32 %v255_v17, %v191_v22  ;;  %v320_v35 = vadd.f32 %v256_v18, %v192_v23  ;;  %v66_v37 = vld [vmem:[%s1064_s0 + $0x198] sm:$0xff]  ;;  %v259_v46 = vld [vmem:[%s1066_s2 + $0x180] sm:$0xff]  ;;  %v69_v49 = vld [vmem:[%s1064_s0 + $0x1b0] sm:$0xff] }
  0x33   :  { %443 = vst [vmem:[#allocation2 + $0x140] sm:$0xff] %v379_v26  ;;  %v382_v38 = vmax.f32 %v318_v27, 0.0  ;;  %v321_v39 = vadd.f32 %v257_v24, %v193_v28  ;;  %v194_v40 = vadd.f32 %v550_v2, %v128_v29  ;;  %v129_v41 = vmul.f32 %v545_v1, %v63_v25  ;;  %v260_v53 = vld [vmem:[%s1066_s2 + $0x188] sm:$0xff]  ;;  %v261_v54 = vld [vmem:[%s1066_s2 + $0x190] sm:$0xff]  ;;  %v262_v58 = vld [vmem:[%s1066_s2 + $0x198] sm:$0xff] }
  0x34   :  { %444 = vst [vmem:[#allocation2 + $0x148] sm:$0xff] %v380_v32  ;;  %v383_v44 = vmax.f32 %v319_v34, 0.0  ;;  %v384_v45 = vmax.f32 %v320_v35, 0.0  ;;  %v130_v47 = vmul.f32 %v545_v1, %v64_v30  ;;  %v131_v48 = vmul.f32 %v545_v1, %v65_v31  ;;  %v70_v61 = vld [vmem:[%s1064_s0 + $0x1b8] sm:$0xff]  ;;  %v263_v3 = vld [vmem:[%s1066_s2 + $0x1a0] sm:$0xff]  ;;  %v264_v4 = vld [vmem:[%s1066_s2 + $0x1a8] sm:$0xff] }
  0x35   :  { %445 = vst [vmem:[#allocation2 + $0x150] sm:$0xff] %v381_v33  ;;  %v385_v50 = vmax.f32 %v321_v39, 0.0  ;;  %v322_v51 = vadd.f32 %v258_v36, %v194_v40  ;;  %v195_v52 = vadd.f32 %v550_v2, %v129_v41  ;;  %v132_v55 = vmul.f32 %v545_v1, %v66_v37  ;;  %v265_v10 = vld [vmem:[%s1066_s2 + $0x1b0] sm:$0xff]  ;;  %v71_v11 = vld [vmem:[%s1064_s0 + $0x1c0] sm:$0xff]  ;;  %v72_v16 = vld [vmem:[%s1064_s0 + $0x1c8] sm:$0xff] }
  0x36   :  { %446 = vst [vmem:[#allocation2 + $0x158] sm:$0xff] %v382_v38  ;;  %v196_v56 = vadd.f32 %v550_v2, %v130_v47  ;;  %v197_v57 = vadd.f32 %v550_v2, %v131_v48  ;;  %v133_v59 = vmul.f32 %v545_v1, %v67_v42  ;;  %v134_v60 = vmul.f32 %v545_v1, %v68_v43  ;;  %v73_v17 = vld [vmem:[%s1064_s0 + $0x1d0] sm:$0xff]  ;;  %v266_v22 = vld [vmem:[%s1066_s2 + $0x1b8] sm:$0xff]  ;;  %v75_v28 = vld [vmem:[%s1064_s0 + $0x1e0] sm:$0xff] }
  0x37   :  { %447 = vst [vmem:[#allocation2 + $0x160] sm:$0xff] %v383_v44  ;;  %v386_v62 = vmax.f32 %v322_v51, 0.0  ;;  %v323_v63 = vadd.f32 %v259_v46, %v195_v52  ;;  %v198_v0 = vadd.f32 %v550_v2, %v132_v55  ;;  %v135_v5 = vmul.f32 %v545_v1, %v69_v49  ;;  %v74_v23 = vld [vmem:[%s1064_s0 + $0x1d8] sm:$0xff]  ;;  %v76_v29 = vld [vmem:[%s1064_s0 + $0x1e8] sm:$0xff]  ;;  %v267_v32 = vld [vmem:[%s1066_s2 + $0x1c0] sm:$0xff] }
  0x38   :  { %448 = vst [vmem:[#allocation2 + $0x168] sm:$0xff] %v384_v45  ;;  %v324_v6 = vadd.f32 %v260_v53, %v196_v56  ;;  %v325_v7 = vadd.f32 %v261_v54, %v197_v57  ;;  %v199_v8 = vadd.f32 %v550_v2, %v133_v59  ;;  %v200_v9 = vadd.f32 %v550_v2, %v134_v60  ;;  %v77_v35 = vld [vmem:[%s1064_s0 + $0x1f0] sm:$0xff]  ;;  %v268_v39 = vld [vmem:[%s1066_s2 + $0x1c8] sm:$0xff]  ;;  %v270_v44 = vld [vmem:[%s1066_s2 + $0x1d8] sm:$0xff] }
  0x39   :  { %449 = vst [vmem:[#allocation2 + $0x170] sm:$0xff] %v385_v50  ;;  %v387_v12 = vmax.f32 %v323_v63, 0.0  ;;  %v326_v13 = vadd.f32 %v262_v58, %v198_v0  ;;  %v201_v14 = vadd.f32 %v550_v2, %v135_v5  ;;  %v136_v15 = vmul.f32 %v545_v1, %v70_v61  ;;  %v269_v40 = vld [vmem:[%s1066_s2 + $0x1d0] sm:$0xff]  ;;  %v78_v47 = vld [vmem:[%s1064_s0 + $0x1f8] sm:$0xff]  ;;  %v271_v51 = vld [vmem:[%s1066_s2 + $0x1e0] sm:$0xff] }
  0x3a   :  { %450 = vst [vmem:[#allocation2 + $0x178] sm:$0xff] %v386_v62  ;;  %v388_v18 = vmax.f32 %v324_v6, 0.0  ;;  %v389_v19 = vmax.f32 %v325_v7, 0.0  ;;  %v327_v20 = vadd.f32 %v263_v3, %v199_v8  ;;  %v328_v21 = vadd.f32 %v264_v4, %v200_v9  ;;  %v272_v52 = vld [vmem:[%s1066_s2 + $0x1e8] sm:$0xff]  ;;  %v273_v58 = vld [vmem:[%s1066_s2 + $0x1f0] sm:$0xff]  ;;  %v274_v5 = vld [vmem:[%s1066_s2 + $0x1f8] sm:$0xff] }
  0x3b   :  { %451 = vst [vmem:[#allocation2 + $0x180] sm:$0xff] %v387_v12  ;;  %v390_v24 = vmax.f32 %v326_v13, 0.0  ;;  %v329_v25 = vadd.f32 %v265_v10, %v201_v14  ;;  %v202_v26 = vadd.f32 %v550_v2, %v136_v15  ;;  %v137_v27 = vmul.f32 %v545_v1, %v71_v11  ;;  %s517_s2 = smov 128  }
  0x3c   :  { %452 = vst [vmem:[#allocation2 + $0x188] sm:$0xff] %v388_v18  ;;  %v391_v30 = vmax.f32 %v327_v20, 0.0  ;;  %v392_v31 = vmax.f32 %v328_v21, 0.0  ;;  %v138_v33 = vmul.f32 %v545_v1, %v72_v16  ;;  %v139_v34 = vmul.f32 %v545_v1, %v73_v17 }
  0x3d   :  { %453 = vst [vmem:[#allocation2 + $0x190] sm:$0xff] %v389_v19  ;;  %v393_v36 = vmax.f32 %v329_v25, 0.0  ;;  %v330_v37 = vadd.f32 %v266_v22, %v202_v26  ;;  %v203_v38 = vadd.f32 %v550_v2, %v137_v27  ;;  %v140_v41 = vmul.f32 %v545_v1, %v74_v23 }
  0x3e   :  { %454 = vst [vmem:[#allocation2 + $0x198] sm:$0xff] %v390_v24  ;;  %v204_v42 = vadd.f32 %v550_v2, %v138_v33  ;;  %v205_v43 = vadd.f32 %v550_v2, %v139_v34  ;;  %v141_v45 = vmul.f32 %v545_v1, %v75_v28  ;;  %v142_v46 = vmul.f32 %v545_v1, %v76_v29 }
  0x3f   :  { %455 = vst [vmem:[#allocation2 + $0x1a0] sm:$0xff] %v391_v30  ;;  %v394_v48 = vmax.f32 %v330_v37, 0.0  ;;  %v331_v49 = vadd.f32 %v267_v32, %v203_v38  ;;  %v206_v50 = vadd.f32 %v550_v2, %v140_v41  ;;  %v143_v53 = vmul.f32 %v545_v1, %v77_v35 }
  0x40   :  { %456 = vst [vmem:[#allocation2 + $0x1a8] sm:$0xff] %v392_v31  ;;  %v332_v54 = vadd.f32 %v268_v39, %v204_v42  ;;  %v333_v55 = vadd.f32 %v269_v40, %v205_v43  ;;  %v207_v56 = vadd.f32 %v550_v2, %v141_v45  ;;  %v208_v57 = vadd.f32 %v550_v2, %v142_v46 }
  0x41   :  { %457 = vst [vmem:[#allocation2 + $0x1b0] sm:$0xff] %v393_v36  ;;  %v395_v59 = vmax.f32 %v331_v49, 0.0  ;;  %v334_v60 = vadd.f32 %v270_v44, %v206_v50  ;;  %v209_v61 = vadd.f32 %v550_v2, %v143_v53  ;;  %v144_v62 = vmul.f32 %v545_v1, %v78_v47 }
  0x42   :  { %458 = vst [vmem:[#allocation2 + $0x1b8] sm:$0xff] %v394_v48  ;;  %v396_v63 = vmax.f32 %v332_v54, 0.0  ;;  %v397_v0 = vmax.f32 %v333_v55, 0.0  ;;  %v335_v3 = vadd.f32 %v271_v51, %v207_v56  ;;  %v336_v4 = vadd.f32 %v272_v52, %v208_v57 }
  0x43   :  { %459 = vst [vmem:[#allocation2 + $0x1c0] sm:$0xff] %v395_v59  ;;  %v398_v6 = vmax.f32 %v334_v60, 0.0  ;;  %v337_v7 = vadd.f32 %v273_v58, %v209_v61  ;;  %v210_v8 = vadd.f32 %v550_v2, %v144_v62 }
  0x44   :  { %460 = vst [vmem:[#allocation2 + $0x1c8] sm:$0xff] %v396_v63  ;;  %v399_v9 = vmax.f32 %v335_v3, 0.0  ;;  %v400_v10 = vmax.f32 %v336_v4, 0.0 }
  0x45   :  { %461 = vst [vmem:[#allocation2 + $0x1d0] sm:$0xff] %v397_v0  ;;  %v401_v1 = vmax.f32 %v337_v7, 0.0  ;;  %v338_v11 = vadd.f32 %v274_v5, %v210_v8 }
  0x46   :  { %462 = vst [vmem:[#allocation2 + $0x1d8] sm:$0xff] %v398_v6 }
  0x47   :  { %463 = vst [vmem:[#allocation2 + $0x1e0] sm:$0xff] %v399_v9  ;;  %v402_v12 = vmax.f32 %v338_v11, 0.0 }
  0x48   :  { %464 = vst [vmem:[#allocation2 + $0x1e8] sm:$0xff] %v400_v10 }
  0x49   :  { %465 = vst [vmem:[#allocation2 + $0x1f0] sm:$0xff] %v401_v1 }
  0x4a   :  { %466 = vst [vmem:[#allocation2 + $0x1f8] sm:$0xff] %v402_v12 }
  0x4b   :  { %479 = dma.vmem_to_hbm [thread:$0]  %s472_s20, 8192, %s474_s23, [#allocation3], %s517_s2, %s517_s2, %s518_s24  }
  0x4c   :  { %514 = dma.done.wait [#allocation3], 8192  }
  0x4d   :  { %515 = vsyncadd [#allocation3], 4294959104 }
  0x4e   :  { %484 = vsyncpa [#allocation3], 1 }

// kernel: _lambda_.10
= control target key start
LH: loop header
LB: loop body
LE: loop exit
PB: predicated region body
PF: predicated region fallthrough
CT: control target
= control target key end

     0   :  { %s2117_s15 = smov 0   ;;  %s3106_s0 = inlined_call_operand.vmem [shape: bf16[2,18,18,32], index: 0, kind: input, shape index: {}]   ;;  %s3107_s1 = inlined_call_operand.vmem [shape: bf16[288,32], index: 1, kind: input, shape index: {}]   ;;  %s3108_s2 = inlined_call_operand.vmem [shape: f32[2,256,32], index: 2, kind: output, shape index: {0}]   ;;  %s3109_s3 = inlined_call_operand.vmem [shape: f32[1,32], index: 3, kind: output, shape index: {1}]   ;;  %s3110_s4 = inlined_call_operand.vmem [shape: f32[1,32], index: 4, kind: output, shape index: {2}]  }
   0x1 LB: > { %s1841_s16 = sadd.s32 4294967295, %s2086_s15   ;;  %p1845_p0 = scmp.ge.s32.totalorder %s2086_s15, 1  ;;  %s2086_s15 = sphi %s2117_s15, %s15_s15  }
   0x2   : > { %p157_p1 = scmp.lt.s32.totalorder %s2086_s15, 3 }
   0x4   : > { %p158_p2 = pnand %p1845_p0, %p157_p1 }
   0x5   : > { %p183_p3 = scmp.lt.s32.totalorder (!%p158_p2), %s1841_s16, 1  ;;  %p1849_p4 = scmp.ne.s32.totalorder (!%p158_p2), %s1841_s16, 0 }
   0x6   : > { %161 = sbr.rel (%p158_p2) target bundleno = 567 (0x237), region = 28 }
   0xb   : > { %s184_s17 = scalar_select %p183_p3, %s1841_s16, 1 }
   0xc   : > { %197 = sbr.rel (%p1849_p4) target bundleno = 20 (0x14), region = 32 }
   0xd   : > { %s2067_s18 = smul.u32 216, %s184_s17  ;;  %s2012_s19 = sshll.u32 %s184_s17, 8 }
   0xe   : > { %s2128_s22 = scalar_lea.vmem %s3108_s2, %s2012_s19 }
   0xf   : > { %s2133_s25 = scalar_lea.vmem %s3106_s0, %s2067_s18 }
  0x11   : > { %vm198_vm0 = vcmask 253952   ;;  %v2088_v0 = vmov 0.0  }
  0x12   : > { %199 = vst.msk [vmem:[%s3109_s3] sm:$0x1] %vm198_vm0, %v2088_v0 }
  0x13   : > { %200 = vst.msk [vmem:[%s3110_s4] sm:$0x1] %vm198_vm0, %v2088_v0 }
  0x14 PF: > { %v2142_v1 = vld [vmem:[%s2133_s25 + $0x18] sm:$0xff]  ;;  %v2145_v2 = vld [vmem:[%s2133_s25 + $0xc] sm:$0xff]  ;;  %v206_v3 = vld [vmem:[%s2133_s25 + $0x14] sm:$0x1]  ;;  %s2089_s30 = smov 64   ;;  %vm608_vm1 = vcmask 1046528  }
  0x15   : > { %v352_v4 = vunpack.c.l.b16 %v206_v3  ;;  %v2149_v5 = vld [vmem:[%s2133_s25] sm:$0xff]  ;;  %v203_v6 = vld [vmem:[%s2133_s25 + $0x8] sm:$0x1]  ;;  %781 = vrot.lane.b32.xlu1 %v2142_v1, %s2089_s30  ;;  %v612_v10 = vrot.slane %v2145_v2, 1  ;;  %s2090_s5 = smov 96   ;;  %v409_v18 = vshrl.u32 %v2142_v1, 16 }
  0x16   : > { %v351_v7 = vunpack.c.l.b16 %v203_v6  ;;  %v209_v8 = vld [vmem:[%s2133_s25 + $0x20] sm:$0x1]  ;;  %v387_v11 = vshll.u32 %v2149_v5, 16  ;;  %694 = vrot.lane.b32.xlu2 %v2145_v2, %s2090_s5  ;;  %v609_v13 = vrot.slane %v2149_v5, 1  ;;  %v385_v14 = vshrl.u32 %v2149_v5, 16  ;;  %s2091_s6 = smov 32  }
  0x17   : > { %v368_v9 = vpack.c.b16 %v352_v4, %v352_v4  ;;  %v353_v15 = vunpack.c.l.b16 %v209_v8  ;;  %v411_v19 = vshll.u32 %v2142_v1, 16  ;;  %v399_v26 = vshll.u32 %v2145_v2, 16  ;;  %v212_v34 = vld [vmem:[%s2133_s25 + $0x2c] sm:$0x1]  ;;  %v2180_v42 = vld [vmem:[%s2133_s25 + $0x24] sm:$0xff]  ;;  %v2204_v59 = vld [vmem:[%s2133_s25 + $0x30] sm:$0xff] }
  0x18   : > { %v367_v12 = vpack.c.b16 %v351_v7, %v351_v7  ;;  %v389_v17 = vrot.slane %v387_v11, 1  ;;  %vm383_vm2 = vsmask.f32 7424  ;;  %v615_v31 = vrot.slane %v2142_v1, 1  ;;  %v215_v56 = vld [vmem:[%s2133_s25 + $0x38] sm:$0x1] }
  0x19   : > { %v613_v16 = vrot.slane %v368_v9, 1  ;;  %v369_v23 = vpack.c.b16 %v353_v15, %v353_v15  ;;  %v413_v24 = vrot.slane %v411_v19, 1  ;;  %v397_v35 = vshrl.u32 %v2145_v2, 16  ;;  %v239_v60 = vld [vmem:[%s2133_s25 + $0x98] sm:$0x1]  ;;  %v2212_v6 = vld [vmem:[%s2133_s25 + $0x90] sm:$0xff] }
  0x1a   : > { %v610_v20 = vrot.slane %v367_v12, 1  ;;  %v392_v21 = vshll.u32 %v367_v12, 16  ;;  %v390_v27 = vor.u32 %v389_v17, %v385_v14  ;;  %v401_v37 = vrot.slane %v399_v26, 1  ;;  %v2217_v8 = vld [vmem:[%s3107_s1 + $0x88] sm:$0xff]  ;;  %v2228_v12 = vld [vmem:[%s3107_s1 + $0x80] sm:$0xff] }
  0x1b   : > { %v614_v22 = vsel %vm608_vm1, %v612_v10, %v613_v16  ;;  %v414_v29 = vor.u32 %v413_v24, %v409_v18  ;;  %v416_v30 = vshll.u32 %v369_v23, 16  ;;  %v616_v32 = vrot.slane %v369_v23, 1  ;;  %1482 = vmatpush.bf16.msra.mxu2 %v2217_v8  ;;  %v218_v24 = vld [vmem:[%s2133_s25 + $0x44] sm:$0x1] }
  0x1c   : > { %744 = vrot.lane.b32.xlu0 %v614_v22, %s2091_s6  ;;  %v611_v25 = vsel %vm608_vm1, %v609_v13, %v610_v20  ;;  %v394_v28 = vrot.slane %v392_v21, 1  ;;  %v404_v38 = vshll.u32 %v368_v9, 16  ;;  %v354_v40 = vunpack.c.l.b16 %v212_v34 }
  0x1d   : > { %657 = vrot.lane.b32.xlu1 %v611_v25, %s2089_s30  ;;  %v418_v33 = vrot.slane %v416_v30, 1  ;;  %v617_v41 = vsel %vm608_vm1, %v615_v31, %v616_v32  ;;  %v402_v43 = vor.u32 %v401_v37, %v397_v35  ;;  %v423_v46 = vshll.u32 %v2180_v42, 16  ;;  %v2249_v25 = vld [vmem:[%s2133_s25 + $0x9c] sm:$0xff]  ;;  %v242_v30 = vld [vmem:[%s2133_s25 + $0xa4] sm:$0x1] }
  0x1e   : > { %v395_v36 = vsel %vm383_vm2, %v390_v27, %v394_v28  ;;  %v406_v44 = vrot.slane %v404_v38, 1  ;;  %v370_v45 = vpack.c.b16 %v354_v40, %v354_v40  ;;  %v421_v47 = vshrl.u32 %v2180_v42, 16  ;;  %v2270_v32 = vld [vmem:[%s3107_s1 + $0x78] sm:$0xff] }
  0x1f   : > { %v2173_v39 = vsel %vm383_vm2, %v414_v29, %v418_v33  ;;  %v425_v48 = vrot.slane %v423_v46, 1  ;;  %v618_v53 = vrot.slane %v2180_v42, 1  ;;  %v355_v57 = vunpack.c.l.b16 %v215_v56  ;;  %1483 = vmatpush.bf16.msra.mxu2 %v2228_v12  ;;  %v2262_v29 = vld [vmem:[%s2133_s25 + $0x3c] sm:$0xff]  ;;  %1387 = vmatpush.bf16.msra.mxu1 %v2270_v32  ;;  %v2294_v46 = vld [vmem:[%s3107_s1 + $0x68] sm:$0xff]  ;;  %v2037_v56 = vld [vmem:[%s3107_s1 + $0x30] sm:$0xff] }
  0x20   : > { %828 = vrot.lane.b32.xlu2 %v2173_v39, %s2090_s5  ;;  %v428_v49 = vshll.u32 %v370_v45, 16  ;;  %v2186_v50 = vsel %vm383_vm2, %v402_v43, %v406_v44  ;;  %v619_v54 = vrot.slane %v370_v45, 1  ;;  %v435_v62 = vshll.u32 %v2204_v59, 16  ;;  %v2282_v43 = vld [vmem:[%s3107_s1 + $0x70] sm:$0xff]  ;;  %v2038_v45 = vld [vmem:[%s3107_s1 + $0x38] sm:$0xff] }
  0x21   : > { %v426_v51 = vor.u32 %v425_v48, %v421_v47  ;;  %v371_v61 = vpack.c.b16 %v355_v57, %v355_v57  ;;  %v363_v63 = vunpack.c.l.b16 %v239_v60  ;;  %v433_v0 = vshrl.u32 %v2204_v59, 16  ;;  %1298 = vmatpush.bf16.msra.mxu0 %v2038_v45  ;;  %2049 = vmatpush.bf16.msra.mxu3 %v2038_v45  ;;  %v2315_v57 = vld [vmem:[%s3107_s1 + $0x60] sm:$0xff]  ;;  %v2032_v45 = vld [vmem:[%s3107_s1 + $0x8] sm:$0xff] }
  0x22   : > { %v430_v52 = vrot.slane %v428_v49, 1  ;;  %v620_v58 = vsel %vm608_vm1, %v618_v53, %v619_v54  ;;  %v437_v3 = vrot.slane %v435_v62, 1  ;;  %v531_v11 = vshll.u32 %v2212_v6, 16 }
  0x23   : > { %v440_v4 = vshll.u32 %v371_v61, 16  ;;  %v379_v7 = vpack.c.b16 %v363_v63, %v363_v63  ;;  %v645_v13 = vrot.slane %v2212_v6, 1  ;;  %v529_v16 = vshrl.u32 %v2212_v6, 16  ;;  %1388 = vmatpush.bf16.msra.mxu1 %v2282_v43 }
  0x24   : > { %576 = vrot.lane.b32.xlu0 %v395_v36, %s2091_s6  ;;  %v2195_v55 = vsel %vm383_vm2, %v426_v51, %v430_v52  ;;  %v438_v9 = vor.u32 %v437_v3, %v433_v0  ;;  %v533_v17 = vrot.slane %v531_v11, 1  ;;  %vm863_vm3 = vcmask 261120   ;;  %v221_v0 = vld [vmem:[%s2133_s25 + $0x50] sm:$0x1]  ;;  %v2328_v3 = vld [vmem:[%s3107_s1 + $0x58] sm:$0xff]  ;;  %v2342_v11 = vld [vmem:[%s2133_s25 + $0x48] sm:$0xff] }
  0x25   : > { %746 = vrot.lane.b32.xlu1 %v617_v41, %s2091_s6  ;;  %v442_v10 = vrot.slane %v440_v4, 1  ;;  %v646_v14 = vrot.slane %v379_v7, 1  ;;  %v536_v18 = vshll.u32 %v379_v7, 16  ;;  %1994 = vmatmul.msk.bf16.vlgmr.msra.gmra.mxu2 %vm863_vm3, %v617_v41  ;;  %v622_v23 = vrot.slane %v371_v61, 1  ;;  %v2036_v61 = vld [vmem:[%s3107_s1 + $0x28] sm:$0xff] }
  0x26   : > { %v534_v20 = vor.u32 %v533_v17, %v529_v16  ;;  %v356_v27 = vunpack.c.l.b16 %v218_v24  ;;  %v447_v33 = vshll.u32 %v2262_v29, 16  ;;  %v364_v34 = vunpack.c.l.b16 %v242_v30  ;;  %1299 = vmatpush.bf16.msra.mxu0 %v2037_v56  ;;  %2050 = vmatpush.bf16.msra.mxu3 %v2037_v56  ;;  %v2331_v4 = vld [vmem:[%s2133_s25 + $0xa8] sm:$0xff]  ;;  %v2356_v16 = vld [vmem:[%s3107_s1 + $0x50] sm:$0xff] }
  0x27   : > { %v2232_v15 = vsel %vm383_vm2, %v438_v9, %v442_v10  ;;  %v2239_v19 = vsel %vm608_vm1, %v645_v13, %v646_v14  ;;  %v538_v21 = vrot.slane %v536_v18, 1  ;;  %v445_v35 = vshrl.u32 %v2262_v29, 16  ;;  %1389 = vmatpush.bf16.msra.mxu1 %v2294_v46  ;;  %v245_v13 = vld [vmem:[%s2133_s25 + $0xb0] sm:$0x1]  ;;  %v2035_v14 = vld [vmem:[%s3107_s1 + $0x20] sm:$0xff] }
  0x28   : > { %659 = vrot.lane.b32.xlu2 %v614_v22, %s2089_s30  ;;  %v621_v22 = vrot.slane %v2204_v59, 1  ;;  %v372_v31 = vpack.c.b16 %v356_v27, %v356_v27  ;;  %v449_v36 = vrot.slane %v447_v33, 1  ;;  %v380_v38 = vpack.c.b16 %v364_v34, %v364_v34 }
  0x29   : > { %v2252_v26 = vsel %vm383_vm2, %v534_v20, %v538_v21  ;;  %v543_v44 = vshll.u32 %v2249_v25, 16  ;;  %v648_v47 = vrot.slane %v2249_v25, 1  ;;  %v541_v51 = vshrl.u32 %v2249_v25, 16  ;;  %v2034_v21 = vld [vmem:[%s3107_s1 + $0x18] sm:$0xff] }
  0x2a   : > { %v2257_v28 = vsel %vm608_vm1, %v621_v22, %v622_v23  ;;  %v452_v37 = vshll.u32 %v372_v31, 16  ;;  %v450_v40 = vor.u32 %v449_v36, %v445_v35  ;;  %v649_v48 = vrot.slane %v380_v38, 1  ;;  %1300 = vmatpush.bf16.msra.mxu0 %v2036_v61  ;;  %2051 = vmatpush.bf16.msra.mxu3 %v2036_v61  ;;  %v2368_v22 = vld [vmem:[%s3107_s1 + $0x48] sm:$0xff]  ;;  %v2033_v35 = vld [vmem:[%s3107_s1 + $0x10] sm:$0xff] }
  0x2b   : > { %v545_v52 = vrot.slane %v543_v44, 1  ;;  %v548_v53 = vshll.u32 %v380_v38, 16  ;;  %v624_v62 = vrot.slane %v2262_v29, 1  ;;  %v625_v63 = vrot.slane %v372_v31, 1  ;;  %1390 = vmatpush.bf16.msra.mxu1 %v2315_v57  ;;  %v2415_v61 = vld [vmem:[%s2133_s25 + $0xb4] sm:$0xff] }
  0x2c   : > { %578 = vrot.lane.b32.xlu0 %v2186_v50, %s2091_s6  ;;  %v2305_v54 = vsel %vm608_vm1, %v648_v47, %v649_v48  ;;  %v357_v9 = vunpack.c.l.b16 %v221_v0  ;;  %v459_v18 = vshll.u32 %v2342_v11, 16  ;;  %v365_v20 = vunpack.c.l.b16 %v245_v13  ;;  %v248_v13 = vld [vmem:[%s2133_s25 + $0xbc] sm:$0x1] }
  0x2d   : > { %696 = vrot.lane.b32.xlu1 %v2142_v1, %s2090_s5  ;;  %v550_v60 = vrot.slane %v548_v53, 1  ;;  %v2339_v10 = vsel %vm608_vm1, %v624_v62, %v625_v63  ;;  %v457_v23 = vshrl.u32 %v2342_v11, 16  ;;  %v555_v34 = vshll.u32 %v2331_v4, 16  ;;  %v2031_v53 = vld [vmem:[%s3107_s1] sm:$0xff] }
  0x2e   : > { %v373_v17 = vpack.c.b16 %v357_v9, %v357_v9  ;;  %1301 = vmatpush.bf16.msra.mxu0 %v2035_v14  ;;  %2052 = vmatpush.bf16.msra.mxu3 %v2035_v14  ;;  %v461_v24 = vrot.slane %v459_v18, 1  ;;  %v381_v30 = vpack.c.b16 %v365_v20, %v365_v20  ;;  %v651_v36 = vrot.slane %v2331_v4, 1  ;;  %v2429_v9 = vld [vmem:[%s2133_s25 + $0x54] sm:$0xff] }
  0x2f   : > { %1391 = vmatpush.bf16.msra.mxu1 %v2328_v3  ;;  %v627_v56 = vrot.slane %v2342_v11, 1  ;;  %v471_v18 = vshll.u32 %v2429_v9, 16  ;;  %v366_v20 = vunpack.c.l.b16 %v248_v13  ;;  %vm896_vm4 = vcmask 523264  }
  0x30   : > { %830 = vrot.lane.b32.xlu2 %v2195_v55, %s2090_s5  ;;  %v464_v27 = vshll.u32 %v373_v17, 16  ;;  %v462_v31 = vor.u32 %v461_v24, %v457_v23  ;;  %v560_v44 = vshll.u32 %v381_v30, 16  ;;  %vm929_vm5 = vcmask 785408  }
  0x31   : > { %v382_v24 = vpack.c.b16 %v366_v20, %v366_v20  ;;  %vm1668_vm6 = vcmask 253952  }
  0x32   : > { %1302 = vmatpush.bf16.msra.mxu0 %v2034_v21  ;;  %v466_v33 = vrot.slane %v464_v27, 1  ;;  %2053 = vmatpush.bf16.msra.mxu3 %v2034_v21  ;;  %v473_v21 = vrot.slane %v471_v18, 1 }
  0x33   : > { %1392 = vmatpush.bf16.msra.mxu1 %v2356_v16 }
  0x34   : > { %783 = vrot.lane.b32.xlu0 %v2180_v42, %s2089_s30  ;;  %v2389_v38 = vsel %vm383_vm2, %v462_v31, %v466_v33 }
  0x35   : > { %748 = vrot.lane.b32.xlu1 %v620_v58, %s2091_s6  ;;  %1995 = vmatmul.msk.bf16.gmra.mxu2 %vm863_vm3, %v620_v58 }
  0x36   : > { %1303 = vmatpush.bf16.msra.mxu0 %v2033_v35  ;;  %2054 = vmatpush.bf16.msra.mxu3 %v2033_v35  ;;  %v565_v35 = vshrl.u32 %v2415_v61, 16 }
  0x37   : > { %1393 = vmatpush.bf16.msra.mxu1 %v2368_v22 }
  0x38   : > { %661 = vrot.lane.b32.xlu2 %v617_v41, %s2089_s30  ;;  %v454_v41 = vrot.slane %v452_v37, 1  ;;  %v652_v37 = vrot.slane %v381_v30, 1 }
  0x3a   : > { %v2298_v49 = vsel %vm383_vm2, %v450_v40, %v454_v41  ;;  %v553_v40 = vshrl.u32 %v2331_v4, 16  ;;  %v557_v41 = vrot.slane %v555_v34, 1  ;;  %v2401_v48 = vsel %vm608_vm1, %v651_v36, %v652_v37  ;;  %1304 = vmatpush.bf16.msra.mxu0 %v2032_v45  ;;  %2055 = vmatpush.bf16.msra.mxu3 %v2032_v45 }
  0x3b   : > { %v572_v37 = vshll.u32 %v382_v24, 16 }
  0x3c   : > { %580 = vrot.lane.b32.xlu0 %v2173_v39, %s2091_s6 }
  0x3d   : > { %698 = vrot.lane.b32.xlu1 %v2180_v42, %s2090_s5 }
  0x3e   : > { %1305 = vmatpush.bf16.msra.mxu0 %v2031_v53  ;;  %2056 = vmatpush.bf16.msra.mxu3 %v2031_v53 }
  0x40   : > { %832 = vrot.lane.b32.xlu2 %v2232_v15, %s2090_s5 }
  0x42   : > { %2057 = vmatpush.bf16.msrb.mxu3 %v2270_v32  ;;  %v469_v32 = vshrl.u32 %v2429_v9, 16 }
  0x44   : > { %785 = vrot.lane.b32.xlu0 %v2204_v59, %s2089_s30  ;;  %v474_v27 = vor.u32 %v473_v21, %v469_v32 }
  0x45   : > { %681 = vrot.lane.b32.xlu1 %v2239_v19, %s2089_s30  ;;  %1996 = vmatmul.msk.bf16.gmra.mxu2 %vm863_vm3, %v2257_v28 }
  0x46   : > { %2058 = vmatpush.bf16.msrb.mxu3 %v2282_v43  ;;  %v567_v43 = vshll.u32 %v2415_v61, 16 }
  0x48   : > { %718 = vrot.lane.b32.xlu2 %v2249_v25, %s2090_s5  ;;  %v569_v36 = vrot.slane %v567_v43, 1 }
  0x4a   : > { %2059 = vmatpush.bf16.msrb.mxu3 %v2294_v46  ;;  %v654_v46 = vrot.slane %v2415_v61, 1 }
  0x4c   : > { %600 = vrot.lane.b32.xlu0 %v2252_v26, %s2091_s6 }
  0x4d   : > { %750 = vrot.lane.b32.xlu1 %v2257_v28, %s2091_s6 }
  0x4e   : > { %2060 = vmatpush.bf16.msrb.mxu3 %v2315_v57 }
  0x50   : > { %663 = vrot.lane.b32.xlu2 %v620_v58, %s2089_s30  ;;  %v546_v58 = vor.u32 %v545_v52, %v541_v51  ;;  %v558_v51 = vor.u32 %v557_v41, %v553_v40  ;;  %v562_v52 = vrot.slane %v560_v44, 1  ;;  %v570_v41 = vor.u32 %v569_v36, %v565_v35 }
  0x51   : > { %v574_v44 = vrot.slane %v572_v37, 1 }
  0x52   : > { %v2334_v7 = vsel %vm383_vm2, %v546_v58, %v550_v60  ;;  %v628_v58 = vrot.slane %v373_v17, 1  ;;  %v224_v60 = vld [vmem:[%s2133_s25 + $0x5c] sm:$0x1]  ;;  %v2418_v62 = vsel %vm383_vm2, %v558_v51, %v562_v52  ;;  %2061 = vmatpush.bf16.msrb.mxu3 %v2328_v3  ;;  %v2468_v51 = vld [vmem:[%s2133_s25 + $0xc0] sm:$0xff]  ;;  %v630_v52 = vrot.slane %v2429_v9, 1 }
  0x53   : > { %v358_v63 = vunpack.c.l.b16 %v224_v60  ;;  %v2478_v13 = vsel %vm383_vm2, %v570_v41, %v574_v44  ;;  %v230_v44 = vld [vmem:[%s2133_s25 + $0x74] sm:$0x1] }
  0x54   : > { %582 = vrot.lane.b32.xlu0 %v2195_v55, %s2091_s6  ;;  %v2424_v0 = vsel %vm608_vm1, %v627_v56, %v628_v58  ;;  %v227_v56 = vld [vmem:[%s2133_s25 + $0x68] sm:$0x1] }
  0x55   : > { %700 = vrot.lane.b32.xlu1 %v2204_v59, %s2090_s5  ;;  %1997 = vmatmul.msk.bf16.gmra.mxu2 %vm863_vm3, %v2339_v10  ;;  %v374_v17 = vpack.c.b16 %v358_v63, %v358_v63 }
  0x56   : > { %2062 = vmatpush.bf16.msrb.mxu3 %v2356_v16  ;;  %v359_v16 = vunpack.c.l.b16 %v227_v56 }
  0x57   : > { %v476_v23 = vshll.u32 %v374_v17, 16  ;;  %v631_v53 = vrot.slane %v374_v17, 1 }
  0x58   : > { %834 = vrot.lane.b32.xlu2 %v2298_v49, %s2090_s5  ;;  %v375_v20 = vpack.c.b16 %v359_v16, %v359_v16 }
  0x59   : > { %v478_v30 = vrot.slane %v476_v23, 1  ;;  %v632_v18 = vsel %vm608_vm1, %v630_v52, %v631_v53  ;;  %v360_v53 = vunpack.c.l.b16 %v230_v44 }
  0x5a   : > { %2063 = vmatpush.bf16.msrb.mxu3 %v2368_v22  ;;  %v634_v35 = vrot.slane %v375_v20, 1 }
  0x5b   : > { %v2452_v33 = vsel %vm383_vm2, %v474_v27, %v478_v30  ;;  %v488_v30 = vshll.u32 %v375_v20, 16 }
  0x5c   : > { %787 = vrot.lane.b32.xlu0 %v2262_v29, %s2089_s30 }
  0x5d   : > { %683 = vrot.lane.b32.xlu1 %v2305_v54, %s2089_s30 }
  0x60   : > { %720 = vrot.lane.b32.xlu2 %v2331_v4, %s2090_s5 }
  0x64   : > { %602 = vrot.lane.b32.xlu0 %v2334_v7, %s2091_s6 }
  0x65   : > { %752 = vrot.lane.b32.xlu1 %v2339_v10, %s2091_s6  ;;  %1998 = vmatmul.msk.bf16.gmra.mxu2 %vm863_vm3, %v2424_v0 }
  0x68   : > { %665 = vrot.lane.b32.xlu2 %v2257_v28, %s2089_s30  ;;  %v2383_v28 = vld [vmem:[%s3107_s1 + $0x40] sm:$0xff] }
  0x69   : > { %1394 = vmatpush.bf16.msra.mxu1 %v2383_v28  ;;  %2064 = vmatpush.bf16.msrb.mxu3 %v2383_v28 }
  0x6c   : > { %584 = vrot.lane.b32.xlu0 %v2232_v15, %s2091_s6 }
  0x6d   : > { %702 = vrot.lane.b32.xlu1 %v2262_v29, %s2090_s5 }
  0x70   : > { %v2396_v47 = vpop.permute.xlu2 %694  ;;  %836 = vrot.lane.b32.xlu2 %v2389_v38, %s2090_s5 }
  0x74   : > { %789 = vrot.lane.b32.xlu0 %v2342_v11, %s2089_s30 }
  0x75   : > { %685 = vrot.lane.b32.xlu1 %v2401_v48, %s2089_s30  ;;  %1999 = vmatmul.msk.bf16.gmra.mxu2 %vm863_vm3, %v632_v18 }
  0x78   : > { %722 = vrot.lane.b32.xlu2 %v2415_v61, %s2090_s5 }
  0x7a   : > { %v829_v14 = vpop.permute.xlu2 %828 }
  0x7c   : > { %604 = vrot.lane.b32.xlu0 %v2418_v62, %s2091_s6 }
  0x7d   : > { %754 = vrot.lane.b32.xlu1 %v2424_v0, %s2091_s6 }
  0x80   : > { %667 = vrot.lane.b32.xlu2 %v2339_v10, %s2089_s30  ;;  %v655_v10 = vrot.slane %v382_v24, 1 }
  0x82   : > { %v2442_v31 = vpop.permute.xlu2 %659  ;;  %v2459_v57 = vsel %vm608_vm1, %v654_v46, %v655_v10  ;;  %v490_v10 = vrot.slane %v488_v30, 1 }
  0x84   : > { %586 = vrot.lane.b32.xlu0 %v2298_v49, %s2091_s6 }
  0x85   : > { %704 = vrot.lane.b32.xlu1 %v2342_v11, %s2090_s5 }
  0x87   : > { %v782_v34 = vpop.permute.xlu1 %781 }
  0x88   : > { %838 = vrot.lane.b32.xlu2 %v2452_v33, %s2090_s5 }
  0x8a   : > { %v2463_v40 = vpop.permute.xlu2 %830 }
  0x8c   : > { %791 = vrot.lane.b32.xlu0 %v2429_v9, %s2089_s30 }
  0x8d   : > { %687 = vrot.lane.b32.xlu1 %v2459_v57, %s2089_s30 }
  0x8e   : > { %v745_v45 = vpop.permute.xlu0 %744 }
  0x8f   : > { %v980_v3 = vsel %vm863_vm3, %v2186_v50, %v745_v45  ;;  %v658_v58 = vpop.permute.xlu1 %657  ;;  %v2487_v50 = vld [vmem:[%s2133_s25 + $0x60] sm:$0xff] }
  0x90   : > { %v1027_v60 = vsel %vm896_vm4, %v980_v3, %v782_v34  ;;  %724 = vrot.lane.b32.xlu2 %v2468_v51, %s2090_s5  ;;  %v483_v32 = vshll.u32 %v2487_v50, 16  ;;  %v481_v24 = vshrl.u32 %v2487_v50, 16  ;;  %v633_v34 = vrot.slane %v2487_v50, 1 }
  0x91   : > { %v1059_v63 = vsel %vm929_vm5, %v1027_v60, %v829_v14 }
  0x92   : > { %1395 = vmatmul.bf16.vlgmr.msra.gmra.mxu1 %v1059_v63  ;;  %v2489_v17 = vpop.permute.xlu2 %661  ;;  %v485_v27 = vrot.slane %v483_v32, 1  ;;  %v2516_v37 = vsel %vm608_vm1, %v633_v34, %v634_v35 }
  0x93   : > { %2000 = vmatmul.msk.bf16.gmra.mxu2 %vm863_vm3, %v2516_v37 }
  0x94   : > { %606 = vrot.lane.b32.xlu0 %v2478_v13, %s2091_s6  ;;  %v486_v46 = vor.u32 %v485_v27, %v481_v24 }
  0x95   : > { %756 = vrot.lane.b32.xlu1 %v632_v18, %s2091_s6 }
  0x96   : > { %v577_v14 = vpop.permute.xlu0 %576 }
  0x97   : > { %v865_v21 = vsel %vm863_vm3, %v2149_v5, %v577_v14  ;;  %v747_v22 = vpop.permute.xlu1 %746 }
  0x98   : > { %v898_v23 = vsel %vm896_vm4, %v865_v21, %v658_v58  ;;  %669 = vrot.lane.b32.xlu2 %v2424_v0, %s2089_s30  ;;  %v983_v45 = vsel %vm863_vm3, %v2173_v39, %v747_v22  ;;  %v376_v39 = vpack.c.b16 %v360_v53, %v360_v53 }
  0x99   : > { %v931_v43 = vsel %vm929_vm5, %v898_v23, %v2396_v47  ;;  %v2509_v47 = vsel %vm383_vm2, %v486_v46, %v490_v10 }
  0x9a   : > { %1306 = vmatmul.bf16.vlgmr.msra.gmra.mxu0 %v931_v43  ;;  %v833_v5 = vpop.permute.xlu2 %832  ;;  %v637_v20 = vrot.slane %v376_v39, 1  ;;  %v500_v23 = vshll.u32 %v376_v39, 16 }
  0x9c   : > { %588 = vrot.lane.b32.xlu0 %v2389_v38, %s2091_s6  ;;  %v502_v43 = vrot.slane %v500_v23, 1 }
  0x9d   : > { %706 = vrot.lane.b32.xlu1 %v2429_v9, %s2090_s5 }
  0x9e   : > { %v579_v28 = vpop.permute.xlu0 %578 }
  0x9f   : > { %v697_v36 = vpop.permute.xlu1 %696  ;;  %v867_v0 = vsel %vm863_vm3, %v2145_v2, %v579_v28  ;;  %v233_v28 = vld [vmem:[%s2133_s25 + $0x80] sm:$0x1] }
  0xa0   : > { %840 = vrot.lane.b32.xlu2 %v2509_v47, %s2090_s5  ;;  %v900_v3 = vsel %vm896_vm4, %v867_v0, %v2442_v31  ;;  %v2538_v31 = vld [vmem:[%s2133_s25 + $0x6c] sm:$0xff] }
  0xa1   : > { %v934_v60 = vsel %vm929_vm5, %v900_v3, %v697_v36  ;;  %v636_v14 = vrot.slane %v2538_v31, 1  ;;  %v493_v21 = vshrl.u32 %v2538_v31, 16  ;;  %v361_v36 = vunpack.c.l.b16 %v233_v28  ;;  %v2577_v3 = vld [vmem:[%s2133_s25 + $0x78] sm:$0xff] }
  0xa2   : > { %v719_v41 = vpop.permute.xlu2 %718 }
  0xa3   : > { %v2549_v27 = vsel %vm608_vm1, %v636_v14, %v637_v20 }
  0xa4   : > { %793 = vrot.lane.b32.xlu0 %v2487_v50, %s2089_s30  ;;  %2001 = vmatmul.msk.bf16.gmra.mxu2 %vm863_vm3, %v2549_v27 }
  0xa5   : > { %805 = vrot.lane.b32.xlu1 %v2331_v4, %s2089_s30 }
  0xa6   : > { %v784_v52 = vpop.permute.xlu0 %783 }
  0xa7   : > { %v1029_v2 = vsel %vm896_vm4, %v983_v45, %v784_v52  ;;  %v749_v56 = vpop.permute.xlu1 %748 }
  0xa8   : > { %v1062_v58 = vsel %vm929_vm5, %v1029_v2, %v2463_v40  ;;  %852 = vrot.lane.b32.xlu2 %v2418_v62, %s2090_s5  ;;  %v495_v40 = vshll.u32 %v2538_v31, 16  ;;  %v986_v10 = vsel %vm863_vm3, %v2195_v55, %v749_v56  ;;  %v639_v2 = vrot.slane %v2577_v3, 1 }
  0xa9   : > { %1400 = vmatmul.bf16.gmra.mxu1 %v1062_v58 }
  0xaa   : > { %1311 = vmatmul.bf16.gmra.mxu0 %v934_v60  ;;  %v664_v63 = vpop.permute.xlu2 %663  ;;  %v497_v22 = vrot.slane %v495_v40, 1 }
  0xac   : > { %768 = vrot.lane.b32.xlu0 %v2305_v54, %s2091_s6  ;;  %v498_v30 = vor.u32 %v497_v22, %v493_v21  ;;  %v505_v21 = vshrl.u32 %v2577_v3, 16 }
  0xad   : > { %758 = vrot.lane.b32.xlu1 %v2516_v37, %s2091_s6 }
  0xae   : > { %v581_v16 = vpop.permute.xlu0 %580  ;;  %v2566_v35 = vsel %vm383_vm2, %v498_v30, %v502_v43  ;;  %v251_v43 = vld [vmem:[%s2133_s25 + $0xc8] sm:$0x1] }
  0xaf   : > { %v699_v32 = vpop.permute.xlu1 %698  ;;  %v869_v24 = vsel %vm863_vm3, %v2142_v1, %v581_v16 }
  0xb0   : > { %671 = vrot.lane.b32.xlu2 %v632_v18, %s2089_s30  ;;  %v902_v18 = vsel %vm896_vm4, %v869_v24, %v2489_v17  ;;  %v377_v17 = vpack.c.b16 %v361_v36, %v361_v36 }
  0xb1   : > { %v937_v55 = vsel %vm929_vm5, %v902_v18, %v699_v32 }
  0xb2   : > { %v2553_v46 = vpop.permute.xlu2 %834  ;;  %v640_v53 = vrot.slane %v377_v17, 1  ;;  %v512_v23 = vshll.u32 %v377_v17, 16 }
  0xb4   : > { %590 = vrot.lane.b32.xlu0 %v2452_v33, %s2091_s6  ;;  %v2589_v39 = vsel %vm608_vm1, %v639_v2, %v640_v53  ;;  %v514_v30 = vrot.slane %v512_v23, 1 }
  0xb5   : > { %708 = vrot.lane.b32.xlu1 %v2487_v50, %s2090_s5  ;;  %2002 = vmatmul.msk.bf16.gmra.mxu2 %vm863_vm3, %v2589_v39 }
  0xb6   : > { %v786_v1 = vpop.permute.xlu0 %785 }
  0xb7   : > { %v1031_v34 = vsel %vm896_vm4, %v986_v10, %v786_v1  ;;  %v682_v0 = vpop.permute.xlu1 %681  ;;  %v727_v10 = vunpack.c.l.b16 %v251_v43 }
  0xb8   : > { %v1065_v44 = vsel %vm929_vm5, %v1031_v34, %v833_v5  ;;  %842 = vrot.lane.b32.xlu2 %v2566_v35, %s2090_s5 }
  0xb9   : > { %1405 = vmatmul.bf16.gmra.mxu1 %v1065_v44  ;;  %v2621_v34 = vpack.c.b16 %v727_v10, %v727_v10 }
  0xba   : > { %1316 = vmatmul.bf16.gmra.mxu0 %v937_v55  ;;  %v2574_v45 = vpop.permute.xlu2 %720 }
  0xbb   : > { %v737_v53 = vshll.u32 %v2621_v34, 16 }
  0xbc   : > { %795 = vrot.lane.b32.xlu0 %v2538_v31, %s2089_s30 }
  0xbd   : > { %807 = vrot.lane.b32.xlu1 %v2415_v61, %s2089_s30 }
  0xbe   : > { %v601_v52 = vpop.permute.xlu0 %600 }
  0xbf   : > { %v889_v5 = vsel %vm863_vm3, %v2212_v6, %v601_v52  ;;  %v751_v56 = vpop.permute.xlu1 %750 }
  0xc0   : > { %v922_v58 = vsel %vm896_vm4, %v889_v5, %v682_v0  ;;  %854 = vrot.lane.b32.xlu2 %v2478_v13, %s2090_s5  ;;  %v989_v1 = vsel %vm863_vm3, %v2232_v15, %v751_v56  ;;  %v2626_v0 = vld [vmem:[%s2133_s25 + $0x84] sm:$0xff]  ;;  %v730_v5 = vshrl.u32 %v2468_v51, 16 }
  0xc1   : > { %v967_v60 = vsel %vm929_vm5, %v922_v58, %v719_v41  ;;  %v507_v41 = vshll.u32 %v2577_v3, 16  ;;  %v642_v56 = vrot.slane %v2626_v0, 1  ;;  %v519_v43 = vshll.u32 %v2626_v0, 16 }
  0xc2   : > { %1366 = vmatmul.bf16.vlgmr.msra.gmra.mxu3 %v967_v60  ;;  %v2594_v16 = vpop.permute.xlu2 %665 }
  0xc3   : > { %2065 = vmatpush.bf16.msra.mxu3 %v2217_v8  ;;  %v2603_v8 = vpop.f32.mrf.mxu2  ;;  %v509_v22 = vrot.slane %v507_v41, 1  ;;  %v739_v41 = vrot.slane %v737_v53, 1 }
  0xc4   : > { %770 = vrot.lane.b32.xlu0 %v2401_v48, %s2091_s6 }
  0xc5   : > { %760 = vrot.lane.b32.xlu1 %v2549_v27, %s2091_s6 }
  0xc6   : > { %v583_v40 = vpop.permute.xlu0 %582 }
  0xc7   : > { %v871_v14 = vsel %vm863_vm3, %v2180_v42, %v583_v40  ;;  %2066 = vmatpush.bf16.msra.mxu3 %v2228_v12  ;;  %v701_v32 = vpop.permute.xlu1 %700  ;;  %v510_v42 = vor.u32 %v509_v22, %v505_v21 }
  0xc8   : > { %v904_v20 = vsel %vm896_vm4, %v871_v14, %v664_v63  ;;  %673 = vrot.lane.b32.xlu2 %v2516_v37, %s2089_s30  ;;  %v236_v63 = vld [vmem:[%s2133_s25 + $0x8c] sm:$0x1]  ;;  %v732_v37 = vshll.u32 %v2468_v51, 16 }
  0xc9   : > { %v940_v24 = vsel %vm929_vm5, %v904_v20, %v701_v32  ;;  %v362_v18 = vunpack.c.l.b16 %v236_v63  ;;  %v2629_v44 = vsel %vm383_vm2, %v510_v42, %v514_v30 }
  0xca   : > { %1321 = vmatmul.bf16.gmra.mxu0 %v940_v24  ;;  %v2614_v12 = vpop.permute.xlu2 %836  ;;  %v734_v2 = vrot.slane %v732_v37, 1 }
  0xcb   : > { %v2631_v55 = vpop.f32.mrf.mxu2  ;;  %v378_v17 = vpack.c.b16 %v362_v18, %v362_v18 }
  0xcc   : > { %592 = vrot.lane.b32.xlu0 %v2509_v47, %s2091_s6  ;;  %v735_v40 = vor.u32 %v734_v2, %v730_v5  ;;  %v254_v5 = vld [vmem:[%s2133_s25 + $0xd4] sm:$0x1] }
  0xcd   : > { %710 = vrot.lane.b32.xlu1 %v2538_v31, %s2090_s5  ;;  %v643_v58 = vrot.slane %v378_v17, 1  ;;  %v524_v37 = vshll.u32 %v378_v17, 16  ;;  %v814_v2 = vunpack.c.l.b16 %v254_v5 }
  0xce   : > { %v788_v28 = vpop.permute.xlu0 %787  ;;  %v2654_v32 = vsel %vm383_vm2, %v735_v40, %v739_v41 }
  0xcf   : > { %v1033_v36 = vsel %vm896_vm4, %v989_v1, %v788_v28  ;;  %v684_v52 = vpop.permute.xlu1 %683  ;;  %v2641_v60 = vsel %vm608_vm1, %v642_v56, %v643_v58  ;;  %v517_v1 = vshrl.u32 %v2626_v0, 16  ;;  %v521_v28 = vrot.slane %v519_v43, 1 }
  0xd0   : > { %v1068_v15 = vsel %vm929_vm5, %v1033_v36, %v2553_v46  ;;  %844 = vrot.lane.b32.xlu2 %v2629_v44, %s2090_s5  ;;  %2003 = vmatmul.msk.bf16.gmra.mxu2 %vm863_vm3, %v2641_v60 }
  0xd1   : > { %1410 = vmatmul.bf16.gmra.mxu1 %v1068_v15  ;;  %v526_v15 = vrot.slane %v524_v37, 1 }
  0xd2   : > { %v2645_v46 = vpop.permute.xlu2 %722 }
  0xd3   : > { %v2656_v21 = vpop.f32.mrf.mxu2 }
  0xd4   : > { %797 = vrot.lane.b32.xlu0 %v2577_v3, %s2089_s30 }
  0xd5   : > { %809 = vrot.lane.b32.xlu1 %v2468_v51, %s2089_s30 }
  0xd6   : > { %v603_v14 = vpop.permute.xlu0 %602 }
  0xd7   : > { %v891_v20 = vsel %vm863_vm3, %v2249_v25, %v603_v14  ;;  %v753_v22 = vpop.permute.xlu1 %752 }
  0xd8   : > { %v924_v23 = vsel %vm896_vm4, %v891_v20, %v684_v52  ;;  %856 = vrot.lane.b32.xlu2 %v2654_v32, %s2090_s5  ;;  %v522_v52 = vor.u32 %v521_v28, %v517_v1  ;;  %v992_v17 = vsel %vm863_vm3, %v2298_v49, %v753_v22 }
  0xd9   : > { %v970_v24 = vsel %vm929_vm5, %v924_v23, %v2574_v45 }
  0xda   : > { %1371 = vmatmul.bf16.gmra.mxu3 %v970_v24  ;;  %v668_v42 = vpop.permute.xlu2 %667  ;;  %v2695_v40 = vsel %vm383_vm2, %v522_v52, %v526_v15 }
  0xdb   : > { %v2670_v45 = vpop.f32.mrf.mxu2 }
  0xdc   : > { %772 = vrot.lane.b32.xlu0 %v2459_v57, %s2091_s6 }
  0xdd   : > { %762 = vrot.lane.b32.xlu1 %v2589_v39, %s2091_s6 }
  0xde   : > { %v585_v30 = vpop.permute.xlu0 %584 }
  0xdf   : > { %v873_v63 = vsel %vm863_vm3, %v2204_v59, %v585_v30  ;;  %v703_v18 = vpop.permute.xlu1 %702  ;;  %v2682_v59 = vld [vmem:[%s2133_s25 + $0xcc] sm:$0xff] }
  0xe0   : > { %v906_v10 = vsel %vm896_vm4, %v873_v63, %v2594_v16  ;;  %675 = vrot.lane.b32.xlu2 %v2549_v27, %s2089_s30  ;;  %2004 = vmatmul.msk.bf16.gmra.mxu2 %vm863_vm3, %v2239_v19  ;;  %v2690_v27 = vpack.c.b16 %v814_v2, %v814_v2  ;;  %v819_v56 = vshll.u32 %v2682_v59, 16  ;;  %v817_v49 = vshrl.u32 %v2682_v59, 16 }
  0xe1   : > { %v943_v36 = vsel %vm929_vm5, %v906_v10, %v703_v18  ;;  %v741_v63 = vrot.slane %v2468_v51, 1  ;;  %v742_v10 = vrot.slane %v2621_v34, 1 }
  0xe2   : > { %1326 = vmatmul.bf16.gmra.mxu0 %v943_v36  ;;  %v839_v16 = vpop.permute.xlu2 %838  ;;  %v821_v22 = vrot.slane %v819_v56, 1  ;;  %v824_v23 = vshll.u32 %v2690_v27, 16 }
  0xe3   : > { %v2697_v41 = vpop.f32.mrf.mxu2  ;;  %v2720_v51 = vsel %vm608_vm1, %v741_v63, %v742_v10 }
  0xe4   : > { %594 = vrot.lane.b32.xlu0 %v2566_v35, %s2091_s6  ;;  %v822_v24 = vor.u32 %v821_v22, %v817_v49  ;;  %v826_v30 = vrot.slane %v824_v23, 1 }
  0xe5   : > { %712 = vrot.lane.b32.xlu1 %v2577_v3, %s2090_s5 }
  0xe6   : > { %v790_v53 = vpop.permute.xlu0 %789  ;;  %v827_v1 = vsel %vm383_vm2, %v822_v24, %v826_v30 }
  0xe7   : > { %v1035_v58 = vsel %vm896_vm4, %v992_v17, %v790_v53  ;;  %v686_v14 = vpop.permute.xlu1 %685 }
  0xe8   : > { %v1071_v20 = vsel %vm929_vm5, %v1035_v58, %v2614_v12  ;;  %846 = vrot.lane.b32.xlu2 %v2695_v40, %s2090_s5 }
  0xe9   : > { %1415 = vmatmul.bf16.gmra.mxu1 %v1071_v20 }
  0xea   : > { %v725_v43 = vpop.permute.xlu2 %724 }
  0xeb   : > { %v2714_v28 = vpop.f32.mrf.mxu2 }
  0xec   : > { %799 = vrot.lane.b32.xlu0 %v2626_v0, %s2089_s30 }
  0xed   : > { %811 = vrot.lane.b32.xlu1 %v2682_v59, %s2089_s30 }
  0xee   : > { %v605_v12 = vpop.permute.xlu0 %604 }
  0xef   : > { %v893_v18 = vsel %vm863_vm3, %v2331_v4, %v605_v12  ;;  %v755_v37 = vpop.permute.xlu1 %754 }
  0xf0   : > { %v926_v36 = vsel %vm896_vm4, %v893_v18, %v686_v14  ;;  %858 = vrot.lane.b32.xlu2 %v827_v1, %s2090_s5  ;;  %2005 = vmatmul.msk.bf16.gmra.mxu2 %vm863_vm3, %v2305_v54  ;;  %v995_v53 = vsel %vm863_vm3, %v2389_v38, %v755_v37 }
  0xf1   : > { %v973_v52 = vsel %vm929_vm5, %v926_v36, %v2645_v46 }
  0xf2   : > { %1376 = vmatmul.bf16.gmra.mxu3 %v973_v52  ;;  %v670_v4 = vpop.permute.xlu2 %669 }
  0xf3   : > { %v2731_v15 = vpop.f32.mrf.mxu2 }
  0xf4   : > { %774 = vrot.lane.b32.xlu0 %v2720_v51, %s2091_s6 }
  0xf5   : > { %764 = vrot.lane.b32.xlu1 %v2641_v60, %s2091_s6 }
  0xf6   : > { %v587_v34 = vpop.permute.xlu0 %586 }
  0xf7   : > { %v875_v46 = vsel %vm863_vm3, %v2262_v29, %v587_v34  ;;  %v705_v2 = vpop.permute.xlu1 %704 }
  0xf8   : > { %v908_v5 = vsel %vm896_vm4, %v875_v46, %v668_v42  ;;  %677 = vrot.lane.b32.xlu2 %v2589_v39, %s2089_s30 }
  0xf9   : > { %v946_v17 = vsel %vm929_vm5, %v908_v5, %v705_v2 }
  0xfa   : > { %1331 = vmatmul.bf16.gmra.mxu0 %v946_v17  ;;  %v841_v54 = vpop.permute.xlu2 %840 }
  0xfb   : > { %v2744_v42 = vpop.f32.mrf.mxu2 }
  0xfc   : > { %596 = vrot.lane.b32.xlu0 %v2629_v44, %s2091_s6 }
  0xfd   : > { %714 = vrot.lane.b32.xlu1 %v2626_v0, %s2090_s5 }
  0xfe   : > { %v792_v56 = vpop.permute.xlu0 %791 }
  0xff   : > { %v1037_v29 = vsel %vm896_vm4, %v995_v53, %v792_v56  ;;  %v688_v58 = vpop.permute.xlu1 %687 }
 0x100   : > { %v1074_v14 = vsel %vm929_vm5, %v1037_v29, %v839_v16  ;;  %848 = vrot.lane.b32.xlu2 %v2252_v26, %s2090_s5  ;;  %2006 = vmatmul.msk.bf16.gmra.mxu2 %vm863_vm3, %v2401_v48 }
 0x101   : > { %1420 = vmatmul.bf16.gmra.mxu1 %v1074_v14 }
 0x102   : > { %v853_v39 = vpop.permute.xlu2 %852 }
 0x103   : > { %v2757_v49 = vpop.f32.mrf.mxu2 }
 0x104   : > { %801 = vrot.lane.b32.xlu0 %v2212_v6, %s2089_s30 }
 0x105   : > { %766 = vrot.lane.b32.xlu1 %v2239_v19, %s2091_s6 }
 0x106   : > { %v607_v38 = vpop.permute.xlu0 %606 }
 0x107   : > { %v895_v20 = vsel %vm863_vm3, %v2415_v61, %v607_v38  ;;  %v757_v16 = vpop.permute.xlu1 %756 }
 0x108   : > { %v928_v22 = vsel %vm896_vm4, %v895_v20, %v688_v58  ;;  %679 = vrot.lane.b32.xlu2 %v2641_v60, %s2089_s30 }
 0x109   : > { %v976_v23 = vsel %vm929_vm5, %v928_v22, %v725_v43 }
 0x10a   : > { %1381 = vmatmul.bf16.gmra.mxu3 %v976_v23  ;;  %v672_v48 = vpop.permute.xlu2 %671 }
 0x10b   : > { %v2769_v61 = vpop.f32.mrf.mxu2 }
 0x10c   : > { %598 = vrot.lane.b32.xlu0 %v2695_v40, %s2091_s6 }
 0x10d   : > { %716 = vrot.lane.b32.xlu1 %v2212_v6, %s2090_s5 }
 0x10e   : > { %v589_v24 = vpop.permute.xlu0 %588 }
 0x10f   : > { %v877_v19 = vsel %vm863_vm3, %v2342_v11, %v589_v24  ;;  %v707_v43 = vpop.permute.xlu1 %706  ;;  %v1396_v60 = vpop.f32.mrf.mxu1  ;;  %v998_v11 = vsel %vm863_vm3, %v2452_v33, %v757_v16 }
 0x110   : > { %v910_v30 = vsel %vm896_vm4, %v877_v19, %v670_v4  ;;  %850 = vrot.lane.b32.xlu2 %v2334_v7, %s2090_s5  ;;  %2007 = vmatmul.msk.bf16.gmra.mxu2 %vm863_vm3, %v2459_v57 }
 0x111   : > { %v949_v63 = vsel %vm929_vm5, %v910_v30, %v707_v43 }
 0x112   : > { %1336 = vmatmul.bf16.gmra.mxu0 %v949_v63  ;;  %v843_v6 = vpop.permute.xlu2 %842 }
 0x113   : > { %v2783_v52 = vpop.f32.mrf.mxu2 }
 0x114   : > { %803 = vrot.lane.b32.xlu0 %v2249_v25, %s2089_s30 }
 0x116   : > { %v794_v10 = vpop.permute.xlu0 %793 }
 0x117   : > { %v1039_v12 = vsel %vm896_vm4, %v998_v11, %v794_v10  ;;  %v1307_v18 = vpop.f32.mrf.mxu0  ;;  %v806_v37 = vpop.permute.xlu1 %805 }
 0x118   : > { %v1397_v1 = vadd.f32 %v1396_v60, %v1307_v18  ;;  %v1077_v36 = vsel %vm929_vm5, %v1039_v12, %v841_v54  ;;  %v1398_v57 = vpop.f32.mrf.mxu1 }
 0x119   : > { %1425 = vmatmul.bf16.gmra.mxu1 %v1077_v36 }
 0x11a   : > { %v1486_v25 = vadd.f32 %v2603_v8, %v1397_v1  ;;  %v855_v46 = vpop.permute.xlu2 %854 }
 0x11b   : > { %v2792_v53 = vpop.f32.mrf.mxu2 }
 0x11c   : > { %1565 = vst.msk [vmem:[%s2128_s22] sm:$0xff] %vm863_vm3, %v1486_v25  ;;  %v1671_v56 = vmul.f32 %v1486_v25, %v1486_v25  ;;  %v1598_v29 = vsel %vm863_vm3, %v1486_v25, 0.0 }
 0x11e   : > { %v769_v4 = vpop.permute.xlu0 %768  ;;  %v1703_v38 = vsel %vm863_vm3, %v1671_v56, 0.0 }
 0x11f   : > { %v1016_v33 = vsel %vm863_vm3, %v2334_v7, %v769_v4  ;;  %v1309_v34 = vpop.f32.mrf.mxu0  ;;  %v759_v2 = vpop.permute.xlu1 %758 }
 0x120   : > { %v1399_v5 = vadd.f32 %v1398_v57, %v1309_v34  ;;  %v1051_v17 = vsel %vm896_vm4, %v1016_v33, %v806_v37 }
 0x121   : > { %v1095_v54 = vsel %vm929_vm5, %v1051_v17, %v853_v39 }
 0x122   : > { %v1488_v8 = vadd.f32 %v2631_v55, %v1399_v5  ;;  %1455 = vmatmul.bf16.vlgmr.msrb.gmra.mxu3 %v1095_v54  ;;  %v674_v63 = vpop.permute.xlu2 %673 }
 0x123   : > { %v2806_v11 = vpop.f32.mrf.mxu2 }
 0x124   : > { %1566 = vst.msk [vmem:[%s2128_s22 + $0x8] sm:$0xff] %vm863_vm3, %v1488_v8  ;;  %v1599_v7 = vsel %vm863_vm3, %v1488_v8, 0.0  ;;  %v1672_v58 = vmul.f32 %v1488_v8, %v1488_v8 }
 0x125   : > { %v1600_v14 = vadd.f32 %v1599_v7, %v1598_v29 }
 0x126   : > { %v1704_v20 = vsel %vm863_vm3, %v1672_v58, 0.0  ;;  %v1401_v39 = vpop.f32.mrf.mxu1  ;;  %v591_v16 = vpop.permute.xlu0 %590 }
 0x127   : > { %v1705_v22 = vadd.f32 %v1704_v20, %v1703_v38  ;;  %v879_v55 = vsel %vm863_vm3, %v2429_v9, %v591_v16  ;;  %v1312_v23 = vpop.f32.mrf.mxu0  ;;  %v709_v30 = vpop.permute.xlu1 %708 }
 0x128   : > { %v912_v24 = vsel %vm896_vm4, %v879_v55, %v672_v48  ;;  %v1402_v19 = vadd.f32 %v1401_v39, %v1312_v23  ;;  %v1001_v48 = vsel %vm863_vm3, %v2509_v47, %v759_v2 }
 0x129   : > { %v952_v43 = vsel %vm929_vm5, %v912_v24, %v709_v30 }
 0x12a   : > { %v1491_v60 = vadd.f32 %v2656_v21, %v1402_v19  ;;  %1341 = vmatmul.bf16.gmra.mxu0 %v952_v43  ;;  %v845_v5 = vpop.permute.xlu2 %844 }
 0x12b   : > { %v2820_v54 = vpop.f32.mrf.mxu2 }
 0x12c   : > { %1567 = vst.msk [vmem:[%s2128_s22 + $0x10] sm:$0xff] %vm863_vm3, %v1491_v60  ;;  %v1601_v10 = vsel %vm863_vm3, %v1491_v60, 0.0  ;;  %v1673_v12 = vmul.f32 %v1491_v60, %v1491_v60 }
 0x12d   : > { %v1602_v9 = vadd.f32 %v1601_v10, %v1600_v14 }
 0x12e   : > { %v1706_v18 = vsel %vm863_vm3, %v1673_v12, 0.0  ;;  %v1403_v1 = vpop.f32.mrf.mxu1  ;;  %v796_v37 = vpop.permute.xlu0 %795 }
 0x12f   : > { %v1707_v36 = vadd.f32 %v1706_v18, %v1705_v22  ;;  %v1041_v21 = vsel %vm896_vm4, %v1001_v48, %v796_v37  ;;  %v1314_v25 = vpop.f32.mrf.mxu0  ;;  %v808_v4 = vpop.permute.xlu1 %807 }
 0x130   : > { %v1404_v57 = vadd.f32 %v1403_v1, %v1314_v25  ;;  %v1080_v33 = vsel %vm929_vm5, %v1041_v21, %v843_v6 }
 0x131   : > { %1430 = vmatmul.bf16.gmra.mxu1 %v1080_v33 }
 0x132   : > { %v1493_v34 = vadd.f32 %v2670_v45, %v1404_v57  ;;  %v857_v23 = vpop.permute.xlu2 %856 }
 0x133   : > { %v2834_v60 = vpop.f32.mrf.mxu2 }
 0x134   : > { %1568 = vst.msk [vmem:[%s2128_s22 + $0x18] sm:$0xff] %vm863_vm3, %v1493_v34  ;;  %v1603_v47 = vsel %vm863_vm3, %v1493_v34, 0.0  ;;  %v1674_v2 = vmul.f32 %v1493_v34, %v1493_v34 }
 0x135   : > { %v1604_v17 = vadd.f32 %v1603_v47, %v1602_v9 }
 0x136   : > { %v1708_v56 = vsel %vm863_vm3, %v1674_v2, 0.0  ;;  %v1406_v8 = vpop.f32.mrf.mxu1  ;;  %v771_v29 = vpop.permute.xlu0 %770 }
 0x137   : > { %v1709_v7 = vadd.f32 %v1708_v56, %v1707_v36  ;;  %v1019_v6 = vsel %vm863_vm3, %v2418_v62, %v771_v29  ;;  %v1317_v58 = vpop.f32.mrf.mxu0  ;;  %v761_v14 = vpop.permute.xlu1 %760 }
 0x138   : > { %v1407_v45 = vadd.f32 %v1406_v8, %v1317_v58  ;;  %v1053_v38 = vsel %vm896_vm4, %v1019_v6, %v808_v4 }
 0x139   : > { %v1098_v20 = vsel %vm929_vm5, %v1053_v38, %v855_v46 }
 0x13a   : > { %v1496_v39 = vadd.f32 %v2697_v41, %v1407_v45  ;;  %1460 = vmatmul.bf16.gmra.mxu3 %v1098_v20  ;;  %v676_v57 = vpop.permute.xlu2 %675 }
 0x13b   : > { %v2847_v33 = vpop.f32.mrf.mxu2 }
 0x13c   : > { %1569 = vst.msk [vmem:[%s2128_s22 + $0x20] sm:$0xff] %vm863_vm3, %v1496_v39  ;;  %v1605_v16 = vsel %vm863_vm3, %v1496_v39, 0.0  ;;  %v1675_v22 = vmul.f32 %v1496_v39, %v1496_v39 }
 0x13d   : > { %v1606_v55 = vadd.f32 %v1605_v16, %v1604_v17 }
 0x13e   : > { %v1710_v62 = vsel %vm863_vm3, %v1675_v22, 0.0  ;;  %v1408_v24 = vpop.f32.mrf.mxu1  ;;  %v593_v19 = vpop.permute.xlu0 %592 }
 0x13f   : > { %v1711_v30 = vadd.f32 %v1710_v62, %v1709_v7  ;;  %v881_v43 = vsel %vm863_vm3, %v2487_v50, %v593_v19  ;;  %v1319_v46 = vpop.f32.mrf.mxu0  ;;  %v711_v12 = vpop.permute.xlu1 %710  ;;  %v1004_v50 = vsel %vm863_vm3, %v2566_v35, %v761_v14 }
 0x140   : > { %v914_v41 = vsel %vm896_vm4, %v881_v43, %v674_v63  ;;  %v1409_v10 = vadd.f32 %v1408_v24, %v1319_v46 }
 0x141   : > { %v955_v9 = vsel %vm929_vm5, %v914_v41, %v711_v12 }
 0x142   : > { %v1498_v48 = vadd.f32 %v2714_v28, %v1409_v10  ;;  %1346 = vmatmul.bf16.gmra.mxu0 %v955_v9  ;;  %v847_v6 = vpop.permute.xlu2 %846 }
 0x143   : > { %v2857_v45 = vpop.f32.mrf.mxu2 }
 0x144   : > { %1570 = vst.msk [vmem:[%s2128_s22 + $0x28] sm:$0xff] %vm863_vm3, %v1498_v48  ;;  %v1607_v18 = vsel %vm863_vm3, %v1498_v48, 0.0  ;;  %v1676_v1 = vmul.f32 %v1498_v48, %v1498_v48 }
 0x145   : > { %v1608_v37 = vadd.f32 %v1607_v18, %v1606_v55  ;;  %v2868_v41 = vpop.f32.mrf.mxu3 }
 0x146   : > { %v1712_v36 = vsel %vm863_vm3, %v1676_v1, 0.0  ;;  %v798_v21 = vpop.permute.xlu0 %797 }
 0x147   : > { %v1713_v63 = vadd.f32 %v1712_v36, %v1711_v30  ;;  %v1043_v25 = vsel %vm896_vm4, %v1004_v50, %v798_v21  ;;  %v810_v4 = vpop.permute.xlu1 %809  ;;  %v1322_v34 = vpop.f32.mrf.mxu0 }
 0x148   : > { %v1083_v28 = vsel %vm929_vm5, %v1043_v25, %v845_v5 }
 0x149   : > { %1435 = vmatmul.bf16.gmra.mxu1 %v1083_v28 }
 0x14a   : > { %v859_v43 = vpop.permute.xlu2 %858 }
 0x14e   : > { %v1411_v47 = vpop.f32.mrf.mxu1  ;;  %v773_v2 = vpop.permute.xlu0 %772 }
 0x14f   : > { %v1412_v17 = vadd.f32 %v1411_v47, %v1322_v34  ;;  %v1022_v35 = vsel %vm863_vm3, %v2478_v13, %v773_v2  ;;  %v763_v56 = vpop.permute.xlu1 %762  ;;  %v1324_v38 = vpop.f32.mrf.mxu0 }
 0x150   : > { %v1055_v8 = vsel %vm896_vm4, %v1022_v35, %v810_v4  ;;  %v1007_v12 = vsel %vm863_vm3, %v2629_v44, %v763_v56 }
 0x151   : > { %v1501_v29 = vadd.f32 %v2731_v15, %v1412_v17  ;;  %v1101_v7 = vsel %vm929_vm5, %v1055_v8, %v857_v23 }
 0x152   : > { %1465 = vmatmul.bf16.gmra.mxu3 %v1101_v7  ;;  %v678_v50 = vpop.permute.xlu2 %677 }
 0x153   : > { %1571 = vst.msk [vmem:[%s2128_s22 + $0x30] sm:$0xff] %vm863_vm3, %v1501_v29  ;;  %v1609_v5 = vsel %vm863_vm3, %v1501_v29, 0.0  ;;  %v1677_v58 = vmul.f32 %v1501_v29, %v1501_v29 }
 0x154   : > { %v1610_v14 = vadd.f32 %v1609_v5, %v1608_v37 }
 0x155   : > { %v1714_v13 = vsel %vm863_vm3, %v1677_v58, 0.0 }
 0x156   : > { %v1715_v20 = vadd.f32 %v1714_v13, %v1713_v63  ;;  %v1413_v39 = vpop.f32.mrf.mxu1  ;;  %v595_v16 = vpop.permute.xlu0 %594 }
 0x157   : > { %v1414_v15 = vadd.f32 %v1413_v39, %v1324_v38  ;;  %v883_v22 = vsel %vm863_vm3, %v2538_v31, %v595_v16  ;;  %v713_v23 = vpop.permute.xlu1 %712  ;;  %v2871_v31 = vpop.f32.mrf.mxu2 }
 0x158   : > { %v916_v55 = vsel %vm896_vm4, %v883_v22, %v676_v57  ;;  %v2877_v63 = vpop.f32.mrf.mxu3 }
 0x159   : > { %v1503_v62 = vadd.f32 %v2744_v42, %v1414_v15  ;;  %v958_v24 = vsel %vm929_vm5, %v916_v55, %v713_v23 }
 0x15a   : > { %1351 = vmatmul.bf16.gmra.mxu0 %v958_v24  ;;  %v849_v13 = vpop.permute.xlu2 %848 }
 0x15b   : > { %1572 = vst.msk [vmem:[%s2128_s22 + $0x38] sm:$0xff] %vm863_vm3, %v1503_v62  ;;  %v1611_v19 = vsel %vm863_vm3, %v1503_v62, 0.0  ;;  %v1678_v30 = vmul.f32 %v1503_v62, %v1503_v62 }
 0x15c   : > { %v1612_v46 = vadd.f32 %v1611_v19, %v1610_v14 }
 0x15d   : > { %v1716_v10 = vsel %vm863_vm3, %v1678_v30, 0.0 }
 0x15e   : > { %v1717_v42 = vadd.f32 %v1716_v10, %v1715_v20  ;;  %v800_v9 = vpop.permute.xlu0 %799 }
 0x15f   : > { %v1045_v48 = vsel %vm896_vm4, %v1007_v12, %v800_v9  ;;  %v812_v18 = vpop.permute.xlu1 %811  ;;  %v1327_v37 = vpop.f32.mrf.mxu0 }
 0x160   : > { %v1086_v1 = vsel %vm929_vm5, %v1045_v48, %v847_v6  ;;  %v2881_v44 = vpop.f32.mrf.mxu2  ;;  %v2890_v6 = vpop.f32.mrf.mxu3 }
 0x161   : > { %1440 = vmatmul.bf16.gmra.mxu1 %v1086_v1 }
 0x166   : > { %v1416_v36 = vpop.f32.mrf.mxu1  ;;  %v775_v21 = vpop.permute.xlu0 %774 }
 0x167   : > { %v1417_v25 = vadd.f32 %v1416_v36, %v1327_v37  ;;  %v1025_v57 = vsel %vm863_vm3, %v2654_v32, %v775_v21  ;;  %v765_v4 = vpop.permute.xlu1 %764  ;;  %v1329_v32 = vpop.f32.mrf.mxu0  ;;  %v860_v21 = vrot.slane %v2682_v59, 1 }
 0x168   : > { %v1057_v28 = vsel %vm896_vm4, %v1025_v57, %v812_v18  ;;  %v2897_v39 = vpop.f32.mrf.mxu2  ;;  %v2907_v30 = vpop.f32.mrf.mxu3 }
 0x169   : > { %v1506_v34 = vadd.f32 %v2757_v49, %v1417_v25  ;;  %v1104_v47 = vsel %vm929_vm5, %v1057_v28, %v859_v43  ;;  %v680_v43 = vpop.permute.xlu2 %679  ;;  %v861_v25 = vrot.slane %v2690_v27, 1 }
 0x16a   : > { %1470 = vmatmul.bf16.gmra.mxu3 %v1104_v47 }
 0x16b   : > { %1573 = vst.msk [vmem:[%s2128_s22 + $0x40] sm:$0xff] %vm863_vm3, %v1506_v34  ;;  %v1613_v2 = vsel %vm863_vm3, %v1506_v34, 0.0  ;;  %v1679_v17 = vmul.f32 %v1506_v34, %v1506_v34  ;;  %v862_v59 = vsel %vm608_vm1, %v860_v21, %v861_v25 }
 0x16c   : > { %v1614_v35 = vadd.f32 %v1613_v2, %v1612_v46 }
 0x16d   : > { %v1718_v56 = vsel %vm863_vm3, %v1679_v17, 0.0 }
 0x16e   : > { %v1719_v8 = vadd.f32 %v1718_v56, %v1717_v42  ;;  %v1418_v29 = vpop.f32.mrf.mxu1  ;;  %v597_v7 = vpop.permute.xlu0 %596 }
 0x16f   : > { %v1419_v5 = vadd.f32 %v1418_v29, %v1329_v32  ;;  %v885_v49 = vsel %vm863_vm3, %v2577_v3, %v597_v7  ;;  %v715_v14 = vpop.permute.xlu1 %714  ;;  %v1010_v3 = vsel %vm863_vm3, %v2695_v40, %v765_v4 }
 0x170   : > { %v918_v58 = vsel %vm896_vm4, %v885_v49, %v678_v50  ;;  %v2911_v10 = vpop.f32.mrf.mxu2 }
 0x171   : > { %v1508_v38 = vadd.f32 %v2769_v61, %v1419_v5  ;;  %v961_v20 = vsel %vm929_vm5, %v918_v58, %v715_v14  ;;  %v851_v57 = vpop.permute.xlu2 %850 }
 0x172   : > { %1356 = vmatmul.bf16.gmra.mxu0 %v961_v20 }
 0x173   : > { %1574 = vst.msk [vmem:[%s2128_s22 + $0x48] sm:$0xff] %vm863_vm3, %v1508_v38  ;;  %v1615_v16 = vsel %vm863_vm3, %v1508_v38, 0.0  ;;  %v1680_v15 = vmul.f32 %v1508_v38, %v1508_v38 }
 0x174   : > { %v1616_v22 = vadd.f32 %v1615_v16, %v1614_v35 }
 0x175   : > { %v1720_v55 = vsel %vm863_vm3, %v1680_v15, 0.0  ;;  %v2916_v1 = vpop.f32.mrf.mxu3 }
 0x176   : > { %v1721_v23 = vadd.f32 %v1720_v55, %v1719_v8  ;;  %v802_v62 = vpop.permute.xlu0 %801 }
 0x177   : > { %v1047_v61 = vsel %vm896_vm4, %v1010_v3, %v802_v62  ;;  %v767_v24 = vpop.permute.xlu1 %766  ;;  %v1332_v46 = vpop.f32.mrf.mxu0 }
 0x178   : > { %v1089_v19 = vsel %vm929_vm5, %v1047_v61, %v849_v13  ;;  %v2926_v34 = vpop.f32.mrf.mxu2 }
 0x179   : > { %1445 = vmatmul.bf16.gmra.mxu1 %v1089_v19 }
 0x17a   : > { %2008 = vmatmul.msk.bf16.vlgmr.msra.gmra.mxu3 %vm863_vm3, %v2720_v51 }
 0x17d   : > { %v2935_v8 = vpop.f32.mrf.mxu3 }
 0x17e   : > { %v1421_v12 = vpop.f32.mrf.mxu1  ;;  %v599_v40 = vpop.permute.xlu0 %598 }
 0x17f   : > { %v1422_v42 = vadd.f32 %v1421_v12, %v1332_v46  ;;  %v887_v9 = vsel %vm863_vm3, %v2626_v0, %v599_v40  ;;  %v717_v18 = vpop.permute.xlu1 %716  ;;  %v1334_v28 = vpop.f32.mrf.mxu0 }
 0x180   : > { %v920_v48 = vsel %vm896_vm4, %v887_v9, %v680_v43  ;;  %v2941_v58 = vpop.f32.mrf.mxu2 }
 0x181   : > { %v1511_v37 = vadd.f32 %v2783_v52, %v1422_v42  ;;  %v964_v50 = vsel %vm929_vm5, %v920_v48, %v717_v18  ;;  %v1013_v52 = vsel %vm863_vm3, %v2252_v26, %v767_v24 }
 0x182   : > { %1361 = vmatmul.bf16.gmra.mxu0 %v964_v50 }
 0x183   : > { %1575 = vst.msk [vmem:[%s2128_s22 + $0x50] sm:$0xff] %vm863_vm3, %v1511_v37  ;;  %v1617_v51 = vsel %vm863_vm3, %v1511_v37, 0.0  ;;  %v1681_v36 = vmul.f32 %v1511_v37, %v1511_v37 }
 0x184   : > { %v1618_v0 = vadd.f32 %v1617_v51, %v1616_v22 }
 0x185   : > { %v1722_v4 = vsel %vm863_vm3, %v1681_v36, 0.0 }
 0x186   : > { %v1723_v47 = vadd.f32 %v1722_v4, %v1721_v23  ;;  %v1423_v2 = vpop.f32.mrf.mxu1  ;;  %v804_v17 = vpop.permute.xlu0 %803 }
 0x187   : > { %v1424_v35 = vadd.f32 %v1423_v2, %v1334_v28  ;;  %v1049_v56 = vsel %vm896_vm4, %v1013_v52, %v804_v17 }
 0x188   : > { %v1092_v27 = vsel %vm929_vm5, %v1049_v56, %v851_v57  ;;  %v2946_v16 = vpop.f32.mrf.mxu2 }
 0x189   : > { %v1513_v32 = vadd.f32 %v2792_v53, %v1424_v35  ;;  %1450 = vmatmul.bf16.gmra.mxu1 %v1092_v27 }
 0x18a   : > { %2009 = vmatmul.msk.bf16.gmra.mxu3 %vm863_vm3, %v862_v59 }
 0x18b   : > { %1576 = vst.msk [vmem:[%s2128_s22 + $0x58] sm:$0xff] %vm863_vm3, %v1513_v32  ;;  %v1619_v26 = vsel %vm863_vm3, %v1513_v32, 0.0  ;;  %v1682_v29 = vmul.f32 %v1513_v32, %v1513_v32 }
 0x18c   : > { %v1620_v7 = vadd.f32 %v1619_v26, %v1618_v0 }
 0x18d   : > { %v1724_v5 = vsel %vm863_vm3, %v1682_v29, 0.0  ;;  %v2943_v14 = vpop.f32.mrf.mxu3 }
 0x18e   : > { %v1725_v49 = vadd.f32 %v1724_v5, %v1723_v47 }
 0x18f   : > { %v1337_v53 = vpop.f32.mrf.mxu0 }
 0x190   : > { %v1545_v12 = vpop.f32.mrf.mxu2 }
 0x195   : > { %v2951_v3 = vpop.f32.mrf.mxu3 }
 0x196   : > { %v1426_v13 = vpop.f32.mrf.mxu1 }
 0x197   : > { %v1427_v38 = vadd.f32 %v1426_v13, %v1337_v53  ;;  %v1339_v61 = vpop.f32.mrf.mxu0 }
 0x198   : > { %v1547_v51 = vpop.f32.mrf.mxu2 }
 0x199   : > { %v1516_v20 = vadd.f32 %v2806_v11, %v1427_v38 }
 0x19b   : > { %1577 = vst.msk [vmem:[%s2128_s22 + $0x60] sm:$0xff] %vm863_vm3, %v1516_v20  ;;  %v1621_v15 = vsel %vm863_vm3, %v1516_v20, 0.0  ;;  %v1683_v22 = vmul.f32 %v1516_v20, %v1516_v20 }
 0x19c   : > { %v1622_v55 = vadd.f32 %v1621_v15, %v1620_v7 }
 0x19d   : > { %v1726_v23 = vsel %vm863_vm3, %v1683_v22, 0.0 }
 0x19e   : > { %v1727_v62 = vadd.f32 %v1726_v23, %v1725_v49  ;;  %v1428_v24 = vpop.f32.mrf.mxu1 }
 0x19f   : > { %v1429_v19 = vadd.f32 %v1428_v24, %v1339_v61 }
 0x1a0   : > { %v1550_v59 = vpop.f32.mrf.mxu2 }
 0x1a1   : > { %v1518_v43 = vadd.f32 %v2820_v54, %v1429_v19 }
 0x1a3   : > { %1578 = vst.msk [vmem:[%s2128_s22 + $0x68] sm:$0xff] %vm863_vm3, %v1518_v43  ;;  %v1623_v11 = vsel %vm863_vm3, %v1518_v43, 0.0  ;;  %v1684_v46 = vmul.f32 %v1518_v43, %v1518_v43 }
 0x1a4   : > { %v1624_v40 = vadd.f32 %v1623_v11, %v1622_v55 }
 0x1a5   : > { %v1728_v42 = vsel %vm863_vm3, %v1684_v46, 0.0  ;;  %v1456_v9 = vpop.f32.mrf.mxu3 }
 0x1a6   : > { %v1729_v48 = vadd.f32 %v1728_v42, %v1727_v62  ;;  %v1457_v18 = vadd.f32 %v1456_v9, %v2868_v41 }
 0x1a7   : > { %v1342_v54 = vpop.f32.mrf.mxu0 }
 0x1a8   : > { %v2960_v37 = vadd.f32 %v1545_v12, %v1457_v18  ;;  %v1552_v53 = vpop.f32.mrf.mxu2 }
 0x1aa   : > { %1589 = vst.msk [vmem:[%s2128_s22 + $0xc0] sm:$0xff] %vm863_vm3, %v2960_v37 }
 0x1ad   : > { %v1458_v50 = vpop.f32.mrf.mxu3 }
 0x1ae   : > { %v1459_v36 = vadd.f32 %v1458_v50, %v2877_v63  ;;  %v1431_v21 = vpop.f32.mrf.mxu1 }
 0x1af   : > { %v1432_v25 = vadd.f32 %v1431_v21, %v1342_v54  ;;  %v1344_v47 = vpop.f32.mrf.mxu0 }
 0x1b0   : > { %v2966_v0 = vadd.f32 %v1547_v51, %v1459_v36 }
 0x1b1   : > { %v1521_v57 = vadd.f32 %v2834_v60, %v1432_v25 }
 0x1b2   : > { %1590 = vst.msk [vmem:[%s2128_s22 + $0xc8] sm:$0xff] %vm863_vm3, %v2966_v0 }
 0x1b3   : > { %1579 = vst.msk [vmem:[%s2128_s22 + $0x70] sm:$0xff] %vm863_vm3, %v1521_v57  ;;  %v1625_v41 = vsel %vm863_vm3, %v1521_v57, 0.0  ;;  %v1685_v4 = vmul.f32 %v1521_v57, %v1521_v57 }
 0x1b4   : > { %v1626_v28 = vadd.f32 %v1625_v41, %v1624_v40 }
 0x1b5   : > { %v1730_v52 = vsel %vm863_vm3, %v1685_v4, 0.0 }
 0x1b6   : > { %v1731_v63 = vadd.f32 %v1730_v52, %v1729_v48  ;;  %v1433_v2 = vpop.f32.mrf.mxu1 }
 0x1b7   : > { %v1434_v17 = vadd.f32 %v1433_v2, %v1344_v47 }
 0x1b9   : > { %v1523_v35 = vadd.f32 %v2847_v33, %v1434_v17 }
 0x1bb   : > { %1580 = vst.msk [vmem:[%s2128_s22 + $0x78] sm:$0xff] %vm863_vm3, %v1523_v35  ;;  %v1627_v60 = vsel %vm863_vm3, %v1523_v35, 0.0  ;;  %v1686_v56 = vmul.f32 %v1523_v35, %v1523_v35 }
 0x1bc   : > { %v1628_v27 = vadd.f32 %v1627_v60, %v1626_v28 }
 0x1bd   : > { %v1732_v32 = vsel %vm863_vm3, %v1686_v56, 0.0  ;;  %v1461_v26 = vpop.f32.mrf.mxu3 }
 0x1be   : > { %v2981_v29 = vadd.f32 %v1732_v32, %v1731_v63  ;;  %v1462_v7 = vadd.f32 %v1461_v26, %v2890_v6 }
 0x1bf   : > { %v1347_v33 = vpop.f32.mrf.mxu0 }
 0x1c0   : > { %v2984_v5 = vadd.f32 %v1550_v59, %v1462_v7 }
 0x1c2   : > { %1591 = vst.msk [vmem:[%s2128_s22 + $0xd0] sm:$0xff] %vm863_vm3, %v2984_v5 }
 0x1c5   : > { %v1463_v49 = vpop.f32.mrf.mxu3 }
 0x1c6   : > { %v1464_v13 = vadd.f32 %v1463_v49, %v2907_v30  ;;  %v1436_v38 = vpop.f32.mrf.mxu1 }
 0x1c7   : > { %v1437_v20 = vadd.f32 %v1436_v38, %v1347_v33  ;;  %v1349_v6 = vpop.f32.mrf.mxu0 }
 0x1c8   : > { %v2990_v15 = vadd.f32 %v1552_v53, %v1464_v13 }
 0x1c9   : > { %v1526_v22 = vadd.f32 %v2857_v45, %v1437_v20 }
 0x1ca   : > { %1592 = vst.msk [vmem:[%s2128_s22 + $0xd8] sm:$0xff] %vm863_vm3, %v2990_v15 }
 0x1cb   : > { %1581 = vst.msk [vmem:[%s2128_s22 + $0x80] sm:$0xff] %vm863_vm3, %v1526_v22  ;;  %v1687_v25 = vmul.f32 %v1526_v22, %v1526_v22  ;;  %v1629_v41 = vsel %vm863_vm3, %v1526_v22, 0.0 }
 0x1cc   : > { %v1630_v2 = vadd.f32 %v1629_v41, %v1628_v27 }
 0x1cd   : > { %v1734_v28 = vsel %vm863_vm3, %v1687_v25, 0.0 }
 0x1ce   : > { %v1438_v55 = vpop.f32.mrf.mxu1 }
 0x1cf   : > { %v1439_v23 = vadd.f32 %v1438_v55, %v1349_v6 }
 0x1d1   : > { %v1528_v62 = vadd.f32 %v2871_v31, %v1439_v23 }
 0x1d3   : > { %1582 = vst.msk [vmem:[%s2128_s22 + $0x88] sm:$0xff] %vm863_vm3, %v1528_v62  ;;  %v1688_v4 = vmul.f32 %v1528_v62, %v1528_v62  ;;  %v1631_v52 = vsel %vm863_vm3, %v1528_v62, 0.0 }
 0x1d4   : > { %v1632_v32 = vadd.f32 %v1631_v52, %v1630_v2 }
 0x1d5   : > { %v1466_v30 = vpop.f32.mrf.mxu3 }
 0x1d6   : > { %v1467_v50 = vadd.f32 %v1466_v30, %v2916_v1 }
 0x1d7   : > { %v1352_v61 = vpop.f32.mrf.mxu0 }
 0x1dd   : > { %v1468_v43 = vpop.f32.mrf.mxu3 }
 0x1de   : > { %v1441_v24 = vpop.f32.mrf.mxu1 }
 0x1df   : > { %v1442_v19 = vadd.f32 %v1441_v24, %v1352_v61  ;;  %v1354_v11 = vpop.f32.mrf.mxu0 }
 0x1e1   : > { %v1531_v45 = vadd.f32 %v2881_v44, %v1442_v19 }
 0x1e3   : > { %1583 = vst.msk [vmem:[%s2128_s22 + $0x90] sm:$0xff] %vm863_vm3, %v1531_v45  ;;  %v1689_v63 = vmul.f32 %v1531_v45, %v1531_v45  ;;  %v1633_v60 = vsel %vm863_vm3, %v1531_v45, 0.0 }
 0x1e4   : > { %v1634_v53 = vadd.f32 %v1633_v60, %v1632_v32 }
 0x1e5   : > { %v1738_v26 = vsel %vm863_vm3, %v1689_v63, 0.0  ;;  %v1649_v63 = vsel %vm863_vm3, %v2984_v5, 0.0 }
 0x1e6   : > { %v1443_v46 = vpop.f32.mrf.mxu1 }
 0x1e7   : > { %v1444_v12 = vadd.f32 %v1443_v46, %v1354_v11 }
 0x1e9   : > { %v1533_v40 = vadd.f32 %v2897_v39, %v1444_v12 }
 0x1eb   : > { %1584 = vst.msk [vmem:[%s2128_s22 + $0x98] sm:$0xff] %vm863_vm3, %v1533_v40  ;;  %v1690_v56 = vmul.f32 %v1533_v40, %v1533_v40  ;;  %v1635_v27 = vsel %vm863_vm3, %v1533_v40, 0.0 }
 0x1ec   : > { %v1636_v22 = vadd.f32 %v1635_v27, %v1634_v53 }
 0x1ed   : > { %v1471_v31 = vpop.f32.mrf.mxu3  ;;  %v1740_v13 = vsel %vm863_vm3, %v1690_v56, 0.0 }
 0x1ee   : > { %v1472_v6 = vadd.f32 %v1471_v31, %v2943_v14 }
 0x1ef   : > { %v1357_v42 = vpop.f32.mrf.mxu0 }
 0x1f5   : > { %v3007_v9 = vpop.f32.mrf.mxu3 }
 0x1f6   : > { %v1446_v48 = vpop.f32.mrf.mxu1 }
 0x1f7   : > { %v1447_v18 = vadd.f32 %v1446_v48, %v1357_v42  ;;  %v1359_v54 = vpop.f32.mrf.mxu0 }
 0x1f9   : > { %v1536_v44 = vadd.f32 %v2911_v10, %v1447_v18  ;;  %v1469_v10 = vadd.f32 %v1468_v43, %v2935_v8  ;;  %v1735_v8 = vadd.f32 %v1734_v28, %v2981_v29  ;;  %v1695_v18 = vmul.f32 %v2960_v37, %v2960_v37 }
 0x1fa   : > { %v1647_v28 = vsel %vm863_vm3, %v2966_v0, 0.0 }
 0x1fb   : > { %1585 = vst.msk [vmem:[%s2128_s22 + $0xa0] sm:$0xff] %vm863_vm3, %v1536_v44  ;;  %v1691_v7 = vmul.f32 %v1536_v44, %v1536_v44  ;;  %v1637_v38 = vsel %vm863_vm3, %v1536_v44, 0.0 }
 0x1fc   : > { %v1638_v61 = vadd.f32 %v1637_v38, %v1636_v22 }
 0x1fd   : > { %v1555_v51 = vpop.f32.mrf.mxu3  ;;  %v1742_v55 = vsel %vm863_vm3, %v1691_v7, 0.0 }
 0x1fe   : > { %v3013_v36 = vadd.f32 %v1555_v51, %v1467_v50  ;;  %v1448_v39 = vpop.f32.mrf.mxu1  ;;  %v1474_v50 = vadd.f32 %v3007_v9, %v2951_v3  ;;  %v1697_v3 = vmul.f32 %v2984_v5, %v2984_v5 }
 0x1ff   : > { %v1449_v21 = vadd.f32 %v1448_v39, %v1359_v54  ;;  %v1362_v1 = vpop.f32.mrf.mxu0 }
 0x200   : > { %1593 = vst.msk [vmem:[%s2128_s22 + $0xe0] sm:$0xff] %vm863_vm3, %v3013_v36  ;;  %v1699_v60 = vmul.f32 %v3013_v36, %v3013_v36  ;;  %v1653_v5 = vsel %vm863_vm3, %v3013_v36, 0.0 }
 0x201   : > { %v1538_v57 = vadd.f32 %v2926_v34, %v1449_v21  ;;  %v1736_v34 = vsel %vm863_vm3, %v1688_v4, 0.0  ;;  %v1645_v21 = vsel %vm863_vm3, %v2960_v37, 0.0 }
 0x202   : > { %v1737_v49 = vadd.f32 %v1736_v34, %v1735_v8  ;;  %v1754_v34 = vsel %vm863_vm3, %v1697_v3, 0.0  ;;  %v1758_v7 = vsel %vm863_vm3, %v1699_v60, 0.0 }
 0x203   : > { %1586 = vst.msk [vmem:[%s2128_s22 + $0xa8] sm:$0xff] %vm863_vm3, %v1538_v57  ;;  %v1692_v20 = vmul.f32 %v1538_v57, %v1538_v57  ;;  %v1639_v23 = vsel %vm863_vm3, %v1538_v57, 0.0 }
 0x204   : > { %v1739_v29 = vadd.f32 %v1738_v26, %v1737_v49  ;;  %v1640_v40 = vadd.f32 %v1639_v23, %v1638_v61 }
 0x205   : > { %v1557_v47 = vpop.f32.mrf.mxu3  ;;  %v1744_v43 = vsel %vm863_vm3, %v1692_v20, 0.0 }
 0x206   : > { %v3025_v17 = vadd.f32 %v1557_v47, %v1469_v10  ;;  %v1451_v35 = vpop.f32.mrf.mxu1  ;;  %v1741_v30 = vadd.f32 %v1740_v13, %v1739_v29  ;;  %v1698_v47 = vmul.f32 %v2990_v15, %v2990_v15 }
 0x207   : > { %v1452_v59 = vadd.f32 %v1451_v35, %v1362_v1  ;;  %v1364_v24 = vpop.f32.mrf.mxu0  ;;  %v1750_v1 = vsel %vm863_vm3, %v1695_v18, 0.0 }
 0x208   : > { %1594 = vst.msk [vmem:[%s2128_s22 + $0xe8] sm:$0xff] %vm863_vm3, %v3025_v17  ;;  %v1743_v12 = vadd.f32 %v1742_v55, %v1741_v30  ;;  %v1756_v8 = vsel %vm863_vm3, %v1698_v47, 0.0  ;;  %v1700_v32 = vmul.f32 %v3025_v17, %v3025_v17 }
 0x209   : > { %v1541_v33 = vadd.f32 %v2941_v58, %v1452_v59 }
 0x20a   : > { %v1745_v42 = vadd.f32 %v1744_v43, %v1743_v12  ;;  %v1760_v13 = vsel %vm863_vm3, %v1700_v32, 0.0  ;;  %v1597_v12 = vld [vmem:[%s3109_s3] sm:$0x1] }
 0x20b   : > { %1587 = vst.msk [vmem:[%s2128_s22 + $0xb0] sm:$0xff] %vm863_vm3, %v1541_v33  ;;  %v1693_v62 = vmul.f32 %v1541_v33, %v1541_v33  ;;  %v1641_v11 = vsel %vm863_vm3, %v1541_v33, 0.0 }
 0x20c   : > { %v1642_v48 = vadd.f32 %v1641_v11, %v1640_v40 }
 0x20d   : > { %v1560_v58 = vpop.f32.mrf.mxu3  ;;  %v1746_v14 = vsel %vm863_vm3, %v1693_v62, 0.0 }
 0x20e   : > { %v1561_v19 = vadd.f32 %v1560_v58, %v1472_v6  ;;  %v1453_v45 = vpop.f32.mrf.mxu1  ;;  %v1747_v51 = vadd.f32 %v1746_v14, %v1745_v42 }
 0x20f   : > { %v1454_v46 = vadd.f32 %v1453_v45, %v1364_v24 }
 0x210   : > { %1595 = vst.msk [vmem:[%s2128_s22 + $0xf0] sm:$0xff] %vm863_vm3, %v1561_v19  ;;  %v1701_v33 = vmul.f32 %v1561_v19, %v1561_v19  ;;  %v1657_v38 = vsel %vm863_vm3, %v1561_v19, 0.0 }
 0x211   : > { %v1543_v31 = vadd.f32 %v2946_v16, %v1454_v46  ;;  %v1696_v16 = vmul.f32 %v2966_v0, %v2966_v0  ;;  %v1651_v0 = vsel %vm863_vm3, %v2990_v15, 0.0  ;;  %v1655_v15 = vsel %vm863_vm3, %v3025_v17, 0.0 }
 0x212   : > { %v1762_v22 = vsel %vm863_vm3, %v1701_v33, 0.0 }
 0x213   : > { %1588 = vst.msk [vmem:[%s2128_s22 + $0xb8] sm:$0xff] %vm863_vm3, %v1543_v31  ;;  %v1643_v44 = vsel %vm863_vm3, %v1543_v31, 0.0  ;;  %v1694_v54 = vmul.f32 %v1543_v31, %v1543_v31  ;;  %v1752_v37 = vsel %vm863_vm3, %v1696_v16, 0.0  ;;  %v1670_v31 = vld [vmem:[%s3110_s4] sm:$0x1] }
 0x214   : > { %v1644_v39 = vadd.f32 %v1643_v44, %v1642_v48 }
 0x215   : > { %v1748_v25 = vsel %vm863_vm3, %v1694_v54, 0.0  ;;  %v1562_v57 = vpop.f32.mrf.mxu3 }
 0x216   : > { %v1646_v41 = vadd.f32 %v1645_v21, %v1644_v39  ;;  %v1749_v4 = vadd.f32 %v1748_v25, %v1747_v51  ;;  %v1563_v10 = vadd.f32 %v1562_v57, %v1474_v50 }
 0x218   : > { %v1648_v9 = vadd.f32 %v1647_v28, %v1646_v41  ;;  %v1751_v52 = vadd.f32 %v1750_v1, %v1749_v4  ;;  %1596 = vst.msk [vmem:[%s2128_s22 + $0xf8] sm:$0xff] %vm863_vm3, %v1563_v10  ;;  %v1702_v20 = vmul.f32 %v1563_v10, %v1563_v10  ;;  %v1659_v6 = vsel %vm863_vm3, %v1563_v10, 0.0 }
 0x21a   : > { %v1650_v2 = vadd.f32 %v1649_v63, %v1648_v9  ;;  %v1753_v35 = vadd.f32 %v1752_v37, %v1751_v52  ;;  %v1764_v62 = vsel %vm863_vm3, %v1702_v20, 0.0 }
 0x21c   : > { %v1755_v56 = vadd.f32 %v1754_v34, %v1753_v35  ;;  %v1652_v59 = vadd.f32 %v1651_v0, %v1650_v2 }
 0x21e   : > { %v1654_v26 = vadd.f32 %v1653_v5, %v1652_v59  ;;  %v1757_v27 = vadd.f32 %v1756_v8, %v1755_v56 }
 0x220   : > { %v1656_v49 = vadd.f32 %v1655_v15, %v1654_v26  ;;  %v1759_v53 = vadd.f32 %v1758_v7, %v1757_v27 }
 0x222   : > { %v1658_v29 = vadd.f32 %v1657_v38, %v1656_v49  ;;  %v1761_v36 = vadd.f32 %v1760_v13, %v1759_v53 }
 0x224   : > { %v1660_v55 = vadd.f32 %v1659_v6, %v1658_v29  ;;  %v1763_v23 = vadd.f32 %v1762_v22, %v1761_v36 }
 0x226   : > { %v1661_v58 = vrot.slane %v1660_v55, 4  ;;  %v1765_v17 = vadd.f32 %v1764_v62, %v1763_v23 }
 0x228   : > { %v1662_v30 = vadd.f32 %v1661_v58, %v1660_v55  ;;  %v1766_v61 = vrot.slane %v1765_v17, 4 }
 0x22a   : > { %v1663_v24 = vrot.slane %v1662_v30, 2  ;;  %v1767_v45 = vadd.f32 %v1766_v61, %v1765_v17 }
 0x22c   : > { %v1664_v43 = vadd.f32 %v1663_v24, %v1662_v30  ;;  %v1768_v11 = vrot.slane %v1767_v45, 2 }
 0x22e   : > { %v1665_v19 = vrot.slane %v1664_v43, 1  ;;  %v1769_v46 = vadd.f32 %v1768_v11, %v1767_v45 }
 0x230   : > { %v1666_v40 = vadd.f32 %v1665_v19, %v1664_v43  ;;  %v1770_v14 = vrot.slane %v1769_v46, 1 }
 0x232   : > { %v1667_v42 = vadd.f32 %v1666_v40, %v1597_v12  ;;  %v1771_v48 = vadd.f32 %v1770_v14, %v1769_v46 }
 0x234   : > { %1669 = vst.msk [vmem:[%s3109_s3] sm:$0x1] %vm1668_vm6, %v1667_v42  ;;  %v1772_v18 = vadd.f32 %v1771_v48, %v1670_v31 }
 0x236   : > { %1773 = vst.msk [vmem:[%s3110_s4] sm:$0x1] %vm1668_vm6, %v1772_v18 }
 0x237 PF: > { %s15_s15 = sadd.s32 1, %s2086_s15  }
 0x238   : > { %p12_p5 = scmp.ge.s32.totalorder %s15_s15, 4  }
 0x23a   :  { %14 = sbr.rel (!%p12_p5) target bundleno = 1 (0x1), region = 78 }

// kernel: _lambda_.12
= control target key start
LH: loop header
LB: loop body
LE: loop exit
PB: predicated region body
PF: predicated region fallthrough
CT: control target
= control target key end

     0   :  { %vm394_vm0 = vcmask 261120   ;;  %s2012_s1 = inlined_call_operand.vmem [shape: bf16[32,128], index: 1, kind: input, shape index: {}]   ;;  %s2013_s0 = inlined_call_operand.vmem [shape: bf16[512,32], index: 0, kind: input, shape index: {}]   ;;  %s2014_s2 = inlined_call_operand.vmem [shape: f32[512,128], index: 2, kind: output, shape index: {0}]   ;;  %s2015_s3 = inlined_call_operand.vmem [shape: f32[1,128], index: 3, kind: output, shape index: {1}]   ;;  %s2016_s4 = inlined_call_operand.vmem [shape: f32[1,128], index: 4, kind: output, shape index: {2}]  }
   0x1   :  { %v1340_v0 = vld [vmem:[%s2012_s1 + $0x8] sm:$0xff]  ;;  %v1339_v1 = vld [vmem:[%s2012_s1] sm:$0xff]  ;;  %v1309_v7 = vld [vmem:[%s2013_s0 + $0x10] sm:$0xff] }
   0x2   :  { %497 = vmatpush.bf16.msra.mxu0 %v1340_v0  ;;  %1341 = vmatpush.bf16.msra.mxu1 %v1340_v0  ;;  %v1307_v2 = vld [vmem:[%s2013_s0] sm:$0xff]  ;;  %v1308_v4 = vld [vmem:[%s2013_s0 + $0x8] sm:$0xff]  ;;  %v1317_v8 = vld [vmem:[%s2013_s0 + $0x50] sm:$0xff] }
   0x3   :  { %1342 = vmatpush.bf16.msra.mxu2 %v1340_v0  ;;  %1343 = vmatpush.bf16.msra.mxu3 %v1340_v0  ;;  %v1315_v3 = vld [vmem:[%s2013_s0 + $0x40] sm:$0xff]  ;;  %v1316_v5 = vld [vmem:[%s2013_s0 + $0x48] sm:$0xff]  ;;  %v1310_v10 = vld [vmem:[%s2013_s0 + $0x18] sm:$0xff] }
   0x4   :  { %v1323_v6 = vld [vmem:[%s2013_s0 + $0x80] sm:$0xff]  ;;  %v1324_v9 = vld [vmem:[%s2013_s0 + $0x88] sm:$0xff]  ;;  %v1318_v11 = vld [vmem:[%s2013_s0 + $0x58] sm:$0xff] }
   0x5   :  { %v1325_v12 = vld [vmem:[%s2013_s0 + $0x90] sm:$0xff]  ;;  %v1331_v13 = vld [vmem:[%s2013_s0 + $0xc0] sm:$0xff]  ;;  %v1326_v16 = vld [vmem:[%s2013_s0 + $0x98] sm:$0xff] }
   0x6   :  { %498 = vmatpush.bf16.msra.mxu0 %v1339_v1  ;;  %1344 = vmatpush.bf16.msra.mxu1 %v1339_v1  ;;  %v1311_v14 = vld [vmem:[%s2013_s0 + $0x20] sm:$0xff]  ;;  %v1332_v17 = vld [vmem:[%s2013_s0 + $0xc8] sm:$0xff]  ;;  %v1333_v21 = vld [vmem:[%s2013_s0 + $0xd0] sm:$0xff] }
   0x7   :  { %1345 = vmatpush.bf16.msra.mxu2 %v1339_v1  ;;  %1346 = vmatpush.bf16.msra.mxu3 %v1339_v1  ;;  %v1319_v15 = vld [vmem:[%s2013_s0 + $0x60] sm:$0xff]  ;;  %v1312_v18 = vld [vmem:[%s2013_s0 + $0x28] sm:$0xff]  ;;  %v1313_v22 = vld [vmem:[%s2013_s0 + $0x30] sm:$0xff] }
   0x8   :  { %v1320_v19 = vld [vmem:[%s2013_s0 + $0x68] sm:$0xff]  ;;  %v1327_v20 = vld [vmem:[%s2013_s0 + $0xa0] sm:$0xff]  ;;  %v1321_v23 = vld [vmem:[%s2013_s0 + $0x70] sm:$0xff] }
   0x9   :  { %1275 = vmatmul.msk.bf16.vlgmr.msra.gmra.mxu0 %vm394_vm0, %v1307_v2  ;;  %1283 = vmatmul.msk.bf16.vlgmr.msra.gmra.mxu1 %vm394_vm0, %v1315_v3  ;;  %v1328_v24 = vld [vmem:[%s2013_s0 + $0xa8] sm:$0xff]  ;;  %v1334_v25 = vld [vmem:[%s2013_s0 + $0xd8] sm:$0xff]  ;;  %v1329_v28 = vld [vmem:[%s2013_s0 + $0xb0] sm:$0xff] }
   0xa   :  { %1291 = vmatmul.msk.bf16.vlgmr.msra.gmra.mxu2 %vm394_vm0, %v1323_v6  ;;  %1299 = vmatmul.msk.bf16.vlgmr.msra.gmra.mxu3 %vm394_vm0, %v1331_v13  ;;  %v1314_v26 = vld [vmem:[%s2013_s0 + $0x38] sm:$0xff]  ;;  %v1335_v29 = vld [vmem:[%s2013_s0 + $0xe0] sm:$0xff]  ;;  %v1336_v33 = vld [vmem:[%s2013_s0 + $0xe8] sm:$0xff] }
   0xb   :  { %v1322_v27 = vld [vmem:[%s2013_s0 + $0x78] sm:$0xff]  ;;  %v1337_v45 = vld [vmem:[%s2013_s0 + $0xf0] sm:$0xff] }
   0xc   :  { %v1330_v32 = vld [vmem:[%s2013_s0 + $0xb8] sm:$0xff] }
   0xd   :  { %v1338_v58 = vld [vmem:[%s2013_s0 + $0xf8] sm:$0xff] }
  0x19   :  { %1276 = vmatmul.msk.bf16.gmra.mxu0 %vm394_vm0, %v1308_v4  ;;  %1284 = vmatmul.msk.bf16.gmra.mxu1 %vm394_vm0, %v1316_v5 }
  0x1a   :  { %1292 = vmatmul.msk.bf16.gmra.mxu2 %vm394_vm0, %v1324_v9  ;;  %1300 = vmatmul.msk.bf16.gmra.mxu3 %vm394_vm0, %v1332_v17 }
  0x29   :  { %1277 = vmatmul.msk.bf16.gmra.mxu0 %vm394_vm0, %v1309_v7  ;;  %1285 = vmatmul.msk.bf16.gmra.mxu1 %vm394_vm0, %v1317_v8 }
  0x2a   :  { %1293 = vmatmul.msk.bf16.gmra.mxu2 %vm394_vm0, %v1325_v12  ;;  %1301 = vmatmul.msk.bf16.gmra.mxu3 %vm394_vm0, %v1333_v21 }
  0x39   :  { %1278 = vmatmul.msk.bf16.gmra.mxu0 %vm394_vm0, %v1310_v10  ;;  %1286 = vmatmul.msk.bf16.gmra.mxu1 %vm394_vm0, %v1318_v11 }
  0x3a   :  { %1294 = vmatmul.msk.bf16.gmra.mxu2 %vm394_vm0, %v1326_v16  ;;  %1302 = vmatmul.msk.bf16.gmra.mxu3 %vm394_vm0, %v1334_v25 }
  0x49   :  { %1279 = vmatmul.msk.bf16.gmra.mxu0 %vm394_vm0, %v1311_v14  ;;  %1287 = vmatmul.msk.bf16.gmra.mxu1 %vm394_vm0, %v1319_v15 }
  0x4a   :  { %1295 = vmatmul.msk.bf16.gmra.mxu2 %vm394_vm0, %v1327_v20  ;;  %1303 = vmatmul.msk.bf16.gmra.mxu3 %vm394_vm0, %v1335_v29 }
  0x59   :  { %1280 = vmatmul.msk.bf16.gmra.mxu0 %vm394_vm0, %v1312_v18  ;;  %1288 = vmatmul.msk.bf16.gmra.mxu1 %vm394_vm0, %v1320_v19 }
  0x5a   :  { %1296 = vmatmul.msk.bf16.gmra.mxu2 %vm394_vm0, %v1328_v24  ;;  %1304 = vmatmul.msk.bf16.gmra.mxu3 %vm394_vm0, %v1336_v33 }
  0x69   :  { %1281 = vmatmul.msk.bf16.gmra.mxu0 %vm394_vm0, %v1313_v22  ;;  %1289 = vmatmul.msk.bf16.gmra.mxu1 %vm394_vm0, %v1321_v23 }
  0x6a   :  { %1297 = vmatmul.msk.bf16.gmra.mxu2 %vm394_vm0, %v1329_v28  ;;  %1305 = vmatmul.msk.bf16.gmra.mxu3 %vm394_vm0, %v1337_v45 }
  0x79   :  { %1282 = vmatmul.msk.bf16.gmra.mxu0 %vm394_vm0, %v1314_v26  ;;  %1290 = vmatmul.msk.bf16.gmra.mxu1 %vm394_vm0, %v1322_v27 }
  0x7a   :  { %1298 = vmatmul.msk.bf16.gmra.mxu2 %vm394_vm0, %v1330_v32  ;;  %1306 = vmatmul.msk.bf16.gmra.mxu3 %vm394_vm0, %v1338_v58 }
  0x86   :  { %v500_v30 = vpop.f32.mrf.mxu0  ;;  %v1492_v31 = vpop.f32.mrf.mxu1 }
  0x87   :  { %855 = vst [vmem:[%s2014_s2] sm:$0xff] %v500_v30  ;;  %v992_v36 = vmul.f32 %v500_v30, %v500_v30 }
  0x88   :  { %871 = vst [vmem:[%s2014_s2 + $0x80] sm:$0xff] %v1492_v31 }
  0x8d   :  { %v1536_v50 = vpop.f32.mrf.mxu2  ;;  %v1606_v4 = vpop.f32.mrf.mxu3 }
  0x8e   :  { %v502_v34 = vpop.f32.mrf.mxu0  ;;  %v1509_v35 = vpop.f32.mrf.mxu1  ;;  %887 = vst [vmem:[%s2014_s2 + $0x100] sm:$0xff] %v1536_v50 }
  0x8f   :  { %856 = vst [vmem:[%s2014_s2 + $0x8] sm:$0xff] %v502_v34  ;;  %v920_v37 = vadd.f32 %v502_v34, %v500_v30  ;;  %v993_v38 = vmul.f32 %v502_v34, %v502_v34 }
  0x90   :  { %872 = vst [vmem:[%s2014_s2 + $0x88] sm:$0xff] %v1509_v35 }
  0x91   :  { %v1056_v39 = vadd.f32 %v993_v38, %v992_v36  ;;  %903 = vst [vmem:[%s2014_s2 + $0x180] sm:$0xff] %v1606_v4 }
  0x95   :  { %v1553_v56 = vpop.f32.mrf.mxu2  ;;  %v1627_v8 = vpop.f32.mrf.mxu3 }
  0x96   :  { %v505_v40 = vpop.f32.mrf.mxu0  ;;  %v1518_v41 = vpop.f32.mrf.mxu1  ;;  %888 = vst [vmem:[%s2014_s2 + $0x108] sm:$0xff] %v1553_v56 }
  0x97   :  { %857 = vst [vmem:[%s2014_s2 + $0x10] sm:$0xff] %v505_v40  ;;  %v921_v42 = vadd.f32 %v920_v37, %v505_v40  ;;  %v994_v43 = vmul.f32 %v505_v40, %v505_v40 }
  0x98   :  { %873 = vst [vmem:[%s2014_s2 + $0x90] sm:$0xff] %v1518_v41 }
  0x99   :  { %v1057_v44 = vadd.f32 %v1056_v39, %v994_v43  ;;  %904 = vst [vmem:[%s2014_s2 + $0x188] sm:$0xff] %v1627_v8 }
  0x9d   :  { %v1574_v61 = vpop.f32.mrf.mxu2  ;;  %v1648_v12 = vpop.f32.mrf.mxu3 }
  0x9e   :  { %v507_v46 = vpop.f32.mrf.mxu0  ;;  %v1531_v47 = vpop.f32.mrf.mxu1  ;;  %889 = vst [vmem:[%s2014_s2 + $0x110] sm:$0xff] %v1574_v61 }
  0x9f   :  { %858 = vst [vmem:[%s2014_s2 + $0x18] sm:$0xff] %v507_v46  ;;  %v922_v48 = vadd.f32 %v921_v42, %v507_v46  ;;  %v995_v49 = vmul.f32 %v507_v46, %v507_v46 }
  0xa0   :  { %874 = vst [vmem:[%s2014_s2 + $0x98] sm:$0xff] %v1531_v47 }
  0xa1   :  { %v1058_v51 = vadd.f32 %v1057_v44, %v995_v49  ;;  %905 = vst [vmem:[%s2014_s2 + $0x190] sm:$0xff] %v1648_v12 }
  0xa5   :  { %v1589_v0 = vpop.f32.mrf.mxu2  ;;  %v1669_v16 = vpop.f32.mrf.mxu3 }
  0xa6   :  { %v510_v52 = vpop.f32.mrf.mxu0  ;;  %v1546_v53 = vpop.f32.mrf.mxu1  ;;  %890 = vst [vmem:[%s2014_s2 + $0x118] sm:$0xff] %v1589_v0 }
  0xa7   :  { %859 = vst [vmem:[%s2014_s2 + $0x20] sm:$0xff] %v510_v52  ;;  %v1551_v54 = vadd.f32 %v922_v48, %v510_v52  ;;  %v996_v55 = vmul.f32 %v510_v52, %v510_v52 }
  0xa8   :  { %875 = vst [vmem:[%s2014_s2 + $0xa0] sm:$0xff] %v1546_v53 }
  0xa9   :  { %v1559_v57 = vadd.f32 %v1058_v51, %v996_v55  ;;  %906 = vst [vmem:[%s2014_s2 + $0x198] sm:$0xff] %v1669_v16 }
  0xad   :  { %v1604_v3 = vpop.f32.mrf.mxu2  ;;  %v1690_v20 = vpop.f32.mrf.mxu3 }
  0xae   :  { %v512_v59 = vpop.f32.mrf.mxu0  ;;  %v1569_v60 = vpop.f32.mrf.mxu1  ;;  %891 = vst [vmem:[%s2014_s2 + $0x120] sm:$0xff] %v1604_v3 }
  0xaf   :  { %860 = vst [vmem:[%s2014_s2 + $0x28] sm:$0xff] %v512_v59  ;;  %v997_v25 = vmul.f32 %v512_v59, %v512_v59  ;;  %v924_v26 = vadd.f32 %v1551_v54, %v512_v59 }
  0xb0   :  { %876 = vst [vmem:[%s2014_s2 + $0xa8] sm:$0xff] %v1569_v60 }
  0xb1   :  { %907 = vst [vmem:[%s2014_s2 + $0x1a0] sm:$0xff] %v1690_v20  ;;  %v1060_v28 = vadd.f32 %v1559_v57, %v997_v25 }
  0xb5   :  { %v1625_v7 = vpop.f32.mrf.mxu2  ;;  %v1711_v24 = vpop.f32.mrf.mxu3 }
  0xb6   :  { %v515_v62 = vpop.f32.mrf.mxu0  ;;  %v1584_v63 = vpop.f32.mrf.mxu1  ;;  %892 = vst [vmem:[%s2014_s2 + $0x128] sm:$0xff] %v1625_v7 }
  0xb7   :  { %861 = vst [vmem:[%s2014_s2 + $0x30] sm:$0xff] %v515_v62  ;;  %v998_v27 = vmul.f32 %v515_v62, %v515_v62  ;;  %v925_v29 = vadd.f32 %v924_v26, %v515_v62 }
  0xb8   :  { %877 = vst [vmem:[%s2014_s2 + $0xb0] sm:$0xff] %v1584_v63 }
  0xb9   :  { %908 = vst [vmem:[%s2014_s2 + $0x1a8] sm:$0xff] %v1711_v24  ;;  %v1061_v34 = vadd.f32 %v1060_v28, %v998_v27 }
  0xbd   :  { %v1646_v11 = vpop.f32.mrf.mxu2  ;;  %v1734_v39 = vpop.f32.mrf.mxu3 }
  0xbe   :  { %v517_v1 = vpop.f32.mrf.mxu0  ;;  %v1599_v2 = vpop.f32.mrf.mxu1  ;;  %893 = vst [vmem:[%s2014_s2 + $0x130] sm:$0xff] %v1646_v11 }
  0xbf   :  { %862 = vst [vmem:[%s2014_s2 + $0x38] sm:$0xff] %v517_v1  ;;  %v999_v30 = vmul.f32 %v517_v1, %v517_v1  ;;  %v926_v36 = vadd.f32 %v925_v29, %v517_v1 }
  0xc0   :  { %878 = vst [vmem:[%s2014_s2 + $0xb8] sm:$0xff] %v1599_v2 }
  0xc1   :  { %v1062_v40 = vadd.f32 %v1061_v34, %v999_v30  ;;  %909 = vst [vmem:[%s2014_s2 + $0x1b0] sm:$0xff] %v1734_v39 }
  0xc5   :  { %v1667_v15 = vpop.f32.mrf.mxu2  ;;  %v1755_v62 = vpop.f32.mrf.mxu3 }
  0xc6   :  { %v520_v5 = vpop.f32.mrf.mxu0  ;;  %v1620_v6 = vpop.f32.mrf.mxu1  ;;  %894 = vst [vmem:[%s2014_s2 + $0x138] sm:$0xff] %v1667_v15 }
  0xc7   :  { %863 = vst [vmem:[%s2014_s2 + $0x40] sm:$0xff] %v520_v5  ;;  %v1000_v37 = vmul.f32 %v520_v5, %v520_v5  ;;  %v927_v42 = vadd.f32 %v926_v36, %v520_v5 }
  0xc8   :  { %879 = vst [vmem:[%s2014_s2 + $0xc0] sm:$0xff] %v1620_v6 }
  0xc9   :  { %v1063_v44 = vadd.f32 %v1062_v40, %v1000_v37  ;;  %910 = vst [vmem:[%s2014_s2 + $0x1b8] sm:$0xff] %v1755_v62 }
  0xcd   :  { %v1688_v19 = vpop.f32.mrf.mxu2  ;;  %v1776_v37 = vpop.f32.mrf.mxu3 }
  0xce   :  { %v522_v9 = vpop.f32.mrf.mxu0  ;;  %v1641_v10 = vpop.f32.mrf.mxu1  ;;  %895 = vst [vmem:[%s2014_s2 + $0x140] sm:$0xff] %v1688_v19 }
  0xcf   :  { %864 = vst [vmem:[%s2014_s2 + $0x48] sm:$0xff] %v522_v9  ;;  %v1001_v43 = vmul.f32 %v522_v9, %v522_v9  ;;  %v928_v45 = vadd.f32 %v927_v42, %v522_v9 }
  0xd0   :  { %880 = vst [vmem:[%s2014_s2 + $0xc8] sm:$0xff] %v1641_v10 }
  0xd1   :  { %v1064_v48 = vadd.f32 %v1063_v44, %v1001_v43  ;;  %911 = vst [vmem:[%s2014_s2 + $0x1c0] sm:$0xff] %v1776_v37  ;;  %v1009_v43 = vmul.f32 %v1509_v35, %v1509_v35 }
  0xd5   :  { %v1709_v23 = vpop.f32.mrf.mxu2 }
  0xd6   :  { %v525_v13 = vpop.f32.mrf.mxu0  ;;  %v1662_v14 = vpop.f32.mrf.mxu1  ;;  %896 = vst [vmem:[%s2014_s2 + $0x148] sm:$0xff] %v1709_v23 }
  0xd7   :  { %865 = vst [vmem:[%s2014_s2 + $0x50] sm:$0xff] %v525_v13  ;;  %v1002_v46 = vmul.f32 %v525_v13, %v525_v13  ;;  %v929_v49 = vadd.f32 %v928_v45, %v525_v13 }
  0xd8   :  { %881 = vst [vmem:[%s2014_s2 + $0xd0] sm:$0xff] %v1662_v14 }
  0xd9   :  { %v1065_v55 = vadd.f32 %v1064_v48, %v1002_v46 }
  0xdd   :  { %v1732_v38 = vpop.f32.mrf.mxu2 }
  0xde   :  { %v527_v17 = vpop.f32.mrf.mxu0  ;;  %v1683_v18 = vpop.f32.mrf.mxu1  ;;  %897 = vst [vmem:[%s2014_s2 + $0x150] sm:$0xff] %v1732_v38 }
  0xdf   :  { %866 = vst [vmem:[%s2014_s2 + $0x58] sm:$0xff] %v527_v17  ;;  %v1003_v51 = vmul.f32 %v527_v17, %v527_v17  ;;  %v930_v57 = vadd.f32 %v929_v49, %v527_v17  ;;  %v1011_v49 = vmul.f32 %v1531_v47, %v1531_v47 }
  0xe0   :  { %882 = vst [vmem:[%s2014_s2 + $0xd8] sm:$0xff] %v1683_v18 }
  0xe1   :  { %v1066_v1 = vadd.f32 %v1065_v55, %v1003_v51 }
  0xe5   :  { %v1753_v59 = vpop.f32.mrf.mxu2 }
  0xe6   :  { %v530_v21 = vpop.f32.mrf.mxu0  ;;  %v1704_v22 = vpop.f32.mrf.mxu1  ;;  %898 = vst [vmem:[%s2014_s2 + $0x158] sm:$0xff] %v1753_v59 }
  0xe7   :  { %867 = vst [vmem:[%s2014_s2 + $0x60] sm:$0xff] %v530_v21  ;;  %v1004_v58 = vmul.f32 %v530_v21, %v530_v21  ;;  %v931_v5 = vadd.f32 %v930_v57, %v530_v21  ;;  %v1804_v57 = vpop.f32.mrf.mxu3 }
  0xe8   :  { %883 = vst [vmem:[%s2014_s2 + $0xe0] sm:$0xff] %v1704_v22 }
  0xe9   :  { %v1067_v13 = vadd.f32 %v1066_v1, %v1004_v58  ;;  %912 = vst [vmem:[%s2014_s2 + $0x1c8] sm:$0xff] %v1804_v57 }
  0xed   :  { %v1774_v36 = vpop.f32.mrf.mxu2 }
  0xee   :  { %v532_v32 = vpop.f32.mrf.mxu0  ;;  %v1727_v33 = vpop.f32.mrf.mxu1  ;;  %899 = vst [vmem:[%s2014_s2 + $0x160] sm:$0xff] %v1774_v36 }
  0xef   :  { %868 = vst [vmem:[%s2014_s2 + $0x68] sm:$0xff] %v532_v32  ;;  %v1005_v9 = vmul.f32 %v532_v32, %v532_v32  ;;  %v932_v17 = vadd.f32 %v931_v5, %v532_v32  ;;  %v1008_v32 = vmul.f32 %v1492_v31, %v1492_v31 }
  0xf0   :  { %884 = vst [vmem:[%s2014_s2 + $0xe8] sm:$0xff] %v1727_v33 }
  0xf1   :  { %v1068_v26 = vadd.f32 %v1067_v13, %v1005_v9  ;;  %v1014_v9 = vmul.f32 %v1584_v63, %v1584_v63 }
  0xf5   :  { %v1802_v55 = vpop.f32.mrf.mxu2 }
  0xf6   :  { %v535_v52 = vpop.f32.mrf.mxu0  ;;  %v1748_v54 = vpop.f32.mrf.mxu1  ;;  %900 = vst [vmem:[%s2014_s2 + $0x168] sm:$0xff] %v1802_v55 }
  0xf7   :  { %869 = vst [vmem:[%s2014_s2 + $0x70] sm:$0xff] %v535_v52  ;;  %v1006_v25 = vmul.f32 %v535_v52, %v535_v52  ;;  %v933_v27 = vadd.f32 %v932_v17, %v535_v52 }
  0xf8   :  { %885 = vst [vmem:[%s2014_s2 + $0xf0] sm:$0xff] %v1748_v54 }
  0xf9   :  { %v1069_v21 = vadd.f32 %v1068_v26, %v1006_v25 }
  0xfe   :  { %v537_v28 = vpop.f32.mrf.mxu0  ;;  %v1769_v29 = vpop.f32.mrf.mxu1 }
  0xff   :  { %870 = vst [vmem:[%s2014_s2 + $0x78] sm:$0xff] %v537_v28  ;;  %v934_v30 = vadd.f32 %v933_v27, %v537_v28  ;;  %v1007_v34 = vmul.f32 %v537_v28, %v537_v28  ;;  %v1826_v27 = vpop.f32.mrf.mxu2  ;;  %v1828_v28 = vpop.f32.mrf.mxu3 }
 0x100   :  { %886 = vst [vmem:[%s2014_s2 + $0xf8] sm:$0xff] %v1769_v29 }
 0x101   :  { %v935_v40 = vadd.f32 %v934_v30, %v1492_v31  ;;  %v1070_v42 = vadd.f32 %v1069_v21, %v1007_v34  ;;  %v1010_v31 = vmul.f32 %v1518_v41, %v1518_v41  ;;  %901 = vst [vmem:[%s2014_s2 + $0x170] sm:$0xff] %v1826_v27 }
 0x102   :  { %913 = vst [vmem:[%s2014_s2 + $0x1d0] sm:$0xff] %v1828_v28 }
 0x103   :  { %v936_v44 = vadd.f32 %v935_v40, %v1509_v35  ;;  %v1071_v45 = vadd.f32 %v1070_v42, %v1008_v32  ;;  %v1012_v35 = vmul.f32 %v1546_v53, %v1546_v53  ;;  %v1018_v32 = vmul.f32 %v1662_v14, %v1662_v14 }
 0x105   :  { %v937_v46 = vadd.f32 %v936_v44, %v1518_v41  ;;  %v1072_v48 = vadd.f32 %v1071_v45, %v1009_v43 }
 0x107   :  { %v938_v51 = vadd.f32 %v937_v46, %v1531_v47  ;;  %v1073_v52 = vadd.f32 %v1072_v48, %v1010_v31  ;;  %v1013_v47 = vmul.f32 %v1569_v60, %v1569_v60  ;;  %v1850_v45 = vpop.f32.mrf.mxu2  ;;  %v1852_v31 = vpop.f32.mrf.mxu3 }
 0x108   :  { %902 = vst [vmem:[%s2014_s2 + $0x178] sm:$0xff] %v1850_v45 }
 0x109   :  { %v939_v41 = vadd.f32 %v938_v51, %v1546_v53  ;;  %v1074_v58 = vadd.f32 %v1073_v52, %v1011_v49  ;;  %v1015_v53 = vmul.f32 %v1599_v2, %v1599_v2  ;;  %914 = vst [vmem:[%s2014_s2 + $0x1d8] sm:$0xff] %v1852_v31  ;;  %v1021_v49 = vmul.f32 %v1727_v33, %v1727_v33 }
 0x10b   :  { %v940_v1 = vadd.f32 %v939_v41, %v1569_v60  ;;  %v1075_v5 = vadd.f32 %v1074_v58, %v1012_v35  ;;  %v1016_v60 = vmul.f32 %v1620_v6, %v1620_v6  ;;  %v1022_v35 = vmul.f32 %v1748_v54, %v1748_v54 }
 0x10c   :  { %v1023_v58 = vmul.f32 %v1769_v29, %v1769_v29 }
 0x10d   :  { %v1076_v13 = vadd.f32 %v1075_v5, %v1013_v47  ;;  %v941_v17 = vadd.f32 %v940_v1, %v1584_v63 }
 0x10f   :  { %v942_v25 = vadd.f32 %v941_v17, %v1599_v2  ;;  %v1077_v26 = vadd.f32 %v1076_v13, %v1014_v9  ;;  %v1017_v2 = vmul.f32 %v1641_v10, %v1641_v10  ;;  %v1874_v47 = vpop.f32.mrf.mxu3 }
 0x110   :  { %915 = vst [vmem:[%s2014_s2 + $0x1e0] sm:$0xff] %v1874_v47 }
 0x111   :  { %v943_v63 = vadd.f32 %v942_v25, %v1620_v6  ;;  %v1078_v21 = vadd.f32 %v1077_v26, %v1015_v53  ;;  %v1019_v6 = vmul.f32 %v1683_v18, %v1683_v18  ;;  %v1027_v25 = vmul.f32 %v1589_v0, %v1589_v0 }
 0x113   :  { %v944_v30 = vadd.f32 %v943_v63, %v1641_v10  ;;  %v1079_v34 = vadd.f32 %v1078_v21, %v1016_v60  ;;  %v1029_v21 = vmul.f32 %v1625_v7, %v1625_v7 }
 0x115   :  { %v945_v40 = vadd.f32 %v944_v30, %v1662_v14  ;;  %v1080_v42 = vadd.f32 %v1079_v34, %v1017_v2  ;;  %v1020_v14 = vmul.f32 %v1704_v22, %v1704_v22  ;;  %v1030_v30 = vmul.f32 %v1646_v11, %v1646_v11 }
 0x117   :  { %v946_v43 = vadd.f32 %v945_v40, %v1683_v18  ;;  %v1081_v44 = vadd.f32 %v1080_v42, %v1018_v32  ;;  %v1031_v40 = vmul.f32 %v1667_v15, %v1667_v15 }
 0x119   :  { %v947_v10 = vadd.f32 %v946_v43, %v1704_v22  ;;  %v1082_v46 = vadd.f32 %v1081_v44, %v1019_v6 }
 0x11b   :  { %v1083_v18 = vadd.f32 %v1082_v46, %v1020_v14  ;;  %v948_v48 = vadd.f32 %v947_v10, %v1727_v33  ;;  %v1024_v33 = vmul.f32 %v1536_v50, %v1536_v50  ;;  %v1034_v14 = vmul.f32 %v1732_v38, %v1732_v38 }
 0x11d   :  { %v1084_v51 = vadd.f32 %v1083_v18, %v1021_v49  ;;  %v949_v52 = vadd.f32 %v948_v48, %v1748_v54  ;;  %v1025_v54 = vmul.f32 %v1553_v56, %v1553_v56  ;;  %v1035_v49 = vmul.f32 %v1753_v59, %v1753_v59 }
 0x11f   :  { %v1085_v41 = vadd.f32 %v1084_v51, %v1022_v35  ;;  %v950_v22 = vadd.f32 %v949_v52, %v1769_v29  ;;  %v1026_v29 = vmul.f32 %v1574_v61, %v1574_v61 }
 0x121   :  { %v951_v1 = vadd.f32 %v950_v22, %v1536_v50  ;;  %v1086_v5 = vadd.f32 %v1085_v41, %v1023_v58  ;;  %v1892_v50 = vpop.f32.mrf.mxu3 }
 0x122   :  { %916 = vst [vmem:[%s2014_s2 + $0x1e8] sm:$0xff] %v1892_v50 }
 0x123   :  { %v952_v9 = vadd.f32 %v951_v1, %v1553_v56  ;;  %v1087_v13 = vadd.f32 %v1086_v5, %v1024_v33  ;;  %v1028_v56 = vmul.f32 %v1604_v3, %v1604_v3  ;;  %v1038_v33 = vmul.f32 %v1826_v27, %v1826_v27 }
 0x125   :  { %v953_v17 = vadd.f32 %v952_v9, %v1574_v61  ;;  %v1088_v53 = vadd.f32 %v1087_v13, %v1025_v54  ;;  %v1039_v54 = vmul.f32 %v1850_v45, %v1850_v45  ;;  %v1348_v9 = vmov 0.0  }
 0x126   :  { %21 = vst [vmem:[%s2015_s3] sm:$0x1] %v1348_v9 }
 0x127   :  { %v954_v26 = vadd.f32 %v953_v17, %v1589_v0  ;;  %v1089_v60 = vadd.f32 %v1088_v53, %v1026_v29  ;;  %22 = vst [vmem:[%s2016_s4] sm:$0x1] %v1348_v9  ;;  %v1042_v17 = vmul.f32 %v1648_v12, %v1648_v12 }
 0x129   :  { %v955_v63 = vadd.f32 %v954_v26, %v1604_v3  ;;  %v1090_v61 = vadd.f32 %v1089_v60, %v1027_v25  ;;  %v1910_v3 = vpop.f32.mrf.mxu3 }
 0x12a   :  { %917 = vst [vmem:[%s2014_s2 + $0x1f0] sm:$0xff] %v1910_v3 }
 0x12b   :  { %v956_v2 = vadd.f32 %v955_v63, %v1625_v7  ;;  %v1091_v0 = vadd.f32 %v1090_v61, %v1028_v56  ;;  %v1032_v7 = vmul.f32 %v1688_v19, %v1688_v19  ;;  %v1044_v56 = vmul.f32 %v1690_v20, %v1690_v20 }
 0x12d   :  { %v1092_v34 = vadd.f32 %v1091_v0, %v1029_v21  ;;  %v957_v32 = vadd.f32 %v956_v2, %v1646_v11  ;;  %v1033_v11 = vmul.f32 %v1709_v23, %v1709_v23 }
 0x12f   :  { %v958_v42 = vadd.f32 %v957_v32, %v1667_v15  ;;  %v1093_v6 = vadd.f32 %v1092_v34, %v1030_v30 }
 0x131   :  { %v959_v43 = vadd.f32 %v958_v42, %v1688_v19  ;;  %v1094_v44 = vadd.f32 %v1093_v6, %v1031_v40  ;;  %v1928_v19 = vpop.f32.mrf.mxu3 }
 0x132   :  { %918 = vst [vmem:[%s2014_s2 + $0x1f8] sm:$0xff] %v1928_v19 }
 0x133   :  { %v960_v10 = vadd.f32 %v959_v43, %v1709_v23  ;;  %v1095_v15 = vadd.f32 %v1094_v44, %v1032_v7 }
 0x135   :  { %v961_v46 = vadd.f32 %v960_v10, %v1732_v38  ;;  %v1096_v18 = vadd.f32 %v1095_v15, %v1033_v11  ;;  %v1036_v38 = vmul.f32 %v1774_v36, %v1774_v36  ;;  %v1051_v11 = vmul.f32 %v1852_v31, %v1852_v31 }
 0x137   :  { %v962_v48 = vadd.f32 %v961_v46, %v1753_v59  ;;  %v1097_v51 = vadd.f32 %v1096_v18, %v1034_v14  ;;  %v1037_v59 = vmul.f32 %v1802_v55, %v1802_v55  ;;  %v1052_v14 = vmul.f32 %v1874_v47, %v1874_v47 }
 0x138   :  { %v1053_v18 = vmul.f32 %v1892_v50, %v1892_v50 }
 0x139   :  { %v1098_v23 = vadd.f32 %v1097_v51, %v1035_v49  ;;  %v963_v52 = vadd.f32 %v962_v48, %v1774_v36  ;;  %v1040_v36 = vmul.f32 %v1606_v4, %v1606_v4  ;;  %v1054_v49 = vmul.f32 %v1910_v3, %v1910_v3 }
 0x13b   :  { %v1099_v35 = vadd.f32 %v1098_v23, %v1036_v38  ;;  %v964_v41 = vadd.f32 %v963_v52, %v1802_v55  ;;  %v1055_v23 = vmul.f32 %v1928_v19, %v1928_v19 }
 0x13d   :  { %v1100_v22 = vadd.f32 %v1099_v35, %v1037_v59  ;;  %v965_v58 = vadd.f32 %v964_v41, %v1826_v27  ;;  %v1041_v27 = vmul.f32 %v1627_v8, %v1627_v8 }
 0x13f   :  { %v1101_v1 = vadd.f32 %v1100_v22, %v1038_v33  ;;  %v966_v5 = vadd.f32 %v965_v58, %v1850_v45 }
 0x141   :  { %v967_v55 = vadd.f32 %v966_v5, %v1606_v4  ;;  %v1102_v13 = vadd.f32 %v1101_v1, %v1039_v54  ;;  %v1043_v4 = vmul.f32 %v1669_v16, %v1669_v16 }
 0x143   :  { %v968_v45 = vadd.f32 %v967_v55, %v1627_v8  ;;  %v1103_v29 = vadd.f32 %v1102_v13, %v1040_v36  ;;  %v1045_v8 = vmul.f32 %v1711_v24, %v1711_v24 }
 0x145   :  { %v969_v53 = vadd.f32 %v968_v45, %v1648_v12  ;;  %v1104_v25 = vadd.f32 %v1103_v29, %v1041_v27  ;;  %v1046_v12 = vmul.f32 %v1734_v39, %v1734_v39 }
 0x147   :  { %v970_v26 = vadd.f32 %v969_v53, %v1669_v16  ;;  %v1105_v60 = vadd.f32 %v1104_v25, %v1042_v17  ;;  %v1047_v16 = vmul.f32 %v1755_v62, %v1755_v62 }
 0x149   :  { %v971_v63 = vadd.f32 %v970_v26, %v1690_v20  ;;  %v1106_v61 = vadd.f32 %v1105_v60, %v1043_v4  ;;  %v1048_v20 = vmul.f32 %v1776_v37, %v1776_v37 }
 0x14b   :  { %v972_v21 = vadd.f32 %v971_v63, %v1711_v24  ;;  %v1107_v2 = vadd.f32 %v1106_v61, %v1044_v56  ;;  %v1049_v24 = vmul.f32 %v1804_v57, %v1804_v57 }
 0x14d   :  { %v1108_v0 = vadd.f32 %v1107_v2, %v1045_v8  ;;  %v973_v30 = vadd.f32 %v972_v21, %v1734_v39  ;;  %v1050_v39 = vmul.f32 %v1828_v28, %v1828_v28 }
 0x14f   :  { %v974_v34 = vadd.f32 %v973_v30, %v1755_v62  ;;  %v1109_v32 = vadd.f32 %v1108_v0, %v1046_v12 }
 0x151   :  { %v975_v40 = vadd.f32 %v974_v34, %v1776_v37  ;;  %v1110_v42 = vadd.f32 %v1109_v32, %v1047_v16 }
 0x153   :  { %v976_v6 = vadd.f32 %v975_v40, %v1804_v57  ;;  %v1111_v7 = vadd.f32 %v1110_v42, %v1048_v20 }
 0x155   :  { %v977_v43 = vadd.f32 %v976_v6, %v1828_v28  ;;  %v1112_v44 = vadd.f32 %v1111_v7, %v1049_v24 }
 0x157   :  { %v978_v62 = vadd.f32 %v977_v43, %v1852_v31  ;;  %v1113_v10 = vadd.f32 %v1112_v44, %v1050_v39 }
 0x159   :  { %v1114_v37 = vadd.f32 %v1113_v10, %v1051_v11  ;;  %v979_v15 = vadd.f32 %v978_v62, %v1874_v47 }
 0x15b   :  { %v1115_v57 = vadd.f32 %v1114_v37, %v1052_v14  ;;  %v980_v46 = vadd.f32 %v979_v15, %v1892_v50 }
 0x15d   :  { %v1116_v28 = vadd.f32 %v1115_v57, %v1053_v18  ;;  %v981_v48 = vadd.f32 %v980_v46, %v1910_v3  ;;  %v919_v3 = vld [vmem:[%s2015_s3] sm:$0x1] }
 0x15f   :  { %v1117_v31 = vadd.f32 %v1116_v28, %v1054_v49  ;;  %v982_v51 = vadd.f32 %v981_v48, %v1928_v19  ;;  %v991_v19 = vld [vmem:[%s2016_s4] sm:$0x1] }
 0x161   :  { %v983_v52 = vrot.slane %v982_v51, 4  ;;  %v1118_v47 = vadd.f32 %v1117_v31, %v1055_v23 }
 0x163   :  { %v984_v38 = vadd.f32 %v983_v52, %v982_v51  ;;  %v1119_v35 = vrot.slane %v1118_v47, 4 }
 0x165   :  { %v985_v41 = vrot.slane %v984_v38, 2  ;;  %v1120_v59 = vadd.f32 %v1119_v35, %v1118_v47 }
 0x167   :  { %v986_v22 = vadd.f32 %v985_v41, %v984_v38  ;;  %v1121_v50 = vrot.slane %v1120_v59, 2 }
 0x169   :  { %v987_v58 = vrot.slane %v986_v22, 1  ;;  %v1122_v33 = vadd.f32 %v1121_v50, %v1120_v59 }
 0x16b   :  { %v988_v1 = vadd.f32 %v987_v58, %v986_v22  ;;  %v1123_v5 = vrot.slane %v1122_v33, 1 }
 0x16d   :  { %v989_v54 = vadd.f32 %v988_v1, %v919_v3  ;;  %v1124_v9 = vadd.f32 %v1123_v5, %v1122_v33 }
 0x16f   :  { %990 = vst [vmem:[%s2015_s3] sm:$0x1] %v989_v54  ;;  %v1125_v36 = vadd.f32 %v1124_v9, %v991_v19 }
 0x171   :  { %1126 = vst [vmem:[%s2016_s4] sm:$0x1] %v1125_v36 }

</bundles_post_ra>
